<compile_context>
chip_gen: v7x
topology: tpu7x:2x2x1
jax: 0.10.0
libtpu: 0.0.40
codegen_flags: <defaults>
</compile_context>

<pallas_src>
import functools

import numpy as np
import jax
import jax.numpy as jnp
from jax.experimental import pallas as pl
from jax.experimental.pallas import tpu as pltpu

_LOG2 = float(np.log(2.0))
_LOG_EPS = float(np.log(1e-20))
LANE = 128
SUBLANE = 8


def _rup(n, m):
    return ((n + m - 1) // m) * m


def _pad_rows(x, rows):
    x = jnp.asarray(x, jnp.float32)
    pad = [(0, rows - x.shape[0])] + [(0, 0)] * (x.ndim - 1)
    return jnp.pad(x, pad)


def _pad2(x, rows, cols):
    x = jnp.asarray(x, jnp.float32)
    return jnp.pad(x, ((0, rows - x.shape[0]), (0, cols - x.shape[1])))


def _ssp(y):
    # shifted softplus used by SchNet: softplus(y) - log(2)  (stable form)
    return jnp.maximum(y, 0.0) + jnp.log(1.0 + jnp.exp(-jnp.abs(y))) - _LOG2


# ----------------------------------------------------------------------------
# Fused SchNet feature network: all interaction blocks in ONE pallas_call.
# grid = (num_interactions [arbitrary], row_blocks [arbitrary]); the node
# features are carried across grid steps in a VMEM scratch.
# ----------------------------------------------------------------------------
def _schnet_kernel(h0_ref, d_ref, cm_ref, off_ref,
                   w1_ref, b1_ref, w2_ref, b2_ref,
                   lin1_ref, lin2_ref, lin2b_ref, lin_ref, linb_ref,
                   ho_ref, h_scr, xj_scr, *, coeff, n_nodes, tm):
    t = pl.program_id(0)      # interaction index (sequential)
    i = pl.program_id(1)      # row-block index within an interaction (sequential)

    @pl.when((t == 0) & (i == 0))
    def _():
        h_scr[...] = h0_ref[...]                    # load initial embeddings once

    # CFConv.lin1 hoisted: computed ONCE per interaction for ALL source nodes.
    @pl.when(i == 0)
    def _():
        xj_scr[...] = jnp.dot(h_scr[...], lin1_ref[0],
                              preferred_element_type=jnp.float32)

    gp = off_ref.shape[1]
    fp = w1_ref.shape[2]

    d = d_ref[...][:, :n_nodes]        # (tm, N) lane-dense pair distances
    cmv = cm_ref[...][:, :n_nodes]     # (tm, N) cosine-cutoff * adjacency mask

    # Gaussian smearing fused (exp lands on the EUP slot); the O(N^2*G) basis
    # never exists in HBM.  Padded gaussian lanes hit zero-padded w1 rows.
    ea = jnp.exp(coeff * (d[:, :, None] - off_ref[...]) ** 2)       # (tm, N, GP)
    ea2 = ea.reshape(tm * n_nodes, gp)                              # free leading merge
    # Filter network: Linear -> ssp -> Linear  (bf16 MXU inputs, f32 acc).
    h1 = _ssp(jnp.dot(ea2.astype(jnp.bfloat16), w1_ref[0].astype(jnp.bfloat16),
                      preferred_element_type=jnp.float32) + b1_ref[0])
    wf = jnp.dot(h1.astype(jnp.bfloat16), w2_ref[0].astype(jnp.bfloat16),
                 preferred_element_type=jnp.float32) + b2_ref[0]    # (tm*N, FP)
    wm = wf.reshape(tm, n_nodes, fp) * cmv[:, :, None]
    # Neighbor sum: sublane (XLU) reduce against the hoisted xj — no selector
    # matmul, no concat, no extra VMEM copies.
    agg = jnp.sum(wm * xj_scr[...][None, :, :], axis=1)             # (tm, FP)

    # CFConv.lin2, InteractionBlock ssp + lin, residual add.
    y = _ssp(jnp.dot(agg, lin2_ref[0], preferred_element_type=jnp.float32)
             + lin2b_ref[0])
    y = jnp.dot(y, lin_ref[0], preferred_element_type=jnp.float32) + linb_ref[0]

    row0 = pl.multiple_of(i * tm, tm)
    h_new = h_scr[pl.ds(row0, tm), :] + y        # reads previous-interaction rows
    h_scr[pl.ds(row0, tm), :] = h_new            # row blocks only overwrite own rows
    ho_ref[...] = h_new


def schnet_forward(sch, z, pos, batch, cfg, NP):
    cutoff, G = cfg["cutoff"], cfg["num_gaussians"]
    N = z.shape[0]
    LI, GP, FP = sch["w1"].shape[0], sch["w1"].shape[1], sch["w1"].shape[2]
    HP = sch["embedding"].shape[1]
    NPc = _rup(NP, LANE)

    h0 = _pad_rows(sch["embedding"][z], NP)                         # (NP, HP)

    # TODO(synk): for large N compute d / cutoff mask inside the kernel from a
    # position tile instead of materializing O(N^2) tensors host-side.
    pos_p = _pad_rows(pos.astype(jnp.float32), NP)
    batch_p = jnp.pad(batch.astype(jnp.int32), (0, NP - N), constant_values=-1)
    valid = jnp.arange(NP) < N
    diff = pos_p[:, None, :] - pos_p[None, :, :]
    d = jnp.sqrt(jnp.maximum(jnp.sum(diff * diff, axis=-1), 1e-12))
    adj = ((batch_p[:, None] == batch_p[None, :]) & (~jnp.eye(NP, dtype=bool))
           & (d < cutoff) & valid[:, None] & valid[None, :])
    ccut = 0.5 * (jnp.cos(d * jnp.pi / cutoff) + 1.0)               # cosine cutoff
    cm = jnp.where(adj, ccut, 0.0).astype(jnp.float32)
    # lane-dense (NP, NPc) pair tensors -> full-burst DMAs
    d_pad = _pad2(d.astype(jnp.float32), NP, NPc)
    cm_pad = _pad2(cm, NP, NPc)

    offset_np = np.linspace(0.0, cutoff, G)
    coeff = -0.5 / float(offset_np[1] - offset_np[0]) ** 2
    off = jnp.zeros((1, GP), jnp.float32).at[0, :G].set(jnp.asarray(offset_np, jnp.float32))

    tm = min(NP, 128)
    while NP % tm:
        tm -= SUBLANE
    nsteps = NP // tm

    def wspec(d1, d2):                     # per-interaction stacked weights
        return pl.BlockSpec((1, d1, d2), lambda t, i: (t, 0, 0))

    def rows(shape):
        return pl.BlockSpec(shape, lambda t, i: (i, 0))

    full = lambda shape: pl.BlockSpec(shape, lambda t, i: (0,) * len(shape))

    flops = 2 * LI * (NP * NP * (GP * FP + FP * FP + FP)
                      + NP * HP * FP + NP * (FP * HP + HP * HP))
    trans = LI * (NP * NP * (GP + 2 * FP) + 2 * NP * HP)
    nbytes = 4 * (h0.size + LI * (d_pad.size + cm_pad.size) + off.size
                  + sum(int(sch[k].size) for k in
                        ("w1", "b1", "w2", "b2", "lin1", "lin2", "lin2b", "lin", "linb"))
                  + NP * HP)

    return pl.pallas_call(
        functools.partial(_schnet_kernel, coeff=float(coeff), n_nodes=NP, tm=tm),
        out_shape=jax.ShapeDtypeStruct((NP, HP), jnp.float32),
        grid=(LI, nsteps),
        in_specs=[
            full((NP, HP)),                 # initial node features (VMEM resident)
            rows((tm, NPc)),                # pair distances (lane-dense tile)
            rows((tm, NPc)),                # cutoff * adjacency mask
            full((1, GP)),                  # gaussian centers
            wspec(GP, FP), wspec(1, FP),    # filter net layer 1
            wspec(FP, FP), wspec(1, FP),    # filter net layer 2
            wspec(HP, FP),                  # CFConv.lin1
            wspec(FP, HP), wspec(1, HP),    # CFConv.lin2
            wspec(HP, HP), wspec(1, HP),    # InteractionBlock.lin
        ],
        out_specs=rows((tm, HP)),
        scratch_shapes=[pltpu.VMEM((NP, HP), jnp.float32),    # carried node features
                        pltpu.VMEM((NP, FP), jnp.float32)],   # hoisted xj
        compiler_params=pltpu.CompilerParams(
            dimension_semantics=("arbitrary", "arbitrary"),
            vmem_limit_bytes=32 * 1024 * 1024),
        cost_estimate=pl.CostEstimate(flops=int(flops), transcendentals=int(trans),
                                      bytes_accessed=int(nbytes)),
    )(h0, d_pad, cm_pad, off,
      sch["w1"], sch["b1"], sch["w2"], sch["b2"],
      sch["lin1"], sch["lin2"], sch["lin2b"], sch["lin"], sch["linb"])


# ----------------------------------------------------------------------------
# Fused flows: node / dist / angle / torsion in ONE gridded ("parallel") call.
# Per layer: one tanh matmul, one fused (HP x 2*dout) matmul for the s|t halves
# of linear2, in-kernel Rescale, affine update, exact log-Jacobian.
# ----------------------------------------------------------------------------
def _flows_kernel(x_ref, feat_ref, w1_ref, b1_ref, w2_ref, b2_ref, resc_ref,
                  xo_ref, lj_ref, *, num_layers, dout_p):
    x = x_ref[0]
    feat = feat_ref[0]
    lj = jnp.zeros_like(x)
    for l in range(num_layers):                      # tiny static L -> unrolled
        h = jnp.tanh(jnp.dot(feat, w1_ref[l], preferred_element_type=jnp.float32)
                     + b1_ref[l])
        st = jnp.dot(h, w2_ref[l], preferred_element_type=jnp.float32) + b2_ref[l]
        # TODO(synk): Rescale() assumed to scale the full linear2 output (s and t),
        # matching `x = self.rescale1(self.linear2(...))`; verify against checkpoint.
        st = st * jnp.exp(resc_ref[l])
        s = st[:, :dout_p]
        tt = st[:, dout_p:]
        x = (x + tt) * jnp.exp(s)
        # reference: log(|exp(s)| + 1e-20), computed exactly in stable form
        m = jnp.maximum(s, _LOG_EPS)
        lj = lj + m + jnp.log(1.0 + jnp.exp(-jnp.abs(s - _LOG_EPS)))
    xo_ref[0] = x
    lj_ref[0] = lj


def flows_forward(fp, x_all, feat_all):
    nf, BP, XP = x_all.shape
    L = fp["w1"].shape[0] // nf
    FEATP, HP = fp["w1"].shape[1], fp["w1"].shape[2]
    DO2 = fp["w2"].shape[2]

    in_specs = [
        pl.BlockSpec((1, BP, XP), lambda f: (f, 0, 0)),
        pl.BlockSpec((1, BP, FEATP), lambda f: (f, 0, 0)),
        pl.BlockSpec((L, FEATP, HP), lambda f: (f, 0, 0)),
        pl.BlockSpec((L, 1, HP), lambda f: (f, 0, 0)),
        pl.BlockSpec((L, HP, DO2), lambda f: (f, 0, 0)),
        pl.BlockSpec((L, 1, DO2), lambda f: (f, 0, 0)),
        pl.BlockSpec((L, 1, 1), lambda f: (f, 0, 0)),
    ]
    out_spec = pl.BlockSpec((1, BP, XP), lambda f: (f, 0, 0))
    out_shape = (jax.ShapeDtypeStruct((nf, BP, XP), jnp.float32),
                 jax.ShapeDtypeStruct((nf, BP, XP), jnp.float32))
    return pl.pallas_call(
        functools.partial(_flows_kernel, num_layers=L, dout_p=DO2 // 2),
        out_shape=out_shape,
        grid=(nf,),
        in_specs=in_specs,
        out_specs=(out_spec, out_spec),
        compiler_params=pltpu.CompilerParams(dimension_semantics=("parallel",)),
    )(x_all, feat_all, fp["w1"], fp["b1"], fp["w2"], fp["b2"], fp["rescale"])


# ----------------------------------------------------------------------------
# Fused focus/contact MLP heads (Linear -> ReLU -> Linear -> Sigmoid) and the
# two LB2 basis projections; each pair runs as one gridded ("parallel") call.
# ----------------------------------------------------------------------------
def _mlp_kernel(x_ref, w1_ref, b1_ref, w2_ref, b2_ref, o_ref):
    h = jnp.maximum(jnp.dot(x_ref[0], w1_ref[0],
                            preferred_element_type=jnp.float32) + b1_ref[0], 0.0)
    y = jnp.dot(h, w2_ref[0], preferred_element_type=jnp.float32) + b2_ref[0]
    o_ref[0] = 1.0 / (1.0 + jnp.exp(-y))


def mlp_heads_forward(mp, x_all):
    nh, rows, HP = x_all.shape
    H2P = mp["w1"].shape[2]
    OP = mp["w2"].shape[2]
    spec3 = lambda a, b: pl.BlockSpec((1, a, b), lambda m: (m, 0, 0))
    return pl.pallas_call(
        _mlp_kernel,
        out_shape=jax.ShapeDtypeStruct((nh, rows, OP), jnp.float32),
        grid=(nh,),
        in_specs=[spec3(rows, HP), spec3(HP, H2P), spec3(1, H2P),
                  spec3(H2P, OP), spec3(1, OP)],
        out_specs=spec3(rows, OP),
        compiler_params=pltpu.CompilerParams(dimension_semantics=("parallel",)),
    )(x_all, mp["w1"], mp["b1"], mp["w2"], mp["b2"])


def _lb2_kernel(x_ref, w1_ref, w2_ref, o_ref):
    h = jnp.dot(x_ref[0], w1_ref[0], preferred_element_type=jnp.float32)
    o_ref[0] = jnp.dot(h, w2_ref[0], preferred_element_type=jnp.float32)


def lb2_forward(lp, x_all):
    nb, NP, BIP = x_all.shape
    EP = lp["w1"].shape[2]
    HP = lp["w2"].shape[2]
    spec3 = lambda a, b: pl.BlockSpec((1, a, b), lambda m: (m, 0, 0))
    return pl.pallas_call(
        _lb2_kernel,
        out_shape=jax.ShapeDtypeStruct((nb, NP, HP), jnp.float32),
        grid=(nb,),
        in_specs=[spec3(NP, BIP), spec3(BIP, EP), spec3(EP, HP)],
        out_specs=spec3(NP, HP),
        compiler_params=pltpu.CompilerParams(dimension_semantics=("parallel",)),
    )(x_all, lp["w1"], lp["w2"])


# -------- DimeNet-style bases (feature-engineering glue, plain JAX) ----------
def _sph_j(l, x, xp=jnp):
    if l == 0:
        return xp.sin(x) / x
    if l == 1:
        return xp.sin(x) / x ** 2 - xp.cos(x) / x
    if l == 2:
        return (3.0 / x ** 2 - 1.0) * xp.sin(x) / x - 3.0 * xp.cos(x) / x ** 2
    if l == 3:
        return (15.0 / x ** 3 - 6.0 / x) * xp.sin(x) / x - (15.0 / x ** 2 - 1.0) * xp.cos(x) / x
    raise NotImplementedError(l)


_SPH_ZEROS = np.stack([
    np.pi * np.arange(1, 7),
    np.array([4.493409457909064, 7.725251836937707, 10.904121659428899,
              14.066193912831473, 17.220755271930768, 20.371302959287563]),
    np.array([5.763459196894550, 9.095011330476353, 12.322940970566582,
              15.514603010886749, 18.689036355362822, 21.853874222709714]),
])
_SPH_NORM = np.stack([np.sqrt(2.0) / np.abs(np.asarray(_sph_j(l + 1, _SPH_ZEROS[l], xp=np)))
                      for l in range(3)])


def dist_emb_fn(d, cutoff, num_radial, envelope_exponent=5):
    # NOTE: like the reference dist_emb, the envelope is not clamped for d >= cutoff.
    x = d / cutoff
    p = envelope_exponent + 1
    a = -(p + 1) * (p + 2) / 2.0
    b = p * (p + 2)
    c = -p * (p + 1) / 2.0
    env = 1.0 / x + a * x ** (p - 1) + b * x ** p + c * x ** (p + 1)
    freq = jnp.pi * jnp.arange(1, num_radial + 1, dtype=jnp.float32)
    return env[:, None] * jnp.sin(freq[None, :] * x[:, None])


def angle_emb_fn(d, theta, cutoff, num_spherical, num_radial):
    # TODO(synk): the sympy-generated DimeNet bessel_basis / real_sph_harm constants are
    # approximated with closed-form spherical Bessel j_l and m=0 real spherical harmonics.
    assert num_spherical <= 3 and num_radial <= 6
    x = d / cutoff
    z = jnp.asarray(_SPH_ZEROS[:num_spherical, :num_radial], jnp.float32)
    norm = jnp.asarray(_SPH_NORM[:num_spherical, :num_radial], jnp.float32)
    arg = z[None, :, :] * x[:, None, None]                       # (M, S, R)
    rbf = jnp.stack([_sph_j(l, arg[:, l, :]) for l in range(num_spherical)], axis=1)
    rbf = rbf * norm[None, :, :]
    ct = jnp.cos(theta)
    sph = [0.5 * np.sqrt(1.0 / np.pi) * jnp.ones_like(ct),
           0.5 * np.sqrt(3.0 / np.pi) * ct,
           0.25 * np.sqrt(5.0 / np.pi) * (3.0 * ct ** 2 - 1.0)]
    cbf = jnp.stack(sph[:num_spherical], axis=1)                  # (M, S)
    return (rbf * cbf[:, :, None]).reshape(d.shape[0], num_spherical * num_radial)


# ----------------------------------------------------------------------------
# GraphBP forward
# ----------------------------------------------------------------------------
def graphbp_forward(params, data, cfg, noise_key):
    z, pos, batch = data["atom_type"], data["position"], data["batch"]
    N = z.shape[0]
    NP = _rup(N, SUBLANE)
    H = cfg["hidden_channels"]
    TL = cfg["num_lig_node_types"]
    B = data["new_atom_type"].shape[0]
    BP = _rup(B, SUBLANE)
    FEATP = _rup(3 * H, LANE)

    node_feat = schnet_forward(params["schnet"], z, pos, batch, cfg, NP)   # (NP, HP)

    # boolean-mask indexing replaced by host-precomputed index arrays (static shapes).
    lig_idx, contact_idx = data["lig_idx"], data["contact_idx"]
    nl, nc = lig_idx.shape[0], contact_idx.shape[0]
    rows = max(_rup(nl, SUBLANE), _rup(nc, SUBLANE))
    mlp_x = jnp.stack([_pad_rows(node_feat[lig_idx], rows),
                       _pad_rows(node_feat[contact_idx], rows)])
    scores = mlp_heads_forward(params["mlps"], mlp_x)
    focus_score = scores[0, :nl, :1]
    contact_score = scores[1, :nc, :1]

    new_atom_type, focus = data["new_atom_type"], data["focus"]
    c1_focus, c2_c1_focus = data["c1_focus"], data["c2_c1_focus"]
    dist, angle, torsion = data["new_dist"], data["new_angle"], data["new_torsion"]

    # ---- both LB2 basis projections in one call ----
    batch_pad = jnp.pad(batch.astype(jnp.int32), (0, NP - N))     # pad rows -> graph 0
    d_per_node = jnp.squeeze(dist, -1)[batch_pad].astype(jnp.float32)
    a_per_node = jnp.squeeze(angle, -1)[batch_pad].astype(jnp.float32)
    rbf = dist_emb_fn(d_per_node, cfg["cutoff"], cfg["num_radial"])
    ab = angle_emb_fn(d_per_node, a_per_node, cfg["cutoff"],
                      cfg["num_spherical"], cfg["num_radial"])
    BIP = params["lb2"]["w1"].shape[1]
    lb2_out = lb2_forward(params["lb2"],
                          jnp.stack([_pad2(rbf, NP, BIP), _pad2(ab, NP, BIP)]))
    dist_embedding, dist_angle_emd = lb2_out[0], lb2_out[1]

    # ---- node_emb staging (tiny elementwise glue; padded rows stay zero) ----
    emb_table = params["schnet"]["embedding"]
    node_type_emb = emb_table[new_atom_type]                      # (B, HP)
    node_emb0 = node_feat * node_type_emb[batch_pad]
    node_emb1 = node_emb0 * dist_embedding
    node_emb2 = node_emb1 * dist_angle_emd

    # ---- all four flows in one gridded call ----
    x_z = jax.nn.one_hot(new_atom_type, TL, dtype=jnp.float32)
    x_z = x_z + cfg["deq_coeff"] * jax.random.uniform(noise_key, x_z.shape, dtype=jnp.float32)
    local_angle_feat = jnp.concatenate(
        (node_emb1[c1_focus[:, 1], :H], node_emb1[c1_focus[:, 0], :H]), axis=1)
    local_torsion_feat = jnp.concatenate(
        (node_emb2[c2_c1_focus[:, 2], :H], node_emb2[c2_c1_focus[:, 1], :H],
         node_emb2[c2_c1_focus[:, 0], :H]), axis=1)

    x_all = jnp.stack([_pad2(x_z, BP, LANE), _pad2(dist, BP, LANE),
                       _pad2(angle, BP, LANE), _pad2(torsion, BP, LANE)])
    feat_all = jnp.stack([
        _pad2(node_feat[focus[:, 0]], BP, FEATP),
        _pad2(node_emb0[focus[:, 0]], BP, FEATP),
        _pad2(local_angle_feat, BP, FEATP),
        _pad2(local_torsion_feat, BP, FEATP)])
    xo, lj = flows_forward(params["flows"], x_all, feat_all)

    node_latent, node_log_jacob = xo[0, :B, :TL], lj[0, :B, :TL]
    dist_latent, dist_log_jacob = xo[1, :B, :1], lj[1, :B, :1]
    angle_latent, angle_log_jacob = xo[2, :B, :1], lj[2, :B, :1]
    torsion_latent, torsion_log_jacob = xo[3, :B, :1], lj[3, :B, :1]

    return ((node_latent, node_log_jacob), focus_score, contact_score,
            (dist_latent, dist_log_jacob), (angle_latent, angle_log_jacob),
            (torsion_latent, torsion_log_jacob))


# ----------------------------------------------------------------------------
# Deterministic parameter initialization (synthetic, no checkpoint).
# Weights are stored pre-padded to 128 lanes with zero padding; padded rows /
# lanes stay exactly zero through the network (zero biases), so they never leak
# into the real (sliced / gathered) outputs.
# ----------------------------------------------------------------------------
def init_params(key, cfg):
    H, F, G = cfg["hidden_channels"], cfg["num_filters"], cfg["num_gaussians"]
    R, S, E = cfg["num_radial"], cfg["num_spherical"], cfg["basis_emb_size"]
    L, T, TL = cfg["num_flow_layers"], cfg["num_node_types"], cfg["num_lig_node_types"]
    LI = cfg["num_interactions"]
    HP, FP, GP = _rup(H, LANE), _rup(F, LANE), _rup(G, LANE)
    H2P, EP = _rup(H // 2, LANE), _rup(E, LANE)
    BIP = _rup(max(R, S * R), LANE)
    FEATP = _rup(3 * H, LANE)
    DOP = LANE                         # padded per-branch flow output dim
    keys = iter(jax.random.split(key, 1024))

    def dense(rows_, cols, prows, pcols, scale=0.1):
        w = scale * jax.random.normal(next(keys), (rows_, cols), dtype=jnp.float32)
        return jnp.pad(w, ((0, prows - rows_), (0, pcols - cols)))

    def zb(pcols):
        return jnp.zeros((1, pcols), jnp.float32)

    schnet = dict(
        embedding=dense(T, H, T, HP, 1.0),
        w1=jnp.stack([dense(G, F, GP, FP) for _ in range(LI)]),
        b1=jnp.stack([zb(FP) for _ in range(LI)]),
        w2=jnp.stack([dense(F, F, FP, FP) for _ in range(LI)]),
        b2=jnp.stack([zb(FP) for _ in range(LI)]),
        lin1=jnp.stack([dense(H, F, HP, FP) for _ in range(LI)]),
        lin2=jnp.stack([dense(F, H, FP, HP) for _ in range(LI)]),
        lin2b=jnp.stack([zb(HP) for _ in range(LI)]),
        lin=jnp.stack([dense(H, H, HP, HP) for _ in range(LI)]),
        linb=jnp.stack([zb(HP) for _ in range(LI)]),
    )

    # Flow stacks: 4 flows x L layers merged along the leading axis (layer fastest).
    flow_in_dims = (H, H, 2 * H, 3 * H)        # node, dist, angle, torsion
    flow_out_dims = (TL, 1, 1, 1)
    w1, b1, w2, b2, resc = [], [], [], [], []
    for din, dout in zip(flow_in_dims, flow_out_dims):
        for _ in range(L):
            w1.append(dense(din, H, FEATP, HP))
            b1.append(jnp.zeros((1, HP), jnp.float32))
            w2s = dense(H, dout, HP, DOP, 0.05)
            w2t = dense(H, dout, HP, DOP, 0.05)
            w2.append(jnp.concatenate([w2s, w2t], axis=1))        # (HP, 2*DOP)  s | t
            b2.append(jnp.zeros((1, 2 * DOP), jnp.float32))
            resc.append(jnp.zeros((1, 1), jnp.float32))           # Rescale() weight
    flows = dict(w1=jnp.stack(w1), b1=jnp.stack(b1), w2=jnp.stack(w2),
                 b2=jnp.stack(b2), rescale=jnp.stack(resc))

    mlps = dict(                                           # [focus, contact]
        w1=jnp.stack([dense(H, H // 2, HP, H2P) for _ in range(2)]),
        b1=jnp.stack([jnp.zeros((1, H2P), jnp.float32) for _ in range(2)]),
        w2=jnp.stack([dense(H // 2, 1, H2P, LANE) for _ in range(2)]),
        b2=jnp.stack([jnp.zeros((1, LANE), jnp.float32) for _ in range(2)]),
    )

    lb2 = dict(                                            # [dist_lb2, angle_lb2]
        w1=jnp.stack([dense(R, E, BIP, EP), dense(S * R, E, BIP, EP)]),
        w2=jnp.stack([dense(E, H, EP, HP), dense(E, H, EP, HP)]),
    )

    return dict(schnet=schnet, flows=flows, mlps=mlps, lb2=lb2)


# ----------------------------------------------------------------------------
if __name__ == "__main__":
    cfg = dict(cutoff=5.0, num_node_types=8, num_lig_node_types=4, num_interactions=2,
               num_filters=32, num_gaussians=16, hidden_channels=32, basis_emb_size=8,
               num_spherical=3, num_radial=6, num_flow_layers=2, deq_coeff=0.9)

    key = jax.random.PRNGKey(0)
    pkey, dkey, nkey = jax.random.split(key, 3)
    params = init_params(pkey, cfg)

    B = 2                     # graphs in the batch (one new ligand atom per graph)
    n_lig, n_rec = 6, 7
    per_graph = n_lig + n_rec
    N = B * per_graph         # 26 nodes total

    kz, kp = jax.random.split(dkey)
    atom_type = jax.random.randint(kz, (N,), 0, cfg["num_node_types"])
    position = 2.0 * jax.random.normal(kp, (N, 3), dtype=jnp.float32)
    batch = jnp.repeat(jnp.arange(B, dtype=jnp.int32), per_graph)

    rec_mask_np = np.tile(np.array([False] * n_lig + [True] * n_rec), B)
    contact_np = np.zeros(N, dtype=bool)
    contact_np[n_lig] = True
    contact_np[per_graph + n_lig] = True

    data = dict(
        atom_type=atom_type, position=position, batch=batch,
        lig_idx=jnp.asarray(np.where(~rec_mask_np)[0], jnp.int32),
        contact_idx=jnp.asarray(np.where(contact_np)[0], jnp.int32),
        new_atom_type=jnp.array([1, 3], jnp.int32),
        focus=jnp.array([[2], [per_graph + 2]], jnp.int32),
        c1_focus=jnp.array([[3, 2], [per_graph + 3, per_graph + 2]], jnp.int32),
        c2_c1_focus=jnp.array([[4, 3, 2],
                               [per_graph + 4, per_graph + 3, per_graph + 2]], jnp.int32),
        new_dist=jnp.array([[1.3], [1.7]], jnp.float32),
        new_angle=jnp.array([[1.1], [2.0]], jnp.float32),
        new_torsion=jnp.array([[0.4], [-1.2]], jnp.float32),
    )

    # TODO(synk): GraphBP.generate() (autoregressive sampling loop) is not implemented.
    fwd = jax.jit(lambda p, d, k: graphbp_forward(p, d, cfg, k))
    out = fwd(params, data, nkey)
    jax.block_until_ready(out)
    print("KERNEL_OK")
</pallas_src>

<mosaic_0001>
module attributes {stable_mosaic.version = 11 : i64} {
  func.func @_lb2_kernel(%arg0: i32, %arg1: memref<1x32x128xf32, #tpu.memory_space<vmem>>, %arg2: memref<1x128x128xf32, #tpu.memory_space<vmem>>, %arg3: memref<1x128x128xf32, #tpu.memory_space<vmem>>, %arg4: memref<1x32x128xf32, #tpu.memory_space<vmem>>) attributes {dimension_semantics = [#tpu.dimension_semantics<parallel>], iteration_bounds = array<i64: 2>, scalar_prefetch = 0 : i64, scratch_operands = 0 : i64, tpu.core_type = #tpu.core_type<tc>, window_params = [{transform_indices = @transform_0, window_bounds = array<i64: 1, 32, 128>}, {transform_indices = @transform_1, window_bounds = array<i64: 1, 128, 128>}, {transform_indices = @transform_2, window_bounds = array<i64: 1, 128, 128>}, {transform_indices = @transform_3, window_bounds = array<i64: 1, 32, 128>}]} {
    %c0 = arith.constant 0 : index
    %c0_0 = arith.constant 0 : index
    %c0_1 = arith.constant 0 : index
    %0 = vector.load %arg1[%c0, %c0_0, %c0_1] : memref<1x32x128xf32, #tpu.memory_space<vmem>>, vector<1x32x128xf32>
    %1 = vector.shape_cast %0 : vector<1x32x128xf32> to vector<32x128xf32>
    %c0_2 = arith.constant 0 : index
    %c0_3 = arith.constant 0 : index
    %c0_4 = arith.constant 0 : index
    %2 = vector.load %arg2[%c0_2, %c0_3, %c0_4] : memref<1x128x128xf32, #tpu.memory_space<vmem>>, vector<1x128x128xf32>
    %3 = vector.shape_cast %2 : vector<1x128x128xf32> to vector<128x128xf32>
    %cst = arith.constant dense<0.000000e+00> : vector<32x128xf32>
    %4 = tpu.matmul %1, %3, %cst {dimension_numbers = #tpu.dot_dimension_numbers<[1], [0], [0], [1], [0, 0, 1, 1], [], []>} : vector<32x128xf32>, vector<128x128xf32>, vector<32x128xf32> -> vector<32x128xf32>
    %c0_5 = arith.constant 0 : index
    %c0_6 = arith.constant 0 : index
    %c0_7 = arith.constant 0 : index
    %5 = vector.load %arg3[%c0_5, %c0_6, %c0_7] : memref<1x128x128xf32, #tpu.memory_space<vmem>>, vector<1x128x128xf32>
    %6 = vector.shape_cast %5 : vector<1x128x128xf32> to vector<128x128xf32>
    %cst_8 = arith.constant dense<0.000000e+00> : vector<32x128xf32>
    %7 = tpu.matmul %4, %6, %cst_8 {dimension_numbers = #tpu.dot_dimension_numbers<[1], [0], [0], [1], [0, 0, 1, 1], [], []>} : vector<32x128xf32>, vector<128x128xf32>, vector<32x128xf32> -> vector<32x128xf32>
    %c0_9 = arith.constant 0 : index
    %c0_10 = arith.constant 0 : index
    %c0_11 = arith.constant 0 : index
    %8 = vector.load %arg4[%c0_9, %c0_10, %c0_11] : memref<1x32x128xf32, #tpu.memory_space<vmem>>, vector<1x32x128xf32>
    %9 = vector.shape_cast %8 : vector<1x32x128xf32> to vector<32x128xf32>
    %10 = vector.shape_cast %7 : vector<32x128xf32> to vector<1x32x128xf32>
    tpu.vector_store %arg4[%c0_9, %c0_10, %c0_11], %10 {strides = array<i32>} : memref<1x32x128xf32, #tpu.memory_space<vmem>>, vector<1x32x128xf32>,
    return
  }
  func.func @transform_0(%arg0: i32) -> (i32, i32, i32) {
    %c0_i32 = arith.constant 0 : i32
    %c0_i32_0 = arith.constant 0 : i32
    %c0_i32_1 = arith.constant 0 : i32
    return %arg0, %c0_i32, %c0_i32_0 : i32, i32, i32
  }
  func.func @transform_1(%arg0: i32) -> (i32, i32, i32) {
    %c0_i32 = arith.constant 0 : i32
    %c0_i32_0 = arith.constant 0 : i32
    %c0_i32_1 = arith.constant 0 : i32
    return %arg0, %c0_i32, %c0_i32_0 : i32, i32, i32
  }
  func.func @transform_2(%arg0: i32) -> (i32, i32, i32) {
    %c0_i32 = arith.constant 0 : i32
    %c0_i32_0 = arith.constant 0 : i32
    %c0_i32_1 = arith.constant 0 : i32
    return %arg0, %c0_i32, %c0_i32_0 : i32, i32, i32
  }
  func.func @transform_3(%arg0: i32) -> (i32, i32, i32) {
    %c0_i32 = arith.constant 0 : i32
    %c0_i32_0 = arith.constant 0 : i32
    %c0_i32_1 = arith.constant 0 : i32
    return %arg0, %c0_i32, %c0_i32_0 : i32, i32, i32
  }
}

module attributes {stable_mosaic.version = 11 : i64} {
  func.func @_schnet_kernel(%arg0: i32, %arg1: i32, %arg2: memref<32x128xf32, #tpu.memory_space<vmem>>, %arg3: memref<32x128xf32, #tpu.memory_space<vmem>>, %arg4: memref<32x128xf32, #tpu.memory_space<vmem>>, %arg5: memref<1x128xf32, #tpu.memory_space<vmem>>, %arg6: memref<1x128x128xf32, #tpu.memory_space<vmem>>, %arg7: memref<1x1x128xf32, #tpu.memory_space<vmem>>, %arg8: memref<1x128x128xf32, #tpu.memory_space<vmem>>, %arg9: memref<1x1x128xf32, #tpu.memory_space<vmem>>, %arg10: memref<1x128x128xf32, #tpu.memory_space<vmem>>, %arg11: memref<1x128x128xf32, #tpu.memory_space<vmem>>, %arg12: memref<1x1x128xf32, #tpu.memory_space<vmem>>, %arg13: memref<1x128x128xf32, #tpu.memory_space<vmem>>, %arg14: memref<1x1x128xf32, #tpu.memory_space<vmem>>, %arg15: memref<32x128xf32, #tpu.memory_space<vmem>>, %arg16: memref<32x128xf32, #tpu.memory_space<vmem>>, %arg17: memref<32x128xf32, #tpu.memory_space<vmem>>) attributes {dimension_semantics = [#tpu.dimension_semantics<arbitrary>, #tpu.dimension_semantics<arbitrary>], iteration_bounds = array<i64: 2, 1>, scalar_prefetch = 0 : i64, scratch_operands = 2 : i64, tpu.core_type = #tpu.core_type<tc>, window_params = [{pipeline_mode = #tpu.pipeline_mode<synchronous>, transform_indices = @transform_0, window_bounds = array<i64: 32, 128>}, {transform_indices = @transform_1, window_bounds = array<i64: 32, 128>}, {transform_indices = @transform_2, window_bounds = array<i64: 32, 128>}, {pipeline_mode = #tpu.pipeline_mode<synchronous>, transform_indices = @transform_3, window_bounds = array<i64: 1, 128>}, {transform_indices = @transform_4, window_bounds = array<i64: 1, 128, 128>}, {transform_indices = @transform_5, window_bounds = array<i64: 1, 1, 128>}, {transform_indices = @transform_6, window_bounds = array<i64: 1, 128, 128>}, {transform_indices = @transform_7, window_bounds = array<i64: 1, 1, 128>}, {transform_indices = @transform_8, window_bounds = array<i64: 1, 128, 128>}, {transform_indices = @transform_9, window_bounds = array<i64: 1, 128, 128>}, {transform_indices = @transform_10, window_bounds = array<i64: 1, 1, 128>}, {transform_indices = @transform_11, window_bounds = array<i64: 1, 128, 128>}, {transform_indices = @transform_12, window_bounds = array<i64: 1, 1, 128>}, {transform_indices = @transform_13, window_bounds = array<i64: 32, 128>}]} {
    %c0_i32 = arith.constant 0 : i32
    %0 = arith.cmpi eq, %arg0, %c0_i32 : i32
    %c0_i32_0 = arith.constant 0 : i32
    %1 = arith.cmpi eq, %arg1, %c0_i32_0 : i32
    %2 = arith.andi %0, %1 : i1
    %3 = arith.extui %2 : i1 to i32
    %c0_i32_1 = arith.constant 0 : i32
    %4 = arith.cmpi ne, %3, %c0_i32_1 : i32
    scf.if %4 {
      %c0_52 = arith.constant 0 : index
      %c0_53 = arith.constant 0 : index
      %96 = vector.load %arg2[%c0_52, %c0_53] : memref<32x128xf32, #tpu.memory_space<vmem>>, vector<32x128xf32>
      %c0_54 = arith.constant 0 : index
      %c0_55 = arith.constant 0 : index
      %97 = vector.load %arg16[%c0_54, %c0_55] : memref<32x128xf32, #tpu.memory_space<vmem>>, vector<32x128xf32>
      tpu.vector_store %arg16[%c0_54, %c0_55], %96 {strides = array<i32>} : memref<32x128xf32, #tpu.memory_space<vmem>>, vector<32x128xf32>,
    } else {
    }
    %c0_i32_2 = arith.constant 0 : i32
    %5 = arith.cmpi eq, %arg1, %c0_i32_2 : i32
    %6 = arith.extui %5 : i1 to i32
    %c0_i32_3 = arith.constant 0 : i32
    %7 = arith.cmpi ne, %6, %c0_i32_3 : i32
    scf.if %7 {
      %c0_52 = arith.constant 0 : index
      %c0_53 = arith.constant 0 : index
      %96 = vector.load %arg16[%c0_52, %c0_53] : memref<32x128xf32, #tpu.memory_space<vmem>>, vector<32x128xf32>
      %c0_54 = arith.constant 0 : index
      %c0_55 = arith.constant 0 : index
      %c0_56 = arith.constant 0 : index
      %97 = vector.load %arg10[%c0_54, %c0_55, %c0_56] : memref<1x128x128xf32, #tpu.memory_space<vmem>>, vector<1x128x128xf32>
      %98 = vector.shape_cast %97 : vector<1x128x128xf32> to vector<128x128xf32>
      %cst_57 = arith.constant dense<0.000000e+00> : vector<32x128xf32>
      %99 = tpu.matmul %96, %98, %cst_57 {dimension_numbers = #tpu.dot_dimension_numbers<[1], [0], [0], [1], [0, 0, 1, 1], [], []>} : vector<32x128xf32>, vector<128x128xf32>, vector<32x128xf32> -> vector<32x128xf32>
      %c0_58 = arith.constant 0 : index
      %c0_59 = arith.constant 0 : index
      %100 = vector.load %arg17[%c0_58, %c0_59] : memref<32x128xf32, #tpu.memory_space<vmem>>, vector<32x128xf32>
      tpu.vector_store %arg17[%c0_58, %c0_59], %99 {strides = array<i32>} : memref<32x128xf32, #tpu.memory_space<vmem>>, vector<32x128xf32>,
    } else {
    }
    %c0 = arith.constant 0 : index
    %c0_4 = arith.constant 0 : index
    %8 = vector.load %arg3[%c0, %c0_4] : memref<32x128xf32, #tpu.memory_space<vmem>>, vector<32x128xf32>
    %9 = vector.extract_strided_slice %8 {offsets = [0, 0], sizes = [32, 32], strides = [1, 1]} : vector<32x128xf32> to vector<32x32xf32>
    %c0_5 = arith.constant 0 : index
    %c0_6 = arith.constant 0 : index
    %10 = vector.load %arg4[%c0_5, %c0_6] : memref<32x128xf32, #tpu.memory_space<vmem>>, vector<32x128xf32>
    %11 = vector.extract_strided_slice %10 {offsets = [0, 0], sizes = [32, 32], strides = [1, 1]} : vector<32x128xf32> to vector<32x32xf32>
    %12 = vector.shape_cast %9 : vector<32x32xf32> to vector<32x32x1xf32>
    %c0_7 = arith.constant 0 : index
    %c0_8 = arith.constant 0 : index
    %13 = vector.load %arg5[%c0_7, %c0_8] : memref<1x128xf32, #tpu.memory_space<vmem>>, vector<1x128xf32>
    %14 = vector.shape_cast %13 : vector<1x128xf32> to vector<1x1x128xf32>
    %15 = vector.broadcast %12 : vector<32x32x1xf32> to vector<32x32x128xf32>
    %16 = vector.broadcast %14 : vector<1x1x128xf32> to vector<32x32x128xf32>
    %17 = arith.subf %15, %16 : vector<32x32x128xf32>
    %18 = arith.mulf %17, %17 : vector<32x32x128xf32>
    %cst = arith.constant -4.500000e+00 : f32
    %19 = vector.broadcast %cst : f32 to vector<32x32x128xf32>
    %20 = arith.mulf %19, %18 : vector<32x32x128xf32>
    %21 = math.exp %20 : vector<32x32x128xf32>
    %22 = vector.shape_cast %21 : vector<32x32x128xf32> to vector<1024x128xf32>
    %23 = arith.truncf %22 : vector<1024x128xf32> to vector<1024x128xbf16>
    %c0_9 = arith.constant 0 : index
    %c0_10 = arith.constant 0 : index
    %c0_11 = arith.constant 0 : index
    %24 = vector.load %arg6[%c0_9, %c0_10, %c0_11] : memref<1x128x128xf32, #tpu.memory_space<vmem>>, vector<1x128x128xf32>
    %25 = vector.shape_cast %24 : vector<1x128x128xf32> to vector<128x128xf32>
    %26 = arith.truncf %25 : vector<128x128xf32> to vector<128x128xbf16>
    %cst_12 = arith.constant dense<0.000000e+00> : vector<1024x128xf32>
    %27 = tpu.matmul %23, %26, %cst_12 {dimension_numbers = #tpu.dot_dimension_numbers<[1], [0], [0], [1], [0, 0, 1, 1], [], []>} : vector<1024x128xbf16>, vector<128x128xbf16>, vector<1024x128xf32> -> vector<1024x128xf32>
    %c0_13 = arith.constant 0 : index
    %c0_14 = arith.constant 0 : index
    %c0_15 = arith.constant 0 : index
    %28 = vector.load %arg7[%c0_13, %c0_14, %c0_15] : memref<1x1x128xf32, #tpu.memory_space<vmem>>, vector<1x1x128xf32>
    %29 = vector.shape_cast %28 : vector<1x1x128xf32> to vector<1x128xf32>
    %30 = vector.broadcast %29 : vector<1x128xf32> to vector<1024x128xf32>
    %31 = arith.addf %27, %30 : vector<1024x128xf32>
    %cst_16 = arith.constant 0.000000e+00 : f32
    %32 = vector.broadcast %cst_16 : f32 to vector<1024x128xf32>
    %33 = arith.maximumf %31, %32 : vector<1024x128xf32>
    %34 = math.absf %31 : vector<1024x128xf32>
    %cst_17 = arith.constant 0.000000e+00 : f32
    %35 = vector.broadcast %cst_17 : f32 to vector<1024x128xf32>
    %36 = arith.subf %35, %34 : vector<1024x128xf32>
    %37 = math.exp %36 : vector<1024x128xf32>
    %cst_18 = arith.constant 1.000000e+00 : f32
    %38 = vector.broadcast %cst_18 : f32 to vector<1024x128xf32>
    %39 = arith.addf %38, %37 : vector<1024x128xf32>
    %40 = math.log %39 : vector<1024x128xf32>
    %41 = arith.addf %33, %40 : vector<1024x128xf32>
    %cst_19 = arith.constant 0.693147182 : f32
    %42 = vector.broadcast %cst_19 : f32 to vector<1024x128xf32>
    %43 = arith.subf %41, %42 : vector<1024x128xf32>
    %44 = arith.truncf %43 : vector<1024x128xf32> to vector<1024x128xbf16>
    %c0_20 = arith.constant 0 : index
    %c0_21 = arith.constant 0 : index
    %c0_22 = arith.constant 0 : index
    %45 = vector.load %arg8[%c0_20, %c0_21, %c0_22] : memref<1x128x128xf32, #tpu.memory_space<vmem>>, vector<1x128x128xf32>
    %46 = vector.shape_cast %45 : vector<1x128x128xf32> to vector<128x128xf32>
    %47 = arith.truncf %46 : vector<128x128xf32> to vector<128x128xbf16>
    %cst_23 = arith.constant dense<0.000000e+00> : vector<1024x128xf32>
    %48 = tpu.matmul %44, %47, %cst_23 {dimension_numbers = #tpu.dot_dimension_numbers<[1], [0], [0], [1], [0, 0, 1, 1], [], []>} : vector<1024x128xbf16>, vector<128x128xbf16>, vector<1024x128xf32> -> vector<1024x128xf32>
    %c0_24 = arith.constant 0 : index
    %c0_25 = arith.constant 0 : index
    %c0_26 = arith.constant 0 : index
    %49 = vector.load %arg9[%c0_24, %c0_25, %c0_26] : memref<1x1x128xf32, #tpu.memory_space<vmem>>, vector<1x1x128xf32>
    %50 = vector.shape_cast %49 : vector<1x1x128xf32> to vector<1x128xf32>
    %51 = vector.broadcast %50 : vector<1x128xf32> to vector<1024x128xf32>
    %52 = arith.addf %48, %51 : vector<1024x128xf32>
    %53 = vector.shape_cast %52 : vector<1024x128xf32> to vector<32x32x128xf32>
    %54 = vector.shape_cast %11 : vector<32x32xf32> to vector<32x32x1xf32>
    %55 = vector.broadcast %54 : vector<32x32x1xf32> to vector<32x32x128xf32>
    %56 = arith.mulf %53, %55 : vector<32x32x128xf32>
    %c0_27 = arith.constant 0 : index
    %c0_28 = arith.constant 0 : index
    %57 = vector.load %arg17[%c0_27, %c0_28] : memref<32x128xf32, #tpu.memory_space<vmem>>, vector<32x128xf32>
    %58 = vector.shape_cast %57 : vector<32x128xf32> to vector<1x32x128xf32>
    %59 = vector.broadcast %58 : vector<1x32x128xf32> to vector<32x32x128xf32>
    %60 = arith.mulf %56, %59 : vector<32x32x128xf32>
    %cst_29 = arith.constant dense<0.000000e+00> : vector<32x128xf32>
    %61 = vector.multi_reduction <add>, %60, %cst_29 [1] : vector<32x32x128xf32> to vector<32x128xf32>
    %c0_30 = arith.constant 0 : index
    %c0_31 = arith.constant 0 : index
    %c0_32 = arith.constant 0 : index
    %62 = vector.load %arg11[%c0_30, %c0_31, %c0_32] : memref<1x128x128xf32, #tpu.memory_space<vmem>>, vector<1x128x128xf32>
    %63 = vector.shape_cast %62 : vector<1x128x128xf32> to vector<128x128xf32>
    %cst_33 = arith.constant dense<0.000000e+00> : vector<32x128xf32>
    %64 = tpu.matmul %61, %63, %cst_33 {dimension_numbers = #tpu.dot_dimension_numbers<[1], [0], [0], [1], [0, 0, 1, 1], [], []>} : vector<32x128xf32>, vector<128x128xf32>, vector<32x128xf32> -> vector<32x128xf32>
    %c0_34 = arith.constant 0 : index
    %c0_35 = arith.constant 0 : index
    %c0_36 = arith.constant 0 : index
    %65 = vector.load %arg12[%c0_34, %c0_35, %c0_36] : memref<1x1x128xf32, #tpu.memory_space<vmem>>, vector<1x1x128xf32>
    %66 = vector.shape_cast %65 : vector<1x1x128xf32> to vector<1x128xf32>
    %67 = vector.broadcast %66 : vector<1x128xf32> to vector<32x128xf32>
    %68 = arith.addf %64, %67 : vector<32x128xf32>
    %cst_37 = arith.constant 0.000000e+00 : f32
    %69 = vector.broadcast %cst_37 : f32 to vector<32x128xf32>
    %70 = arith.maximumf %68, %69 : vector<32x128xf32>
    %71 = math.absf %68 : vector<32x128xf32>
    %cst_38 = arith.constant 0.000000e+00 : f32
    %72 = vector.broadcast %cst_38 : f32 to vector<32x128xf32>
    %73 = arith.subf %72, %71 : vector<32x128xf32>
    %74 = math.exp %73 : vector<32x128xf32>
    %cst_39 = arith.constant 1.000000e+00 : f32
    %75 = vector.broadcast %cst_39 : f32 to vector<32x128xf32>
    %76 = arith.addf %75, %74 : vector<32x128xf32>
    %77 = math.log %76 : vector<32x128xf32>
    %78 = arith.addf %70, %77 : vector<32x128xf32>
    %cst_40 = arith.constant 0.693147182 : f32
    %79 = vector.broadcast %cst_40 : f32 to vector<32x128xf32>
    %80 = arith.subf %78, %79 : vector<32x128xf32>
    %c0_41 = arith.constant 0 : index
    %c0_42 = arith.constant 0 : index
    %c0_43 = arith.constant 0 : index
    %81 = vector.load %arg13[%c0_41, %c0_42, %c0_43] : memref<1x128x128xf32, #tpu.memory_space<vmem>>, vector<1x128x128xf32>
    %82 = vector.shape_cast %81 : vector<1x128x128xf32> to vector<128x128xf32>
    %cst_44 = arith.constant dense<0.000000e+00> : vector<32x128xf32>
    %83 = tpu.matmul %80, %82, %cst_44 {dimension_numbers = #tpu.dot_dimension_numbers<[1], [0], [0], [1], [0, 0, 1, 1], [], []>} : vector<32x128xf32>, vector<128x128xf32>, vector<32x128xf32> -> vector<32x128xf32>
    %c0_45 = arith.constant 0 : index
    %c0_46 = arith.constant 0 : index
    %c0_47 = arith.constant 0 : index
    %84 = vector.load %arg14[%c0_45, %c0_46, %c0_47] : memref<1x1x128xf32, #tpu.memory_space<vmem>>, vector<1x1x128xf32>
    %85 = vector.shape_cast %84 : vector<1x1x128xf32> to vector<1x128xf32>
    %86 = vector.broadcast %85 : vector<1x128xf32> to vector<32x128xf32>
    %87 = arith.addf %83, %86 : vector<32x128xf32>
    %c32_i32 = arith.constant 32 : i32
    %88 = arith.muli %arg1, %c32_i32 : i32
    %89 = tpu.assume_multiple %88, 32 : i32
    %90 = arith.index_cast %89 : i32 to index
    %c0_48 = arith.constant 0 : index
    %91 = vector.load %arg16[%90, %c0_48] : memref<32x128xf32, #tpu.memory_space<vmem>>, vector<32x128xf32>
    %92 = arith.addf %91, %87 : vector<32x128xf32>
    %93 = arith.index_cast %89 : i32 to index
    %c0_49 = arith.constant 0 : index
    %94 = vector.load %arg16[%93, %c0_49] : memref<32x128xf32, #tpu.memory_space<vmem>>, vector<32x128xf32>
    tpu.vector_store %arg16[%93, %c0_49], %92 {strides = array<i32>} : memref<32x128xf32, #tpu.memory_space<vmem>>, vector<32x128xf32>,
    %c0_50 = arith.constant 0 : index
    %c0_51 = arith.constant 0 : index
    %95 = vector.load %arg15[%c0_50, %c0_51] : memref<32x128xf32, #tpu.memory_space<vmem>>, vector<32x128xf32>
    tpu.vector_store %arg15[%c0_50, %c0_51], %92 {strides = array<i32>} : memref<32x128xf32, #tpu.memory_space<vmem>>, vector<32x128xf32>,
    return
  }
  func.func @transform_0(%arg0: i32, %arg1: i32) -> (i32, i32) {
    %c0_i32 = arith.constant 0 : i32
    %c0_i32_0 = arith.constant 0 : i32
    %c0_i32_1 = arith.constant 0 : i32
    return %c0_i32, %c0_i32_0 : i32, i32
  }
  func.func @transform_1(%arg0: i32, %arg1: i32) -> (i32, i32) {
    %c0_i32 = arith.constant 0 : i32
    %c0_i32_0 = arith.constant 0 : i32
    return %arg1, %c0_i32 : i32, i32
  }
  func.func @transform_2(%arg0: i32, %arg1: i32) -> (i32, i32) {
    %c0_i32 = arith.constant 0 : i32
    %c0_i32_0 = arith.constant 0 : i32
    return %arg1, %c0_i32 : i32, i32
  }
  func.func @transform_3(%arg0: i32, %arg1: i32) -> (i32, i32) {
    %c0_i32 = arith.constant 0 : i32
    %c0_i32_0 = arith.constant 0 : i32
    %c0_i32_1 = arith.constant 0 : i32
    return %c0_i32, %c0_i32_0 : i32, i32
  }
  func.func @transform_4(%arg0: i32, %arg1: i32) -> (i32, i32, i32) {
    %c0_i32 = arith.constant 0 : i32
    %c0_i32_0 = arith.constant 0 : i32
    %c0_i32_1 = arith.constant 0 : i32
    return %arg0, %c0_i32, %c0_i32_0 : i32, i32, i32
  }
  func.func @transform_5(%arg0: i32, %arg1: i32) -> (i32, i32, i32) {
    %c0_i32 = arith.constant 0 : i32
    %c0_i32_0 = arith.constant 0 : i32
    %c0_i32_1 = arith.constant 0 : i32
    return %arg0, %c0_i32, %c0_i32_0 : i32, i32, i32
  }
  func.func @transform_6(%arg0: i32, %arg1: i32) -> (i32, i32, i32) {
    %c0_i32 = arith.constant 0 : i32
    %c0_i32_0 = arith.constant 0 : i32
    %c0_i32_1 = arith.constant 0 : i32
    return %arg0, %c0_i32, %c0_i32_0 : i32, i32, i32
  }
  func.func @transform_7(%arg0: i32, %arg1: i32) -> (i32, i32, i32) {
    %c0_i32 = arith.constant 0 : i32
    %c0_i32_0 = arith.constant 0 : i32
    %c0_i32_1 = arith.constant 0 : i32
    return %arg0, %c0_i32, %c0_i32_0 : i32, i32, i32
  }
  func.func @transform_8(%arg0: i32, %arg1: i32) -> (i32, i32, i32) {
    %c0_i32 = arith.constant 0 : i32
    %c0_i32_0 = arith.constant 0 : i32
    %c0_i32_1 = arith.constant 0 : i32
    return %arg0, %c0_i32, %c0_i32_0 : i32, i32, i32
  }
  func.func @transform_9(%arg0: i32, %arg1: i32) -> (i32, i32, i32) {
    %c0_i32 = arith.constant 0 : i32
    %c0_i32_0 = arith.constant 0 : i32
    %c0_i32_1 = arith.constant 0 : i32
    return %arg0, %c0_i32, %c0_i32_0 : i32, i32, i32
  }
  func.func @transform_10(%arg0: i32, %arg1: i32) -> (i32, i32, i32) {
    %c0_i32 = arith.constant 0 : i32
    %c0_i32_0 = arith.constant 0 : i32
    %c0_i32_1 = arith.constant 0 : i32
    return %arg0, %c0_i32, %c0_i32_0 : i32, i32, i32
  }
  func.func @transform_11(%arg0: i32, %arg1: i32) -> (i32, i32, i32) {
    %c0_i32 = arith.constant 0 : i32
    %c0_i32_0 = arith.constant 0 : i32
    %c0_i32_1 = arith.constant 0 : i32
    return %arg0, %c0_i32, %c0_i32_0 : i32, i32, i32
  }
  func.func @transform_12(%arg0: i32, %arg1: i32) -> (i32, i32, i32) {
    %c0_i32 = arith.constant 0 : i32
    %c0_i32_0 = arith.constant 0 : i32
    %c0_i32_1 = arith.constant 0 : i32
    return %arg0, %c0_i32, %c0_i32_0 : i32, i32, i32
  }
  func.func @transform_13(%arg0: i32, %arg1: i32) -> (i32, i32) {
    %c0_i32 = arith.constant 0 : i32
    %c0_i32_0 = arith.constant 0 : i32
    return %arg1, %c0_i32 : i32, i32
  }
}

module attributes {stable_mosaic.version = 11 : i64} {
  func.func @_flows_kernel(%arg0: i32, %arg1: memref<1x8x128xf32, #tpu.memory_space<vmem>>, %arg2: memref<1x8x128xf32, #tpu.memory_space<vmem>>, %arg3: memref<2x128x128xf32, #tpu.memory_space<vmem>>, %arg4: memref<2x1x128xf32, #tpu.memory_space<vmem>>, %arg5: memref<2x128x256xf32, #tpu.memory_space<vmem>>, %arg6: memref<2x1x256xf32, #tpu.memory_space<vmem>>, %arg7: memref<2x1x1xf32, #tpu.memory_space<vmem>>, %arg8: memref<1x8x128xf32, #tpu.memory_space<vmem>>, %arg9: memref<1x8x128xf32, #tpu.memory_space<vmem>>) attributes {dimension_semantics = [#tpu.dimension_semantics<parallel>], iteration_bounds = array<i64: 4>, scalar_prefetch = 0 : i64, scratch_operands = 0 : i64, tpu.core_type = #tpu.core_type<tc>, window_params = [{transform_indices = @transform_0, window_bounds = array<i64: 1, 8, 128>}, {transform_indices = @transform_1, window_bounds = array<i64: 1, 8, 128>}, {transform_indices = @transform_2, window_bounds = array<i64: 2, 128, 128>}, {transform_indices = @transform_3, window_bounds = array<i64: 2, 1, 128>}, {transform_indices = @transform_4, window_bounds = array<i64: 2, 128, 256>}, {transform_indices = @transform_5, window_bounds = array<i64: 2, 1, 256>}, {transform_indices = @transform_6, window_bounds = array<i64: 2, 1, 1>}, {transform_indices = @transform_7, window_bounds = array<i64: 1, 8, 128>}, {transform_indices = @transform_8, window_bounds = array<i64: 1, 8, 128>}]} {
    %c0 = arith.constant 0 : index
    %c0_0 = arith.constant 0 : index
    %c0_1 = arith.constant 0 : index
    %0 = vector.load %arg1[%c0, %c0_0, %c0_1] : memref<1x8x128xf32, #tpu.memory_space<vmem>>, vector<1x8x128xf32>
    %1 = vector.shape_cast %0 : vector<1x8x128xf32> to vector<8x128xf32>
    %c0_2 = arith.constant 0 : index
    %c0_3 = arith.constant 0 : index
    %c0_4 = arith.constant 0 : index
    %2 = vector.load %arg2[%c0_2, %c0_3, %c0_4] : memref<1x8x128xf32, #tpu.memory_space<vmem>>, vector<1x8x128xf32>
    %3 = vector.shape_cast %2 : vector<1x8x128xf32> to vector<8x128xf32>
    %cst = arith.constant 0.000000e+00 : f32
    %4 = vector.broadcast %cst : f32 to vector<8x128xf32>
    %c0_5 = arith.constant 0 : index
    %c0_6 = arith.constant 0 : index
    %c0_7 = arith.constant 0 : index
    %5 = vector.load %arg3[%c0_5, %c0_6, %c0_7] : memref<2x128x128xf32, #tpu.memory_space<vmem>>, vector<1x128x128xf32>
    %6 = vector.shape_cast %5 : vector<1x128x128xf32> to vector<128x128xf32>
    %cst_8 = arith.constant dense<0.000000e+00> : vector<8x128xf32>
    %7 = tpu.matmul %3, %6, %cst_8 {dimension_numbers = #tpu.dot_dimension_numbers<[1], [0], [0], [1], [0, 0, 1, 1], [], []>} : vector<8x128xf32>, vector<128x128xf32>, vector<8x128xf32> -> vector<8x128xf32>
    %c0_9 = arith.constant 0 : index
    %c0_10 = arith.constant 0 : index
    %c0_11 = arith.constant 0 : index
    %8 = vector.load %arg4[%c0_9, %c0_10, %c0_11] : memref<2x1x128xf32, #tpu.memory_space<vmem>>, vector<1x1x128xf32>
    %9 = vector.shape_cast %8 : vector<1x1x128xf32> to vector<1x128xf32>
    %10 = vector.broadcast %9 : vector<1x128xf32> to vector<8x128xf32>
    %11 = arith.addf %7, %10 : vector<8x128xf32>
    %12 = math.tanh %11 : vector<8x128xf32>
    %c0_12 = arith.constant 0 : index
    %c0_13 = arith.constant 0 : index
    %c0_14 = arith.constant 0 : index
    %13 = vector.load %arg5[%c0_12, %c0_13, %c0_14] : memref<2x128x256xf32, #tpu.memory_space<vmem>>, vector<1x128x256xf32>
    %14 = vector.shape_cast %13 : vector<1x128x256xf32> to vector<128x256xf32>
    %cst_15 = arith.constant dense<0.000000e+00> : vector<8x256xf32>
    %15 = tpu.matmul %12, %14, %cst_15 {dimension_numbers = #tpu.dot_dimension_numbers<[1], [0], [0], [1], [0, 0, 1, 1], [], []>} : vector<8x128xf32>, vector<128x256xf32>, vector<8x256xf32> -> vector<8x256xf32>
    %c0_16 = arith.constant 0 : index
    %c0_17 = arith.constant 0 : index
    %c0_18 = arith.constant 0 : index
    %16 = vector.load %arg6[%c0_16, %c0_17, %c0_18] : memref<2x1x256xf32, #tpu.memory_space<vmem>>, vector<1x1x256xf32>
    %17 = vector.shape_cast %16 : vector<1x1x256xf32> to vector<1x256xf32>
    %18 = vector.broadcast %17 : vector<1x256xf32> to vector<8x256xf32>
    %19 = arith.addf %15, %18 : vector<8x256xf32>
    %c0_19 = arith.constant 0 : index
    %c0_20 = arith.constant 0 : index
    %c0_21 = arith.constant 0 : index
    %20 = vector.load %arg7[%c0_19, %c0_20, %c0_21] : memref<2x1x1xf32, #tpu.memory_space<vmem>>, vector<1x1x1xf32>
    %21 = vector.shape_cast %20 : vector<1x1x1xf32> to vector<1x1xf32>
    %22 = math.exp %21 : vector<1x1xf32>
    %23 = vector.broadcast %22 : vector<1x1xf32> to vector<8x256xf32>
    %24 = arith.mulf %19, %23 : vector<8x256xf32>
    %25 = vector.extract_strided_slice %24 {offsets = [0, 0], sizes = [8, 128], strides = [1, 1]} : vector<8x256xf32> to vector<8x128xf32>
    %26 = vector.extract_strided_slice %24 {offsets = [0, 128], sizes = [8, 128], strides = [1, 1]} : vector<8x256xf32> to vector<8x128xf32>
    %27 = arith.addf %1, %26 : vector<8x128xf32>
    %28 = math.exp %25 : vector<8x128xf32>
    %29 = arith.mulf %27, %28 : vector<8x128xf32>
    %cst_22 = arith.constant -4.605170e+01 : f32
    %30 = vector.broadcast %cst_22 : f32 to vector<8x128xf32>
    %31 = arith.maximumf %25, %30 : vector<8x128xf32>
    %32 = arith.addf %4, %31 : vector<8x128xf32>
    %cst_23 = arith.constant -4.605170e+01 : f32
    %33 = vector.broadcast %cst_23 : f32 to vector<8x128xf32>
    %34 = arith.subf %25, %33 : vector<8x128xf32>
    %35 = math.absf %34 : vector<8x128xf32>
    %cst_24 = arith.constant 0.000000e+00 : f32
    %36 = vector.broadcast %cst_24 : f32 to vector<8x128xf32>
    %37 = arith.subf %36, %35 : vector<8x128xf32>
    %38 = math.exp %37 : vector<8x128xf32>
    %cst_25 = arith.constant 1.000000e+00 : f32
    %39 = vector.broadcast %cst_25 : f32 to vector<8x128xf32>
    %40 = arith.addf %39, %38 : vector<8x128xf32>
    %41 = math.log %40 : vector<8x128xf32>
    %42 = arith.addf %32, %41 : vector<8x128xf32>
    %c1 = arith.constant 1 : index
    %c0_26 = arith.constant 0 : index
    %c0_27 = arith.constant 0 : index
    %43 = vector.load %arg3[%c1, %c0_26, %c0_27] : memref<2x128x128xf32, #tpu.memory_space<vmem>>, vector<1x128x128xf32>
    %44 = vector.shape_cast %43 : vector<1x128x128xf32> to vector<128x128xf32>
    %cst_28 = arith.constant dense<0.000000e+00> : vector<8x128xf32>
    %45 = tpu.matmul %3, %44, %cst_28 {dimension_numbers = #tpu.dot_dimension_numbers<[1], [0], [0], [1], [0, 0, 1, 1], [], []>} : vector<8x128xf32>, vector<128x128xf32>, vector<8x128xf32> -> vector<8x128xf32>
    %c1_29 = arith.constant 1 : index
    %c0_30 = arith.constant 0 : index
    %c0_31 = arith.constant 0 : index
    %46 = vector.load %arg4[%c1_29, %c0_30, %c0_31] : memref<2x1x128xf32, #tpu.memory_space<vmem>>, vector<1x1x128xf32>
    %47 = vector.shape_cast %46 : vector<1x1x128xf32> to vector<1x128xf32>
    %48 = vector.broadcast %47 : vector<1x128xf32> to vector<8x128xf32>
    %49 = arith.addf %45, %48 : vector<8x128xf32>
    %50 = math.tanh %49 : vector<8x128xf32>
    %c1_32 = arith.constant 1 : index
    %c0_33 = arith.constant 0 : index
    %c0_34 = arith.constant 0 : index
    %51 = vector.load %arg5[%c1_32, %c0_33, %c0_34] : memref<2x128x256xf32, #tpu.memory_space<vmem>>, vector<1x128x256xf32>
    %52 = vector.shape_cast %51 : vector<1x128x256xf32> to vector<128x256xf32>
    %cst_35 = arith.constant dense<0.000000e+00> : vector<8x256xf32>
    %53 = tpu.matmul %50, %52, %cst_35 {dimension_numbers = #tpu.dot_dimension_numbers<[1], [0], [0], [1], [0, 0, 1, 1], [], []>} : vector<8x128xf32>, vector<128x256xf32>, vector<8x256xf32> -> vector<8x256xf32>
    %c1_36 = arith.constant 1 : index
    %c0_37 = arith.constant 0 : index
    %c0_38 = arith.constant 0 : index
    %54 = vector.load %arg6[%c1_36, %c0_37, %c0_38] : memref<2x1x256xf32, #tpu.memory_space<vmem>>, vector<1x1x256xf32>
    %55 = vector.shape_cast %54 : vector<1x1x256xf32> to vector<1x256xf32>
    %56 = vector.broadcast %55 : vector<1x256xf32> to vector<8x256xf32>
    %57 = arith.addf %53, %56 : vector<8x256xf32>
    %c1_39 = arith.constant 1 : index
    %c0_40 = arith.constant 0 : index
    %c0_41 = arith.constant 0 : index
    %58 = vector.load %arg7[%c1_39, %c0_40, %c0_41] : memref<2x1x1xf32, #tpu.memory_space<vmem>>, vector<1x1x1xf32>
    %59 = vector.shape_cast %58 : vector<1x1x1xf32> to vector<1x1xf32>
    %60 = math.exp %59 : vector<1x1xf32>
    %61 = vector.broadcast %60 : vector<1x1xf32> to vector<8x256xf32>
    %62 = arith.mulf %57, %61 : vector<8x256xf32>
    %63 = vector.extract_strided_slice %62 {offsets = [0, 0], sizes = [8, 128], strides = [1, 1]} : vector<8x256xf32> to vector<8x128xf32>
    %64 = vector.extract_strided_slice %62 {offsets = [0, 128], sizes = [8, 128], strides = [1, 1]} : vector<8x256xf32> to vector<8x128xf32>
    %65 = arith.addf %29, %64 : vector<8x128xf32>
    %66 = math.exp %63 : vector<8x128xf32>
    %67 = arith.mulf %65, %66 : vector<8x128xf32>
    %cst_42 = arith.constant -4.605170e+01 : f32
    %68 = vector.broadcast %cst_42 : f32 to vector<8x128xf32>
    %69 = arith.maximumf %63, %68 : vector<8x128xf32>
    %70 = arith.addf %42, %69 : vector<8x128xf32>
    %cst_43 = arith.constant -4.605170e+01 : f32
    %71 = vector.broadcast %cst_43 : f32 to vector<8x128xf32>
    %72 = arith.subf %63, %71 : vector<8x128xf32>
    %73 = math.absf %72 : vector<8x128xf32>
    %cst_44 = arith.constant 0.000000e+00 : f32
    %74 = vector.broadcast %cst_44 : f32 to vector<8x128xf32>
    %75 = arith.subf %74, %73 : vector<8x128xf32>
    %76 = math.exp %75 : vector<8x128xf32>
    %cst_45 = arith.constant 1.000000e+00 : f32
    %77 = vector.broadcast %cst_45 : f32 to vector<8x128xf32>
    %78 = arith.addf %77, %76 : vector<8x128xf32>
    %79 = math.log %78 : vector<8x128xf32>
    %80 = arith.addf %70, %79 : vector<8x128xf32>
    %c0_46 = arith.constant 0 : index
    %c0_47 = arith.constant 0 : index
    %c0_48 = arith.constant 0 : index
    %81 = vector.load %arg8[%c0_46, %c0_47, %c0_48] : memref<1x8x128xf32, #tpu.memory_space<vmem>>, vector<1x8x128xf32>
    %82 = vector.shape_cast %81 : vector<1x8x128xf32> to vector<8x128xf32>
    %83 = vector.shape_cast %67 : vector<8x128xf32> to vector<1x8x128xf32>
    tpu.vector_store %arg8[%c0_46, %c0_47, %c0_48], %83 {strides = array<i32>} : memref<1x8x128xf32, #tpu.memory_space<vmem>>, vector<1x8x128xf32>,
    %c0_49 = arith.constant 0 : index
    %c0_50 = arith.constant 0 : index
    %c0_51 = arith.constant 0 : index
    %84 = vector.load %arg9[%c0_49, %c0_50, %c0_51] : memref<1x8x128xf32, #tpu.memory_space<vmem>>, vector<1x8x128xf32>
    %85 = vector.shape_cast %84 : vector<1x8x128xf32> to vector<8x128xf32>
    %86 = vector.shape_cast %80 : vector<8x128xf32> to vector<1x8x128xf32>
    tpu.vector_store %arg9[%c0_49, %c0_50, %c0_51], %86 {strides = array<i32>} : memref<1x8x128xf32, #tpu.memory_space<vmem>>, vector<1x8x128xf32>,
    return
  }
  func.func @transform_0(%arg0: i32) -> (i32, i32, i32) {
    %c0_i32 = arith.constant 0 : i32
    %c0_i32_0 = arith.constant 0 : i32
    %c0_i32_1 = arith.constant 0 : i32
    return %arg0, %c0_i32, %c0_i32_0 : i32, i32, i32
  }
  func.func @transform_1(%arg0: i32) -> (i32, i32, i32) {
    %c0_i32 = arith.constant 0 : i32
    %c0_i32_0 = arith.constant 0 : i32
    %c0_i32_1 = arith.constant 0 : i32
    return %arg0, %c0_i32, %c0_i32_0 : i32, i32, i32
  }
  func.func @transform_2(%arg0: i32) -> (i32, i32, i32) {
    %c0_i32 = arith.constant 0 : i32
    %c0_i32_0 = arith.constant 0 : i32
    %c0_i32_1 = arith.constant 0 : i32
    return %arg0, %c0_i32, %c0_i32_0 : i32, i32, i32
  }
  func.func @transform_3(%arg0: i32) -> (i32, i32, i32) {
    %c0_i32 = arith.constant 0 : i32
    %c0_i32_0 = arith.constant 0 : i32
    %c0_i32_1 = arith.constant 0 : i32
    return %arg0, %c0_i32, %c0_i32_0 : i32, i32, i32
  }
  func.func @transform_4(%arg0: i32) -> (i32, i32, i32) {
    %c0_i32 = arith.constant 0 : i32
    %c0_i32_0 = arith.constant 0 : i32
    %c0_i32_1 = arith.constant 0 : i32
    return %arg0, %c0_i32, %c0_i32_0 : i32, i32, i32
  }
  func.func @transform_5(%arg0: i32) -> (i32, i32, i32) {
    %c0_i32 = arith.constant 0 : i32
    %c0_i32_0 = arith.constant 0 : i32
    %c0_i32_1 = arith.constant 0 : i32
    return %arg0, %c0_i32, %c0_i32_0 : i32, i32, i32
  }
  func.func @transform_6(%arg0: i32) -> (i32, i32, i32) {
    %c0_i32 = arith.constant 0 : i32
    %c0_i32_0 = arith.constant 0 : i32
    %c0_i32_1 = arith.constant 0 : i32
    return %arg0, %c0_i32, %c0_i32_0 : i32, i32, i32
  }
  func.func @transform_7(%arg0: i32) -> (i32, i32, i32) {
    %c0_i32 = arith.constant 0 : i32
    %c0_i32_0 = arith.constant 0 : i32
    %c0_i32_1 = arith.constant 0 : i32
    return %arg0, %c0_i32, %c0_i32_0 : i32, i32, i32
  }
  func.func @transform_8(%arg0: i32) -> (i32, i32, i32) {
    %c0_i32 = arith.constant 0 : i32
    %c0_i32_0 = arith.constant 0 : i32
    %c0_i32_1 = arith.constant 0 : i32
    return %arg0, %c0_i32, %c0_i32_0 : i32, i32, i32
  }
}

module attributes {stable_mosaic.version = 11 : i64} {
  func.func @_mlp_kernel(%arg0: i32, %arg1: memref<1x16x128xf32, #tpu.memory_space<vmem>>, %arg2: memref<1x128x128xf32, #tpu.memory_space<vmem>>, %arg3: memref<1x1x128xf32, #tpu.memory_space<vmem>>, %arg4: memref<1x128x128xf32, #tpu.memory_space<vmem>>, %arg5: memref<1x1x128xf32, #tpu.memory_space<vmem>>, %arg6: memref<1x16x128xf32, #tpu.memory_space<vmem>>) attributes {dimension_semantics = [#tpu.dimension_semantics<parallel>], iteration_bounds = array<i64: 2>, scalar_prefetch = 0 : i64, scratch_operands = 0 : i64, tpu.core_type = #tpu.core_type<tc>, window_params = [{transform_indices = @transform_0, window_bounds = array<i64: 1, 16, 128>}, {transform_indices = @transform_1, window_bounds = array<i64: 1, 128, 128>}, {transform_indices = @transform_2, window_bounds = array<i64: 1, 1, 128>}, {transform_indices = @transform_3, window_bounds = array<i64: 1, 128, 128>}, {transform_indices = @transform_4, window_bounds = array<i64: 1, 1, 128>}, {transform_indices = @transform_5, window_bounds = array<i64: 1, 16, 128>}]} {
    %c0 = arith.constant 0 : index
    %c0_0 = arith.constant 0 : index
    %c0_1 = arith.constant 0 : index
    %0 = vector.load %arg1[%c0, %c0_0, %c0_1] : memref<1x16x128xf32, #tpu.memory_space<vmem>>, vector<1x16x128xf32>
    %1 = vector.shape_cast %0 : vector<1x16x128xf32> to vector<16x128xf32>
    %c0_2 = arith.constant 0 : index
    %c0_3 = arith.constant 0 : index
    %c0_4 = arith.constant 0 : index
    %2 = vector.load %arg2[%c0_2, %c0_3, %c0_4] : memref<1x128x128xf32, #tpu.memory_space<vmem>>, vector<1x128x128xf32>
    %3 = vector.shape_cast %2 : vector<1x128x128xf32> to vector<128x128xf32>
    %cst = arith.constant dense<0.000000e+00> : vector<16x128xf32>
    %4 = tpu.matmul %1, %3, %cst {dimension_numbers = #tpu.dot_dimension_numbers<[1], [0], [0], [1], [0, 0, 1, 1], [], []>} : vector<16x128xf32>, vector<128x128xf32>, vector<16x128xf32> -> vector<16x128xf32>
    %c0_5 = arith.constant 0 : index
    %c0_6 = arith.constant 0 : index
    %c0_7 = arith.constant 0 : index
    %5 = vector.load %arg3[%c0_5, %c0_6, %c0_7] : memref<1x1x128xf32, #tpu.memory_space<vmem>>, vector<1x1x128xf32>
    %6 = vector.shape_cast %5 : vector<1x1x128xf32> to vector<1x128xf32>
    %7 = vector.broadcast %6 : vector<1x128xf32> to vector<16x128xf32>
    %8 = arith.addf %4, %7 : vector<16x128xf32>
    %cst_8 = arith.constant 0.000000e+00 : f32
    %9 = vector.broadcast %cst_8 : f32 to vector<16x128xf32>
    %10 = arith.maximumf %8, %9 : vector<16x128xf32>
    %c0_9 = arith.constant 0 : index
    %c0_10 = arith.constant 0 : index
    %c0_11 = arith.constant 0 : index
    %11 = vector.load %arg4[%c0_9, %c0_10, %c0_11] : memref<1x128x128xf32, #tpu.memory_space<vmem>>, vector<1x128x128xf32>
    %12 = vector.shape_cast %11 : vector<1x128x128xf32> to vector<128x128xf32>
    %cst_12 = arith.constant dense<0.000000e+00> : vector<16x128xf32>
    %13 = tpu.matmul %10, %12, %cst_12 {dimension_numbers = #tpu.dot_dimension_numbers<[1], [0], [0], [1], [0, 0, 1, 1], [], []>} : vector<16x128xf32>, vector<128x128xf32>, vector<16x128xf32> -> vector<16x128xf32>
    %c0_13 = arith.constant 0 : index
    %c0_14 = arith.constant 0 : index
    %c0_15 = arith.constant 0 : index
    %14 = vector.load %arg5[%c0_13, %c0_14, %c0_15] : memref<1x1x128xf32, #tpu.memory_space<vmem>>, vector<1x1x128xf32>
    %15 = vector.shape_cast %14 : vector<1x1x128xf32> to vector<1x128xf32>
    %16 = vector.broadcast %15 : vector<1x128xf32> to vector<16x128xf32>
    %17 = arith.addf %13, %16 : vector<16x128xf32>
    %cst_16 = arith.constant 0.000000e+00 : f32
    %18 = vector.broadcast %cst_16 : f32 to vector<16x128xf32>
    %19 = arith.subf %18, %17 : vector<16x128xf32>
    %20 = math.exp %19 : vector<16x128xf32>
    %cst_17 = arith.constant 1.000000e+00 : f32
    %21 = vector.broadcast %cst_17 : f32 to vector<16x128xf32>
    %22 = arith.addf %21, %20 : vector<16x128xf32>
    %cst_18 = arith.constant 1.000000e+00 : f32
    %23 = vector.broadcast %cst_18 : f32 to vector<16x128xf32>
    %24 = arith.divf %23, %22 : vector<16x128xf32>
    %c0_19 = arith.constant 0 : index
    %c0_20 = arith.constant 0 : index
    %c0_21 = arith.constant 0 : index
    %25 = vector.load %arg6[%c0_19, %c0_20, %c0_21] : memref<1x16x128xf32, #tpu.memory_space<vmem>>, vector<1x16x128xf32>
    %26 = vector.shape_cast %25 : vector<1x16x128xf32> to vector<16x128xf32>
    %27 = vector.shape_cast %24 : vector<16x128xf32> to vector<1x16x128xf32>
    tpu.vector_store %arg6[%c0_19, %c0_20, %c0_21], %27 {strides = array<i32>} : memref<1x16x128xf32, #tpu.memory_space<vmem>>, vector<1x16x128xf32>,
    return
  }
  func.func @transform_0(%arg0: i32) -> (i32, i32, i32) {
    %c0_i32 = arith.constant 0 : i32
    %c0_i32_0 = arith.constant 0 : i32
    %c0_i32_1 = arith.constant 0 : i32
    return %arg0, %c0_i32, %c0_i32_0 : i32, i32, i32
  }
  func.func @transform_1(%arg0: i32) -> (i32, i32, i32) {
    %c0_i32 = arith.constant 0 : i32
    %c0_i32_0 = arith.constant 0 : i32
    %c0_i32_1 = arith.constant 0 : i32
    return %arg0, %c0_i32, %c0_i32_0 : i32, i32, i32
  }
  func.func @transform_2(%arg0: i32) -> (i32, i32, i32) {
    %c0_i32 = arith.constant 0 : i32
    %c0_i32_0 = arith.constant 0 : i32
    %c0_i32_1 = arith.constant 0 : i32
    return %arg0, %c0_i32, %c0_i32_0 : i32, i32, i32
  }
  func.func @transform_3(%arg0: i32) -> (i32, i32, i32) {
    %c0_i32 = arith.constant 0 : i32
    %c0_i32_0 = arith.constant 0 : i32
    %c0_i32_1 = arith.constant 0 : i32
    return %arg0, %c0_i32, %c0_i32_0 : i32, i32, i32
  }
  func.func @transform_4(%arg0: i32) -> (i32, i32, i32) {
    %c0_i32 = arith.constant 0 : i32
    %c0_i32_0 = arith.constant 0 : i32
    %c0_i32_1 = arith.constant 0 : i32
    return %arg0, %c0_i32, %c0_i32_0 : i32, i32, i32
  }
  func.func @transform_5(%arg0: i32) -> (i32, i32, i32) {
    %c0_i32 = arith.constant 0 : i32
    %c0_i32_0 = arith.constant 0 : i32
    %c0_i32_1 = arith.constant 0 : i32
    return %arg0, %c0_i32, %c0_i32_0 : i32, i32, i32
  }
}

</mosaic_0001>

<bundles_post_ra>
// kernel: _lambda_.5
= control target key start
LH: loop header
LB: loop body
LE: loop exit
PB: predicated region body
PF: predicated region fallthrough
CT: control target
= control target key end

     0   :  { %s735_s12 = smov 0   ;;  %s808_s0 = inlined_call_operand.vmem [shape: f32[2,32,128], index: 0, kind: input, shape index: {}]   ;;  %s809_s1 = inlined_call_operand.vmem [shape: f32[2,128,128], index: 1, kind: input, shape index: {}]   ;;  %s810_s2 = inlined_call_operand.vmem [shape: f32[2,128,128], index: 2, kind: input, shape index: {}]   ;;  %s811_s3 = inlined_call_operand.vmem [shape: f32[2,32,128], index: 3, kind: output, shape index: {}]  }
   0x1 LB: > { %s500_s13 = sadd.s32 4294967295, %s713_s12   ;;  %p504_p0 = scmp.ge.s32.totalorder %s713_s12, 1  ;;  %s713_s12 = sphi %s735_s12, %s13_s12  }
   0x2   : > { %p157_p1 = scmp.lt.s32.totalorder %s713_s12, 3 }
   0x4   : > { %p158_p2 = pnand %p504_p0, %p157_p1 }
   0x5   : > { %p191_p3 = scmp.lt.s32.totalorder (!%p158_p2), %s500_s13, 1 }
   0x6   : > { %161 = sbr.rel (%p158_p2) target bundleno = 483 (0x1e3), region = 32 }
   0xd   : > { %s813_s13 = smov (!%p191_p3, %s500_s13), 1 }
   0xe   : > { %s516_s14 = sshll.u32 %s813_s13, 7  ;;  %s515_s18 = sshll.u32 %s813_s13, 5 }
   0xf   : > { %s749_s17 = scalar_lea.vmem %s809_s1, %s516_s14  ;;  %s763_s21 = scalar_lea.vmem %s808_s0, %s515_s18 }
  0x10   : > { %v215_v0 = vld [vmem:[%s749_s17] sm:$0xff]  ;;  %v216_v1 = vld [vmem:[%s749_s17 + $0x8] sm:$0xff]  ;;  %v217_v2 = vld [vmem:[%s749_s17 + $0x10] sm:$0xff]  ;;  %s768_s24 = scalar_lea.vmem %s810_s2, %s516_s14  ;;  %s210_s27 = scalar_lea.vmem %s811_s3, %s515_s18 }
  0x11   : > { %v635_v3 = vpack.c.bf16 %v216_v1, %v215_v0  ;;  %v218_v4 = vld [vmem:[%s749_s17 + $0x18] sm:$0xff]  ;;  %v219_v6 = vld [vmem:[%s749_s17 + $0x20] sm:$0xff]  ;;  %v220_v7 = vld [vmem:[%s749_s17 + $0x28] sm:$0xff] }
  0x12   : > { %v639_v5 = vpack.c.bf16 %v218_v4, %v217_v2  ;;  %v643_v8 = vpack.c.bf16 %v220_v7, %v219_v6  ;;  %v211_v9 = vld [vmem:[%s763_s21] sm:$0xff]  ;;  %v221_v10 = vld [vmem:[%s749_s17 + $0x30] sm:$0xff]  ;;  %v222_v11 = vld [vmem:[%s749_s17 + $0x38] sm:$0xff] }
  0x13   : > { %636 = vmatprep.subr.bf16.mxu0 %v635_v3  ;;  %591 = vmatprep.mubr.f32.mxu0 %v211_v9  ;;  %v316_v12 = vld [vmem:[%s768_s24] sm:$0xff]  ;;  %v317_v13 = vld [vmem:[%s768_s24 + $0x8] sm:$0xff]  ;;  %v318_v14 = vld [vmem:[%s768_s24 + $0x10] sm:$0xff]  ;;  %v647_v18 = vpack.c.bf16 %v222_v11, %v221_v10 }
  0x14   : > { %638 = vmatpush3.bf16.msra.mxu0 %v635_v3  ;;  %v319_v15 = vld [vmem:[%s768_s24 + $0x18] sm:$0xff]  ;;  %v667_v16 = vpack.c.bf16 %v317_v13, %v316_v12  ;;  %v320_v19 = vld [vmem:[%s768_s24 + $0x20] sm:$0xff]  ;;  %v321_v20 = vld [vmem:[%s768_s24 + $0x28] sm:$0xff] }
  0x15   : > { %640 = vmatprep.subr.bf16.mxu0 %v639_v5  ;;  %v671_v17 = vpack.c.bf16 %v319_v15, %v318_v14  ;;  %v223_v21 = vld [vmem:[%s749_s17 + $0x40] sm:$0xff]  ;;  %v224_v22 = vld [vmem:[%s749_s17 + $0x48] sm:$0xff]  ;;  %v675_v23 = vpack.c.bf16 %v321_v20, %v320_v19  ;;  %v322_v25 = vld [vmem:[%s768_s24 + $0x30] sm:$0xff] }
  0x16   : > { %668 = vmatprep.subr.bf16.mxu1 %v667_v16  ;;  %v651_v24 = vpack.c.bf16 %v224_v22, %v223_v21  ;;  %v323_v26 = vld [vmem:[%s768_s24 + $0x38] sm:$0xff]  ;;  %v225_v27 = vld [vmem:[%s749_s17 + $0x50] sm:$0xff]  ;;  %v324_v31 = vld [vmem:[%s768_s24 + $0x40] sm:$0xff] }
  0x17   : > { %670 = vmatpush3.bf16.msra.mxu1 %v667_v16  ;;  %v226_v28 = vld [vmem:[%s749_s17 + $0x58] sm:$0xff]  ;;  %v679_v29 = vpack.c.bf16 %v323_v26, %v322_v25  ;;  %v325_v32 = vld [vmem:[%s768_s24 + $0x48] sm:$0xff]  ;;  %v227_v33 = vld [vmem:[%s749_s17 + $0x60] sm:$0xff] }
  0x18   : > { %642 = vmatpush3.bf16.msra.mxu0 %v639_v5  ;;  %672 = vmatprep.subr.bf16.mxu1 %v671_v17  ;;  %v655_v30 = vpack.c.bf16 %v226_v28, %v225_v27  ;;  %v228_v34 = vld [vmem:[%s749_s17 + $0x68] sm:$0xff]  ;;  %v683_v35 = vpack.c.bf16 %v325_v32, %v324_v31  ;;  %v326_v37 = vld [vmem:[%s768_s24 + $0x50] sm:$0xff]  ;;  %v327_v38 = vld [vmem:[%s768_s24 + $0x58] sm:$0xff] }
  0x19   : > { %644 = vmatprep.subr.bf16.mxu0 %v643_v8  ;;  %v659_v36 = vpack.c.bf16 %v228_v34, %v227_v33  ;;  %v229_v39 = vld [vmem:[%s749_s17 + $0x70] sm:$0xff]  ;;  %v230_v40 = vld [vmem:[%s749_s17 + $0x78] sm:$0xff]  ;;  %v687_v41 = vpack.c.bf16 %v327_v38, %v326_v37  ;;  %v328_v43 = vld [vmem:[%s768_s24 + $0x60] sm:$0xff] }
  0x1a   : > { %v663_v42 = vpack.c.bf16 %v230_v40, %v229_v39  ;;  %v329_v44 = vld [vmem:[%s768_s24 + $0x68] sm:$0xff]  ;;  %v330_v46 = vld [vmem:[%s768_s24 + $0x70] sm:$0xff]  ;;  %v331_v47 = vld [vmem:[%s768_s24 + $0x78] sm:$0xff] }
  0x1b   : > { %674 = vmatpush3.bf16.msra.mxu1 %v671_v17  ;;  %v691_v45 = vpack.c.bf16 %v329_v44, %v328_v43  ;;  %v212_v48 = vld [vmem:[%s763_s21 + $0x8] sm:$0xff]  ;;  %v695_v49 = vpack.c.bf16 %v331_v47, %v330_v46  ;;  %v213_v50 = vld [vmem:[%s763_s21 + $0x10] sm:$0xff]  ;;  %v214_v51 = vld [vmem:[%s763_s21 + $0x18] sm:$0xff] }
  0x1c   : > { %646 = vmatpush3.bf16.msra.mxu0 %v643_v8  ;;  %676 = vmatprep.subr.bf16.mxu1 %v675_v23 }
  0x1d   : > { %648 = vmatprep.subr.bf16.mxu0 %v647_v18 }
  0x1f   : > { %678 = vmatpush3.bf16.msra.mxu1 %v675_v23 }
  0x20   : > { %650 = vmatpush3.bf16.msra.mxu0 %v647_v18  ;;  %680 = vmatprep.subr.bf16.mxu1 %v679_v29 }
  0x21   : > { %652 = vmatprep.subr.bf16.mxu0 %v651_v24 }
  0x23   : > { %682 = vmatpush3.bf16.msra.mxu1 %v679_v29 }
  0x24   : > { %654 = vmatpush3.bf16.msra.mxu0 %v651_v24  ;;  %684 = vmatprep.subr.bf16.mxu1 %v683_v35 }
  0x25   : > { %656 = vmatprep.subr.bf16.mxu0 %v655_v30 }
  0x27   : > { %686 = vmatpush3.bf16.msra.mxu1 %v683_v35 }
  0x28   : > { %658 = vmatpush3.bf16.msra.mxu0 %v655_v30  ;;  %688 = vmatprep.subr.bf16.mxu1 %v687_v41 }
  0x29   : > { %660 = vmatprep.subr.bf16.mxu0 %v659_v36 }
  0x2b   : > { %690 = vmatpush3.bf16.msra.mxu1 %v687_v41 }
  0x2c   : > { %662 = vmatpush3.bf16.msra.mxu0 %v659_v36  ;;  %692 = vmatprep.subr.bf16.mxu1 %v691_v45 }
  0x2d   : > { %664 = vmatprep.subr.bf16.mxu0 %v663_v42 }
  0x2f   : > { %694 = vmatpush3.bf16.msra.mxu1 %v691_v45 }
  0x30   : > { %666 = vmatpush3.bf16.msra.mxu0 %v663_v42  ;;  %696 = vmatprep.subr.bf16.mxu1 %v695_v49 }
  0x33   : > { %592 = vmatmul.mubr.f32.vlgmr.msra.gmra.mrb[0].mxu0 %v212_v48  ;;  %698 = vmatpush3.bf16.msra.mxu1 %v695_v49 }
  0x34   : > { %594 = vmatprep.mubr.f32.mxu0 %v213_v50 }
  0x37   : > { %595 = vmatmul.mubr.f32.gmra.mrb[2].mxu0 %v214_v51 }
 0x106   : > { %v593_v52 = vpop.f32.mrb[0].mxu0 }
 0x107   : > { %v297_v53 = vpop.f32.mrb[1].mxu0 }
 0x108   : > { %629 = vmatprep.mubr.f32.mxu1 %v297_v53 }
 0x109   : > { %630 = vmatmul.mubr.f32.vlgmr.msra.gmra.mrb[0].mxu1 %v593_v52 }
 0x10a   : > { %v596_v54 = vpop.f32.mrb[2].mxu0 }
 0x10b   : > { %v307_v55 = vpop.f32.mrb[3].mxu0 }
 0x10c   : > { %632 = vmatprep.mubr.f32.mxu1 %v307_v55 }
 0x10d   : > { %633 = vmatmul.mubr.f32.gmra.mrb[2].mxu1 %v596_v54 }
 0x1dc   : > { %v631_v56 = vpop.f32.mrb[0].mxu1 }
 0x1dd   : > { %418 = vst [vmem:[%s210_s27 + $0x8] sm:$0xff] %v631_v56  ;;  %v398_v57 = vpop.f32.mrb[1].mxu1 }
 0x1de   : > { %417 = vst [vmem:[%s210_s27] sm:$0xff] %v398_v57 }
 0x1e0   : > { %v634_v58 = vpop.f32.mrb[2].mxu1 }
 0x1e1   : > { %420 = vst [vmem:[%s210_s27 + $0x18] sm:$0xff] %v634_v58  ;;  %v408_v59 = vpop.f32.mrb[3].mxu1 }
 0x1e2   : > { %419 = vst [vmem:[%s210_s27 + $0x10] sm:$0xff] %v408_v59 }
 0x1e3 PF: > { %s13_s12 = sadd.s32 1, %s713_s12  }
 0x1e4   : > { %p10_p4 = scmp.ge.s32.totalorder %s13_s12, 4  }
 0x1e6   :  { %12 = sbr.rel (!%p10_p4) target bundleno = 1 (0x1), region = 68 }

// kernel: _lambda_.6
= control target key start
LH: loop header
LB: loop body
LE: loop exit
PB: predicated region body
PF: predicated region fallthrough
CT: control target
= control target key end

     0   :  { %s1458_s27 = smov 0   ;;  %s1652_s0 = inlined_call_operand.vmem [shape: f32[4,8,128], index: 0, kind: input, shape index: {}]   ;;  %s1653_s1 = inlined_call_operand.vmem [shape: f32[4,8,128], index: 1, kind: input, shape index: {}]   ;;  %s1654_s2 = inlined_call_operand.vmem [shape: f32[8,128,128], index: 2, kind: input, shape index: {}]   ;;  %s1655_s3 = inlined_call_operand.vmem [shape: f32[8,1,128], index: 3, kind: input, shape index: {}]   ;;  %s1656_s4 = inlined_call_operand.vmem [shape: f32[8,128,256], index: 4, kind: input, shape index: {}]   ;;  %s1657_s5 = inlined_call_operand.vmem [shape: f32[8,1,256], index: 5, kind: input, shape index: {}]   ;;  %s1658_s6 = inlined_call_operand.vmem [shape: f32[8,1,1], index: 6, kind: input, shape index: {}]   ;;  %s1659_s7 = inlined_call_operand.vmem [shape: f32[4,8,128], index: 7, kind: output, shape index: {0}]   ;;  %s1660_s8 = inlined_call_operand.vmem [shape: f32[4,8,128], index: 8, kind: output, shape index: {1}]  }
   0x1 LB: > { %s1464_s28 = sadd.s32 4294967295, %s1407_s27   ;;  %p1078_p0 = scmp.ge.s32.totalorder %s1407_s27, 1  ;;  %s1407_s27 = sphi %s1458_s27, %s19_s27  }
   0x2   : > { %p328_p1 = scmp.lt.s32.totalorder %s1407_s27, 5 }
   0x4   : > { %p329_p2 = pnand %p1078_p0, %p328_p1 }
   0x5   : > { %s1081_s29 = sshll.u32 (!%p329_p2), %s1464_s28, 1  ;;  %v1409_v0 = vmov (!%p329_p2), 0.0|0.0   ;;  %vm1410_vm0 = vmmov (!%p329_p2), 0   ;;  %v1411_v1 = vmov (!%p329_p2), 0.0   ;;  %p393_p4 = scmp.lt.s32.totalorder (!%p329_p2), %s1464_s28, 3 }
   0x6   : > { %332 = sbr.rel (%p329_p2) target bundleno = 560 (0x230), region = 48  ;;  %1256 = vmatprep.subr.bf16.mxu0 (!%p329_p2), %v1409_v0  ;;  %p402_p3 = scmp.lt.s32.totalorder (!%p329_p2), %s1081_s29, 7  ;;  %1218 = vmatprep.mubr.msk.f32.mxu0 (!%p329_p2), %vm1410_vm0, %v1411_v1 }
   0x7   : > { %643 = vmatprep.mubr.f32.mxu1 (!%p329_p2), %v1411_v1 }
   0xd   : > { %s1662_s29 = smov (!%p402_p3, %s1081_s29), 7  ;;  %s1664_s28 = smov (!%p393_p4, %s1464_s28), 3 }
   0xe   : > { %s1150_s30 = sshll.u32 %s1662_s29, 7  ;;  %s1151_s12 = sshll.u32 %s1662_s29, 8 }
   0xf   : > { %s1479_s11 = scalar_lea.vmem %s1654_s2, %s1150_s30  ;;  %s1492_s15 = scalar_lea.vmem %s1656_s4, %s1151_s12 }
  0x10   : > { %v441_v2 = vld [vmem:[%s1479_s11] sm:$0xff]  ;;  %v442_v3 = vld [vmem:[%s1479_s11 + $0x8] sm:$0xff]  ;;  %v443_v4 = vld [vmem:[%s1479_s11 + $0x10] sm:$0xff]  ;;  %s1533_s16 = sshll.u32 %s1664_s28, 3  ;;  %s429_s22 = scalar_lea.vmem %s1658_s6, %s1662_s29 }
  0x11   : > { %v1257_v5 = vpack.c.bf16 %v442_v3, %v441_v2  ;;  %v444_v6 = vld [vmem:[%s1479_s11 + $0x18] sm:$0xff]  ;;  %v445_v8 = vld [vmem:[%s1479_s11 + $0x20] sm:$0xff]  ;;  %v446_v9 = vld [vmem:[%s1479_s11 + $0x28] sm:$0xff]  ;;  %s400_s19 = scalar_lea.vmem %s1653_s1, %s1533_s16  ;;  %s1595_s25 = scalar_lea.vmem %s1655_s3, %s1662_s29 }
  0x12   : > { %v1260_v7 = vpack.c.bf16 %v444_v6, %v443_v4  ;;  %v1263_v10 = vpack.c.bf16 %v446_v9, %v445_v8  ;;  %v447_v11 = vld [vmem:[%s1479_s11 + $0x30] sm:$0xff]  ;;  %v448_v12 = vld [vmem:[%s1479_s11 + $0x38] sm:$0xff]  ;;  %v449_v13 = vld [vmem:[%s1479_s11 + $0x40] sm:$0xff]  ;;  %s1089_s26 = sshll.u32 %s1662_s29, 1  ;;  %s434_s14 = scalar_lea.vmem %s1659_s7, %s1533_s16 }
  0x13   : > { %1258 = vmatpush3.bf16.msra.mxu0 %v1257_v5  ;;  %v450_v14 = vld [vmem:[%s1479_s11 + $0x48] sm:$0xff]  ;;  %v1266_v15 = vpack.c.bf16 %v448_v12, %v447_v11  ;;  %v538_v17 = vld [vmem:[%s1492_s15 + $0x18] sm:$0xff]  ;;  %v535_v18 = vld [vmem:[%s1492_s15] sm:$0xff]  ;;  %s424_s9 = scalar_lea.vmem %s1657_s5, %s1089_s26  ;;  %s438_s18 = scalar_lea.vmem %s1660_s8, %s1533_s16 }
  0x14   : > { %1259 = vmatprep.subr.bf16.mxu0 %v1409_v0  ;;  %v536_v16 = vld [vmem:[%s1492_s15 + $0x8] sm:$0xff]  ;;  %v537_v20 = vld [vmem:[%s1492_s15 + $0x10] sm:$0xff]  ;;  %v542_v22 = vld [vmem:[%s1492_s15 + $0x38] sm:$0xff]  ;;  %v1269_v29 = vpack.c.bf16 %v450_v14, %v449_v13 }
  0x15   : > { %v1280_v19 = vpack.c.bf16 %v538_v17, %v536_v16  ;;  %v540_v21 = vld [vmem:[%s1492_s15 + $0x28] sm:$0xff]  ;;  %v1282_v23 = vpack.c.bf16 %v537_v20, %v535_v18  ;;  %v539_v25 = vld [vmem:[%s1492_s15 + $0x20] sm:$0xff]  ;;  %v541_v26 = vld [vmem:[%s1492_s15 + $0x30] sm:$0xff] }
  0x16   : > { %v1284_v24 = vpack.c.bf16 %v542_v22, %v540_v21  ;;  %v544_v27 = vld [vmem:[%s1492_s15 + $0x48] sm:$0xff]  ;;  %v546_v28 = vld [vmem:[%s1492_s15 + $0x58] sm:$0xff]  ;;  %v451_v30 = vld [vmem:[%s1479_s11 + $0x50] sm:$0xff]  ;;  %v1286_v31 = vpack.c.bf16 %v541_v26, %v539_v25 }
  0x17   : > { %1261 = vmatpush3.bf16.msra.mxu0 %v1260_v7  ;;  %1281 = vmatprep.subr.bf16.mxu1 %v1280_v19  ;;  %v452_v32 = vld [vmem:[%s1479_s11 + $0x58] sm:$0xff]  ;;  %v1288_v33 = vpack.c.bf16 %v546_v28, %v544_v27  ;;  %v543_v34 = vld [vmem:[%s1492_s15 + $0x40] sm:$0xff]  ;;  %v545_v35 = vld [vmem:[%s1492_s15 + $0x50] sm:$0xff] }
  0x18   : > { %1262 = vmatprep.subr.bf16.mxu0 %v1409_v0  ;;  %1283 = vmatpush1.bf16.msra.mxu1 %v1282_v23  ;;  %v548_v36 = vld [vmem:[%s1492_s15 + $0x68] sm:$0xff]  ;;  %v550_v37 = vld [vmem:[%s1492_s15 + $0x78] sm:$0xff]  ;;  %v1272_v38 = vpack.c.bf16 %v452_v32, %v451_v30  ;;  %v453_v39 = vld [vmem:[%s1479_s11 + $0x60] sm:$0xff]  ;;  %v1290_v40 = vpack.c.bf16 %v545_v35, %v543_v34 }
  0x19   : > { %1285 = vmatprep.subr.bf16.mxu1 %v1284_v24  ;;  %v454_v41 = vld [vmem:[%s1479_s11 + $0x68] sm:$0xff]  ;;  %v1292_v42 = vpack.c.bf16 %v550_v37, %v548_v36  ;;  %v547_v43 = vld [vmem:[%s1492_s15 + $0x60] sm:$0xff]  ;;  %v549_v44 = vld [vmem:[%s1492_s15 + $0x70] sm:$0xff] }
  0x1a   : > { %v552_v45 = vld [vmem:[%s1492_s15 + $0x88] sm:$0xff]  ;;  %v554_v46 = vld [vmem:[%s1492_s15 + $0x98] sm:$0xff]  ;;  %v1275_v47 = vpack.c.bf16 %v454_v41, %v453_v39  ;;  %v455_v48 = vld [vmem:[%s1479_s11 + $0x70] sm:$0xff]  ;;  %v1294_v49 = vpack.c.bf16 %v549_v44, %v547_v43  ;;  %v1412_v39 = vmov 0   ;;  %v569_v44 = vlaneseq }
  0x1b   : > { %1264 = vmatpush3.bf16.msra.mxu0 %v1263_v10  ;;  %v456_v50 = vld [vmem:[%s1479_s11 + $0x78] sm:$0xff]  ;;  %v1296_v51 = vpack.c.bf16 %v554_v46, %v552_v45  ;;  %v551_v52 = vld [vmem:[%s1492_s15 + $0x80] sm:$0xff]  ;;  %v553_v53 = vld [vmem:[%s1492_s15 + $0x90] sm:$0xff]  ;;  %1380 = vset.pattern.permute.xlu0 %v1412_v39 }
  0x1c   : > { %1265 = vmatprep.subr.bf16.mxu0 %v1409_v0  ;;  %1287 = vmatpush1.bf16.msra.mxu1 %v1286_v31  ;;  %v1278_v54 = vpack.c.bf16 %v456_v50, %v455_v48  ;;  %v1298_v55 = vpack.c.bf16 %v553_v53, %v551_v52  ;;  %v1095_v56 = vld [vmem:[%s1479_s11 + $0x80] sm:$0xff]  ;;  %v1096_v57 = vld [vmem:[%s1479_s11 + $0x88] sm:$0xff]  ;;  %v1097_v60 = vld [vmem:[%s1479_s11 + $0x90] sm:$0xff]  ;;  %v1584_v45 = vshrl.u32 %v569_v44, 7 }
  0x1d   : > { %1289 = vmatprep.subr.bf16.mxu1 %v1288_v33  ;;  %v440_v58 = vld [vmem:[%s400_s19] sm:$0xff]  ;;  %v1313_v59 = vpack.c.bf16 %v1096_v57, %v1095_v56  ;;  %v1098_v61 = vld [vmem:[%s1479_s11 + $0x98] sm:$0xff]  ;;  %v1100_v2 = vld [vmem:[%s1479_s11 + $0xa8] sm:$0xff] }
  0x1e   : > { %v1316_v62 = vpack.c.bf16 %v1098_v61, %v1097_v60  ;;  %v1099_v63 = vld [vmem:[%s1479_s11 + $0xa0] sm:$0xff]  ;;  %v1101_v4 = vld [vmem:[%s1479_s11 + $0xb0] sm:$0xff]  ;;  %v1102_v5 = vld [vmem:[%s1479_s11 + $0xb8] sm:$0xff]  ;;  %v1587_v46 = vsub.s32 0, %v1584_v45 }
  0x1f   : > { %1267 = vmatpush3.bf16.msra.mxu0 %v1266_v15  ;;  %v1319_v3 = vpack.c.bf16 %v1100_v2, %v1099_v63  ;;  %v1322_v6 = vpack.c.bf16 %v1102_v5, %v1101_v4  ;;  %v1103_v7 = vld [vmem:[%s1479_s11 + $0xc0] sm:$0xff]  ;;  %v1104_v8 = vld [vmem:[%s1479_s11 + $0xc8] sm:$0xff]  ;;  %v1105_v10 = vld [vmem:[%s1479_s11 + $0xd0] sm:$0xff] }
  0x20   : > { %1268 = vmatprep.subr.bf16.mxu0 %v1409_v0  ;;  %1291 = vmatpush1.bf16.msra.mxu1 %v1290_v40  ;;  %v1325_v9 = vpack.c.bf16 %v1104_v8, %v1103_v7  ;;  %v1106_v11 = vld [vmem:[%s1479_s11 + $0xd8] sm:$0xff]  ;;  %v1107_v13 = vld [vmem:[%s1479_s11 + $0xe0] sm:$0xff]  ;;  %v1108_v14 = vld [vmem:[%s1479_s11 + $0xe8] sm:$0xff] }
  0x21   : > { %1293 = vmatprep.subr.bf16.mxu1 %v1292_v42  ;;  %v1328_v12 = vpack.c.bf16 %v1106_v11, %v1105_v10  ;;  %v1331_v15 = vpack.c.bf16 %v1108_v14, %v1107_v13  ;;  %v1109_v16 = vld [vmem:[%s1479_s11 + $0xf0] sm:$0xff]  ;;  %v1110_v17 = vld [vmem:[%s1479_s11 + $0xf8] sm:$0xff]  ;;  %v556_v19 = vld [vmem:[%s1492_s15 + $0xa8] sm:$0xff]  ;;  %s396_s11 = scalar_lea.vmem %s1652_s0, %s1533_s16 }
  0x22   : > { %v1334_v18 = vpack.c.bf16 %v1110_v17, %v1109_v16  ;;  %v558_v20 = vld [vmem:[%s1492_s15 + $0xb8] sm:$0xff]  ;;  %v555_v22 = vld [vmem:[%s1492_s15 + $0xa0] sm:$0xff]  ;;  %v557_v23 = vld [vmem:[%s1492_s15 + $0xb0] sm:$0xff] }
  0x23   : > { %1270 = vmatpush3.bf16.msra.mxu0 %v1269_v29  ;;  %v1300_v21 = vpack.c.bf16 %v558_v20, %v556_v19  ;;  %v1302_v24 = vpack.c.bf16 %v557_v23, %v555_v22  ;;  %v560_v25 = vld [vmem:[%s1492_s15 + $0xc8] sm:$0xff]  ;;  %v562_v26 = vld [vmem:[%s1492_s15 + $0xd8] sm:$0xff]  ;;  %v559_v27 = vld [vmem:[%s1492_s15 + $0xc0] sm:$0xff] }
  0x24   : > { %1271 = vmatprep.subr.bf16.mxu0 %v1409_v0  ;;  %1295 = vmatpush1.bf16.msra.mxu1 %v1294_v49  ;;  %v561_v28 = vld [vmem:[%s1492_s15 + $0xd0] sm:$0xff]  ;;  %v564_v29 = vld [vmem:[%s1492_s15 + $0xe8] sm:$0xff]  ;;  %v566_v30 = vld [vmem:[%s1492_s15 + $0xf8] sm:$0xff] }
  0x25   : > { %1297 = vmatprep.subr.bf16.mxu1 %v1296_v51  ;;  %v1306_v31 = vpack.c.bf16 %v561_v28, %v559_v27  ;;  %v1308_v32 = vpack.c.bf16 %v566_v30, %v564_v29  ;;  %v563_v33 = vld [vmem:[%s1492_s15 + $0xe0] sm:$0xff]  ;;  %v565_v34 = vld [vmem:[%s1492_s15 + $0xf0] sm:$0xff]  ;;  %v1114_v36 = vld [vmem:[%s1492_s15 + $0x108] sm:$0xff] }
  0x26   : > { %v1310_v35 = vpack.c.bf16 %v565_v34, %v563_v33  ;;  %v1116_v37 = vld [vmem:[%s1492_s15 + $0x118] sm:$0xff]  ;;  %v650_v40 = vld [vmem:[%s429_s22] sm:$0x1]  ;;  %v1146_v41 = vld [vmem:[%s429_s22 + $0x1] sm:$0x1] }
  0x27   : > { %1273 = vmatpush3.bf16.msra.mxu0 %v1272_v38  ;;  %v1336_v38 = vpack.c.bf16 %v1116_v37, %v1114_v36  ;;  %v651_v42 = vmul.f32 1.442695, %v650_v40  ;;  %v894_v43 = vmul.f32 1.442695, %v1146_v41  ;;  %v1093_v51 = vld [vmem:[%s1595_s25] ss:$0 sm:$0xff] }
  0x28   : > { %1274 = vmatprep.subr.bf16.mxu0 %v1409_v0  ;;  %1299 = vmatpush1.bf16.msra.mxu1 %v1298_v55  ;;  %v1113_v55 = vld [vmem:[%s1492_s15 + $0x100] sm:$0xff]  ;;  %v1115_v56 = vld [vmem:[%s1492_s15 + $0x110] sm:$0xff]  ;;  %v1118_v57 = vld [vmem:[%s1492_s15 + $0x128] sm:$0xff] }
  0x29   : > { %1301 = vmatprep.subr.bf16.mxu1 %v1300_v21  ;;  %1381 = vpow2.f32 %v651_v42  ;;  %v1117_v61 = vld [vmem:[%s1492_s15 + $0x120] sm:$0xff]  ;;  %v1122_v2 = vld [vmem:[%s1492_s15 + $0x148] sm:$0xff]  ;;  %v1123_v7 = vld [vmem:[%s1492_s15 + $0x150] sm:$0xff] }
  0x2a   : > { %1383 = vpow2.f32 %v894_v43  ;;  %v1126_v8 = vld [vmem:[%s1492_s15 + $0x168] sm:$0xff]  ;;  %v1127_v13 = vld [vmem:[%s1492_s15 + $0x170] sm:$0xff]  ;;  %v1129_v17 = vld [vmem:[%s1492_s15 + $0x180] sm:$0xff] }
  0x2b   : > { %1276 = vmatpush3.bf16.msra.mxu0 %v1275_v47  ;;  %v1130_v14 = vld [vmem:[%s1492_s15 + $0x188] sm:$0xff]  ;;  %v1136_v20 = vld [vmem:[%s1492_s15 + $0x1b8] sm:$0xff]  ;;  %v1133_v23 = vld [vmem:[%s1492_s15 + $0x1a0] sm:$0xff] }
  0x2c   : > { %1277 = vmatprep.subr.bf16.mxu0 %v1409_v0  ;;  %1303 = vmatpush1.bf16.msra.mxu1 %v1302_v24  ;;  %v1134_v19 = vld [vmem:[%s1492_s15 + $0x1a8] sm:$0xff]  ;;  %v1135_v24 = vld [vmem:[%s1492_s15 + $0x1b0] sm:$0xff]  ;;  %v1112_v27 = vld [vmem:[%s1595_s25 + $0x1] ss:$0 sm:$0xff] }
  0x2d   : > { %v1356_v22 = vpack.c.bf16 %v1136_v20, %v1134_v19  ;;  %v1137_v30 = vld [vmem:[%s1492_s15 + $0x1c0] sm:$0xff]  ;;  %v1142_v34 = vld [vmem:[%s1492_s15 + $0x1e8] sm:$0xff]  ;;  %v1143_v39 = vld [vmem:[%s1492_s15 + $0x1f0] sm:$0xff] }
  0x2e   : > { %v567_v42 = vld [vmem:[%s424_s9] sm:$0x3] }
  0x2f   : > { %1279 = vmatpush3.bf16.msra.mxu0 %v1278_v54  ;;  %v572_v43 = vrot.slane %v567_v42, %v1587_v46 }
  0x30   : > { %1312 = vmatprep.subr.bf16.mxu0 %v1409_v0 }
  0x32   : > { %1219 = vmatmul.mubr.f32.vlgmr.msra.gmra.mrb[0].mxu0 %v440_v58 }
  0x33   : > { %1314 = vmatpush3.bf16.msra.mxu0 %v1313_v59  ;;  %1253 = vmatprep.mubr.msk.f32.mxu0 %vm1410_vm0, %v1411_v1  ;;  %v1382_v47 = vpop.eup %1381  ;;  %v1338_v59 = vpack.c.bf16 %v1115_v56, %v1113_v55 }
  0x34   : > { %1315 = vmatprep.subr.bf16.mxu0 %v1409_v0  ;;  %v1384_v48 = vpop.eup %1383  ;;  %v657_v49 = vrot.slane %v1382_v47, %v1587_v46  ;;  %v575_v47 = vsub.s32 1, %v1584_v45 }
  0x35   : > { %v900_v50 = vrot.slane %v1384_v48, %v1587_v46 }
  0x36   : > { %659 = vperm.xlu0 %1380, %v657_v49  }
  0x37   : > { %1317 = vmatpush3.bf16.msra.mxu0 %v1316_v62  ;;  %v1119_v62 = vld [vmem:[%s1492_s15 + $0x130] sm:$0xff] }
  0x38   : > { %1318 = vmatprep.subr.bf16.mxu0 %v1409_v0  ;;  %v1342_v4 = vpack.c.bf16 %v1119_v62, %v1117_v61 }
  0x3a   : > { %902 = vperm.xlu0 %1380, %v900_v50  }
  0x3b   : > { %1320 = vmatpush3.bf16.msra.mxu0 %v1319_v3  ;;  %v1124_v3 = vld [vmem:[%s1492_s15 + $0x158] sm:$0xff] }
  0x3c   : > { %1321 = vmatprep.subr.bf16.mxu0 %v1409_v0  ;;  %v1344_v5 = vpack.c.bf16 %v1124_v3, %v1122_v2  ;;  %v1145_v3 = vld [vmem:[%s424_s9 + $0x2] sm:$0x3] }
  0x3f   : > { %1323 = vmatpush3.bf16.msra.mxu0 %v1322_v6  ;;  %v1121_v6 = vld [vmem:[%s1492_s15 + $0x140] sm:$0xff] }
  0x40   : > { %1324 = vmatprep.subr.bf16.mxu0 %v1409_v0  ;;  %v1346_v10 = vpack.c.bf16 %v1123_v7, %v1121_v6 }
  0x43   : > { %1326 = vmatpush3.bf16.msra.mxu0 %v1325_v9  ;;  %v1128_v9 = vld [vmem:[%s1492_s15 + $0x178] sm:$0xff] }
  0x44   : > { %1327 = vmatprep.subr.bf16.mxu0 %v1409_v0  ;;  %v1348_v11 = vpack.c.bf16 %v1128_v9, %v1126_v8 }
  0x47   : > { %1329 = vmatpush3.bf16.msra.mxu0 %v1328_v12  ;;  %v1125_v12 = vld [vmem:[%s1492_s15 + $0x160] sm:$0xff] }
  0x48   : > { %1330 = vmatprep.subr.bf16.mxu0 %v1409_v0 }
  0x4b   : > { %1332 = vmatpush3.bf16.msra.mxu0 %v1331_v15  ;;  %v1350_v15 = vpack.c.bf16 %v1127_v13, %v1125_v12 }
  0x4c   : > { %1333 = vmatprep.subr.bf16.mxu0 %v1409_v0  ;;  %v1304_v0 = vpack.c.bf16 %v562_v26, %v560_v25  ;;  %v1138_v25 = vld [vmem:[%s1492_s15 + $0x1c8] sm:$0xff]  ;;  %v1140_v26 = vld [vmem:[%s1492_s15 + $0x1d8] sm:$0xff] }
  0x4d   : > { %v1360_v29 = vpack.c.bf16 %v1140_v26, %v1138_v25 }
  0x4e   : > { %1305 = vmatprep.subr.bf16.mxu1 %v1304_v0  ;;  %v1358_v0 = vpack.c.bf16 %v1135_v24, %v1133_v23 }
  0x4f   : > { %1335 = vmatpush3.bf16.msra.mxu0 %v1334_v18  ;;  %1307 = vmatpush1.bf16.msra.mxu1 %v1306_v31  ;;  %v1131_v18 = vld [vmem:[%s1492_s15 + $0x190] sm:$0xff] }
  0x50   : > { %1309 = vmatprep.subr.bf16.mxu1 %v1308_v32  ;;  %v1354_v21 = vpack.c.bf16 %v1131_v18, %v1129_v17  ;;  %v1139_v31 = vld [vmem:[%s1492_s15 + $0x1d0] sm:$0xff] }
  0x51   : > { %v1362_v36 = vpack.c.bf16 %v1139_v31, %v1137_v30 }
  0x52   : > { %1254 = vmatmul.mubr.f32.vlgmr.msra.gmra.mrb[2].mxu0 %v440_v58  ;;  %v1120_v58 = vld [vmem:[%s1492_s15 + $0x138] sm:$0xff] }
  0x53   : > { %1311 = vmatpush1.bf16.msra.mxu1 %v1310_v35  ;;  %v1340_v60 = vpack.c.bf16 %v1120_v58, %v1118_v57  ;;  %v1144_v35 = vld [vmem:[%s1492_s15 + $0x1f8] sm:$0xff] }
  0x54   : > { %1337 = vmatprep.subr.bf16.mxu1 %v1336_v38  ;;  %v1364_v37 = vpack.c.bf16 %v1144_v35, %v1142_v34  ;;  %v1141_v38 = vld [vmem:[%s1492_s15 + $0x1e0] sm:$0xff] }
  0x55   : > { %v1366_v40 = vpack.c.bf16 %v1143_v39, %v1141_v38 }
  0xb5   : > { %v660_v48 = vpop.permute.xlu0 %659 }
  0xb9   : > { %v903_v9 = vpop.permute.xlu0 %902 }
 0x105   : > { %v530_v52 = vpop.f32.mrb[0].mxu0 }
 0x106   : > { %v531_v53 = vadd.f32 %v1093_v51, %v530_v52  ;;  %v1220_v54 = vpop.f32.mrb[1].mxu0  ;;  %v576_v52 = vrot.slane %v567_v42, %v575_v47 }
 0x108   : > { %1385 = vtanh.f32 %v531_v53 }
 0x112   : > { %v1386_v63 = vpop.eup %1385 }
 0x113   : > { %644 = vmatmul.mubr.f32.vlgmr.msra.gmra.mrb[0].mxu1 %v1386_v63 }
 0x114   : > { %1339 = vmatpush1.bf16.msra.mxu1 %v1338_v59  ;;  %885 = vmatprep.mubr.f32.mxu1 %v1411_v1  ;;  %v1132_v1 = vld [vmem:[%s1492_s15 + $0x198] sm:$0xff] }
 0x115   : > { %1341 = vmatprep.subr.bf16.mxu1 %v1340_v60  ;;  %v1352_v16 = vpack.c.bf16 %v1132_v1, %v1130_v14  ;;  %v439_v60 = vld [vmem:[%s396_s11] sm:$0xff] }
 0x118   : > { %1343 = vmatpush1.bf16.msra.mxu1 %v1342_v4  ;;  %v814_v4 = vrot.slane %v1145_v3, %v1587_v46 }
 0x119   : > { %1345 = vmatprep.subr.bf16.mxu1 %v1344_v5  ;;  %v818_v5 = vrot.slane %v1145_v3, %v575_v47 }
 0x11c   : > { %1347 = vmatpush1.bf16.msra.mxu1 %v1346_v10 }
 0x11d   : > { %1349 = vmatprep.subr.bf16.mxu1 %v1348_v11 }
 0x120   : > { %1351 = vmatpush1.bf16.msra.mxu1 %v1350_v15 }
 0x121   : > { %1353 = vmatprep.subr.bf16.mxu1 %v1352_v16 }
 0x124   : > { %1355 = vmatpush1.bf16.msra.mxu1 %v1354_v21 }
 0x125   : > { %v770_v28 = vpop.f32.mrb[2].mxu0  ;;  %1357 = vmatprep.subr.bf16.mxu1 %v1356_v22 }
 0x126   : > { %v771_v32 = vadd.f32 %v1112_v27, %v770_v28  ;;  %v1255_v33 = vpop.f32.mrb[3].mxu0 }
 0x128   : > { %1387 = vtanh.f32 %v771_v32  ;;  %1359 = vmatpush1.bf16.msra.mxu1 %v1358_v0 }
 0x129   : > { %1361 = vmatprep.subr.bf16.mxu1 %v1360_v29 }
 0x12c   : > { %1363 = vmatpush1.bf16.msra.mxu1 %v1362_v36 }
 0x12d   : > { %1365 = vmatprep.subr.bf16.mxu1 %v1364_v37 }
 0x130   : > { %1367 = vmatpush1.bf16.msra.mxu1 %v1366_v40 }
 0x132   : > { %v1388_v41 = vpop.eup %1387 }
 0x133   : > { %886 = vmatmul.mubr.f32.vlgmr.msra.gmra.mrb[2].mxu1 %v1388_v41 }
 0x1e6   : > { %v645_v44 = vpop.f32.mrb[0].mxu1 }
 0x1e7   : > { %v646_v49 = vadd.f32 %v645_v44, %v572_v43  ;;  %v647_v50 = vpop.f32.mrb[1].mxu1 }
 0x1e8   : > { %v648_v56 = vadd.f32 %v647_v50, %v576_v52 }
 0x1e9   : > { %v662_v51 = vmul.f32 %v660_v48, %v646_v49 }
 0x1ea   : > { %v663_v59 = vmul.f32 %v660_v48, %v648_v56 }
 0x1eb   : > { %v665_v53 = vmul.f32 1.442695, %v662_v51  ;;  %v1094_v54 = vadd.f32 46.0517, %v662_v51  ;;  %v668_v14 = vmax.f32 %v662_v51, -46.0517 }
 0x1ec   : > { %v664_v45 = vadd.f32 %v663_v59, %v439_v60 }
 0x1ed   : > { %1389 = vpow2.f32 %v665_v53  ;;  %v671_v55 = vand.u32 2147483647, %v1094_v54 }
 0x1ef   : > { %v672_v57 = vsub.f32 0.0, %v671_v55 }
 0x1f1   : > { %v673_v58 = vmul.f32 1.442695, %v672_v57 }
 0x1f3   : > { %1391 = vpow2.f32 %v673_v58 }
 0x1f7   : > { %v1390_v61 = vpop.eup %1389 }
 0x1f8   : > { %v667_v62 = vmul.f32 %v1390_v61, %v664_v45 }
 0x1fd   : > { %v1392_v63 = vpop.eup %1391 }
 0x1fe   : > { %v675_v2 = vadd.f32 1.0, %v1392_v63 }
 0x200   : > { %1393 = vlog2.f32 %v675_v2 }
 0x206   : > { %v887_v6 = vpop.f32.mrb[2].mxu1 }
 0x207   : > { %v888_v7 = vadd.f32 %v887_v6, %v814_v4  ;;  %v889_v8 = vpop.f32.mrb[3].mxu1 }
 0x208   : > { %v890_v10 = vadd.f32 %v889_v8, %v818_v5 }
 0x209   : > { %v905_v11 = vmul.f32 %v903_v9, %v888_v7 }
 0x20a   : > { %v1394_v12 = vpop.eup %1393  ;;  %v906_v13 = vmul.f32 %v903_v9, %v890_v10 }
 0x20b   : > { %v677_v1 = vmul.f32 0.6931472, %v1394_v12  ;;  %v908_v15 = vmul.f32 1.442695, %v905_v11  ;;  %v1147_v16 = vadd.f32 46.0517, %v905_v11 }
 0x20c   : > { %v907_v17 = vadd.f32 %v906_v13, %v667_v62  ;;  %v911_v19 = vmax.f32 %v905_v11, -46.0517 }
 0x20d   : > { %v678_v18 = vadd.f32 %v677_v1, %v668_v14  ;;  %1395 = vpow2.f32 %v908_v15  ;;  %v914_v46 = vand.u32 2147483647, %v1147_v16 }
 0x20f   : > { %v912_v20 = vadd.f32 %v911_v19, %v678_v18  ;;  %v915_v21 = vsub.f32 0.0, %v914_v46 }
 0x211   : > { %v916_v22 = vmul.f32 1.442695, %v915_v21 }
 0x213   : > { %1397 = vpow2.f32 %v916_v22 }
 0x217   : > { %v1396_v23 = vpop.eup %1395 }
 0x218   : > { %v910_v24 = vmul.f32 %v1396_v23, %v907_v17 }
 0x21a   : > { %922 = vst [vmem:[%s434_s14] sm:$0xff] %v910_v24 }
 0x21d   : > { %v1398_v25 = vpop.eup %1397 }
 0x21e   : > { %v918_v26 = vadd.f32 1.0, %v1398_v25 }
 0x220   : > { %1399 = vlog2.f32 %v918_v26 }
 0x22a   : > { %v1400_v27 = vpop.eup %1399 }
 0x22b   : > { %v920_v0 = vmul.f32 0.6931472, %v1400_v27 }
 0x22d   : > { %v921_v28 = vadd.f32 %v920_v0, %v912_v20 }
 0x22f   : > { %923 = vst [vmem:[%s438_s18] sm:$0xff] %v921_v28 }
 0x230 PF: > { %s19_s27 = sadd.s32 1, %s1407_s27  }
 0x231   : > { %p16_p5 = scmp.ge.s32.totalorder %s19_s27, 6  }
 0x233   :  { %18 = sbr.rel (!%p16_p5) target bundleno = 1 (0x1), region = 113 }

// kernel: _lambda_.7
= control target key start
LH: loop header
LB: loop body
LE: loop exit
PB: predicated region body
PF: predicated region fallthrough
CT: control target
= control target key end

     0   :  { %s849_s18 = smov 0   ;;  %s928_s0 = inlined_call_operand.vmem [shape: f32[2,16,128], index: 0, kind: input, shape index: {}]   ;;  %s929_s1 = inlined_call_operand.vmem [shape: f32[2,128,128], index: 1, kind: input, shape index: {}]   ;;  %s930_s2 = inlined_call_operand.vmem [shape: f32[2,1,128], index: 2, kind: input, shape index: {}]   ;;  %s931_s3 = inlined_call_operand.vmem [shape: f32[2,128,128], index: 3, kind: input, shape index: {}]   ;;  %s932_s4 = inlined_call_operand.vmem [shape: f32[2,1,128], index: 4, kind: input, shape index: {}]   ;;  %s933_s5 = inlined_call_operand.vmem [shape: f32[2,16,128], index: 5, kind: output, shape index: {}]  }
   0x1 LB: > { %s604_s19 = sadd.s32 4294967295, %s817_s18   ;;  %p608_p0 = scmp.ge.s32.totalorder %s817_s18, 1  ;;  %s817_s18 = sphi %s849_s18, %s15_s18  }
   0x2   : > { %p223_p1 = scmp.lt.s32.totalorder %s817_s18, 3 }
   0x4   : > { %p224_p2 = pnand %p608_p0, %p223_p1 }
   0x5   : > { %p267_p3 = scmp.lt.s32.totalorder (!%p224_p2), %s604_s19, 1 }
   0x6   : > { %227 = sbr.rel (%p224_p2) target bundleno = 513 (0x201), region = 40 }
   0xd   : > { %s935_s19 = smov (!%p267_p3, %s604_s19), 1 }
   0xe   : > { %s622_s20 = sshll.u32 %s935_s19, 7  ;;  %s621_s24 = sshll.u32 %s935_s19, 4 }
   0xf   : > { %s863_s23 = scalar_lea.vmem %s929_s1, %s622_s20  ;;  %s877_s27 = scalar_lea.vmem %s928_s0, %s621_s24 }
  0x10   : > { %v295_v0 = vld [vmem:[%s863_s23] sm:$0xff]  ;;  %v296_v1 = vld [vmem:[%s863_s23 + $0x8] sm:$0xff]  ;;  %v297_v2 = vld [vmem:[%s863_s23 + $0x10] sm:$0xff]  ;;  %s882_s30 = scalar_lea.vmem %s931_s3, %s622_s20  ;;  %s279_s8 = scalar_lea.vmem %s930_s2, %s935_s19 }
  0x11   : > { %v731_v3 = vpack.c.bf16 %v296_v1, %v295_v0  ;;  %v298_v4 = vld [vmem:[%s863_s23 + $0x18] sm:$0xff]  ;;  %v299_v6 = vld [vmem:[%s863_s23 + $0x20] sm:$0xff]  ;;  %v300_v7 = vld [vmem:[%s863_s23 + $0x28] sm:$0xff]  ;;  %s287_s11 = scalar_lea.vmem %s932_s4, %s935_s19  ;;  %s292_s14 = scalar_lea.vmem %s933_s5, %s621_s24 }
  0x12   : > { %v735_v5 = vpack.c.bf16 %v298_v4, %v297_v2  ;;  %v739_v8 = vpack.c.bf16 %v300_v7, %v299_v6  ;;  %v301_v9 = vld [vmem:[%s863_s23 + $0x30] sm:$0xff]  ;;  %v302_v10 = vld [vmem:[%s863_s23 + $0x38] sm:$0xff]  ;;  %v293_v11 = vld [vmem:[%s877_s27] sm:$0xff] }
  0x13   : > { %732 = vmatprep.subr.bf16.mxu0 %v731_v3  ;;  %693 = vmatprep.mubr.f32.mxu0 %v293_v11  ;;  %v395_v12 = vld [vmem:[%s882_s30] sm:$0xff]  ;;  %v396_v13 = vld [vmem:[%s882_s30 + $0x8] sm:$0xff]  ;;  %v397_v14 = vld [vmem:[%s882_s30 + $0x10] sm:$0xff]  ;;  %v743_v20 = vpack.c.bf16 %v302_v10, %v301_v9 }
  0x14   : > { %734 = vmatpush3.bf16.msra.mxu0 %v731_v3  ;;  %v763_v15 = vpack.c.bf16 %v396_v13, %v395_v12  ;;  %v398_v16 = vld [vmem:[%s882_s30 + $0x18] sm:$0xff]  ;;  %v399_v18 = vld [vmem:[%s882_s30 + $0x20] sm:$0xff]  ;;  %v400_v19 = vld [vmem:[%s882_s30 + $0x28] sm:$0xff] }
  0x15   : > { %736 = vmatprep.subr.bf16.mxu0 %v735_v5  ;;  %v767_v17 = vpack.c.bf16 %v398_v16, %v397_v14  ;;  %v303_v21 = vld [vmem:[%s863_s23 + $0x40] sm:$0xff]  ;;  %v304_v22 = vld [vmem:[%s863_s23 + $0x48] sm:$0xff]  ;;  %v771_v23 = vpack.c.bf16 %v400_v19, %v399_v18  ;;  %v401_v24 = vld [vmem:[%s882_s30 + $0x30] sm:$0xff] }
  0x16   : > { %764 = vmatprep.subr.bf16.mxu1 %v763_v15  ;;  %v402_v25 = vld [vmem:[%s882_s30 + $0x38] sm:$0xff]  ;;  %v747_v26 = vpack.c.bf16 %v304_v22, %v303_v21  ;;  %v305_v27 = vld [vmem:[%s863_s23 + $0x50] sm:$0xff]  ;;  %v403_v30 = vld [vmem:[%s882_s30 + $0x40] sm:$0xff] }
  0x17   : > { %766 = vmatpush3.bf16.msra.mxu1 %v763_v15  ;;  %v306_v28 = vld [vmem:[%s863_s23 + $0x58] sm:$0xff]  ;;  %v775_v29 = vpack.c.bf16 %v402_v25, %v401_v24  ;;  %v404_v31 = vld [vmem:[%s882_s30 + $0x48] sm:$0xff]  ;;  %v307_v33 = vld [vmem:[%s863_s23 + $0x60] sm:$0xff] }
  0x18   : > { %738 = vmatpush3.bf16.msra.mxu0 %v735_v5  ;;  %768 = vmatprep.subr.bf16.mxu1 %v767_v17  ;;  %v751_v32 = vpack.c.bf16 %v306_v28, %v305_v27  ;;  %v308_v34 = vld [vmem:[%s863_s23 + $0x68] sm:$0xff]  ;;  %v779_v35 = vpack.c.bf16 %v404_v31, %v403_v30  ;;  %v405_v36 = vld [vmem:[%s882_s30 + $0x50] sm:$0xff]  ;;  %v406_v37 = vld [vmem:[%s882_s30 + $0x58] sm:$0xff] }
  0x19   : > { %740 = vmatprep.subr.bf16.mxu0 %v739_v8  ;;  %v755_v38 = vpack.c.bf16 %v308_v34, %v307_v33  ;;  %v309_v39 = vld [vmem:[%s863_s23 + $0x70] sm:$0xff]  ;;  %v310_v40 = vld [vmem:[%s863_s23 + $0x78] sm:$0xff]  ;;  %v783_v41 = vpack.c.bf16 %v406_v37, %v405_v36  ;;  %v407_v42 = vld [vmem:[%s882_s30 + $0x60] sm:$0xff] }
  0x1a   : > { %v408_v43 = vld [vmem:[%s882_s30 + $0x68] sm:$0xff]  ;;  %v759_v44 = vpack.c.bf16 %v310_v40, %v309_v39  ;;  %v409_v47 = vld [vmem:[%s882_s30 + $0x70] sm:$0xff]  ;;  %v410_v48 = vld [vmem:[%s882_s30 + $0x78] sm:$0xff] }
  0x1b   : > { %770 = vmatpush3.bf16.msra.mxu1 %v767_v17  ;;  %v787_v45 = vpack.c.bf16 %v408_v43, %v407_v42  ;;  %v294_v46 = vld [vmem:[%s877_s27 + $0x8] sm:$0xff]  ;;  %v791_v49 = vpack.c.bf16 %v410_v48, %v409_v47  ;;  %v617_v50 = vld [vmem:[%s279_s8] ss:$0 sm:$0xff] }
  0x1c   : > { %742 = vmatpush3.bf16.msra.mxu0 %v739_v8  ;;  %772 = vmatprep.subr.bf16.mxu1 %v771_v23  ;;  %v618_v57 = vld [vmem:[%s287_s11] ss:$0 sm:$0xff] }
  0x1d   : > { %744 = vmatprep.subr.bf16.mxu0 %v743_v20 }
  0x1f   : > { %774 = vmatpush3.bf16.msra.mxu1 %v771_v23 }
  0x20   : > { %746 = vmatpush3.bf16.msra.mxu0 %v743_v20  ;;  %776 = vmatprep.subr.bf16.mxu1 %v775_v29 }
  0x21   : > { %748 = vmatprep.subr.bf16.mxu0 %v747_v26 }
  0x23   : > { %778 = vmatpush3.bf16.msra.mxu1 %v775_v29 }
  0x24   : > { %750 = vmatpush3.bf16.msra.mxu0 %v747_v26  ;;  %780 = vmatprep.subr.bf16.mxu1 %v779_v35 }
  0x25   : > { %752 = vmatprep.subr.bf16.mxu0 %v751_v32 }
  0x27   : > { %782 = vmatpush3.bf16.msra.mxu1 %v779_v35 }
  0x28   : > { %754 = vmatpush3.bf16.msra.mxu0 %v751_v32  ;;  %784 = vmatprep.subr.bf16.mxu1 %v783_v41 }
  0x29   : > { %756 = vmatprep.subr.bf16.mxu0 %v755_v38 }
  0x2b   : > { %786 = vmatpush3.bf16.msra.mxu1 %v783_v41 }
  0x2c   : > { %758 = vmatpush3.bf16.msra.mxu0 %v755_v38  ;;  %788 = vmatprep.subr.bf16.mxu1 %v787_v45 }
  0x2d   : > { %760 = vmatprep.subr.bf16.mxu0 %v759_v44 }
  0x2f   : > { %790 = vmatpush3.bf16.msra.mxu1 %v787_v45 }
  0x30   : > { %762 = vmatpush3.bf16.msra.mxu0 %v759_v44  ;;  %792 = vmatprep.subr.bf16.mxu1 %v791_v49 }
  0x33   : > { %694 = vmatmul.mubr.f32.vlgmr.msra.gmra.mrb[0].mxu0 %v294_v46  ;;  %794 = vmatpush3.bf16.msra.mxu1 %v791_v49 }
 0x106   : > { %v695_v51 = vpop.f32.mrb[0].mxu0 }
 0x107   : > { %v390_v52 = vadd.f32 %v695_v51, %v617_v50  ;;  %v384_v53 = vpop.f32.mrb[1].mxu0 }
 0x108   : > { %v385_v54 = vadd.f32 %v617_v50, %v384_v53 }
 0x109   : > { %v394_v56 = vmax.f32 %v390_v52, 0.0 }
 0x10a   : > { %v393_v55 = vmax.f32 %v385_v54, 0.0 }
 0x10c   : > { %728 = vmatprep.mubr.f32.mxu1 %v393_v55 }
 0x10d   : > { %729 = vmatmul.mubr.f32.vlgmr.msra.gmra.mrb[0].mxu1 %v394_v56 }
 0x1e0   : > { %v730_v58 = vpop.f32.mrb[0].mxu1 }
 0x1e1   : > { %v490_v59 = vadd.f32 %v730_v58, %v618_v57  ;;  %v484_v60 = vpop.f32.mrb[1].mxu1 }
 0x1e2   : > { %v485_v61 = vadd.f32 %v618_v57, %v484_v60 }
 0x1e3   : > { %v494_v62 = vsub.f32 0.0, %v490_v59 }
 0x1e4   : > { %v493_v63 = vsub.f32 0.0, %v485_v61 }
 0x1e5   : > { %v497_v0 = vmul.f32 1.442695, %v494_v62 }
 0x1e6   : > { %v495_v1 = vmul.f32 1.442695, %v493_v63 }
 0x1e7   : > { %803 = vpow2.f32 %v497_v0 }
 0x1e8   : > { %805 = vpow2.f32 %v495_v1 }
 0x1f1   : > { %v804_v2 = vpop.eup %803 }
 0x1f2   : > { %v806_v3 = vpop.eup %805  ;;  %v500_v4 = vadd.f32 1.0, %v804_v2 }
 0x1f3   : > { %v499_v5 = vadd.f32 1.0, %v806_v3 }
 0x1f4   : > { %807 = vrcp.f32 %v500_v4 }
 0x1f5   : > { %809 = vrcp.f32 %v499_v5 }
 0x1fe   : > { %v808_v6 = vpop.eup %807 }
 0x1ff   : > { %v810_v7 = vpop.eup %809  ;;  %506 = vst [vmem:[%s292_s14 + $0x8] sm:$0xff] %v808_v6 }
 0x200   : > { %505 = vst [vmem:[%s292_s14] sm:$0xff] %v810_v7 }
 0x201 PF: > { %s15_s18 = sadd.s32 1, %s817_s18  }
 0x202   : > { %p12_p4 = scmp.ge.s32.totalorder %s15_s18, 4  }
 0x204   :  { %14 = sbr.rel (!%p12_p4) target bundleno = 1 (0x1), region = 82 }

// kernel: _lambda_.4
= control target key start
LH: loop header
LB: loop body
LE: loop exit
PB: predicated region body
PF: predicated region fallthrough
CT: control target
= control target key end

     0   :  { %s8061_s25 = smov 0   ;;  %s8063_s26 = smov 0   ;;  %s11336_s0 = inlined_call_operand.vmem [shape: f32[32,128], index: 0, kind: input, shape index: {}]   ;;  %s11337_s1 = inlined_call_operand.vmem [shape: f32[32,128], index: 1, kind: input, shape index: {}]   ;;  %s11338_s2 = inlined_call_operand.vmem [shape: f32[32,128], index: 2, kind: input, shape index: {}]   ;;  %s11339_s3 = inlined_call_operand.vmem [shape: f32[1,128], index: 3, kind: input, shape index: {}]   ;;  %s11340_s4 = inlined_call_operand.vmem [shape: f32[2,128,128], index: 4, kind: input, shape index: {}]   ;;  %s11341_s5 = inlined_call_operand.vmem [shape: f32[2,1,128], index: 5, kind: input, shape index: {}]   ;;  %s11342_s6 = inlined_call_operand.vmem [shape: f32[2,128,128], index: 6, kind: input, shape index: {}]   ;;  %s11343_s7 = inlined_call_operand.vmem [shape: f32[2,1,128], index: 7, kind: input, shape index: {}]   ;;  %s11344_s8 = inlined_call_operand.vmem [shape: f32[2,128,128], index: 8, kind: input, shape index: {}]   ;;  %s11345_s9 = inlined_call_operand.vmem [shape: f32[2,128,128], index: 9, kind: input, shape index: {}]   ;;  %s11346_s10 = inlined_call_operand.vmem [shape: f32[2,1,128], index: 10, kind: input, shape index: {}]   ;;  %s11347_s11 = inlined_call_operand.vmem [shape: f32[2,128,128], index: 11, kind: input, shape index: {}]   ;;  %s11348_s12 = inlined_call_operand.vmem [shape: f32[2,1,128], index: 12, kind: input, shape index: {}]   ;;  %s11349_s13 = inlined_call_operand.vmem [shape: f32[32,128], index: 13, kind: output, shape index: {}]  }
   0x1   :  { %11400 = sst [smem:[#allocation113_spill]] %s11340_s4  ;;  %s8065_s27 = smov 0  }
   0x2   :  { %11401 = sst [smem:[#allocation114_spill]] %s11341_s5 }
   0x3   :  { %11402 = sst [smem:[#allocation115_spill]] %s11342_s6 }
   0x4   :  { %11403 = sst [smem:[#allocation116_spill]] %s11343_s7 }
   0x5   :  { %11404 = sst [smem:[#allocation117_spill]] %s11344_s8 }
   0x6 LB: > { %11405 = sst [smem:[#allocation4_spill]] %s7985_s26  ;;  %s35_s28 = sadd.s32 1, %s7985_s26  ;;  %s7989_s27 = sphi %s8065_s27, %s23_s27   ;;  %s7985_s26 = sphi %s8063_s26, %s11897_s26   ;;  %s7981_s25 = sphi %s8061_s25, %s11896_s25  }
   0x7   : > { %p6268_p0 = scmp.ge.s32.totalorder %s7989_s27, 1  ;;  %p37_p1 = scmp.ge.s32.totalorder %s35_s28, 2 }
   0x8   : > { %p493_p2 = scmp.lt.s32.totalorder %s7989_s27, 3 }
   0x9   : > { %s11899_s28 = smov (%p37_p1, %s35_s28), 0 }
   0xa   : > { %11406 = sst [smem:[#allocation5_spill]] %s11899_s28  ;;  %p494_p3 = pnand %p6268_p0, %p493_p2 }
   0xc   : > { %497 = sbr.rel (%p494_p3) target bundleno = 1527 (0x5f7), region = 72 }
  0x13   : > { %p591_p4 = scmp.lt.s32.totalorder %s7981_s25, 1  ;;  %p635_p5 = scmp.eq.s32.totalorder %s7981_s25, 0 }
  0x14   : > { %s11407_s5 = sld [smem:[#allocation114_spill]]  ;;  %s11408_s4 = sld [smem:[#allocation113_spill]]  ;;  %v641_v0 = vld [vmem:[%s11336_s0] sm:$0xff] (%p635_p5)  ;;  %v642_v1 = vld [vmem:[%s11336_s0 + $0x8] sm:$0xff] (%p635_p5)  ;;  %v643_v2 = vld [vmem:[%s11336_s0 + $0x10] sm:$0xff] (%p635_p5) }
  0x15   : > { %s11901_s25 = smov (!%p591_p4, %s7981_s25), 1  ;;  %s11409_s6 = sld [smem:[#allocation115_spill]]  ;;  %645 = vst [vmem:[#allocation2] sm:$0xff] (%p635_p5), %v641_v0  ;;  %646 = vst [vmem:[#allocation2 + $0x8] sm:$0xff] (%p635_p5), %v642_v1  ;;  %v644_v3 = vld [vmem:[%s11336_s0 + $0x18] sm:$0xff] (%p635_p5) }
  0x16   : > { %s6421_s29 = sshll.u32 %s11901_s25, 7  ;;  %s11410_s7 = sld [smem:[#allocation116_spill]]  ;;  %647 = vst [vmem:[#allocation2 + $0x10] sm:$0xff] (%p635_p5), %v643_v2  ;;  %648 = vst [vmem:[#allocation2 + $0x18] sm:$0xff] (%p635_p5), %v644_v3 }
  0x17   : > { %s11411_s8 = sld [smem:[#allocation117_spill]]  ;;  %s8112_s16 = scalar_lea.vmem %s11345_s9, %s6421_s29 }
  0x18   : > { %s619_s19 = scalar_lea.vmem %s11346_s10, %s11901_s25  ;;  %s8121_s22 = scalar_lea.vmem %s11347_s11, %s6421_s29 }
  0x19   : > { %s627_s26 = scalar_lea.vmem %s11348_s12, %s11901_s25  ;;  %640 = sbr.rel (!%p635_p5) target bundleno = 32 (0x20), region = 76 }
  0x1a   : > { %s8086_s15 = scalar_lea.vmem %s11407_s5, %s11901_s25  ;;  %s8091_s18 = scalar_lea.vmem %s11408_s4, %s6421_s29 }
  0x1b   : > { %s8096_s21 = scalar_lea.vmem %s11409_s6, %s6421_s29 }
  0x1c   : > { %s8102_s24 = scalar_lea.vmem %s11410_s7, %s11901_s25 }
  0x1d   : > { %s8107_s30 = scalar_lea.vmem %s11411_s8, %s6421_s29 }
  0x20 PF: > { %v769_v4 = vlaneseq  ;;  %v2088_v5 = vld [vmem:[%s8091_s18] sm:$0xff]  ;;  %v2089_v6 = vld [vmem:[%s8091_s18 + $0x8] sm:$0xff]  ;;  %v2090_v7 = vld [vmem:[%s8091_s18 + $0x10] sm:$0xff]  ;;  %vm5795_vm0 = vcmask 1041409   ;;  %vm5797_vm1 = vcmask 1042434   ;;  %vm5799_vm2 = vcmask 1043459  }
  0x21   : > { %v2091_v8 = vld [vmem:[%s8091_s18 + $0x18] sm:$0xff]  ;;  %v2104_v10 = vpack.c.bf16 %v2089_v6, %v2088_v5  ;;  %v8148_v12 = vld [vmem:[%s11337_s1] sm:$0xff]  ;;  %v2093_v14 = vld [vmem:[%s8091_s18 + $0x28] sm:$0xff]  ;;  %vm5801_vm3 = vcmask 1044484   ;;  %vm5803_vm4 = vcmask 1045509   ;;  %vm5805_vm5 = vcmask 1046534  }
  0x22   : > { %v8143_v9 = vshrl.u32 %v769_v4, 7  ;;  %v2105_v11 = vpack.c.bf16 %v2091_v8, %v2090_v7  ;;  %v2092_v13 = vld [vmem:[%s8091_s18 + $0x20] sm:$0xff]  ;;  %v2094_v18 = vld [vmem:[%s8091_s18 + $0x30] sm:$0xff]  ;;  %v2095_v19 = vld [vmem:[%s8091_s18 + $0x38] sm:$0xff]  ;;  %vm5807_vm6 = vcmask 1047559  }
  0x23   : > { %6669 = vmatprep.subr.bf16.mxu1 %v2104_v10  ;;  %v2106_v17 = vpack.c.bf16 %v2093_v14, %v2092_v13  ;;  %v2107_v21 = vpack.c.bf16 %v2095_v19, %v2094_v18  ;;  %v2096_v22 = vld [vmem:[%s8091_s18 + $0x40] sm:$0xff]  ;;  %v2097_v23 = vld [vmem:[%s8091_s18 + $0x48] sm:$0xff]  ;;  %v2098_v26 = vld [vmem:[%s8091_s18 + $0x50] sm:$0xff] }
  0x24   : > { %v8153_v15 = vsub.s32 0, %v8143_v9  ;;  %6670 = vmatpush3.bf16.msra.mxu1 %v2104_v10  ;;  %v8160_v20 = vsub.s32 1, %v8143_v9  ;;  %v2108_v25 = vpack.c.bf16 %v2097_v23, %v2096_v22  ;;  %v2099_v27 = vld [vmem:[%s8091_s18 + $0x58] sm:$0xff]  ;;  %v8169_v28 = vsub.s32 2, %v8143_v9  ;;  %v2100_v30 = vld [vmem:[%s8091_s18 + $0x60] sm:$0xff]  ;;  %v2101_v31 = vld [vmem:[%s8091_s18 + $0x68] sm:$0xff] }
  0x25   : > { %6671 = vmatprep.subr.bf16.mxu1 %v2105_v11  ;;  %v2109_v29 = vpack.c.bf16 %v2099_v27, %v2098_v26  ;;  %v2110_v33 = vpack.c.bf16 %v2101_v31, %v2100_v30  ;;  %v2102_v34 = vld [vmem:[%s8091_s18 + $0x70] sm:$0xff]  ;;  %v2103_v35 = vld [vmem:[%s8091_s18 + $0x78] sm:$0xff]  ;;  %v8178_v36 = vsub.s32 3, %v8143_v9  ;;  %v8183_v39 = vsub.s32 4, %v8143_v9  ;;  %v762_v47 = vld [vmem:[%s11337_s1 + $0x8] sm:$0xff] }
  0x26   : > { %v772_v16 = vrot.slane %v8148_v12, %v8153_v15  ;;  %v791_v24 = vrot.slane %v8148_v12, %v8160_v20  ;;  %v810_v32 = vrot.slane %v8148_v12, %v8169_v28  ;;  %v2111_v37 = vpack.c.bf16 %v2103_v35, %v2102_v34  ;;  %v8215_v55 = vld [vmem:[%s11339_s3] ss:$0 sm:$0xff]  ;;  %v8225_v7 = vld [vmem:[%s11337_s1 + $0x10] sm:$0xff] }
  0x27   : > { %11412 = vst [vmem:[#allocation6_spill] sm:$0xff] %v8178_v36  ;;  %v829_v38 = vrot.slane %v8148_v12, %v8178_v36  ;;  %11413 = vst [vmem:[#allocation7_spill] sm:$0xff] %v8183_v39  ;;  %v848_v40 = vrot.slane %v8148_v12, %v8183_v39  ;;  %v8188_v41 = vsub.s32 5, %v8143_v9  ;;  %v8193_v43 = vsub.s32 6, %v8143_v9 }
  0x28   : > { %782 = vbcast.lane.b32.xlu1 %v772_v16, 272  ;;  %774 = vbcast.lane.b32.xlu0 %v772_v16, 256  ;;  %v8198_v45 = vsub.s32 7, %v8143_v9  ;;  %v924_v48 = vrot.slane %v762_v47, %v8153_v15  ;;  %v943_v49 = vrot.slane %v762_v47, %v8160_v20  ;;  %v962_v50 = vrot.slane %v762_v47, %v8169_v28 }
  0x29   : > { %6672 = vmatpush3.bf16.msra.mxu1 %v2105_v11  ;;  %11414 = vst [vmem:[#allocation8_spill] sm:$0xff] %v8188_v41  ;;  %v867_v42 = vrot.slane %v8148_v12, %v8188_v41  ;;  %11415 = vst [vmem:[#allocation9_spill] sm:$0xff] %v8193_v43  ;;  %v886_v44 = vrot.slane %v8148_v12, %v8193_v43  ;;  %v981_v51 = vrot.slane %v762_v47, %v8178_v36 }
  0x2a   : > { %6673 = vmatprep.subr.bf16.mxu1 %v2106_v17  ;;  %11416 = vst [vmem:[#allocation10_spill] sm:$0xff] %v8198_v45  ;;  %v905_v46 = vrot.slane %v8148_v12, %v8198_v45  ;;  %v1000_v52 = vrot.slane %v762_v47, %v8183_v39  ;;  %v1019_v53 = vrot.slane %v762_v47, %v8188_v41 }
  0x2b   : > { %v1038_v54 = vrot.slane %v762_v47, %v8193_v43  ;;  %v1057_v60 = vrot.slane %v762_v47, %v8198_v45 }
  0x2c   : > { %786 = vbcast.lane.b32.xlu1 %v772_v16, 280  ;;  %778 = vbcast.lane.b32.xlu0 %v772_v16, 264  ;;  %v1076_v16 = vrot.slane %v8225_v7, %v8153_v15 }
  0x2d   : > { %6674 = vmatpush3.bf16.msra.mxu1 %v2106_v17 }
  0x2e   : > { %6675 = vmatprep.subr.bf16.mxu1 %v2107_v21 }
  0x30   : > { %797 = vbcast.lane.b32.xlu1 %v791_v24, 264  ;;  %793 = vbcast.lane.b32.xlu0 %v791_v24, 256 }
  0x31   : > { %6676 = vmatpush3.bf16.msra.mxu1 %v2107_v21 }
  0x32   : > { %6677 = vmatprep.subr.bf16.mxu1 %v2108_v25 }
  0x34   : > { %805 = vbcast.lane.b32.xlu1 %v791_v24, 280  ;;  %801 = vbcast.lane.b32.xlu0 %v791_v24, 272 }
  0x35   : > { %6678 = vmatpush3.bf16.msra.mxu1 %v2108_v25 }
  0x36   : > { %6679 = vmatprep.subr.bf16.mxu1 %v2109_v29 }
  0x38   : > { %816 = vbcast.lane.b32.xlu1 %v810_v32, 264  ;;  %812 = vbcast.lane.b32.xlu0 %v810_v32, 256 }
  0x39   : > { %6680 = vmatpush3.bf16.msra.mxu1 %v2109_v29 }
  0x3a   : > { %6681 = vmatprep.subr.bf16.mxu1 %v2110_v33 }
  0x3c   : > { %824 = vbcast.lane.b32.xlu1 %v810_v32, 280  ;;  %820 = vbcast.lane.b32.xlu0 %v810_v32, 272 }
  0x3d   : > { %6682 = vmatpush3.bf16.msra.mxu1 %v2110_v33 }
  0x3e   : > { %6683 = vmatprep.subr.bf16.mxu1 %v2111_v37 }
  0x40   : > { %835 = vbcast.lane.b32.xlu1 %v829_v38, 264  ;;  %831 = vbcast.lane.b32.xlu0 %v829_v38, 256 }
  0x41   : > { %6684 = vmatpush3.bf16.msra.mxu1 %v2111_v37 }
  0x44   : > { %843 = vbcast.lane.b32.xlu1 %v829_v38, 280  ;;  %839 = vbcast.lane.b32.xlu0 %v829_v38, 272 }
  0x48   : > { %854 = vbcast.lane.b32.xlu1 %v848_v40, 264  ;;  %850 = vbcast.lane.b32.xlu0 %v848_v40, 256 }
  0x4c   : > { %862 = vbcast.lane.b32.xlu1 %v848_v40, 280  ;;  %858 = vbcast.lane.b32.xlu0 %v848_v40, 272 }
  0x50   : > { %873 = vbcast.lane.b32.xlu1 %v867_v42, 264  ;;  %869 = vbcast.lane.b32.xlu0 %v867_v42, 256 }
  0x54   : > { %881 = vbcast.lane.b32.xlu1 %v867_v42, 280  ;;  %877 = vbcast.lane.b32.xlu0 %v867_v42, 272 }
  0x58   : > { %892 = vbcast.lane.b32.xlu1 %v886_v44, 264  ;;  %888 = vbcast.lane.b32.xlu0 %v886_v44, 256 }
  0x5c   : > { %900 = vbcast.lane.b32.xlu1 %v886_v44, 280  ;;  %896 = vbcast.lane.b32.xlu0 %v886_v44, 272  ;;  %v1095_v44 = vrot.slane %v8225_v7, %v8160_v20 }
  0x60   : > { %911 = vbcast.lane.b32.xlu1 %v905_v46, 264  ;;  %907 = vbcast.lane.b32.xlu0 %v905_v46, 256 }
  0x64   : > { %919 = vbcast.lane.b32.xlu1 %v905_v46, 280  ;;  %915 = vbcast.lane.b32.xlu0 %v905_v46, 272 }
  0x68   : > { %930 = vbcast.lane.b32.xlu1 %v924_v48, 264  ;;  %926 = vbcast.lane.b32.xlu0 %v924_v48, 256 }
  0x6c   : > { %938 = vbcast.lane.b32.xlu1 %v924_v48, 280  ;;  %934 = vbcast.lane.b32.xlu0 %v924_v48, 272 }
  0x70   : > { %949 = vbcast.lane.b32.xlu1 %v943_v49, 264  ;;  %945 = vbcast.lane.b32.xlu0 %v943_v49, 256 }
  0x74   : > { %957 = vbcast.lane.b32.xlu1 %v943_v49, 280  ;;  %953 = vbcast.lane.b32.xlu0 %v943_v49, 272 }
  0x78   : > { %968 = vbcast.lane.b32.xlu1 %v962_v50, 264  ;;  %964 = vbcast.lane.b32.xlu0 %v962_v50, 256 }
  0x7c   : > { %976 = vbcast.lane.b32.xlu1 %v962_v50, 280  ;;  %972 = vbcast.lane.b32.xlu0 %v962_v50, 272 }
  0x80   : > { %987 = vbcast.lane.b32.xlu1 %v981_v51, 264  ;;  %983 = vbcast.lane.b32.xlu0 %v981_v51, 256 }
  0x84   : > { %995 = vbcast.lane.b32.xlu1 %v981_v51, 280  ;;  %991 = vbcast.lane.b32.xlu0 %v981_v51, 272 }
  0x88   : > { %1006 = vbcast.lane.b32.xlu1 %v1000_v52, 264  ;;  %1002 = vbcast.lane.b32.xlu0 %v1000_v52, 256 }
  0x8c   : > { %1014 = vbcast.lane.b32.xlu1 %v1000_v52, 280  ;;  %1010 = vbcast.lane.b32.xlu0 %v1000_v52, 272 }
  0x90   : > { %1025 = vbcast.lane.b32.xlu1 %v1019_v53, 264  ;;  %1021 = vbcast.lane.b32.xlu0 %v1019_v53, 256 }
  0x94   : > { %1033 = vbcast.lane.b32.xlu1 %v1019_v53, 280  ;;  %1029 = vbcast.lane.b32.xlu0 %v1019_v53, 272 }
  0x98   : > { %1044 = vbcast.lane.b32.xlu1 %v1038_v54, 264  ;;  %1040 = vbcast.lane.b32.xlu0 %v1038_v54, 256 }
  0x9a   : > { %v783_v56 = vpop.permute.xlu1 %782  ;;  %v775_v57 = vpop.permute.xlu0 %774 }
  0x9b   : > { %v1386_v58 = vsub.f32 %v783_v56, %v8215_v55  ;;  %v1384_v59 = vsub.f32 %v775_v57, %v8215_v55 }
  0x9c   : > { %1052 = vbcast.lane.b32.xlu1 %v1038_v54, 280  ;;  %1048 = vbcast.lane.b32.xlu0 %v1038_v54, 272 }
  0x9d   : > { %v1514_v61 = vmul.f32 %v1386_v58, %v1386_v58  ;;  %v1512_v62 = vmul.f32 %v1384_v59, %v1384_v59 }
  0x9e   : > { %v787_v63 = vpop.permute.xlu1 %786  ;;  %v779_v0 = vpop.permute.xlu0 %778 }
  0x9f   : > { %v1642_v1 = vmul.f32 -4.5, %v1514_v61  ;;  %v1387_v2 = vsub.f32 %v787_v63, %v8215_v55  ;;  %v1385_v3 = vsub.f32 %v779_v0, %v8215_v55  ;;  %v1640_v4 = vmul.f32 -4.5, %v1512_v62 }
  0xa0   : > { %1063 = vbcast.lane.b32.xlu1 %v1057_v60, 264  ;;  %1059 = vbcast.lane.b32.xlu0 %v1057_v60, 256 }
  0xa1   : > { %v1515_v5 = vmul.f32 %v1387_v2, %v1387_v2  ;;  %v1513_v6 = vmul.f32 %v1385_v3, %v1385_v3  ;;  %v1772_v8 = vmul.f32 1.442695, %v1642_v1  ;;  %v1768_v17 = vmul.f32 1.442695, %v1640_v4 }
  0xa2   : > { %v798_v9 = vpop.permute.xlu1 %797  ;;  %v794_v10 = vpop.permute.xlu0 %793 }
  0xa3   : > { %v1643_v11 = vmul.f32 -4.5, %v1515_v5  ;;  %v1641_v12 = vmul.f32 -4.5, %v1513_v6  ;;  %v1389_v13 = vsub.f32 %v798_v9, %v8215_v55  ;;  %v1388_v14 = vsub.f32 %v794_v10, %v8215_v55 }
  0xa4   : > { %1071 = vbcast.lane.b32.xlu1 %v1057_v60, 280  ;;  %1067 = vbcast.lane.b32.xlu0 %v1057_v60, 272  ;;  %7169 = vpow2.f32 %v1772_v8  ;;  %v1114_v10 = vrot.slane %v8225_v7, %v8169_v28 }
  0xa5   : > { %v1774_v18 = vmul.f32 1.442695, %v1643_v11  ;;  %v1770_v19 = vmul.f32 1.442695, %v1641_v12  ;;  %v1517_v21 = vmul.f32 %v1389_v13, %v1389_v13  ;;  %v1516_v22 = vmul.f32 %v1388_v14, %v1388_v14 }
  0xa6   : > { %v806_v23 = vpop.permute.xlu1 %805  ;;  %v802_v24 = vpop.permute.xlu0 %801 }
  0xa7   : > { %7171 = vpow2.f32 %v1774_v18  ;;  %v1645_v25 = vmul.f32 -4.5, %v1517_v21  ;;  %v1391_v26 = vsub.f32 %v806_v23, %v8215_v55  ;;  %v1390_v27 = vsub.f32 %v802_v24, %v8215_v55 }
  0xa8   : > { %7173 = vpow2.f32 %v1770_v19  ;;  %v1644_v29 = vmul.f32 -4.5, %v1516_v22  ;;  %1082 = vbcast.lane.b32.xlu1 %v1076_v16, 264  ;;  %1078 = vbcast.lane.b32.xlu0 %v1076_v16, 256 }
  0xa9   : > { %7175 = vpow2.f32 %v1768_v17  ;;  %v1778_v30 = vmul.f32 1.442695, %v1645_v25  ;;  %v1519_v31 = vmul.f32 %v1391_v26, %v1391_v26  ;;  %v1518_v32 = vmul.f32 %v1390_v27, %v1390_v27 }
  0xaa   : > { %v1776_v33 = vmul.f32 1.442695, %v1644_v29  ;;  %v817_v34 = vpop.permute.xlu1 %816  ;;  %v813_v35 = vpop.permute.xlu0 %812 }
  0xab   : > { %7177 = vpow2.f32 %v1778_v30  ;;  %v1647_v37 = vmul.f32 -4.5, %v1519_v31  ;;  %v1646_v38 = vmul.f32 -4.5, %v1518_v32  ;;  %v1393_v40 = vsub.f32 %v817_v34, %v8215_v55 }
  0xac   : > { %7179 = vpow2.f32 %v1776_v33  ;;  %v1392_v42 = vsub.f32 %v813_v35, %v8215_v55  ;;  %1090 = vbcast.lane.b32.xlu1 %v1076_v16, 280  ;;  %1086 = vbcast.lane.b32.xlu0 %v1076_v16, 272 }
  0xad   : > { %v1782_v46 = vmul.f32 1.442695, %v1647_v37  ;;  %v1780_v47 = vmul.f32 1.442695, %v1646_v38  ;;  %v1521_v48 = vmul.f32 %v1393_v40, %v1393_v40 }
  0xae   : > { %v1520_v49 = vmul.f32 %v1392_v42, %v1392_v42  ;;  %v825_v50 = vpop.permute.xlu1 %824  ;;  %v821_v51 = vpop.permute.xlu0 %820 }
  0xaf   : > { %7181 = vpow2.f32 %v1782_v46  ;;  %v1649_v52 = vmul.f32 -4.5, %v1521_v48  ;;  %v1395_v53 = vsub.f32 %v825_v50, %v8215_v55  ;;  %v1394_v54 = vsub.f32 %v821_v51, %v8215_v55  ;;  %v7170_v56 = vpop.eup %7169 }
  0xb0   : > { %7183 = vpow2.f32 %v1780_v47  ;;  %v1648_v57 = vmul.f32 -4.5, %v1520_v49  ;;  %1101 = vbcast.lane.b32.xlu1 %v1095_v44, 264  ;;  %1097 = vbcast.lane.b32.xlu0 %v1095_v44, 256 }
  0xb1   : > { %v7172_v58 = vpop.eup %7171  ;;  %v1786_v59 = vmul.f32 1.442695, %v1649_v52  ;;  %v1523_v60 = vmul.f32 %v1395_v53, %v1395_v53  ;;  %v1522_v61 = vmul.f32 %v1394_v54, %v1394_v54 }
  0xb2   : > { %v7174_v62 = vpop.eup %7173  ;;  %v1784_v63 = vmul.f32 1.442695, %v1648_v57  ;;  %v836_v0 = vpop.permute.xlu1 %835  ;;  %v2025_v2 = vpack.c.bf16 %v7172_v58, %v7170_v56 }
  0xb3   : > { %v832_v1 = vpop.permute.xlu0 %831  ;;  %v7176_v3 = vpop.eup %7175  ;;  %7185 = vpow2.f32 %v1786_v59  ;;  %v1651_v4 = vmul.f32 -4.5, %v1523_v60  ;;  %v1650_v5 = vmul.f32 -4.5, %v1522_v61  ;;  %v1397_v6 = vsub.f32 %v836_v0, %v8215_v55 }
  0xb4   : > { %7187 = vpow2.f32 %v1784_v63  ;;  %v1396_v8 = vsub.f32 %v832_v1, %v8215_v55  ;;  %v2024_v9 = vpack.c.bf16 %v7174_v62, %v7176_v3  ;;  %1109 = vbcast.lane.b32.xlu1 %v1095_v44, 280  ;;  %1105 = vbcast.lane.b32.xlu0 %v1095_v44, 272  ;;  %v1133_v44 = vrot.slane %v8225_v7, %v8178_v36 }
  0xb5   : > { %v7178_v11 = vpop.eup %7177  ;;  %v1790_v12 = vmul.f32 1.442695, %v1651_v4  ;;  %v1788_v13 = vmul.f32 1.442695, %v1650_v5  ;;  %v1525_v14 = vmul.f32 %v1397_v6, %v1397_v6 }
  0xb6   : > { %v7180_v16 = vpop.eup %7179  ;;  %v1524_v17 = vmul.f32 %v1396_v8, %v1396_v8  ;;  %6685 = vmatprep.mubr.bf16.mxu1 %v2024_v9  ;;  %v844_v18 = vpop.permute.xlu1 %843 }
  0xb7   : > { %v840_v19 = vpop.permute.xlu0 %839  ;;  %7189 = vpow2.f32 %v1790_v12  ;;  %v1653_v21 = vmul.f32 -4.5, %v1525_v14  ;;  %6686 = vmatmul.mubr.bf16.vlgmr.msra.gmra.mrb[0].mxu1 %v2025_v2  ;;  %v1399_v22 = vsub.f32 %v844_v18, %v8215_v55  ;;  %v2026_v25 = vpack.c.bf16 %v7178_v11, %v7180_v16 }
  0xb8   : > { %v1398_v23 = vsub.f32 %v840_v19, %v8215_v55  ;;  %7191 = vpow2.f32 %v1788_v13  ;;  %v1652_v24 = vmul.f32 -4.5, %v1524_v17  ;;  %1120 = vbcast.lane.b32.xlu1 %v1114_v10, 264  ;;  %1116 = vbcast.lane.b32.xlu0 %v1114_v10, 256 }
  0xb9   : > { %v7182_v26 = vpop.eup %7181  ;;  %v1794_v27 = vmul.f32 1.442695, %v1653_v21  ;;  %v1527_v29 = vmul.f32 %v1399_v22, %v1399_v22  ;;  %6689 = vmatprep.mubr.bf16.mxu1 %v2026_v25 }
  0xba   : > { %v1526_v30 = vmul.f32 %v1398_v23, %v1398_v23  ;;  %v7184_v31 = vpop.eup %7183  ;;  %v1792_v32 = vmul.f32 1.442695, %v1652_v24  ;;  %v855_v33 = vpop.permute.xlu1 %854 }
  0xbb   : > { %v851_v34 = vpop.permute.xlu0 %850  ;;  %7193 = vpow2.f32 %v1794_v27  ;;  %v1655_v35 = vmul.f32 -4.5, %v1527_v29  ;;  %v1401_v38 = vsub.f32 %v855_v33, %v8215_v55  ;;  %v2027_v42 = vpack.c.bf16 %v7182_v26, %v7184_v31 }
  0xbc   : > { %v1654_v37 = vmul.f32 -4.5, %v1526_v30  ;;  %7195 = vpow2.f32 %v1792_v32  ;;  %v1400_v40 = vsub.f32 %v851_v34, %v8215_v55  ;;  %1128 = vbcast.lane.b32.xlu1 %v1114_v10, 280  ;;  %1124 = vbcast.lane.b32.xlu0 %v1114_v10, 272  ;;  %v1152_v10 = vrot.slane %v8225_v7, %v8183_v39 }
  0xbd   : > { %v7186_v46 = vpop.eup %7185  ;;  %v1798_v47 = vmul.f32 1.442695, %v1655_v35  ;;  %v1529_v49 = vmul.f32 %v1401_v38, %v1401_v38 }
  0xbe   : > { %v1796_v48 = vmul.f32 1.442695, %v1654_v37  ;;  %v7188_v50 = vpop.eup %7187  ;;  %v1528_v51 = vmul.f32 %v1400_v40, %v1400_v40  ;;  %v863_v52 = vpop.permute.xlu1 %862 }
  0xbf   : > { %v859_v53 = vpop.permute.xlu0 %858  ;;  %7197 = vpow2.f32 %v1798_v47  ;;  %v1657_v54 = vmul.f32 -4.5, %v1529_v49  ;;  %6690 = vmatmul.mubr.bf16.gmra.mrb[4].mxu1 %v2027_v42  ;;  %v1403_v56 = vsub.f32 %v863_v52, %v8215_v55  ;;  %v2028_v59 = vpack.c.bf16 %v7186_v46, %v7188_v50 }
  0xc0   : > { %v1402_v57 = vsub.f32 %v859_v53, %v8215_v55  ;;  %7199 = vpow2.f32 %v1796_v48  ;;  %v1656_v58 = vmul.f32 -4.5, %v1528_v51  ;;  %1139 = vbcast.lane.b32.xlu1 %v1133_v44, 264  ;;  %1135 = vbcast.lane.b32.xlu0 %v1133_v44, 256 }
  0xc1   : > { %v7190_v60 = vpop.eup %7189  ;;  %v1802_v61 = vmul.f32 1.442695, %v1657_v54  ;;  %v1531_v62 = vmul.f32 %v1403_v56, %v1403_v56  ;;  %6693 = vmatprep.mubr.bf16.mxu1 %v2028_v59 }
  0xc2   : > { %v1530_v63 = vmul.f32 %v1402_v57, %v1402_v57  ;;  %v7192_v0 = vpop.eup %7191  ;;  %v1800_v1 = vmul.f32 1.442695, %v1656_v58  ;;  %v874_v2 = vpop.permute.xlu1 %873 }
  0xc3   : > { %v870_v3 = vpop.permute.xlu0 %869  ;;  %7201 = vpow2.f32 %v1802_v61  ;;  %v1659_v4 = vmul.f32 -4.5, %v1531_v62  ;;  %v1405_v6 = vsub.f32 %v874_v2, %v8215_v55  ;;  %v2029_v9 = vpack.c.bf16 %v7190_v60, %v7192_v0 }
  0xc4   : > { %v1658_v5 = vmul.f32 -4.5, %v1530_v63  ;;  %7203 = vpow2.f32 %v1800_v1  ;;  %v1404_v8 = vsub.f32 %v870_v3, %v8215_v55  ;;  %1147 = vbcast.lane.b32.xlu1 %v1133_v44, 280  ;;  %1143 = vbcast.lane.b32.xlu0 %v1133_v44, 272  ;;  %v1171_v44 = vrot.slane %v8225_v7, %v8188_v41 }
  0xc5   : > { %v7194_v11 = vpop.eup %7193  ;;  %v1806_v12 = vmul.f32 1.442695, %v1659_v4  ;;  %v1533_v14 = vmul.f32 %v1405_v6, %v1405_v6 }
  0xc6   : > { %v1804_v13 = vmul.f32 1.442695, %v1658_v5  ;;  %v7196_v16 = vpop.eup %7195  ;;  %v1532_v17 = vmul.f32 %v1404_v8, %v1404_v8  ;;  %v882_v18 = vpop.permute.xlu1 %881 }
  0xc7   : > { %v878_v19 = vpop.permute.xlu0 %877  ;;  %7205 = vpow2.f32 %v1806_v12  ;;  %v1661_v21 = vmul.f32 -4.5, %v1533_v14  ;;  %6694 = vmatmul.mubr.bf16.gmra.mrb[8].mxu1 %v2029_v9  ;;  %v1407_v22 = vsub.f32 %v882_v18, %v8215_v55  ;;  %v2030_v25 = vpack.c.bf16 %v7194_v11, %v7196_v16 }
  0xc8   : > { %v1406_v23 = vsub.f32 %v878_v19, %v8215_v55  ;;  %7207 = vpow2.f32 %v1804_v13  ;;  %v1660_v24 = vmul.f32 -4.5, %v1532_v17  ;;  %1158 = vbcast.lane.b32.xlu1 %v1152_v10, 264  ;;  %1154 = vbcast.lane.b32.xlu0 %v1152_v10, 256 }
  0xc9   : > { %v7198_v26 = vpop.eup %7197  ;;  %v1810_v27 = vmul.f32 1.442695, %v1661_v21  ;;  %v1535_v29 = vmul.f32 %v1407_v22, %v1407_v22  ;;  %6697 = vmatprep.mubr.bf16.mxu1 %v2030_v25 }
  0xca   : > { %v1534_v30 = vmul.f32 %v1406_v23, %v1406_v23  ;;  %v7200_v31 = vpop.eup %7199  ;;  %v1808_v32 = vmul.f32 1.442695, %v1660_v24  ;;  %v893_v33 = vpop.permute.xlu1 %892 }
  0xcb   : > { %v889_v34 = vpop.permute.xlu0 %888  ;;  %7209 = vpow2.f32 %v1810_v27  ;;  %v1663_v35 = vmul.f32 -4.5, %v1535_v29  ;;  %v1409_v38 = vsub.f32 %v893_v33, %v8215_v55  ;;  %v2031_v42 = vpack.c.bf16 %v7198_v26, %v7200_v31 }
  0xcc   : > { %v1662_v37 = vmul.f32 -4.5, %v1534_v30  ;;  %7211 = vpow2.f32 %v1808_v32  ;;  %v1408_v40 = vsub.f32 %v889_v34, %v8215_v55  ;;  %1166 = vbcast.lane.b32.xlu1 %v1152_v10, 280  ;;  %1162 = vbcast.lane.b32.xlu0 %v1152_v10, 272  ;;  %v1190_v10 = vrot.slane %v8225_v7, %v8193_v43 }
  0xcd   : > { %v7202_v46 = vpop.eup %7201  ;;  %v1814_v47 = vmul.f32 1.442695, %v1663_v35  ;;  %v1537_v49 = vmul.f32 %v1409_v38, %v1409_v38 }
  0xce   : > { %v1812_v48 = vmul.f32 1.442695, %v1662_v37  ;;  %v7204_v50 = vpop.eup %7203  ;;  %v1536_v51 = vmul.f32 %v1408_v40, %v1408_v40  ;;  %v901_v52 = vpop.permute.xlu1 %900 }
  0xcf   : > { %v897_v53 = vpop.permute.xlu0 %896  ;;  %7213 = vpow2.f32 %v1814_v47  ;;  %v1665_v54 = vmul.f32 -4.5, %v1537_v49  ;;  %6698 = vmatmul.mubr.bf16.gmra.mrb[12].mxu1 %v2031_v42  ;;  %v1411_v56 = vsub.f32 %v901_v52, %v8215_v55  ;;  %v2032_v59 = vpack.c.bf16 %v7202_v46, %v7204_v50 }
  0xd0   : > { %v1410_v57 = vsub.f32 %v897_v53, %v8215_v55  ;;  %7215 = vpow2.f32 %v1812_v48  ;;  %v1664_v58 = vmul.f32 -4.5, %v1536_v51  ;;  %1177 = vbcast.lane.b32.xlu1 %v1171_v44, 264  ;;  %1173 = vbcast.lane.b32.xlu0 %v1171_v44, 256 }
  0xd1   : > { %v7206_v60 = vpop.eup %7205  ;;  %v1818_v61 = vmul.f32 1.442695, %v1665_v54  ;;  %v1539_v62 = vmul.f32 %v1411_v56, %v1411_v56  ;;  %6701 = vmatprep.mubr.bf16.mxu1 %v2032_v59 }
  0xd2   : > { %v1538_v63 = vmul.f32 %v1410_v57, %v1410_v57  ;;  %v7208_v0 = vpop.eup %7207  ;;  %v1816_v1 = vmul.f32 1.442695, %v1664_v58  ;;  %v912_v2 = vpop.permute.xlu1 %911 }
  0xd3   : > { %v908_v3 = vpop.permute.xlu0 %907  ;;  %7217 = vpow2.f32 %v1818_v61  ;;  %v1667_v4 = vmul.f32 -4.5, %v1539_v62  ;;  %v1413_v6 = vsub.f32 %v912_v2, %v8215_v55  ;;  %v2033_v9 = vpack.c.bf16 %v7206_v60, %v7208_v0 }
  0xd4   : > { %v1666_v5 = vmul.f32 -4.5, %v1538_v63  ;;  %7219 = vpow2.f32 %v1816_v1  ;;  %v1412_v8 = vsub.f32 %v908_v3, %v8215_v55  ;;  %1185 = vbcast.lane.b32.xlu1 %v1171_v44, 280  ;;  %1181 = vbcast.lane.b32.xlu0 %v1171_v44, 272  ;;  %v1209_v44 = vrot.slane %v8225_v7, %v8198_v45  ;;  %v8278_v63 = vld [vmem:[%s11337_s1 + $0x18] sm:$0xff] }
  0xd5   : > { %v7210_v11 = vpop.eup %7209  ;;  %v1822_v12 = vmul.f32 1.442695, %v1667_v4  ;;  %v1541_v14 = vmul.f32 %v1413_v6, %v1413_v6 }
  0xd6   : > { %v1820_v13 = vmul.f32 1.442695, %v1666_v5  ;;  %v7212_v16 = vpop.eup %7211  ;;  %v1540_v17 = vmul.f32 %v1412_v8, %v1412_v8  ;;  %v920_v18 = vpop.permute.xlu1 %919 }
  0xd7   : > { %v916_v19 = vpop.permute.xlu0 %915  ;;  %7221 = vpow2.f32 %v1822_v12  ;;  %v1669_v21 = vmul.f32 -4.5, %v1541_v14  ;;  %6702 = vmatmul.mubr.bf16.gmra.mrb[16].mxu1 %v2033_v9  ;;  %v1415_v22 = vsub.f32 %v920_v18, %v8215_v55  ;;  %v2034_v25 = vpack.c.bf16 %v7210_v11, %v7212_v16 }
  0xd8   : > { %v1414_v23 = vsub.f32 %v916_v19, %v8215_v55  ;;  %7223 = vpow2.f32 %v1820_v13  ;;  %v1668_v24 = vmul.f32 -4.5, %v1540_v17  ;;  %1196 = vbcast.lane.b32.xlu1 %v1190_v10, 264  ;;  %1192 = vbcast.lane.b32.xlu0 %v1190_v10, 256 }
  0xd9   : > { %v7214_v26 = vpop.eup %7213  ;;  %v1826_v27 = vmul.f32 1.442695, %v1669_v21  ;;  %v1543_v29 = vmul.f32 %v1415_v22, %v1415_v22  ;;  %6705 = vmatprep.mubr.bf16.mxu1 %v2034_v25 }
  0xda   : > { %v1542_v30 = vmul.f32 %v1414_v23, %v1414_v23  ;;  %v7216_v31 = vpop.eup %7215  ;;  %v1824_v32 = vmul.f32 1.442695, %v1668_v24  ;;  %v931_v33 = vpop.permute.xlu1 %930 }
  0xdb   : > { %v927_v34 = vpop.permute.xlu0 %926  ;;  %7225 = vpow2.f32 %v1826_v27  ;;  %v1671_v35 = vmul.f32 -4.5, %v1543_v29  ;;  %v1417_v38 = vsub.f32 %v931_v33, %v8215_v55  ;;  %v2035_v42 = vpack.c.bf16 %v7214_v26, %v7216_v31 }
  0xdc   : > { %v1670_v37 = vmul.f32 -4.5, %v1542_v30  ;;  %7227 = vpow2.f32 %v1824_v32  ;;  %v1416_v40 = vsub.f32 %v927_v34, %v8215_v55  ;;  %1204 = vbcast.lane.b32.xlu1 %v1190_v10, 280  ;;  %1200 = vbcast.lane.b32.xlu0 %v1190_v10, 272  ;;  %v1228_v10 = vrot.slane %v8278_v63, %v8153_v15 }
  0xdd   : > { %v7218_v46 = vpop.eup %7217  ;;  %v1830_v47 = vmul.f32 1.442695, %v1671_v35  ;;  %v1545_v49 = vmul.f32 %v1417_v38, %v1417_v38 }
  0xde   : > { %v1828_v48 = vmul.f32 1.442695, %v1670_v37  ;;  %v7220_v50 = vpop.eup %7219  ;;  %v1544_v51 = vmul.f32 %v1416_v40, %v1416_v40  ;;  %v939_v52 = vpop.permute.xlu1 %938 }
  0xdf   : > { %v935_v53 = vpop.permute.xlu0 %934  ;;  %7229 = vpow2.f32 %v1830_v47  ;;  %v1673_v54 = vmul.f32 -4.5, %v1545_v49  ;;  %6706 = vmatmul.mubr.bf16.gmra.mrb[20].mxu1 %v2035_v42  ;;  %v1419_v56 = vsub.f32 %v939_v52, %v8215_v55  ;;  %v2036_v7 = vpack.c.bf16 %v7218_v46, %v7220_v50 }
  0xe0   : > { %v1418_v57 = vsub.f32 %v935_v53, %v8215_v55  ;;  %7231 = vpow2.f32 %v1828_v48  ;;  %v1672_v58 = vmul.f32 -4.5, %v1544_v51  ;;  %1215 = vbcast.lane.b32.xlu1 %v1209_v44, 264  ;;  %1211 = vbcast.lane.b32.xlu0 %v1209_v44, 256 }
  0xe1   : > { %v7222_v59 = vpop.eup %7221  ;;  %v1834_v60 = vmul.f32 1.442695, %v1673_v54  ;;  %v1547_v61 = vmul.f32 %v1419_v56, %v1419_v56  ;;  %6709 = vmatprep.mubr.bf16.mxu1 %v2036_v7 }
  0xe2   : > { %v1546_v62 = vmul.f32 %v1418_v57, %v1418_v57  ;;  %v7224_v0 = vpop.eup %7223  ;;  %v1832_v1 = vmul.f32 1.442695, %v1672_v58  ;;  %v950_v2 = vpop.permute.xlu1 %949 }
  0xe3   : > { %v946_v3 = vpop.permute.xlu0 %945  ;;  %7233 = vpow2.f32 %v1834_v60  ;;  %v1675_v4 = vmul.f32 -4.5, %v1547_v61  ;;  %v1421_v6 = vsub.f32 %v950_v2, %v8215_v55  ;;  %v2037_v9 = vpack.c.bf16 %v7222_v59, %v7224_v0 }
  0xe4   : > { %v1674_v5 = vmul.f32 -4.5, %v1546_v62  ;;  %7235 = vpow2.f32 %v1832_v1  ;;  %v1420_v8 = vsub.f32 %v946_v3, %v8215_v55  ;;  %1223 = vbcast.lane.b32.xlu1 %v1209_v44, 280  ;;  %1219 = vbcast.lane.b32.xlu0 %v1209_v44, 272  ;;  %v1247_v44 = vrot.slane %v8278_v63, %v8160_v20 }
  0xe5   : > { %v7226_v11 = vpop.eup %7225  ;;  %v1838_v12 = vmul.f32 1.442695, %v1675_v4  ;;  %v1549_v14 = vmul.f32 %v1421_v6, %v1421_v6 }
  0xe6   : > { %v1836_v13 = vmul.f32 1.442695, %v1674_v5  ;;  %v7228_v16 = vpop.eup %7227  ;;  %v1548_v17 = vmul.f32 %v1420_v8, %v1420_v8  ;;  %v958_v18 = vpop.permute.xlu1 %957 }
  0xe7   : > { %v954_v19 = vpop.permute.xlu0 %953  ;;  %7237 = vpow2.f32 %v1838_v12  ;;  %v1677_v21 = vmul.f32 -4.5, %v1549_v14  ;;  %6710 = vmatmul.mubr.bf16.gmra.mrb[24].mxu1 %v2037_v9  ;;  %v1423_v22 = vsub.f32 %v958_v18, %v8215_v55  ;;  %v2038_v25 = vpack.c.bf16 %v7226_v11, %v7228_v16  ;;  %v656_v11 = vld [vmem:[%s8107_s30] sm:$0xff]  ;;  %v657_v12 = vld [vmem:[%s8107_s30 + $0x8] sm:$0xff] }
  0xe8   : > { %v1422_v23 = vsub.f32 %v954_v19, %v8215_v55  ;;  %7239 = vpow2.f32 %v1836_v13  ;;  %v1676_v24 = vmul.f32 -4.5, %v1548_v17  ;;  %1234 = vbcast.lane.b32.xlu1 %v1228_v10, 264  ;;  %1230 = vbcast.lane.b32.xlu0 %v1228_v10, 256  ;;  %v7033_v18 = vpack.c.bf16 %v657_v12, %v656_v11 }
  0xe9   : > { %v7230_v26 = vpop.eup %7229  ;;  %v1842_v27 = vmul.f32 1.442695, %v1677_v21  ;;  %v1551_v29 = vmul.f32 %v1423_v22, %v1423_v22  ;;  %6713 = vmatprep.mubr.bf16.mxu1 %v2038_v25 }
  0xea   : > { %v1550_v30 = vmul.f32 %v1422_v23, %v1422_v23  ;;  %v7232_v31 = vpop.eup %7231  ;;  %v1840_v32 = vmul.f32 1.442695, %v1676_v24  ;;  %v969_v33 = vpop.permute.xlu1 %968  ;;  %7034 = vmatprep.subr.bf16.mxu0 %v7033_v18 }
  0xeb   : > { %v965_v34 = vpop.permute.xlu0 %964  ;;  %7241 = vpow2.f32 %v1842_v27  ;;  %v1679_v35 = vmul.f32 -4.5, %v1551_v29  ;;  %v1425_v38 = vsub.f32 %v969_v33, %v8215_v55  ;;  %v2039_v42 = vpack.c.bf16 %v7230_v26, %v7232_v31  ;;  %v659_v31 = vld [vmem:[%s8107_s30 + $0x18] sm:$0xff]  ;;  %7036 = vmatpush3.bf16.msra.mxu0 %v7033_v18 }
  0xec   : > { %v1678_v37 = vmul.f32 -4.5, %v1550_v30  ;;  %7243 = vpow2.f32 %v1840_v32  ;;  %v1424_v40 = vsub.f32 %v965_v34, %v8215_v55  ;;  %1242 = vbcast.lane.b32.xlu1 %v1228_v10, 280  ;;  %1238 = vbcast.lane.b32.xlu0 %v1228_v10, 272  ;;  %v1266_v10 = vrot.slane %v8278_v63, %v8169_v28  ;;  %v658_v30 = vld [vmem:[%s8107_s30 + $0x10] sm:$0xff] }
  0xed   : > { %v7234_v46 = vpop.eup %7233  ;;  %v1846_v47 = vmul.f32 1.442695, %v1679_v35  ;;  %v1553_v49 = vmul.f32 %v1425_v38, %v1425_v38 }
  0xee   : > { %v1844_v48 = vmul.f32 1.442695, %v1678_v37  ;;  %v7236_v50 = vpop.eup %7235  ;;  %v1552_v51 = vmul.f32 %v1424_v40, %v1424_v40  ;;  %v977_v52 = vpop.permute.xlu1 %976  ;;  %v7037_v37 = vpack.c.bf16 %v659_v31, %v658_v30 }
  0xef   : > { %v973_v53 = vpop.permute.xlu0 %972  ;;  %7245 = vpow2.f32 %v1846_v47  ;;  %v1681_v54 = vmul.f32 -4.5, %v1553_v49  ;;  %6714 = vmatmul.mubr.bf16.gmra.mrb[28].mxu1 %v2039_v42  ;;  %v1427_v56 = vsub.f32 %v977_v52, %v8215_v55  ;;  %v2040_v7 = vpack.c.bf16 %v7234_v46, %v7236_v50  ;;  %v660_v52 = vld [vmem:[%s8107_s30 + $0x20] sm:$0xff] }
  0xf0   : > { %v1426_v57 = vsub.f32 %v973_v53, %v8215_v55  ;;  %7247 = vpow2.f32 %v1844_v48  ;;  %v1680_v58 = vmul.f32 -4.5, %v1552_v51  ;;  %1253 = vbcast.lane.b32.xlu1 %v1247_v44, 264  ;;  %1249 = vbcast.lane.b32.xlu0 %v1247_v44, 256  ;;  %v1285_v51 = vrot.slane %v8278_v63, %v8178_v36  ;;  %v661_v53 = vld [vmem:[%s8107_s30 + $0x28] sm:$0xff] }
  0xf1   : > { %v7238_v59 = vpop.eup %7237  ;;  %v1850_v60 = vmul.f32 1.442695, %v1681_v54  ;;  %v1555_v61 = vmul.f32 %v1427_v56, %v1427_v56  ;;  %6717 = vmatprep.mubr.bf16.mxu1 %v2040_v7  ;;  %7038 = vmatprep.subr.bf16.mxu0 %v7037_v37  ;;  %v7041_v7 = vpack.c.bf16 %v661_v53, %v660_v52  ;;  %v667_v52 = vld [vmem:[%s8107_s30 + $0x58] sm:$0xff] }
  0xf2   : > { %v1554_v62 = vmul.f32 %v1426_v57, %v1426_v57  ;;  %v7240_v0 = vpop.eup %7239  ;;  %v1848_v1 = vmul.f32 1.442695, %v1680_v58  ;;  %v988_v2 = vpop.permute.xlu1 %987  ;;  %7040 = vmatpush3.bf16.msra.mxu0 %v7037_v37 }
  0xf3   : > { %v984_v3 = vpop.permute.xlu0 %983  ;;  %7249 = vpow2.f32 %v1850_v60  ;;  %v1683_v4 = vmul.f32 -4.5, %v1555_v61  ;;  %v1429_v6 = vsub.f32 %v988_v2, %v8215_v55  ;;  %v2041_v9 = vpack.c.bf16 %v7238_v59, %v7240_v0  ;;  %7042 = vmatprep.subr.bf16.mxu0 %v7041_v7 }
  0xf4   : > { %v1682_v5 = vmul.f32 -4.5, %v1554_v62  ;;  %7251 = vpow2.f32 %v1848_v1  ;;  %v1428_v8 = vsub.f32 %v984_v3, %v8215_v55  ;;  %1261 = vbcast.lane.b32.xlu1 %v1247_v44, 280  ;;  %1257 = vbcast.lane.b32.xlu0 %v1247_v44, 272 }
  0xf5   : > { %v7242_v13 = vpop.eup %7241  ;;  %v1854_v14 = vmul.f32 1.442695, %v1683_v4  ;;  %v1557_v17 = vmul.f32 %v1429_v6, %v1429_v6  ;;  %v663_v6 = vld [vmem:[%s8107_s30 + $0x38] sm:$0xff] }
  0xf6   : > { %v1852_v16 = vmul.f32 1.442695, %v1682_v5  ;;  %v7244_v19 = vpop.eup %7243  ;;  %v1556_v21 = vmul.f32 %v1428_v8, %v1428_v8  ;;  %v996_v22 = vpop.permute.xlu1 %995  ;;  %v662_v5 = vld [vmem:[%s8107_s30 + $0x30] sm:$0xff]  ;;  %7044 = vmatpush3.bf16.msra.mxu0 %v7041_v7 }
  0xf7   : > { %v992_v23 = vpop.permute.xlu0 %991  ;;  %7253 = vpow2.f32 %v1854_v14  ;;  %v1685_v24 = vmul.f32 -4.5, %v1557_v17  ;;  %6718 = vmatmul.mubr.bf16.gmra.mrb[32].mxu1 %v2041_v9  ;;  %v1431_v25 = vsub.f32 %v996_v22, %v8215_v55  ;;  %v2042_v29 = vpack.c.bf16 %v7242_v13, %v7244_v19 }
  0xf8   : > { %v1430_v26 = vsub.f32 %v992_v23, %v8215_v55  ;;  %7255 = vpow2.f32 %v1852_v16  ;;  %v1684_v27 = vmul.f32 -4.5, %v1556_v21  ;;  %1272 = vbcast.lane.b32.xlu1 %v1266_v10, 264  ;;  %1268 = vbcast.lane.b32.xlu0 %v1266_v10, 256  ;;  %v7045_v12 = vpack.c.bf16 %v663_v6, %v662_v5 }
  0xf9   : > { %v7246_v32 = vpop.eup %7245  ;;  %v1858_v33 = vmul.f32 1.442695, %v1685_v24  ;;  %v1559_v34 = vmul.f32 %v1431_v25, %v1431_v25  ;;  %6721 = vmatprep.mubr.bf16.mxu1 %v2042_v29  ;;  %v1304_v24 = vrot.slane %v8278_v63, %v8183_v39  ;;  %v664_v25 = vld [vmem:[%s8107_s30 + $0x40] sm:$0xff] }
  0xfa   : > { %v1558_v35 = vmul.f32 %v1430_v26, %v1430_v26  ;;  %v7248_v38 = vpop.eup %7247  ;;  %v1856_v40 = vmul.f32 1.442695, %v1684_v27  ;;  %v1007_v42 = vpop.permute.xlu1 %1006  ;;  %7046 = vmatprep.subr.bf16.mxu0 %v7045_v12  ;;  %v665_v26 = vld [vmem:[%s8107_s30 + $0x48] sm:$0xff] }
  0xfb   : > { %v1003_v44 = vpop.permute.xlu0 %1002  ;;  %7257 = vpow2.f32 %v1858_v33  ;;  %v1687_v46 = vmul.f32 -4.5, %v1559_v34  ;;  %v1433_v48 = vsub.f32 %v1007_v42, %v8215_v55  ;;  %v2043_v50 = vpack.c.bf16 %v7246_v32, %v7248_v38  ;;  %7048 = vmatpush3.bf16.msra.mxu0 %v7045_v12 }
  0xfc   : > { %v1686_v47 = vmul.f32 -4.5, %v1558_v35  ;;  %7259 = vpow2.f32 %v1856_v40  ;;  %v1432_v49 = vsub.f32 %v1003_v44, %v8215_v55  ;;  %1280 = vbcast.lane.b32.xlu1 %v1266_v10, 280  ;;  %1276 = vbcast.lane.b32.xlu0 %v1266_v10, 272  ;;  %v7049_v32 = vpack.c.bf16 %v665_v26, %v664_v25 }
  0xfd   : > { %v7250_v54 = vpop.eup %7249  ;;  %v1862_v56 = vmul.f32 1.442695, %v1687_v46  ;;  %v1561_v58 = vmul.f32 %v1433_v48, %v1433_v48 }
  0xfe   : > { %v1860_v57 = vmul.f32 1.442695, %v1686_v47  ;;  %v7252_v59 = vpop.eup %7251  ;;  %v1560_v60 = vmul.f32 %v1432_v49, %v1432_v49  ;;  %v1015_v61 = vpop.permute.xlu1 %1014  ;;  %7050 = vmatprep.subr.bf16.mxu0 %v7049_v32 }
  0xff   : > { %v1011_v62 = vpop.permute.xlu0 %1010  ;;  %7261 = vpow2.f32 %v1862_v56  ;;  %v1689_v0 = vmul.f32 -4.5, %v1561_v58  ;;  %6722 = vmatmul.mubr.bf16.gmra.mrb[36].mxu1 %v2043_v50  ;;  %v1435_v1 = vsub.f32 %v1015_v61, %v8215_v55  ;;  %v2044_v4 = vpack.c.bf16 %v7250_v54, %v7252_v59  ;;  %7052 = vmatpush3.bf16.msra.mxu0 %v7049_v32  ;;  %v8325_v59 = vld [vmem:[%s11339_s3] ss:$0 sm:$0xff] }
 0x100   : > { %v1434_v2 = vsub.f32 %v1011_v62, %v8215_v55  ;;  %7263 = vpow2.f32 %v1860_v57  ;;  %v1688_v3 = vmul.f32 -4.5, %v1560_v60  ;;  %1291 = vbcast.lane.b32.xlu1 %v1285_v51, 264  ;;  %1287 = vbcast.lane.b32.xlu0 %v1285_v51, 256 }
 0x101   : > { %v7254_v8 = vpop.eup %7253  ;;  %v1866_v9 = vmul.f32 1.442695, %v1689_v0  ;;  %v1563_v10 = vmul.f32 %v1435_v1, %v1435_v1  ;;  %6725 = vmatprep.mubr.bf16.mxu1 %v2044_v4  ;;  %v1323_v0 = vrot.slane %v8278_v63, %v8188_v41 }
 0x102   : > { %v1562_v11 = vmul.f32 %v1434_v2, %v1434_v2  ;;  %v7256_v13 = vpop.eup %7255  ;;  %v1864_v14 = vmul.f32 1.442695, %v1688_v3  ;;  %v1026_v16 = vpop.permute.xlu1 %1025 }
 0x103   : > { %v1022_v17 = vpop.permute.xlu0 %1021  ;;  %7265 = vpow2.f32 %v1866_v9  ;;  %v1691_v18 = vmul.f32 -4.5, %v1563_v10  ;;  %v1437_v21 = vsub.f32 %v1026_v16, %v8215_v55  ;;  %v2045_v23 = vpack.c.bf16 %v7254_v8, %v7256_v13  ;;  %v668_v13 = vld [vmem:[%s8107_s30 + $0x60] sm:$0xff] }
 0x104   : > { %v1690_v19 = vmul.f32 -4.5, %v1562_v11  ;;  %7267 = vpow2.f32 %v1864_v14  ;;  %v1436_v22 = vsub.f32 %v1022_v17, %v8215_v55  ;;  %1299 = vbcast.lane.b32.xlu1 %v1285_v51, 280  ;;  %1295 = vbcast.lane.b32.xlu0 %v1285_v51, 272  ;;  %v666_v51 = vld [vmem:[%s8107_s30 + $0x50] sm:$0xff]  ;;  %v669_v14 = vld [vmem:[%s8107_s30 + $0x68] sm:$0xff] }
 0x105   : > { %v7258_v27 = vpop.eup %7257  ;;  %v1870_v29 = vmul.f32 1.442695, %v1691_v18  ;;  %v1565_v31 = vmul.f32 %v1437_v21, %v1437_v21  ;;  %v7053_v58 = vpack.c.bf16 %v667_v52, %v666_v51  ;;  %v7057_v18 = vpack.c.bf16 %v669_v14, %v668_v13  ;;  %v4009_v13 = vld [vmem:[%s8096_s21 + $0x8] sm:$0xff] }
 0x106   : > { %v1868_v30 = vmul.f32 1.442695, %v1690_v19  ;;  %v7260_v33 = vpop.eup %7259  ;;  %v1564_v34 = vmul.f32 %v1436_v22, %v1436_v22  ;;  %v1034_v35 = vpop.permute.xlu1 %1033 }
 0x107   : > { %v1030_v37 = vpop.permute.xlu0 %1029  ;;  %7269 = vpow2.f32 %v1870_v29  ;;  %v1693_v38 = vmul.f32 -4.5, %v1565_v31  ;;  %6726 = vmatmul.mubr.bf16.gmra.mrb[40].mxu1 %v2045_v23  ;;  %v1439_v40 = vsub.f32 %v1034_v35, %v8215_v55  ;;  %v2046_v46 = vpack.c.bf16 %v7258_v27, %v7260_v33  ;;  %7054 = vmatprep.subr.bf16.mxu0 %v7053_v58 }
 0x108   : > { %v1438_v42 = vsub.f32 %v1030_v37, %v8215_v55  ;;  %7271 = vpow2.f32 %v1868_v30  ;;  %v1692_v44 = vmul.f32 -4.5, %v1564_v34  ;;  %1310 = vbcast.lane.b32.xlu1 %v1304_v24, 264  ;;  %1306 = vbcast.lane.b32.xlu0 %v1304_v24, 256  ;;  %v1342_v34 = vrot.slane %v8278_v63, %v8193_v43 }
 0x109   : > { %v7262_v47 = vpop.eup %7261  ;;  %v1874_v48 = vmul.f32 1.442695, %v1693_v38  ;;  %v1567_v49 = vmul.f32 %v1439_v40, %v1439_v40  ;;  %6729 = vmatprep.mubr.bf16.mxu1 %v2046_v46  ;;  %7056 = vmatpush3.bf16.msra.mxu0 %v7053_v58 }
 0x10a   : > { %v1566_v50 = vmul.f32 %v1438_v42, %v1438_v42  ;;  %v7264_v53 = vpop.eup %7263  ;;  %v1872_v54 = vmul.f32 1.442695, %v1692_v44  ;;  %v1045_v56 = vpop.permute.xlu1 %1044  ;;  %7058 = vmatprep.subr.bf16.mxu0 %v7057_v18  ;;  %v670_v42 = vld [vmem:[%s8107_s30 + $0x70] sm:$0xff]  ;;  %v671_v44 = vld [vmem:[%s8107_s30 + $0x78] sm:$0xff] }
 0x10b   : > { %v1041_v57 = vpop.permute.xlu0 %1040  ;;  %7273 = vpow2.f32 %v1874_v48  ;;  %v1695_v55 = vmul.f32 -4.5, %v1567_v49  ;;  %v1441_v60 = vsub.f32 %v1045_v56, %v8325_v59  ;;  %v2047_v62 = vpack.c.bf16 %v7262_v47, %v7264_v53 }
 0x10c   : > { %v1694_v7 = vmul.f32 -4.5, %v1566_v50  ;;  %7275 = vpow2.f32 %v1872_v54  ;;  %v1440_v61 = vsub.f32 %v1041_v57, %v8325_v59  ;;  %1318 = vbcast.lane.b32.xlu1 %v1304_v24, 280  ;;  %1314 = vbcast.lane.b32.xlu0 %v1304_v24, 272  ;;  %v7061_v50 = vpack.c.bf16 %v671_v44, %v670_v42 }
 0x10d   : > { %v7266_v1 = vpop.eup %7265  ;;  %v1878_v2 = vmul.f32 1.442695, %v1695_v55  ;;  %v1569_v4 = vmul.f32 %v1441_v60, %v1441_v60  ;;  %7060 = vmatpush3.bf16.msra.mxu0 %v7057_v18 }
 0x10e   : > { %v1876_v3 = vmul.f32 1.442695, %v1694_v7  ;;  %v7268_v5 = vpop.eup %7267  ;;  %v1568_v6 = vmul.f32 %v1440_v61, %v1440_v61  ;;  %v1053_v8 = vpop.permute.xlu1 %1052  ;;  %7062 = vmatprep.subr.bf16.mxu0 %v7061_v50 }
 0x10f   : > { %v1049_v9 = vpop.permute.xlu0 %1048  ;;  %7277 = vpow2.f32 %v1878_v2  ;;  %v1697_v10 = vmul.f32 -4.5, %v1569_v4  ;;  %6730 = vmatmul.mubr.bf16.gmra.mrb[44].mxu1 %v2047_v62  ;;  %v1443_v11 = vsub.f32 %v1053_v8, %v8325_v59  ;;  %v2048_v17 = vpack.c.bf16 %v7266_v1, %v7268_v5 }
 0x110   : > { %v1442_v12 = vsub.f32 %v1049_v9, %v8325_v59  ;;  %7279 = vpow2.f32 %v1876_v3  ;;  %v1696_v16 = vmul.f32 -4.5, %v1568_v6  ;;  %1329 = vbcast.lane.b32.xlu1 %v1323_v0, 264  ;;  %1325 = vbcast.lane.b32.xlu0 %v1323_v0, 256  ;;  %v1361_v6 = vrot.slane %v8278_v63, %v8198_v45  ;;  %v653_v63 = vld [vmem:[#allocation2 + $0x8] sm:$0xff] }
 0x111   : > { %v7270_v19 = vpop.eup %7269  ;;  %v1882_v21 = vmul.f32 1.442695, %v1697_v10  ;;  %v1571_v22 = vmul.f32 %v1443_v11, %v1443_v11  ;;  %6733 = vmatprep.mubr.bf16.mxu1 %v2048_v17  ;;  %7064 = vmatpush3.bf16.msra.mxu0 %v7061_v50 }
 0x112   : > { %v1570_v23 = vmul.f32 %v1442_v12, %v1442_v12  ;;  %v7272_v24 = vpop.eup %7271  ;;  %v1880_v25 = vmul.f32 1.442695, %v1696_v16  ;;  %v1064_v26 = vpop.permute.xlu1 %1063  ;;  %v4008_v12 = vld [vmem:[%s8096_s21] sm:$0xff] }
 0x113   : > { %v1060_v27 = vpop.permute.xlu0 %1059  ;;  %7281 = vpow2.f32 %v1882_v21  ;;  %v1699_v29 = vmul.f32 -4.5, %v1571_v22  ;;  %v1445_v31 = vsub.f32 %v1064_v26, %v8325_v59  ;;  %v2049_v33 = vpack.c.bf16 %v7270_v19, %v7272_v24  ;;  %v652_v19 = vld [vmem:[#allocation2] sm:$0xff] }
 0x114   : > { %v1698_v30 = vmul.f32 -4.5, %v1570_v23  ;;  %7283 = vpow2.f32 %v1880_v25  ;;  %v1444_v32 = vsub.f32 %v1060_v27, %v8325_v59  ;;  %1337 = vbcast.lane.b32.xlu1 %v1323_v0, 280  ;;  %1333 = vbcast.lane.b32.xlu0 %v1323_v0, 272  ;;  %v4024_v21 = vpack.c.bf16 %v4009_v13, %v4008_v12 }
 0x115   : > { %v7274_v35 = vpop.eup %7273  ;;  %v1886_v37 = vmul.f32 1.442695, %v1699_v29  ;;  %v1573_v40 = vmul.f32 %v1445_v31, %v1445_v31  ;;  %6663 = vmatprep.mubr.f32.mxu0 %v652_v19 }
 0x116   : > { %v1884_v38 = vmul.f32 1.442695, %v1698_v30  ;;  %v7276_v46 = vpop.eup %7275  ;;  %v1572_v47 = vmul.f32 %v1444_v32, %v1444_v32  ;;  %v1072_v48 = vpop.permute.xlu1 %1071  ;;  %v8354_v32 = vld [vmem:[%s11338_s2] sm:$0xff]  ;;  %6664 = vmatmul.mubr.f32.vlgmr.msra.gmra.mrb[0].mxu0 %v653_v63  ;;  %6813 = vmatprep.subr.bf16.mxu0 %v4024_v21 }
 0x117   : > { %v1068_v49 = vpop.permute.xlu0 %1067  ;;  %7285 = vpow2.f32 %v1886_v37  ;;  %v1701_v51 = vmul.f32 -4.5, %v1573_v40  ;;  %6734 = vmatmul.mubr.bf16.gmra.mrb[48].mxu1 %v2049_v33  ;;  %v1447_v52 = vsub.f32 %v1072_v48, %v8325_v59  ;;  %v2050_v56 = vpack.c.bf16 %v7274_v35, %v7276_v46  ;;  %6814 = vmatpush3.bf16.msra.mxu0 %v4024_v21  ;;  %v4010_v48 = vld [vmem:[%s8096_s21 + $0x10] sm:$0xff] }
 0x118   : > { %v1446_v53 = vsub.f32 %v1068_v49, %v8325_v59  ;;  %7287 = vpow2.f32 %v1884_v38  ;;  %v1700_v54 = vmul.f32 -4.5, %v1572_v47  ;;  %1348 = vbcast.lane.b32.xlu1 %v1342_v34, 264  ;;  %1344 = vbcast.lane.b32.xlu0 %v1342_v34, 256  ;;  %v8360_v47 = vrot.slane %v8354_v32, %v8153_v15  ;;  %v4011_v49 = vld [vmem:[%s8096_s21 + $0x18] sm:$0xff] }
 0x119   : > { %v7278_v57 = vpop.eup %7277  ;;  %v1890_v58 = vmul.f32 1.442695, %v1701_v51  ;;  %v1575_v55 = vmul.f32 %v1447_v52, %v1447_v52  ;;  %6737 = vmatprep.mubr.bf16.mxu1 %v2050_v56  ;;  %v8379_v21 = vrot.slane %v8354_v32, %v8169_v28 }
 0x11a   : > { %v1574_v7 = vmul.f32 %v1446_v53, %v1446_v53  ;;  %v7280_v60 = vpop.eup %7279  ;;  %v1888_v61 = vmul.f32 1.442695, %v1700_v54  ;;  %v1083_v62 = vpop.permute.xlu1 %1082  ;;  %v4025_v54 = vpack.c.bf16 %v4011_v49, %v4010_v48 }
 0x11b   : > { %v1079_v0 = vpop.permute.xlu0 %1078  ;;  %7289 = vpow2.f32 %v1890_v58  ;;  %v1703_v1 = vmul.f32 -4.5, %v1575_v55  ;;  %v1449_v3 = vsub.f32 %v1083_v62, %v8325_v59  ;;  %v2051_v5 = vpack.c.bf16 %v7278_v57, %v7280_v60 }
 0x11c   : > { %v1702_v2 = vmul.f32 -4.5, %v1574_v7  ;;  %7291 = vpow2.f32 %v1888_v61  ;;  %v1448_v4 = vsub.f32 %v1079_v0, %v8325_v59  ;;  %1356 = vbcast.lane.b32.xlu1 %v1342_v34, 280  ;;  %1352 = vbcast.lane.b32.xlu0 %v1342_v34, 272 }
 0x11d   : > { %v7282_v8 = vpop.eup %7281  ;;  %v1894_v9 = vmul.f32 1.442695, %v1703_v1  ;;  %v1577_v11 = vmul.f32 %v1449_v3, %v1449_v3  ;;  %6815 = vmatprep.subr.bf16.mxu0 %v4025_v54  ;;  %v8369_v1 = vrot.slane %v8354_v32, %v8160_v20  ;;  %v4013_v3 = vld [vmem:[%s8096_s21 + $0x28] sm:$0xff] }
 0x11e   : > { %v1892_v10 = vmul.f32 1.442695, %v1702_v2  ;;  %v7284_v14 = vpop.eup %7283  ;;  %v1576_v16 = vmul.f32 %v1448_v4, %v1448_v4  ;;  %v1091_v17 = vpop.permute.xlu1 %1090  ;;  %6816 = vmatpush3.bf16.msra.mxu0 %v4025_v54  ;;  %v4012_v2 = vld [vmem:[%s8096_s21 + $0x20] sm:$0xff] }
 0x11f   : > { %v1087_v18 = vpop.permute.xlu0 %1086  ;;  %7293 = vpow2.f32 %v1894_v9  ;;  %v1705_v22 = vmul.f32 -4.5, %v1577_v11  ;;  %6738 = vmatmul.mubr.bf16.gmra.mrb[52].mxu1 %v2051_v5  ;;  %v1451_v23 = vsub.f32 %v1091_v17, %v8325_v59  ;;  %v2052_v26 = vpack.c.bf16 %v7282_v8, %v7284_v14 }
 0x120   : > { %v1450_v24 = vsub.f32 %v1087_v18, %v8325_v59  ;;  %7295 = vpow2.f32 %v1892_v10  ;;  %v1704_v25 = vmul.f32 -4.5, %v1576_v16  ;;  %1367 = vbcast.lane.b32.xlu1 %v1361_v6, 264  ;;  %1363 = vbcast.lane.b32.xlu0 %v1361_v6, 256  ;;  %v4026_v9 = vpack.c.bf16 %v4013_v3, %v4012_v2 }
 0x121   : > { %v7286_v27 = vpop.eup %7285  ;;  %v1898_v29 = vmul.f32 1.442695, %v1705_v22  ;;  %v1579_v30 = vmul.f32 %v1451_v23, %v1451_v23  ;;  %6741 = vmatprep.mubr.bf16.mxu1 %v2052_v26  ;;  %v8384_v22 = vld [vmem:[%s11338_s2 + $0x8] sm:$0xff]  ;;  %v4014_v26 = vld [vmem:[%s8096_s21 + $0x30] sm:$0xff] }
 0x122   : > { %v1578_v31 = vmul.f32 %v1450_v24, %v1450_v24  ;;  %v7288_v33 = vpop.eup %7287  ;;  %v1896_v34 = vmul.f32 1.442695, %v1704_v25  ;;  %v1102_v35 = vpop.permute.xlu1 %1101  ;;  %6817 = vmatprep.subr.bf16.mxu0 %v4026_v9 }
 0x123   : > { %v1098_v37 = vpop.permute.xlu0 %1097  ;;  %7297 = vpow2.f32 %v1898_v29  ;;  %v1707_v38 = vmul.f32 -4.5, %v1579_v30  ;;  %v1453_v42 = vsub.f32 %v1102_v35, %v8325_v59  ;;  %v2053_v46 = vpack.c.bf16 %v7286_v27, %v7288_v33  ;;  %6818 = vmatpush3.bf16.msra.mxu0 %v4026_v9  ;;  %v4015_v27 = vld [vmem:[%s8096_s21 + $0x38] sm:$0xff] }
 0x124   : > { %v1706_v40 = vmul.f32 -4.5, %v1578_v31  ;;  %7299 = vpow2.f32 %v1896_v34  ;;  %v1452_v44 = vsub.f32 %v1098_v37, %v8325_v59  ;;  %1375 = vbcast.lane.b32.xlu1 %v1361_v6, 280  ;;  %1371 = vbcast.lane.b32.xlu0 %v1361_v6, 272  ;;  %v4027_v34 = vpack.c.bf16 %v4015_v27, %v4014_v26 }
 0x125   : > { %v7290_v50 = vpop.eup %7289  ;;  %v1902_v51 = vmul.f32 1.442695, %v1707_v38  ;;  %v1581_v53 = vmul.f32 %v1453_v42, %v1453_v42 }
 0x126   : > { %v1900_v52 = vmul.f32 1.442695, %v1706_v40  ;;  %v7292_v56 = vpop.eup %7291  ;;  %v1580_v57 = vmul.f32 %v1452_v44, %v1452_v44  ;;  %v1110_v58 = vpop.permute.xlu1 %1109  ;;  %v8394_v44 = vrot.slane %v8384_v22, %v8153_v15  ;;  %6819 = vmatprep.subr.bf16.mxu0 %v4027_v34 }
 0x127   : > { %v1106_v55 = vpop.permute.xlu0 %1105  ;;  %7301 = vpow2.f32 %v1902_v51  ;;  %v1709_v7 = vmul.f32 -4.5, %v1581_v53  ;;  %6742 = vmatmul.mubr.bf16.gmra.mrb[56].mxu1 %v2053_v46  ;;  %v1455_v60 = vsub.f32 %v1110_v58, %v8325_v59  ;;  %v2054_v0 = vpack.c.bf16 %v7290_v50, %v7292_v56  ;;  %6820 = vmatpush3.bf16.msra.mxu0 %v4027_v34 }
 0x128   : > { %v1454_v61 = vsub.f32 %v1106_v55, %v8325_v59  ;;  %7303 = vpow2.f32 %v1900_v52  ;;  %v1708_v62 = vmul.f32 -4.5, %v1580_v57  ;;  %4593 = vbcast.lane.b32.xlu1 %v8360_v47, 264  ;;  %4589 = vbcast.lane.b32.xlu0 %v8360_v47, 256  ;;  %v8416_v34 = vrot.slane %v8354_v32, %v8178_v36 }
 0x129   : > { %v7294_v4 = vpop.eup %7293  ;;  %v1906_v5 = vmul.f32 1.442695, %v1709_v7  ;;  %v1583_v6 = vmul.f32 %v1455_v60, %v1455_v60  ;;  %6745 = vmatprep.mubr.bf16.mxu1 %v2054_v0  ;;  %v8402_v60 = vrot.slane %v8384_v22, %v8160_v20 }
 0x12a   : > { %v1582_v8 = vmul.f32 %v1454_v61, %v1454_v61  ;;  %v7296_v10 = vpop.eup %7295  ;;  %v1904_v11 = vmul.f32 1.442695, %v1708_v62  ;;  %v1121_v12 = vpop.permute.xlu1 %1120  ;;  %v4016_v61 = vld [vmem:[%s8096_s21 + $0x40] sm:$0xff]  ;;  %v4017_v62 = vld [vmem:[%s8096_s21 + $0x48] sm:$0xff]  ;;  %11417 = vst [vmem:[#allocation11_spill] sm:$0xff] %v8416_v34 }
 0x12b   : > { %v1117_v13 = vpop.permute.xlu0 %1116  ;;  %7305 = vpow2.f32 %v1906_v5  ;;  %v1711_v14 = vmul.f32 -4.5, %v1583_v6  ;;  %v1457_v17 = vsub.f32 %v1121_v12, %v8325_v59  ;;  %v2055_v19 = vpack.c.bf16 %v7294_v4, %v7296_v10 }
 0x12c   : > { %v1710_v16 = vmul.f32 -4.5, %v1582_v8  ;;  %7307 = vpow2.f32 %v1904_v11  ;;  %v1456_v18 = vsub.f32 %v1117_v13, %v8325_v59  ;;  %4612 = vbcast.lane.b32.xlu1 %v8369_v1, 264  ;;  %4608 = vbcast.lane.b32.xlu0 %v8369_v1, 256  ;;  %v4028_v5 = vpack.c.bf16 %v4017_v62, %v4016_v61  ;;  %v4021_v61 = vld [vmem:[%s8096_s21 + $0x68] sm:$0xff] }
 0x12d   : > { %v7298_v23 = vpop.eup %7297  ;;  %v1910_v24 = vmul.f32 1.442695, %v1711_v14  ;;  %v1585_v25 = vmul.f32 %v1457_v17, %v1457_v17 }
 0x12e   : > { %v1908_v63 = vmul.f32 1.442695, %v1710_v16  ;;  %v7300_v29 = vpop.eup %7299  ;;  %v1584_v30 = vmul.f32 %v1456_v18, %v1456_v18  ;;  %v1129_v31 = vpop.permute.xlu1 %1128  ;;  %6821 = vmatprep.subr.bf16.mxu0 %v4028_v5 }
 0x12f   : > { %v1125_v33 = vpop.permute.xlu0 %1124  ;;  %7309 = vpow2.f32 %v1910_v24  ;;  %v1713_v35 = vmul.f32 -4.5, %v1585_v25  ;;  %6746 = vmatmul.mubr.bf16.gmra.mrb[60].mxu1 %v2055_v19  ;;  %v1459_v37 = vsub.f32 %v1129_v31, %v8325_v59  ;;  %v2056_v42 = vpack.c.bf16 %v7298_v23, %v7300_v29  ;;  %6822 = vmatpush3.bf16.msra.mxu0 %v4028_v5 }
 0x130   : > { %v1458_v38 = vsub.f32 %v1125_v33, %v8325_v59  ;;  %7311 = vpow2.f32 %v1908_v63  ;;  %v1712_v40 = vmul.f32 -4.5, %v1584_v30  ;;  %4631 = vbcast.lane.b32.xlu1 %v8379_v21, 264  ;;  %4627 = vbcast.lane.b32.xlu0 %v8379_v21, 256 }
 0x131   : > { %v7302_v46 = vpop.eup %7301  ;;  %v1914_v48 = vmul.f32 1.442695, %v1713_v35  ;;  %v1587_v49 = vmul.f32 %v1459_v37, %v1459_v37  ;;  %6749 = vmatprep.mubr.bf16.mxu1 %v2056_v42  ;;  %v4018_v35 = vld [vmem:[%s8096_s21 + $0x50] sm:$0xff]  ;;  %v4019_v37 = vld [vmem:[%s8096_s21 + $0x58] sm:$0xff] }
 0x132   : > { %v1586_v50 = vmul.f32 %v1458_v38, %v1458_v38  ;;  %v7304_v51 = vpop.eup %7303  ;;  %v1912_v52 = vmul.f32 1.442695, %v1712_v40  ;;  %v1140_v53 = vpop.permute.xlu1 %1139 }
 0x133   : > { %v1136_v54 = vpop.permute.xlu0 %1135  ;;  %7313 = vpow2.f32 %v1914_v48  ;;  %v1715_v56 = vmul.f32 -4.5, %v1587_v49  ;;  %v1461_v58 = vsub.f32 %v1140_v53, %v8325_v59  ;;  %v2057_v7 = vpack.c.bf16 %v7302_v46, %v7304_v51 }
 0x134   : > { %v1714_v57 = vmul.f32 -4.5, %v1586_v50  ;;  %7315 = vpow2.f32 %v1912_v52  ;;  %v1460_v55 = vsub.f32 %v1136_v54, %v8325_v59  ;;  %4745 = vbcast.lane.b32.xlu1 %v8394_v44, 264  ;;  %4741 = vbcast.lane.b32.xlu0 %v8394_v44, 256  ;;  %v4029_v48 = vpack.c.bf16 %v4019_v37, %v4018_v35 }
 0x135   : > { %v7306_v0 = vpop.eup %7305  ;;  %v1918_v2 = vmul.f32 1.442695, %v1715_v56  ;;  %v1589_v4 = vmul.f32 %v1461_v58, %v1461_v58 }
 0x136   : > { %v1916_v3 = vmul.f32 1.442695, %v1714_v57  ;;  %v7308_v6 = vpop.eup %7307  ;;  %v1588_v8 = vmul.f32 %v1460_v55, %v1460_v55  ;;  %v1148_v9 = vpop.permute.xlu1 %1147  ;;  %6823 = vmatprep.subr.bf16.mxu0 %v4029_v48  ;;  %v8426_v55 = vrot.slane %v8384_v22, %v8169_v28 }
 0x137   : > { %v1144_v10 = vpop.permute.xlu0 %1143  ;;  %7317 = vpow2.f32 %v1918_v2  ;;  %v1717_v11 = vmul.f32 -4.5, %v1589_v4  ;;  %6750 = vmatmul.mubr.bf16.gmra.mrb[64].mxu1 %v2057_v7  ;;  %v1463_v12 = vsub.f32 %v1148_v9, %v8325_v59  ;;  %v2058_v16 = vpack.c.bf16 %v7306_v0, %v7308_v6  ;;  %6824 = vmatpush3.bf16.msra.mxu0 %v4029_v48  ;;  %v4020_v7 = vld [vmem:[%s8096_s21 + $0x60] sm:$0xff] }
 0x138   : > { %v1462_v13 = vsub.f32 %v1144_v10, %v8325_v59  ;;  %7319 = vpow2.f32 %v1916_v3  ;;  %v1716_v14 = vmul.f32 -4.5, %v1588_v8  ;;  %4764 = vbcast.lane.b32.xlu1 %v8402_v60, 264  ;;  %4760 = vbcast.lane.b32.xlu0 %v8402_v60, 256  ;;  %11418 = vst [vmem:[#allocation12_spill] sm:$0xff] %v8426_v55  ;;  %v4030_v4 = vpack.c.bf16 %v4021_v61, %v4020_v7 }
 0x139   : > { %v7310_v17 = vpop.eup %7309  ;;  %v1922_v18 = vmul.f32 1.442695, %v1717_v11  ;;  %v1591_v19 = vmul.f32 %v1463_v12, %v1463_v12  ;;  %6753 = vmatprep.mubr.bf16.mxu1 %v2058_v16  ;;  %v8436_v16 = vrot.slane %v8354_v32, %v8183_v39 }
 0x13a   : > { %v1590_v23 = vmul.f32 %v1462_v13, %v1462_v13  ;;  %v7312_v24 = vpop.eup %7311  ;;  %v1920_v63 = vmul.f32 1.442695, %v1716_v14  ;;  %v1159_v25 = vpop.permute.xlu1 %1158  ;;  %6825 = vmatprep.subr.bf16.mxu0 %v4030_v4 }
 0x13b   : > { %v1155_v26 = vpop.permute.xlu0 %1154  ;;  %7321 = vpow2.f32 %v1922_v18  ;;  %v1719_v27 = vmul.f32 -4.5, %v1591_v19  ;;  %v1465_v30 = vsub.f32 %v1159_v25, %v8325_v59  ;;  %v2059_v33 = vpack.c.bf16 %v7310_v17, %v7312_v24  ;;  %11419 = vst [vmem:[#allocation13_spill] sm:$0xff] %v8436_v16  ;;  %6826 = vmatpush3.bf16.msra.mxu0 %v4030_v4  ;;  %v654_v17 = vld [vmem:[#allocation2 + $0x10] sm:$0xff]  ;;  %v4023_v19 = vld [vmem:[%s8096_s21 + $0x78] sm:$0xff] }
 0x13c   : > { %v1718_v29 = vmul.f32 -4.5, %v1590_v23  ;;  %7323 = vpow2.f32 %v1920_v63  ;;  %v1464_v31 = vsub.f32 %v1155_v26, %v8325_v59  ;;  %4616 = vbcast.lane.b32.xlu1 %v8369_v1, 272  ;;  %4597 = vbcast.lane.b32.xlu0 %v8360_v47, 272  ;;  %v4022_v18 = vld [vmem:[%s8096_s21 + $0x70] sm:$0xff]  ;;  %v655_v26 = vld [vmem:[#allocation2 + $0x18] sm:$0xff] }
 0x13d   : > { %v7314_v38 = vpop.eup %7313  ;;  %v1926_v40 = vmul.f32 1.442695, %v1719_v27  ;;  %v1593_v46 = vmul.f32 %v1465_v30, %v1465_v30  ;;  %6666 = vmatprep.mubr.f32.mxu0 %v654_v17  ;;  %v4031_v27 = vpack.c.bf16 %v4023_v19, %v4022_v18 }
 0x13e   : > { %v1924_v42 = vmul.f32 1.442695, %v1718_v29  ;;  %v7316_v49 = vpop.eup %7315  ;;  %v1592_v50 = vmul.f32 %v1464_v31, %v1464_v31  ;;  %v1167_v51 = vpop.permute.xlu1 %1166  ;;  %6667 = vmatmul.mubr.f32.gmra.mrb[2].mxu0 %v655_v26 }
 0x13f   : > { %v1163_v52 = vpop.permute.xlu0 %1162  ;;  %7325 = vpow2.f32 %v1926_v40  ;;  %v1721_v53 = vmul.f32 -4.5, %v1593_v46  ;;  %6754 = vmatmul.mubr.bf16.gmra.mrb[68].mxu1 %v2059_v33  ;;  %v1467_v54 = vsub.f32 %v1167_v51, %v8325_v59  ;;  %v2060_v58 = vpack.c.bf16 %v7314_v38, %v7316_v49  ;;  %6827 = vmatprep.subr.bf16.mxu0 %v4031_v27 }
 0x140   : > { %v1466_v56 = vsub.f32 %v1163_v52, %v8325_v59  ;;  %7327 = vpow2.f32 %v1924_v42  ;;  %v1720_v57 = vmul.f32 -4.5, %v1592_v50  ;;  %4650 = vbcast.lane.b32.xlu1 %v8416_v34, 264  ;;  %4646 = vbcast.lane.b32.xlu0 %v8416_v34, 256 }
 0x141   : > { %v7318_v62 = vpop.eup %7317  ;;  %v1930_v0 = vmul.f32 1.442695, %v1721_v53  ;;  %v1595_v2 = vmul.f32 %v1467_v54, %v1467_v54  ;;  %6757 = vmatprep.mubr.bf16.mxu1 %v2060_v58  ;;  %6828 = vmatpush3.bf16.msra.mxu0 %v4031_v27 }
 0x142   : > { %v1594_v3 = vmul.f32 %v1466_v56, %v1466_v56  ;;  %v7320_v5 = vpop.eup %7319  ;;  %v1928_v6 = vmul.f32 1.442695, %v1720_v57  ;;  %v1178_v8 = vpop.permute.xlu1 %1177 }
 0x143   : > { %v1174_v9 = vpop.permute.xlu0 %1173  ;;  %7329 = vpow2.f32 %v1930_v0  ;;  %v1723_v10 = vmul.f32 -4.5, %v1595_v2  ;;  %v1469_v12 = vsub.f32 %v1178_v8, %v8325_v59  ;;  %v2061_v14 = vpack.c.bf16 %v7318_v62, %v7320_v5 }
 0x144   : > { %v1722_v11 = vmul.f32 -4.5, %v1594_v3  ;;  %7331 = vpow2.f32 %v1928_v6  ;;  %v1468_v13 = vsub.f32 %v1174_v9, %v8325_v59  ;;  %4783 = vbcast.lane.b32.xlu1 %v8426_v55, 264  ;;  %4779 = vbcast.lane.b32.xlu0 %v8426_v55, 256  ;;  %v8450_v62 = vrot.slane %v8384_v22, %v8178_v36 }
 0x145   : > { %v7322_v23 = vpop.eup %7321  ;;  %v1934_v24 = vmul.f32 1.442695, %v1723_v10  ;;  %v1597_v25 = vmul.f32 %v1469_v12, %v1469_v12 }
 0x146   : > { %v1932_v63 = vmul.f32 1.442695, %v1722_v11  ;;  %v7324_v29 = vpop.eup %7323  ;;  %v1596_v30 = vmul.f32 %v1468_v13, %v1468_v13  ;;  %v1186_v31 = vpop.permute.xlu1 %1185  ;;  %11420 = vst [vmem:[#allocation14_spill] sm:$0xff] %v8450_v62 }
 0x147   : > { %v1182_v33 = vpop.permute.xlu0 %1181  ;;  %7333 = vpow2.f32 %v1934_v24  ;;  %v1725_v35 = vmul.f32 -4.5, %v1597_v25  ;;  %6758 = vmatmul.mubr.bf16.gmra.mrb[72].mxu1 %v2061_v14  ;;  %v1471_v37 = vsub.f32 %v1186_v31, %v8325_v59  ;;  %v2062_v42 = vpack.c.bf16 %v7322_v23, %v7324_v29 }
 0x148   : > { %v1470_v38 = vsub.f32 %v1182_v33, %v8325_v59  ;;  %7335 = vpow2.f32 %v1932_v63  ;;  %v1724_v40 = vmul.f32 -4.5, %v1596_v30  ;;  %4665 = vbcast.lane.b32.xlu1 %v8436_v16, 256  ;;  %4635 = vbcast.lane.b32.xlu0 %v8379_v21, 272 }
 0x149   : > { %v7326_v46 = vpop.eup %7325  ;;  %v1938_v48 = vmul.f32 1.442695, %v1725_v35  ;;  %v1599_v49 = vmul.f32 %v1471_v37, %v1471_v37  ;;  %6761 = vmatprep.mubr.bf16.mxu1 %v2062_v42 }
 0x14a   : > { %v1598_v50 = vmul.f32 %v1470_v38, %v1470_v38  ;;  %v7328_v51 = vpop.eup %7327  ;;  %v1936_v52 = vmul.f32 1.442695, %v1724_v40  ;;  %v1197_v53 = vpop.permute.xlu1 %1196 }
 0x14b   : > { %v1193_v54 = vpop.permute.xlu0 %1192  ;;  %7337 = vpow2.f32 %v1938_v48  ;;  %v1727_v56 = vmul.f32 -4.5, %v1599_v49  ;;  %v1473_v58 = vsub.f32 %v1197_v53, %v8325_v59  ;;  %v2063_v61 = vpack.c.bf16 %v7326_v46, %v7328_v51 }
 0x14c   : > { %v1726_v57 = vmul.f32 -4.5, %v1598_v50  ;;  %7339 = vpow2.f32 %v1936_v52  ;;  %v1472_v7 = vsub.f32 %v1193_v54, %v8325_v59  ;;  %4749 = vbcast.lane.b32.xlu1 %v8394_v44, 272  ;;  %4669 = vbcast.lane.b32.xlu0 %v8436_v16, 264 }
 0x14d   : > { %v7330_v0 = vpop.eup %7329  ;;  %v1942_v2 = vmul.f32 1.442695, %v1727_v56  ;;  %v1601_v4 = vmul.f32 %v1473_v58, %v1473_v58 }
 0x14e   : > { %v1940_v3 = vmul.f32 1.442695, %v1726_v57  ;;  %v7332_v5 = vpop.eup %7331  ;;  %v1600_v6 = vmul.f32 %v1472_v7, %v1472_v7  ;;  %v1205_v8 = vpop.permute.xlu1 %1204 }
 0x14f   : > { %v1201_v9 = vpop.permute.xlu0 %1200  ;;  %7341 = vpow2.f32 %v1942_v2  ;;  %v1729_v10 = vmul.f32 -4.5, %v1601_v4  ;;  %6762 = vmatmul.mubr.bf16.gmra.mrb[76].mxu1 %v2063_v61  ;;  %v1475_v11 = vsub.f32 %v1205_v8, %v8325_v59  ;;  %v2064_v14 = vpack.c.bf16 %v7330_v0, %v7332_v5 }
 0x150   : > { %v1474_v12 = vsub.f32 %v1201_v9, %v8325_v59  ;;  %7343 = vpow2.f32 %v1940_v3  ;;  %v1728_v13 = vmul.f32 -4.5, %v1600_v6  ;;  %4798 = vbcast.lane.b32.xlu1 %v8450_v62, 256  ;;  %4768 = vbcast.lane.b32.xlu0 %v8402_v60, 272  ;;  %v8469_v9 = vrot.slane %v8354_v32, %v8188_v41 }
 0x151   : > { %v7334_v17 = vpop.eup %7333  ;;  %v1946_v18 = vmul.f32 1.442695, %v1729_v10  ;;  %v1603_v19 = vmul.f32 %v1475_v11, %v1475_v11  ;;  %6765 = vmatprep.mubr.bf16.mxu1 %v2064_v14 }
 0x152   : > { %v1602_v23 = vmul.f32 %v1474_v12, %v1474_v12  ;;  %v7336_v24 = vpop.eup %7335  ;;  %v1944_v63 = vmul.f32 1.442695, %v1728_v13  ;;  %v1216_v25 = vpop.permute.xlu1 %1215  ;;  %11421 = vst [vmem:[#allocation15_spill] sm:$0xff] %v8469_v9 }
 0x153   : > { %v1212_v26 = vpop.permute.xlu0 %1211  ;;  %7345 = vpow2.f32 %v1946_v18  ;;  %v1731_v27 = vmul.f32 -4.5, %v1603_v19  ;;  %v1477_v30 = vsub.f32 %v1216_v25, %v8325_v59  ;;  %v2065_v33 = vpack.c.bf16 %v7334_v17, %v7336_v24 }
 0x154   : > { %v1730_v29 = vmul.f32 -4.5, %v1602_v23  ;;  %7347 = vpow2.f32 %v1944_v63  ;;  %v1476_v31 = vsub.f32 %v1212_v26, %v8325_v59  ;;  %4601 = vbcast.lane.b32.xlu1 %v8360_v47, 280  ;;  %4802 = vbcast.lane.b32.xlu0 %v8450_v62, 264  ;;  %v8477_v26 = vrot.slane %v8384_v22, %v8183_v39 }
 0x155   : > { %v7338_v35 = vpop.eup %7337  ;;  %v1950_v37 = vmul.f32 1.442695, %v1731_v27  ;;  %v1605_v40 = vmul.f32 %v1477_v30, %v1477_v30 }
 0x156   : > { %v1948_v38 = vmul.f32 1.442695, %v1730_v29  ;;  %v7340_v42 = vpop.eup %7339  ;;  %v1604_v46 = vmul.f32 %v1476_v31, %v1476_v31  ;;  %v1224_v48 = vpop.permute.xlu1 %1223  ;;  %11422 = vst [vmem:[#allocation16_spill] sm:$0xff] %v8477_v26 }
 0x157   : > { %v1220_v49 = vpop.permute.xlu0 %1219  ;;  %7349 = vpow2.f32 %v1950_v37  ;;  %v1733_v50 = vmul.f32 -4.5, %v1605_v40  ;;  %6766 = vmatmul.mubr.bf16.gmra.mrb[80].mxu1 %v2065_v33  ;;  %v1479_v51 = vsub.f32 %v1224_v48, %v8325_v59  ;;  %v2066_v47 = vpack.c.bf16 %v7338_v35, %v7340_v42 }
 0x158   : > { %v1478_v52 = vsub.f32 %v1220_v49, %v8325_v59  ;;  %7351 = vpow2.f32 %v1948_v38  ;;  %v1732_v53 = vmul.f32 -4.5, %v1604_v46  ;;  %4654 = vbcast.lane.b32.xlu1 %v8416_v34, 272  ;;  %4620 = vbcast.lane.b32.xlu0 %v8369_v1, 280 }
 0x159   : > { %v7342_v54 = vpop.eup %7341  ;;  %v1954_v56 = vmul.f32 1.442695, %v1733_v50  ;;  %v1607_v57 = vmul.f32 %v1479_v51, %v1479_v51  ;;  %6769 = vmatprep.mubr.bf16.mxu1 %v2066_v47 }
 0x15a   : > { %v1606_v58 = vmul.f32 %v1478_v52, %v1478_v52  ;;  %v7344_v7 = vpop.eup %7343  ;;  %v1952_v61 = vmul.f32 1.442695, %v1732_v53  ;;  %v1235_v0 = vpop.permute.xlu1 %1234 }
 0x15b   : > { %v1231_v2 = vpop.permute.xlu0 %1230  ;;  %7353 = vpow2.f32 %v1954_v56  ;;  %v1735_v3 = vmul.f32 -4.5, %v1607_v57  ;;  %v1481_v5 = vsub.f32 %v1235_v0, %v8325_v59  ;;  %v2067_v8 = vpack.c.bf16 %v7342_v54, %v7344_v7 }
 0x15c   : > { %v1734_v4 = vmul.f32 -4.5, %v1606_v58  ;;  %7355 = vpow2.f32 %v1952_v61  ;;  %v1480_v6 = vsub.f32 %v1231_v2, %v8325_v59  ;;  %4688 = vbcast.lane.b32.xlu1 %v8469_v9, 264  ;;  %4684 = vbcast.lane.b32.xlu0 %v8469_v9, 256 }
 0x15d   : > { %v7346_v10 = vpop.eup %7345  ;;  %v1958_v11 = vmul.f32 1.442695, %v1735_v3  ;;  %v1609_v13 = vmul.f32 %v1481_v5, %v1481_v5  ;;  %v767_v3 = vld [vmem:[%s11338_s2 + $0x10] sm:$0xff] }
 0x15e   : > { %v1956_v12 = vmul.f32 1.442695, %v1734_v4  ;;  %v7348_v14 = vpop.eup %7347  ;;  %v1608_v17 = vmul.f32 %v1480_v6, %v1480_v6  ;;  %v1243_v1 = vpop.permute.xlu1 %1242 }
 0x15f   : > { %v1239_v18 = vpop.permute.xlu0 %1238  ;;  %7357 = vpow2.f32 %v1958_v11  ;;  %v1737_v19 = vmul.f32 -4.5, %v1609_v13  ;;  %6770 = vmatmul.mubr.bf16.gmra.mrb[84].mxu1 %v2067_v8  ;;  %v1483_v23 = vsub.f32 %v1243_v1, %v8325_v59  ;;  %v2068_v25 = vpack.c.bf16 %v7346_v10, %v7348_v14 }
 0x160   : > { %v1482_v24 = vsub.f32 %v1239_v18, %v8325_v59  ;;  %7359 = vpow2.f32 %v1956_v12  ;;  %v1736_v63 = vmul.f32 -4.5, %v1608_v17  ;;  %4817 = vbcast.lane.b32.xlu1 %v8477_v26, 256  ;;  %4787 = vbcast.lane.b32.xlu0 %v8426_v55, 272  ;;  %v8490_v10 = vrot.slane %v767_v3, %v8153_v15 }
 0x161   : > { %v7350_v27 = vpop.eup %7349  ;;  %v1962_v29 = vmul.f32 1.442695, %v1737_v19  ;;  %v1611_v30 = vmul.f32 %v1483_v23, %v1483_v23  ;;  %6773 = vmatprep.mubr.bf16.mxu1 %v2068_v25 }
 0x162   : > { %v1610_v31 = vmul.f32 %v1482_v24, %v1482_v24  ;;  %v7352_v33 = vpop.eup %7351  ;;  %v1960_v35 = vmul.f32 1.442695, %v1736_v63  ;;  %v1254_v37 = vpop.permute.xlu1 %1253  ;;  %11423 = vst [vmem:[#allocation17_spill] sm:$0xff] %v8490_v10 }
 0x163   : > { %v1250_v38 = vpop.permute.xlu0 %1249  ;;  %7361 = vpow2.f32 %v1962_v29  ;;  %v1739_v40 = vmul.f32 -4.5, %v1611_v30  ;;  %v1485_v46 = vsub.f32 %v1254_v37, %v8325_v59  ;;  %v2069_v49 = vpack.c.bf16 %v7350_v27, %v7352_v33 }
 0x164   : > { %v1738_v42 = vmul.f32 -4.5, %v1610_v31  ;;  %7363 = vpow2.f32 %v1960_v35  ;;  %v1484_v48 = vsub.f32 %v1250_v38, %v8325_v59  ;;  %4821 = vbcast.lane.b32.xlu0 %v8477_v26, 264  ;;  %4893 = vbcast.lane.b32.xlu1 %v8490_v10, 256  ;;  %v8497_v29 = vrot.slane %v767_v3, %v8160_v20  ;;  %v8502_v38 = vld [vmem:[%s11339_s3] ss:$0 sm:$0xff] }
 0x165   : > { %v7354_v50 = vpop.eup %7353  ;;  %v1966_v51 = vmul.f32 1.442695, %v1739_v40  ;;  %v1613_v53 = vmul.f32 %v1485_v46, %v1485_v46 }
 0x166   : > { %v1964_v52 = vmul.f32 1.442695, %v1738_v42  ;;  %v7356_v47 = vpop.eup %7355  ;;  %v1612_v54 = vmul.f32 %v1484_v48, %v1484_v48  ;;  %v1262_v56 = vpop.permute.xlu1 %1261  ;;  %11424 = vst [vmem:[#allocation18_spill] sm:$0xff] %v8497_v29 }
 0x167   : > { %v1258_v57 = vpop.permute.xlu0 %1257  ;;  %7365 = vpow2.f32 %v1966_v51  ;;  %v1741_v58 = vmul.f32 -4.5, %v1613_v53  ;;  %6774 = vmatmul.mubr.bf16.gmra.mrb[88].mxu1 %v2069_v49  ;;  %v1487_v7 = vsub.f32 %v1262_v56, %v8325_v59  ;;  %v2070_v2 = vpack.c.bf16 %v7354_v50, %v7356_v47 }
 0x168   : > { %v1486_v61 = vsub.f32 %v1258_v57, %v8325_v59  ;;  %7367 = vpow2.f32 %v1964_v52  ;;  %v1740_v0 = vmul.f32 -4.5, %v1612_v54  ;;  %4897 = vbcast.lane.b32.xlu0 %v8490_v10, 264  ;;  %4912 = vbcast.lane.b32.xlu1 %v8497_v29, 256 }
 0x169   : > { %v7358_v4 = vpop.eup %7357  ;;  %v1970_v5 = vmul.f32 1.442695, %v1741_v58  ;;  %v1615_v6 = vmul.f32 %v1487_v7, %v1487_v7  ;;  %6777 = vmatprep.mubr.bf16.mxu1 %v2070_v2 }
 0x16a   : > { %v1614_v8 = vmul.f32 %v1486_v61, %v1486_v61  ;;  %v7360_v11 = vpop.eup %7359  ;;  %v1968_v12 = vmul.f32 1.442695, %v1740_v0  ;;  %v1273_v13 = vpop.permute.xlu1 %1272 }
 0x16b   : > { %v1269_v14 = vpop.permute.xlu0 %1268  ;;  %7369 = vpow2.f32 %v1970_v5  ;;  %v1743_v17 = vmul.f32 -4.5, %v1615_v6  ;;  %v1489_v18 = vsub.f32 %v1273_v13, %v8325_v59  ;;  %v2071_v23 = vpack.c.bf16 %v7358_v4, %v7360_v11 }
 0x16c   : > { %v1742_v1 = vmul.f32 -4.5, %v1614_v8  ;;  %7371 = vpow2.f32 %v1968_v12  ;;  %v1488_v19 = vsub.f32 %v1269_v14, %v8325_v59  ;;  %4916 = vbcast.lane.b32.xlu0 %v8497_v29, 264  ;;  %4639 = vbcast.lane.b32.xlu1 %v8379_v21, 280 }
 0x16d   : > { %v7362_v24 = vpop.eup %7361  ;;  %v1974_v63 = vmul.f32 1.442695, %v1743_v17  ;;  %v1617_v27 = vmul.f32 %v1489_v18, %v1489_v18 }
 0x16e   : > { %v1972_v25 = vmul.f32 1.442695, %v1742_v1  ;;  %v7364_v30 = vpop.eup %7363  ;;  %v1616_v31 = vmul.f32 %v1488_v19, %v1488_v19  ;;  %v1281_v33 = vpop.permute.xlu1 %1280  ;;  %v8516_v1 = vrot.slane %v8354_v32, %v8193_v43 }
 0x16f   : > { %v1277_v35 = vpop.permute.xlu0 %1276  ;;  %7373 = vpow2.f32 %v1974_v63  ;;  %v1745_v37 = vmul.f32 -4.5, %v1617_v27  ;;  %6778 = vmatmul.mubr.bf16.gmra.mrb[92].mxu1 %v2071_v23  ;;  %v1491_v59 = vsub.f32 %v1281_v33, %v8502_v38  ;;  %v2072_v46 = vpack.c.bf16 %v7362_v24, %v7364_v30 }
 0x170   : > { %v1490_v40 = vsub.f32 %v1277_v35, %v8502_v38  ;;  %7375 = vpow2.f32 %v1972_v25  ;;  %v1744_v42 = vmul.f32 -4.5, %v1616_v31  ;;  %4673 = vbcast.lane.b32.xlu0 %v8436_v16, 272  ;;  %11425 = vst [vmem:[#allocation19_spill] sm:$0xff] %v8516_v1  ;;  %4703 = vbcast.lane.b32.xlu1 %v8516_v1, 256 }
 0x171   : > { %v7366_v48 = vpop.eup %7365  ;;  %v1978_v49 = vmul.f32 1.442695, %v1745_v37  ;;  %v1619_v50 = vmul.f32 %v1491_v59, %v1491_v59  ;;  %6781 = vmatprep.mubr.bf16.mxu1 %v2072_v46 }
 0x172   : > { %v1618_v51 = vmul.f32 %v1490_v40, %v1490_v40  ;;  %v7368_v52 = vpop.eup %7367  ;;  %v1976_v53 = vmul.f32 1.442695, %v1744_v42  ;;  %v1292_v47 = vpop.permute.xlu1 %1291 }
 0x173   : > { %v1288_v54 = vpop.permute.xlu0 %1287  ;;  %7377 = vpow2.f32 %v1978_v49  ;;  %v1747_v56 = vmul.f32 -4.5, %v1619_v50  ;;  %v1493_v58 = vsub.f32 %v1292_v47, %v8502_v38  ;;  %v2073_v61 = vpack.c.bf16 %v7366_v48, %v7368_v52 }
 0x174   : > { %v1746_v57 = vmul.f32 -4.5, %v1618_v51  ;;  %7379 = vpow2.f32 %v1976_v53  ;;  %v1492_v7 = vsub.f32 %v1288_v54, %v8502_v38  ;;  %4707 = vbcast.lane.b32.xlu0 %v8516_v1, 264  ;;  %4753 = vbcast.lane.b32.xlu1 %v8394_v44, 280 }
 0x175   : > { %v7370_v0 = vpop.eup %7369  ;;  %v1982_v2 = vmul.f32 1.442695, %v1747_v56  ;;  %v1621_v4 = vmul.f32 %v1493_v58, %v1493_v58 }
 0x176   : > { %v1980_v3 = vmul.f32 1.442695, %v1746_v57  ;;  %v7372_v5 = vpop.eup %7371  ;;  %v1620_v6 = vmul.f32 %v1492_v7, %v1492_v7  ;;  %v1300_v8 = vpop.permute.xlu1 %1299 }
 0x177   : > { %v1296_v11 = vpop.permute.xlu0 %1295  ;;  %7381 = vpow2.f32 %v1982_v2  ;;  %v1749_v12 = vmul.f32 -4.5, %v1621_v4  ;;  %6782 = vmatmul.mubr.bf16.gmra.mrb[96].mxu1 %v2073_v61  ;;  %v1495_v13 = vsub.f32 %v1300_v8, %v8502_v38  ;;  %v2074_v17 = vpack.c.bf16 %v7370_v0, %v7372_v5 }
 0x178   : > { %v1494_v21 = vsub.f32 %v1296_v11, %v8502_v38  ;;  %7383 = vpow2.f32 %v1980_v3  ;;  %v1748_v14 = vmul.f32 -4.5, %v1620_v6  ;;  %4772 = vbcast.lane.b32.xlu0 %v8402_v60, 280  ;;  %4806 = vbcast.lane.b32.xlu1 %v8450_v62, 272 }
 0x179   : > { %v7374_v18 = vpop.eup %7373  ;;  %v1986_v19 = vmul.f32 1.442695, %v1749_v12  ;;  %v1623_v23 = vmul.f32 %v1495_v13, %v1495_v13  ;;  %6785 = vmatprep.mubr.bf16.mxu1 %v2074_v17 }
 0x17a   : > { %v1622_v24 = vmul.f32 %v1494_v21, %v1494_v21  ;;  %v7376_v63 = vpop.eup %7375  ;;  %v1984_v25 = vmul.f32 1.442695, %v1748_v14  ;;  %v1311_v27 = vpop.permute.xlu1 %1310 }
 0x17b   : > { %v1307_v30 = vpop.permute.xlu0 %1306  ;;  %7385 = vpow2.f32 %v1986_v19  ;;  %v1497_v31 = vsub.f32 %v1311_v27, %v8502_v38  ;;  %v1751_v33 = vmul.f32 -4.5, %v1623_v23  ;;  %v2075_v35 = vpack.c.bf16 %v7374_v18, %v7376_v63  ;;  %v8532_v27 = vld [vmem:[%s8086_s15] ss:$0 sm:$0xff] }
 0x17c   : > { %7387 = vpow2.f32 %v1984_v25  ;;  %v1496_v32 = vsub.f32 %v1307_v30, %v8502_v38  ;;  %v1750_v59 = vmul.f32 -4.5, %v1622_v24 }
 0x17d   : > { %v7378_v37 = vpop.eup %7377  ;;  %v1625_v40 = vmul.f32 %v1497_v31, %v1497_v31  ;;  %v1990_v53 = vmul.f32 1.442695, %v1751_v33 }
 0x17e   : > { %v7380_v42 = vpop.eup %7379  ;;  %v1624_v46 = vmul.f32 %v1496_v32, %v1496_v32  ;;  %v1319_v48 = vpop.permute.xlu1 %1318  ;;  %v1988_v57 = vmul.f32 1.442695, %v1750_v59 }
 0x17f   : > { %v1315_v49 = vpop.permute.xlu0 %1314  ;;  %v1753_v50 = vmul.f32 -4.5, %v1625_v40  ;;  %6786 = vmatmul.mubr.bf16.gmra.mrb[100].mxu1 %v2075_v35  ;;  %v1499_v51 = vsub.f32 %v1319_v48, %v8502_v38  ;;  %v2076_v54 = vpack.c.bf16 %v7378_v37, %v7380_v42  ;;  %7389 = vpow2.f32 %v1990_v53 }
 0x180   : > { %v1498_v52 = vsub.f32 %v1315_v49, %v8502_v38  ;;  %v1752_v47 = vmul.f32 -4.5, %v1624_v46  ;;  %7391 = vpow2.f32 %v1988_v57  ;;  %v8536_v40 = vrot.slane %v8384_v22, %v8188_v41 }
 0x181   : > { %v7382_v56 = vpop.eup %7381  ;;  %v1627_v58 = vmul.f32 %v1499_v51, %v1499_v51  ;;  %v1994_v0 = vmul.f32 1.442695, %v1753_v50  ;;  %6789 = vmatprep.mubr.bf16.mxu1 %v2076_v54 }
 0x182   : > { %v1626_v7 = vmul.f32 %v1498_v52, %v1498_v52  ;;  %v7384_v61 = vpop.eup %7383  ;;  %v1330_v2 = vpop.permute.xlu1 %1329  ;;  %v1992_v3 = vmul.f32 1.442695, %v1752_v47  ;;  %11426 = vst [vmem:[#allocation20_spill] sm:$0xff] %v8536_v40  ;;  %4840 = vbcast.lane.b32.xlu1 %v8536_v40, 264  ;;  %4836 = vbcast.lane.b32.xlu0 %v8536_v40, 256 }
 0x183   : > { %v1326_v44 = vpop.permute.xlu0 %1325  ;;  %v1755_v4 = vmul.f32 -4.5, %v1627_v58  ;;  %v1501_v6 = vsub.f32 %v1330_v2, %v8502_v38  ;;  %v2077_v8 = vpack.c.bf16 %v7382_v56, %v7384_v61  ;;  %7393 = vpow2.f32 %v1994_v0 }
 0x184   : > { %v1754_v5 = vmul.f32 -4.5, %v1626_v7  ;;  %v1500_v60 = vsub.f32 %v1326_v44, %v8502_v38  ;;  %7395 = vpow2.f32 %v1992_v3 }
 0x185   : > { %v7386_v11 = vpop.eup %7385  ;;  %v1998_v12 = vmul.f32 1.442695, %v1755_v4  ;;  %v1629_v13 = vmul.f32 %v1501_v6, %v1501_v6 }
 0x186   : > { %v7388_v21 = vpop.eup %7387  ;;  %v1996_v14 = vmul.f32 1.442695, %v1754_v5  ;;  %v1628_v17 = vmul.f32 %v1500_v60, %v1500_v60  ;;  %v1338_v18 = vpop.permute.xlu1 %1337 }
 0x187   : > { %v1334_v19 = vpop.permute.xlu0 %1333  ;;  %v1757_v23 = vmul.f32 -4.5, %v1629_v13  ;;  %6790 = vmatmul.mubr.bf16.gmra.mrb[104].mxu1 %v2077_v8  ;;  %v1503_v24 = vsub.f32 %v1338_v18, %v8502_v38  ;;  %v2078_v30 = vpack.c.bf16 %v7386_v11, %v7388_v21  ;;  %7397 = vpow2.f32 %v1998_v12 }
 0x188   : > { %v1502_v63 = vsub.f32 %v1334_v19, %v8502_v38  ;;  %v1756_v25 = vmul.f32 -4.5, %v1628_v17  ;;  %7399 = vpow2.f32 %v1996_v14 }
 0x189   : > { %v2002_v31 = vmul.f32 1.442695, %v1757_v23  ;;  %v1631_v33 = vmul.f32 %v1503_v24, %v1503_v24  ;;  %6793 = vmatprep.mubr.bf16.mxu1 %v2078_v30  ;;  %v7390_v7 = vpop.eup %7389 }
 0x18a   : > { %v1630_v32 = vmul.f32 %v1502_v63, %v1502_v63  ;;  %v2000_v35 = vmul.f32 1.442695, %v1756_v25  ;;  %v6687_v37 = vpop.f32.mrb[0].mxu1  ;;  %v1349_v59 = vpop.permute.xlu1 %1348 }
 0x18b   : > { %7401 = vpow2.f32 %v2002_v31  ;;  %v1759_v42 = vmul.f32 -4.5, %v1631_v33  ;;  %v8539_v48 = vadd.f32 %v6687_v37, %v8532_v27  ;;  %v2153_v49 = vpop.f32.mrb[1].mxu1  ;;  %v1345_v50 = vpop.permute.xlu0 %1344  ;;  %v1505_v53 = vsub.f32 %v1349_v59, %v8502_v38 }
 0x18c   : > { %v1758_v46 = vmul.f32 -4.5, %v1630_v32  ;;  %7403 = vpow2.f32 %v2000_v35  ;;  %v8542_v51 = vadd.f32 %v8532_v27, %v2153_v49  ;;  %v6688_v52 = vpop.f32.mrb[2].mxu1  ;;  %v1504_v47 = vsub.f32 %v1345_v50, %v8502_v38  ;;  %v7392_v3 = vpop.eup %7391 }
 0x18d   : > { %v2006_v22 = vmul.f32 1.442695, %v1759_v42  ;;  %v2666_v56 = vmax.f32 %v8539_v48, 0.0  ;;  %v8550_v57 = vadd.f32 %v6688_v52, %v8532_v27  ;;  %v2156_v58 = vpop.f32.mrb[3].mxu1  ;;  %v2794_v61 = vand.u32 2147483647, %v8539_v48  ;;  %v7394_v8 = vpop.eup %7393 }
 0x18e   : > { %v2004_v54 = vmul.f32 1.442695, %v1758_v46  ;;  %v2664_v0 = vmax.f32 %v8542_v51, 0.0  ;;  %v2792_v2 = vand.u32 2147483647, %v8542_v51  ;;  %v1633_v44 = vmul.f32 %v1505_v53, %v1505_v53  ;;  %v1357_v60 = vpop.permute.xlu1 %1356  ;;  %v7396_v14 = vpop.eup %7395 }
 0x18f   : > { %7405 = vpow2.f32 %v2006_v22  ;;  %v2667_v4 = vmax.f32 %v8550_v57, 0.0  ;;  %v2795_v5 = vand.u32 2147483647, %v8550_v57  ;;  %v8558_v6 = vadd.f32 %v8532_v27, %v2156_v58  ;;  %v1353_v21 = vpop.permute.xlu0 %1352 }
 0x190   : > { %7407 = vpow2.f32 %v2004_v54  ;;  %v2922_v11 = vsub.f32 0.0, %v2794_v61  ;;  %v2920_v12 = vsub.f32 0.0, %v2792_v2  ;;  %v1761_v13 = vmul.f32 -4.5, %v1633_v44 }
 0x191   : > { %v2923_v17 = vsub.f32 0.0, %v2795_v5  ;;  %v2665_v18 = vmax.f32 %v8558_v6, 0.0  ;;  %v2793_v19 = vand.u32 2147483647, %v8558_v6  ;;  %v1632_v23 = vmul.f32 %v1504_v47, %v1504_v47  ;;  %v8562_v31 = vpop.eup %7397 }
 0x192   : > { %v3052_v24 = vmul.f32 1.442695, %v2922_v11  ;;  %v3048_v63 = vmul.f32 1.442695, %v2920_v12  ;;  %v2010_v25 = vmul.f32 1.442695, %v1761_v13  ;;  %v2079_v30 = vpack.c.bf16 %v7390_v7, %v7392_v3  ;;  %v7400_v42 = vpop.eup %7399  ;;  %v1368_v7 = vpop.permute.xlu1 %1367 }
 0x193   : > { %v3054_v33 = vmul.f32 1.442695, %v2923_v17  ;;  %v2921_v32 = vsub.f32 0.0, %v2793_v19  ;;  %v1760_v35 = vmul.f32 -4.5, %v1632_v23  ;;  %v1507_v37 = vsub.f32 %v1357_v60, %v8502_v38  ;;  %v6691_v59 = vpop.f32.mrb[4].mxu1  ;;  %v1364_v60 = vpop.permute.xlu0 %1363 }
 0x194   : > { %7409 = vpow2.f32 %v3052_v24  ;;  %6794 = vmatmul.mubr.bf16.gmra.mrb[108].mxu1 %v2079_v30  ;;  %v1506_v46 = vsub.f32 %v1353_v21, %v8502_v38  ;;  %v8567_v49 = vadd.f32 %v6691_v59, %v8532_v27  ;;  %v2169_v50 = vpop.f32.mrb[5].mxu1  ;;  %v2080_v52 = vpack.c.bf16 %v7394_v8, %v7396_v14 }
 0x195   : > { %v8569_v53 = vpop.eup %7401  ;;  %7411 = vpow2.f32 %v3048_v63  ;;  %v3050_v47 = vmul.f32 1.442695, %v2921_v32  ;;  %v2008_v22 = vmul.f32 1.442695, %v1760_v35  ;;  %v1635_v54 = vmul.f32 %v1507_v37, %v1507_v37  ;;  %v6692_v58 = vpop.f32.mrb[6].mxu1 }
 0x196   : > { %v8571_v61 = vpop.eup %7403  ;;  %7413 = vpow2.f32 %v3054_v33  ;;  %v1634_v2 = vmul.f32 %v1506_v46, %v1506_v46  ;;  %v2670_v44 = vmax.f32 %v8567_v49, 0.0  ;;  %v2798_v3 = vand.u32 2147483647, %v8567_v49  ;;  %6797 = vmatprep.mubr.bf16.mxu1 %v2080_v52  ;;  %v2172_v5 = vpop.f32.mrb[7].mxu1 }
 0x197   : > { %7415 = vpow2.f32 %v2010_v25  ;;  %v1763_v8 = vmul.f32 -4.5, %v1635_v54  ;;  %v8576_v11 = vadd.f32 %v8532_v27, %v2169_v50  ;;  %v8579_v12 = vadd.f32 %v6692_v58, %v8532_v27  ;;  %v1376_v50 = vpop.permute.xlu1 %1375  ;;  %v1372_v58 = vpop.permute.xlu0 %1371 }
 0x198   : > { %7417 = vpow2.f32 %v3050_v47  ;;  %v1762_v13 = vmul.f32 -4.5, %v1634_v2  ;;  %v2926_v21 = vsub.f32 0.0, %v2798_v3  ;;  %v1509_v14 = vsub.f32 %v1368_v7, %v8502_v38 }
 0x199   : > { %v8582_v17 = vpop.eup %7405  ;;  %7419 = vpow2.f32 %v2008_v22  ;;  %v2014_v19 = vmul.f32 1.442695, %v1763_v8  ;;  %v2796_v24 = vand.u32 2147483647, %v8576_v11  ;;  %v2799_v59 = vand.u32 2147483647, %v8579_v12 }
 0x19a   : > { %v8586_v63 = vpop.eup %7407  ;;  %v2012_v25 = vmul.f32 1.442695, %v1762_v13  ;;  %v3060_v30 = vmul.f32 1.442695, %v2926_v21  ;;  %v1637_v32 = vmul.f32 %v1509_v14, %v1509_v14  ;;  %v6695_v35 = vpop.f32.mrb[8].mxu1  ;;  %v8591_v46 = vadd.f32 %v8532_v27, %v2172_v5 }
 0x19b   : > { %7421 = vpow2.f32 %v2014_v19  ;;  %v2924_v37 = vsub.f32 0.0, %v2796_v24  ;;  %v2185_v52 = vpop.f32.mrb[9].mxu1  ;;  %v1508_v22 = vsub.f32 %v1364_v60, %v8502_v38  ;;  %v2081_v54 = vpack.c.bf16 %v8562_v31, %v7400_v42 }
 0x19c   : > { %7423 = vpow2.f32 %v2012_v25  ;;  %v1765_v47 = vmul.f32 -4.5, %v1637_v32  ;;  %v6696_v7 = vpop.f32.mrb[10].mxu1  ;;  %v2927_v3 = vsub.f32 0.0, %v2799_v59  ;;  %v2797_v5 = vand.u32 2147483647, %v8591_v46 }
 0x19d   : > { %7425 = vpow2.f32 %v3060_v30  ;;  %v3056_v2 = vmul.f32 1.442695, %v2924_v37  ;;  %v2188_v13 = vpop.f32.mrb[11].mxu1  ;;  %v1636_v19 = vmul.f32 %v1508_v22, %v1508_v22  ;;  %6798 = vmatmul.mubr.bf16.gmra.mrb[112].mxu1 %v2081_v54  ;;  %v1511_v24 = vsub.f32 %v1376_v50, %v8502_v38 }
 0x19e   : > { %v7410_v21 = vpop.eup %7409  ;;  %v2018_v14 = vmul.f32 1.442695, %v1765_v47  ;;  %v3062_v31 = vmul.f32 1.442695, %v2927_v3  ;;  %v1510_v42 = vsub.f32 %v1372_v58, %v8502_v38  ;;  %v2925_v37 = vsub.f32 0.0, %v2797_v5 }
 0x19f   : > { %v7412_v25 = vpop.eup %7411  ;;  %v3306_v60 = vadd.f32 1.0, %v7410_v21  ;;  %7427 = vpow2.f32 %v3056_v2  ;;  %v1764_v59 = vmul.f32 -4.5, %v1636_v19  ;;  %v1639_v33 = vmul.f32 %v1511_v24, %v1511_v24 }
 0x1a0   : > { %v7414_v30 = vpop.eup %7413  ;;  %v3304_v32 = vadd.f32 1.0, %v7412_v25  ;;  %7429 = vpow2.f32 %v2018_v14  ;;  %v1638_v22 = vmul.f32 %v1510_v42, %v1510_v42  ;;  %v3058_v50 = vmul.f32 1.442695, %v2925_v37 }
 0x1a1   : > { %v8599_v8 = vpop.eup %7415  ;;  %7431 = vlog2.f32 %v3306_v60  ;;  %v3307_v47 = vadd.f32 1.0, %v7414_v30  ;;  %v2016_v23 = vmul.f32 1.442695, %v1764_v59  ;;  %v8602_v2 = vadd.f32 %v6695_v35, %v8532_v27 }
 0x1a2   : > { %v7418_v54 = vpop.eup %7417  ;;  %7433 = vlog2.f32 %v3304_v32  ;;  %v6699_v3 = vpop.f32.mrb[12].mxu1  ;;  %v1767_v21 = vmul.f32 -4.5, %v1639_v33  ;;  %v1766_v14 = vmul.f32 -4.5, %v1638_v22  ;;  %v8609_v25 = vadd.f32 %v8532_v27, %v2185_v52 }
 0x1a3   : > { %v8604_v38 = vpop.eup %7419  ;;  %7435 = vlog2.f32 %v3307_v47  ;;  %v3305_v58 = vadd.f32 1.0, %v7418_v54  ;;  %v2201_v5 = vpop.f32.mrb[13].mxu1  ;;  %v2802_v24 = vand.u32 2147483647, %v8602_v2  ;;  %v2082_v33 = vpack.c.bf16 %v8569_v53, %v8571_v61 }
 0x1a4   : > { %7437 = vpow2.f32 %v3062_v31  ;;  %v8611_v60 = vpop.f32.mrb[14].mxu1  ;;  %v2022_v42 = vmul.f32 1.442695, %v1767_v21  ;;  %v2020_v30 = vmul.f32 1.442695, %v1766_v14  ;;  %v8624_v22 = vadd.f32 %v6696_v7, %v8532_v27 }
 0x1a5   : > { %v8613_v35 = vpop.eup %7421  ;;  %7439 = vlog2.f32 %v3305_v58  ;;  %v8617_v32 = vpop.f32.mrb[15].mxu1  ;;  %v2930_v37 = vsub.f32 0.0, %v2802_v24  ;;  %v2800_v52 = vand.u32 2147483647, %v8609_v25  ;;  %6801 = vmatprep.mubr.bf16.mxu1 %v2082_v33  ;;  %v8627_v54 = vadd.f32 %v8532_v27, %v2188_v13 }
 0x1a6   : > { %v8619_v31 = vpop.eup %7423  ;;  %7441 = vpow2.f32 %v3058_v50  ;;  %v2083_v53 = vpack.c.bf16 %v8582_v17, %v8586_v63  ;;  %v8677_v57 = vadd.f32 %v8611_v60, %v8532_v27 }
 0x1a7   : > { %v7426_v47 = vpop.eup %7425  ;;  %7443 = vpow2.f32 %v2016_v23  ;;  %v3068_v50 = vmul.f32 1.442695, %v2930_v37  ;;  %v2928_v58 = vsub.f32 0.0, %v2800_v52  ;;  %v2803_v23 = vand.u32 2147483647, %v8624_v22 }
 0x1a8   : > { %v3310_v61 = vadd.f32 1.0, %v7426_v47  ;;  %7445 = vpow2.f32 %v2022_v42  ;;  %6802 = vmatmul.mubr.bf16.gmra.mrb[116].mxu1 %v2083_v53  ;;  %v2801_v17 = vand.u32 2147483647, %v8627_v54  ;;  %v8643_v52 = vadd.f32 %v8532_v27, %v2201_v5 }
 0x1a9   : > { %v7428_v21 = vpop.eup %7427  ;;  %7447 = vpow2.f32 %v2020_v30  ;;  %v3064_v33 = vmul.f32 1.442695, %v2928_v58  ;;  %v2931_v37 = vsub.f32 0.0, %v2803_v23  ;;  %v8640_v30 = vadd.f32 %v6699_v3, %v8532_v27 }
 0x1aa   : > { %v8634_v7 = vpop.eup %7429  ;;  %7449 = vlog2.f32 %v3310_v61  ;;  %v3308_v13 = vadd.f32 1.0, %v7428_v21  ;;  %v8637_v63 = vpop.f32.mrb[16].mxu1  ;;  %v2929_v61 = vsub.f32 0.0, %v2801_v17  ;;  %v2084_v58 = vpack.c.bf16 %v8599_v8, %v8604_v38 }
 0x1ab   : > { %v7432_v42 = vpop.eup %7431  ;;  %7451 = vpow2.f32 %v3068_v50  ;;  %v8645_v47 = vpop.f32.mrb[17].mxu1  ;;  %v3070_v23 = vmul.f32 1.442695, %v2931_v37  ;;  %v2806_v17 = vand.u32 2147483647, %v8640_v30  ;;  %v2085_v6 = vpack.c.bf16 %v8613_v35, %v8619_v31 }
 0x1ac   : > { %v7434_v53 = vpop.eup %7433  ;;  %v3437_v24 = vmul.f32 0.6931472, %v7432_v42  ;;  %7453 = vlog2.f32 %v3308_v13  ;;  %v8649_v21 = vpop.f32.mrb[18].mxu1  ;;  %v3066_v13 = vmul.f32 1.442695, %v2929_v61  ;;  %6805 = vmatprep.mubr.bf16.mxu1 %v2084_v58 }
 0x1ad   : > { %v7436_v14 = vpop.eup %7435  ;;  %v3433_v50 = vmul.f32 0.6931472, %v7434_v53  ;;  %7455 = vpow2.f32 %v3064_v33  ;;  %v8652_v59 = vpop.f32.mrb[19].mxu1  ;;  %v2934_v51 = vsub.f32 0.0, %v2806_v17 }
 0x1ae   : > { %v7438_v5 = vpop.eup %7437  ;;  %v3690_v19 = vadd.f32 %v3437_v24, %v2666_v56  ;;  %v3439_v42 = vmul.f32 0.6931472, %v7436_v14  ;;  %7457 = vpow2.f32 %v3070_v23 }
 0x1af   : > { %v7440_v8 = vpop.eup %7439  ;;  %v3688_v38 = vadd.f32 %v3433_v50, %v2664_v0  ;;  %v3311_v53 = vadd.f32 1.0, %v7438_v5  ;;  %7459 = vpow2.f32 %v3066_v13  ;;  %v2804_v50 = vand.u32 2147483647, %v8643_v52 }
 0x1b0   : > { %v7442_v37 = vpop.eup %7441  ;;  %v8660_v3 = vadd.f32 -0.6931472, %v3690_v19  ;;  %v3691_v48 = vadd.f32 %v3439_v42, %v2667_v4  ;;  %v3435_v56 = vmul.f32 0.6931472, %v7440_v8  ;;  %v3076_v5 = vmul.f32 1.442695, %v2934_v51  ;;  %6806 = vmatmul.mubr.bf16.gmra.mrb[120].mxu1 %v2085_v6 }
 0x1b1   : > { %v8664_v14 = vpop.eup %7443  ;;  %v8666_v24 = vadd.f32 -0.6931472, %v3688_v38  ;;  %7461 = vlog2.f32 %v3311_v53  ;;  %v3309_v61 = vadd.f32 1.0, %v7442_v37  ;;  %v8685_v42 = vadd.f32 %v8532_v27, %v8617_v32 }
 0x1b2   : > { %v8668_v0 = vpop.eup %7445  ;;  %v8670_v58 = vadd.f32 -0.6931472, %v3691_v48  ;;  %v3689_v19 = vadd.f32 %v3435_v56, %v2665_v18  ;;  %v8679_v4 = vpop.f32.mrb[20].mxu1  ;;  %v2932_v8 = vsub.f32 0.0, %v2804_v50  ;;  %v2807_v32 = vand.u32 2147483647, %v8677_v57 }
 0x1b3   : > { %v8681_v23 = vpop.eup %7447  ;;  %7463 = vlog2.f32 %v3309_v61  ;;  %v8689_v18 = vpop.f32.mrb[21].mxu1  ;;  %v8705_v50 = vadd.f32 %v8637_v63, %v8532_v27  ;;  %v8711_v6 = vadd.f32 %v8532_v27, %v8645_v47  ;;  %v11427_v63 = vmax.f32 %v8576_v11, 0.0 }
 0x1b4   : > { %v7450_v13 = vpop.eup %7449  ;;  %v8693_v17 = vadd.f32 -0.6931472, %v3689_v19  ;;  %v8696_v53 = vpop.f32.mrb[22].mxu1  ;;  %7465 = vpow2.f32 %v3076_v5  ;;  %v3072_v51 = vmul.f32 1.442695, %v2932_v8  ;;  %v2935_v33 = vsub.f32 0.0, %v2807_v32 }
 0x1b5   : > { %v7452_v37 = vpop.eup %7451  ;;  %v3445_v48 = vmul.f32 0.6931472, %v7450_v13  ;;  %v8700_v31 = vpop.f32.mrb[23].mxu1  ;;  %v2805_v19 = vand.u32 2147483647, %v8685_v42  ;;  %v11438_v29 = vmax.f32 %v8685_v42, 0.0 }
 0x1b6   : > { %v7454_v56 = vpop.eup %7453  ;;  %v3314_v61 = vadd.f32 1.0, %v7452_v37  ;;  %v3078_v49 = vmul.f32 1.442695, %v2935_v33  ;;  %v2810_v47 = vand.u32 2147483647, %v8705_v50 }
 0x1b7   : > { %v7456_v38 = vpop.eup %7455  ;;  %v3694_v5 = vadd.f32 %v3445_v48, %v2670_v44  ;;  %v3441_v13 = vmul.f32 0.6931472, %v7454_v56  ;;  %v2933_v37 = vsub.f32 0.0, %v2805_v19 }
 0x1b8   : > { %7467 = vlog2.f32 %v3314_v61  ;;  %v3312_v35 = vadd.f32 1.0, %v7456_v38  ;;  %v7458_v60 = vpop.eup %7457  ;;  %v2938_v33 = vsub.f32 0.0, %v2810_v47 }
 0x1b9   : > { %v8714_v41 = vadd.f32 -0.6931472, %v3694_v5  ;;  %v3692_v39 = vadd.f32 %v3441_v13, %v11427_v63  ;;  %7469 = vpow2.f32 %v3072_v51  ;;  %v7460_v44 = vpop.eup %7459  ;;  %v3315_v48 = vadd.f32 1.0, %v7458_v60 }
 0x1ba   : > { %7471 = vlog2.f32 %v3312_v35  ;;  %v3074_v32 = vmul.f32 1.442695, %v2933_v37  ;;  %v8719_v56 = vpop.f32.mrb[24].mxu1  ;;  %v3313_v19 = vadd.f32 1.0, %v7460_v44  ;;  %v2808_v35 = vand.u32 2147483647, %v8711_v6 }
 0x1bb   : > { %v7462_v38 = vpop.eup %7461  ;;  %v8721_v61 = vadd.f32 -0.6931472, %v3692_v39  ;;  %7473 = vpow2.f32 %v3078_v49  ;;  %v8724_v8 = vpop.f32.mrb[25].mxu1  ;;  %v2086_v13 = vpack.c.bf16 %v8634_v7, %v8664_v14  ;;  %v8733_v39 = vadd.f32 %v8649_v21, %v8532_v27 }
 0x1bc   : > { %v3447_v11 = vmul.f32 0.6931472, %v7462_v38  ;;  %7475 = vlog2.f32 %v3315_v48  ;;  %v8727_v60 = vpop.f32.mrb[26].mxu1  ;;  %v8737_v37 = vadd.f32 %v8532_v27, %v8652_v59  ;;  %v11428_v49 = vmax.f32 %v8579_v12, 0.0 }
 0x1bd   : > { %v7464_v51 = vpop.eup %7463  ;;  %7477 = vlog2.f32 %v3313_v19  ;;  %v8739_v63 = vpop.f32.mrb[27].mxu1  ;;  %v3084_v47 = vmul.f32 1.442695, %v2938_v33  ;;  %v2936_v19 = vsub.f32 0.0, %v2808_v35  ;;  %6809 = vmatprep.mubr.bf16.mxu1 %v2086_v13  ;;  %v2811_v21 = vand.u32 2147483647, %v8733_v39 }
 0x1be   : > { %v3695_v44 = vadd.f32 %v3447_v11, %v11428_v49  ;;  %v3443_v48 = vmul.f32 0.6931472, %v7464_v51  ;;  %7479 = vpow2.f32 %v3074_v32  ;;  %v7466_v38 = vpop.eup %7465  ;;  %v11429_v59 = vmax.f32 %v8591_v46, 0.0 }
 0x1bf   : > { %v3318_v40 = vadd.f32 1.0, %v7466_v38  ;;  %7481 = vpow2.f32 %v3084_v47  ;;  %v3080_v12 = vmul.f32 1.442695, %v2936_v19  ;;  %v2939_v11 = vsub.f32 0.0, %v2811_v21 }
 0x1c0   : > { %v8746_v5 = vadd.f32 -0.6931472, %v3695_v44  ;;  %v3693_v62 = vadd.f32 %v3443_v48, %v11429_v59  ;;  %v2809_v32 = vand.u32 2147483647, %v8737_v37  ;;  %v2087_v33 = vpack.c.bf16 %v8668_v0, %v8681_v23 }
 0x1c1   : > { %7483 = vlog2.f32 %v3318_v40  ;;  %v8757_v13 = vadd.f32 %v8679_v4, %v8532_v27  ;;  %v8761_v46 = vadd.f32 %v8532_v27, %v8689_v18  ;;  %v3086_v47 = vmul.f32 1.442695, %v2939_v11 }
 0x1c2   : > { %v7468_v35 = vpop.eup %7467  ;;  %v8753_v51 = vadd.f32 -0.6931472, %v3693_v62  ;;  %v8763_v49 = vpop.f32.mrb[28].mxu1  ;;  %7485 = vpow2.f32 %v3080_v12  ;;  %v2937_v38 = vsub.f32 0.0, %v2809_v32  ;;  %6810 = vmatmul.mubr.bf16.gmra.mrb[124].mxu1 %v2087_v33  ;;  %v11430_v59 = vmax.f32 %v8602_v2, 0.0 }
 0x1c3   : > { %v7470_v44 = vpop.eup %7469  ;;  %v3453_v48 = vmul.f32 0.6931472, %v7468_v35  ;;  %v8765_v0 = vpop.f32.mrb[29].mxu1  ;;  %v2814_v4 = vand.u32 2147483647, %v8757_v13  ;;  %7487 = vpow2.f32 %v3086_v47  ;;  %v11431_v19 = vmax.f32 %v8609_v25, 0.0 }
 0x1c4   : > { %v7472_v62 = vpop.eup %7471  ;;  %v3316_v40 = vadd.f32 1.0, %v7470_v44  ;;  %v8770_v18 = vpop.f32.mrb[30].mxu1  ;;  %v3082_v11 = vmul.f32 1.442695, %v2937_v38  ;;  %v2812_v23 = vand.u32 2147483647, %v8761_v46 }
 0x1c5   : > { %v7474_v21 = vpop.eup %7473  ;;  %v3698_v35 = vadd.f32 %v3453_v48, %v11430_v59  ;;  %v3449_v12 = vmul.f32 0.6931472, %v7472_v62  ;;  %v8774_v32 = vpop.f32.mrb[31].mxu1  ;;  %v2942_v14 = vsub.f32 0.0, %v2814_v4  ;;  %v8787_v59 = vadd.f32 %v8696_v53, %v8532_v27 }
 0x1c6   : > { %v7476_v33 = vpop.eup %7475  ;;  %7489 = vlog2.f32 %v3316_v40  ;;  %v3319_v44 = vadd.f32 1.0, %v7474_v21  ;;  %v2940_v38 = vsub.f32 0.0, %v2812_v23  ;;  %v11432_v40 = vmax.f32 %v8624_v22, 0.0 }
 0x1c7   : > { %v7478_v7 = vpop.eup %7477  ;;  %v8777_v16 = vadd.f32 -0.6931472, %v3698_v35  ;;  %v3696_v1 = vadd.f32 %v3449_v12, %v11431_v19  ;;  %v3455_v36 = vmul.f32 0.6931472, %v7476_v33  ;;  %7491 = vpow2.f32 %v3082_v11 }
 0x1c8   : > { %v7480_v2 = vpop.eup %7479  ;;  %v3451_v48 = vmul.f32 0.6931472, %v7478_v7  ;;  %7493 = vlog2.f32 %v3319_v44  ;;  %v3092_v47 = vmul.f32 1.442695, %v2942_v14  ;;  %v11433_v25 = vmax.f32 %v8627_v54, 0.0 }
 0x1c9   : > { %v8781_v62 = vadd.f32 -0.6931472, %v3696_v1  ;;  %v3699_v4 = vadd.f32 %v3455_v36, %v11432_v40  ;;  %v3317_v21 = vadd.f32 1.0, %v7480_v2  ;;  %v7482_v35 = vpop.eup %7481  ;;  %v3088_v12 = vmul.f32 1.442695, %v2940_v38 }
 0x1ca   : > { %v3697_v19 = vadd.f32 %v3451_v48, %v11433_v25  ;;  %7495 = vpow2.f32 %v3092_v47  ;;  %v8793_v7 = vadd.f32 %v8532_v27, %v8700_v31  ;;  %v8795_v1 = vpop.f32.mrb[32].mxu1  ;;  %v3322_v36 = vadd.f32 1.0, %v7482_v35 }
 0x1cb   : > { %v8797_v14 = vadd.f32 -0.6931472, %v3699_v4  ;;  %7497 = vlog2.f32 %v3317_v21  ;;  %v8800_v53 = vpop.f32.mrb[33].mxu1  ;;  %v7484_v23 = vpop.eup %7483  ;;  %v2815_v54 = vand.u32 2147483647, %v8787_v59  ;;  %v3944_v47 = vpack.c.bf16 %v8693_v17, %v8666_v24 }
 0x1cc   : > { %v8802_v11 = vadd.f32 -0.6931472, %v3697_v19  ;;  %7499 = vpow2.f32 %v3088_v12  ;;  %v8806_v31 = vpop.f32.mrb[34].mxu1  ;;  %v7486_v44 = vpop.eup %7485  ;;  %v3461_v2 = vmul.f32 0.6931472, %v7484_v23  ;;  %v8815_v21 = vadd.f32 %v8719_v56, %v8532_v27 }
 0x1cd   : > { %7501 = vlog2.f32 %v3322_v36  ;;  %v2813_v48 = vand.u32 2147483647, %v8793_v7  ;;  %v8811_v38 = vpop.f32.mrb[35].mxu1  ;;  %v3320_v40 = vadd.f32 1.0, %v7486_v44  ;;  %v2943_v4 = vsub.f32 0.0, %v2815_v54  ;;  %v7488_v25 = vpop.eup %7487  ;;  %6829 = vmatprep.mubr.bf16.mxu0 %v3944_v47 }
 0x1ce   : > { %v8819_v35 = vadd.f32 %v8532_v27, %v8724_v8  ;;  %v11434_v19 = vmax.f32 %v8640_v30, 0.0  ;;  %v8825_v24 = vadd.f32 %v8727_v60, %v8532_v27  ;;  %v8829_v17 = vadd.f32 %v8532_v27, %v8739_v63 }
 0x1cf   : > { %v2941_v36 = vsub.f32 0.0, %v2813_v48  ;;  %7503 = vlog2.f32 %v3320_v40  ;;  %v3323_v23 = vadd.f32 1.0, %v7488_v25  ;;  %v3094_v54 = vmul.f32 1.442695, %v2943_v4 }
 0x1d0   : > { %v3702_v12 = vadd.f32 %v3461_v2, %v11434_v19  ;;  %v7490_v56 = vpop.eup %7489  ;;  %v11435_v8 = vpack.c.bf16 %v8670_v58, %v8660_v3  ;;  %v3946_v47 = vpack.c.bf16 %v8753_v51, %v8721_v61  ;;  %v2818_v40 = vand.u32 2147483647, %v8815_v21 }
 0x1d1   : > { %v7492_v44 = vpop.eup %7491  ;;  %v3457_v48 = vmul.f32 0.6931472, %v7490_v56  ;;  %v3090_v60 = vmul.f32 1.442695, %v2941_v36  ;;  %7505 = vlog2.f32 %v3323_v23  ;;  %v11436_v3 = vmax.f32 %v8643_v52, 0.0 }
 0x1d2   : > { %6830 = vmatmul.mubr.bf16.vlgmr.msra.gmra.mrb[4].mxu0 %v11435_v8  ;;  %v8835_v2 = vadd.f32 -0.6931472, %v3702_v12  ;;  %v7494_v63 = vpop.eup %7493  ;;  %v3321_v19 = vadd.f32 1.0, %v7492_v44  ;;  %v8841_v25 = vpop.f32.mrb[36].mxu1  ;;  %7507 = vpow2.f32 %v3094_v54  ;;  %v2816_v12 = vand.u32 2147483647, %v8819_v35 }
 0x1d3   : > { %v3700_v58 = vadd.f32 %v3457_v48, %v11436_v3  ;;  %v3463_v8 = vmul.f32 0.6931472, %v7494_v63  ;;  %6833 = vmatprep.mubr.bf16.mxu0 %v3946_v47  ;;  %v8846_v36 = vpop.f32.mrb[37].mxu1  ;;  %v2946_v51 = vsub.f32 0.0, %v2818_v40  ;;  %v2819_v23 = vand.u32 2147483647, %v8825_v24 }
 0x1d4   : > { %v7496_v61 = vpop.eup %7495  ;;  %7509 = vlog2.f32 %v3321_v19  ;;  %v8850_v44 = vpop.f32.mrb[38].mxu1  ;;  %v11437_v52 = vmax.f32 %v8677_v57, 0.0  ;;  %v2944_v40 = vsub.f32 0.0, %v2816_v12  ;;  %v3947_v12 = vpack.c.bf16 %v8746_v5, %v8714_v41 }
 0x1d5   : > { %v7498_v4 = vpop.eup %7497  ;;  %v8852_v30 = vadd.f32 -0.6931472, %v3700_v58  ;;  %v3326_v48 = vadd.f32 1.0, %v7496_v61  ;;  %7511 = vpow2.f32 %v3090_v60  ;;  %v8856_v47 = vpop.f32.mrb[39].mxu1  ;;  %v3100_v19 = vmul.f32 1.442695, %v2946_v51 }
 0x1d6   : > { %v3703_v54 = vadd.f32 %v3463_v8, %v11437_v52  ;;  %v7500_v63 = vpop.eup %7499  ;;  %v3459_v3 = vmul.f32 0.6931472, %v7498_v4  ;;  %v2947_v33 = vsub.f32 0.0, %v2819_v23  ;;  %v3096_v60 = vmul.f32 1.442695, %v2944_v40 }
 0x1d7   : > { %v7502_v56 = vpop.eup %7501  ;;  %7513 = vlog2.f32 %v3326_v48  ;;  %v3324_v10 = vadd.f32 1.0, %v7500_v63  ;;  %v2817_v4 = vand.u32 2147483647, %v8829_v17  ;;  %v11439_v52 = vmax.f32 %v8705_v50, 0.0 }
 0x1d8   : > { %v8858_v22 = vadd.f32 -0.6931472, %v3703_v54  ;;  %v3701_v57 = vadd.f32 %v3459_v3, %v11438_v29  ;;  %v3469_v8 = vmul.f32 0.6931472, %v7502_v56  ;;  %7515 = vpow2.f32 %v3100_v19 }
 0x1d9   : > { %7517 = vlog2.f32 %v3324_v10  ;;  %v3102_v61 = vmul.f32 1.442695, %v2947_v33  ;;  %v7504_v51 = vpop.eup %7503  ;;  %v8872_v29 = vadd.f32 %v8763_v49, %v8532_v27  ;;  %v2945_v33 = vsub.f32 0.0, %v2817_v4 }
 0x1da   : > { %v8866_v23 = vadd.f32 -0.6931472, %v3701_v57  ;;  %v3706_v54 = vadd.f32 %v3469_v8, %v11439_v52  ;;  %7519 = vpow2.f32 %v3096_v60  ;;  %v8874_v42 = vpop.f32.mrb[40].mxu1  ;;  %v3465_v10 = vmul.f32 0.6931472, %v7504_v51  ;;  %6834 = vmatmul.mubr.bf16.gmra.mrb[8].mxu0 %v3947_v12 }
 0x1db   : > { %7521 = vpow2.f32 %v3102_v61  ;;  %v8878_v41 = vadd.f32 %v8532_v27, %v8765_v0  ;;  %v8880_v5 = vpop.f32.mrb[41].mxu1  ;;  %v7506_v56 = vpop.eup %7505  ;;  %v2822_v49 = vand.u32 2147483647, %v8872_v29  ;;  %v8888_v63 = vadd.f32 %v8770_v18, %v8532_v27 }
 0x1dc   : > { %v8882_v50 = vadd.f32 -0.6931472, %v3706_v54  ;;  %v8890_v3 = vpop.f32.mrb[42].mxu1  ;;  %v7508_v19 = vpop.eup %7507  ;;  %v11440_v40 = vmax.f32 %v8711_v6, 0.0  ;;  %v3471_v57 = vmul.f32 0.6931472, %v7506_v56 }
 0x1dd   : > { %v3098_v8 = vmul.f32 1.442695, %v2945_v33  ;;  %v8895_v61 = vpop.f32.mrb[43].mxu1  ;;  %v3327_v12 = vadd.f32 1.0, %v7508_v19  ;;  %v2950_v51 = vsub.f32 0.0, %v2822_v49  ;;  %v11441_v58 = vmax.f32 %v8733_v39, 0.0 }
 0x1de   : > { %v3704_v0 = vadd.f32 %v3465_v10, %v11440_v40  ;;  %v7510_v4 = vpop.eup %7509  ;;  %v2820_v52 = vand.u32 2147483647, %v8878_v41  ;;  %v11442_v49 = vmax.f32 %v8737_v37, 0.0  ;;  %v2823_v18 = vand.u32 2147483647, %v8888_v63 }
 0x1df   : > { %v7512_v54 = vpop.eup %7511  ;;  %v3707_v6 = vadd.f32 %v3471_v57, %v11441_v58  ;;  %v3467_v10 = vmul.f32 0.6931472, %v7510_v4  ;;  %7523 = vpow2.f32 %v3098_v8  ;;  %v3108_v56 = vmul.f32 1.442695, %v2950_v51 }
 0x1e0   : > { %v8899_v48 = vadd.f32 -0.6931472, %v3704_v0  ;;  %7525 = vlog2.f32 %v3327_v12  ;;  %v3325_v33 = vadd.f32 1.0, %v7512_v54  ;;  %v2948_v40 = vsub.f32 0.0, %v2820_v52 }
 0x1e1   : > { %v7514_v60 = vpop.eup %7513  ;;  %v8903_v43 = vadd.f32 -0.6931472, %v3707_v6  ;;  %v3705_v19 = vadd.f32 %v3467_v10, %v11442_v49  ;;  %v8910_v0 = vadd.f32 %v8532_v27, %v8774_v32  ;;  %v3948_v8 = vpack.c.bf16 %v8802_v11, %v8781_v62 }
 0x1e2   : > { %v7516_v39 = vpop.eup %7515  ;;  %v3477_v58 = vmul.f32 0.6931472, %v7514_v60  ;;  %7527 = vlog2.f32 %v3325_v33  ;;  %v3104_v57 = vmul.f32 1.442695, %v2948_v40  ;;  %v8914_v4 = vpop.f32.mrb[44].mxu1  ;;  %v2951_v52 = vsub.f32 0.0, %v2823_v18 }
 0x1e3   : > { %v7518_v12 = vpop.eup %7517  ;;  %v8916_v51 = vadd.f32 -0.6931472, %v3705_v19  ;;  %v3330_v37 = vadd.f32 1.0, %v7516_v39  ;;  %7529 = vpow2.f32 %v3108_v56  ;;  %v8918_v54 = vpop.f32.mrb[45].mxu1  ;;  %v11443_v27 = vmax.f32 %v8757_v13, 0.0  ;;  %6837 = vmatprep.mubr.bf16.mxu0 %v3948_v8 }
 0x1e4   : > { %v7520_v6 = vpop.eup %7519  ;;  %v3473_v60 = vmul.f32 0.6931472, %v7518_v12  ;;  %7531 = vpow2.f32 %v3104_v57  ;;  %v8923_v62 = vpop.f32.mrb[46].mxu1  ;;  %v3110_v40 = vmul.f32 1.442695, %v2951_v52  ;;  %v11444_v13 = vmax.f32 %v8761_v46, 0.0 }
 0x1e5   : > { %v3710_v32 = vadd.f32 %v3477_v58, %v11443_v27  ;;  %v7522_v11 = vpop.eup %7521  ;;  %7533 = vlog2.f32 %v3330_v37  ;;  %v3328_v33 = vadd.f32 1.0, %v7520_v6  ;;  %v2821_v18 = vand.u32 2147483647, %v8910_v0  ;;  %v8926_v56 = vpop.f32.mrb[47].mxu1  ;;  %v8935_v8 = vld [vmem:[%s8086_s15] ss:$0 sm:$0xff] }
 0x1e6   : > { %v3708_v19 = vadd.f32 %v3473_v60, %v11444_v13  ;;  %v3331_v39 = vadd.f32 1.0, %v7522_v11  ;;  %v3949_v58 = vpack.c.bf16 %v8797_v14, %v8777_v16  ;;  %v8939_v12 = vadd.f32 %v8935_v8, %v8795_v1 }
 0x1e7   : > { %v8928_v49 = vadd.f32 -0.6931472, %v3710_v32  ;;  %7535 = vlog2.f32 %v3328_v33  ;;  %v2949_v57 = vsub.f32 0.0, %v2821_v18  ;;  %v8943_v37 = vadd.f32 %v8935_v8, %v8800_v53 }
 0x1e8   : > { %v8945_v52 = vadd.f32 -0.6931472, %v3708_v19  ;;  %7537 = vlog2.f32 %v3331_v39  ;;  %6838 = vmatmul.mubr.bf16.gmra.mrb[12].mxu0 %v3949_v58  ;;  %v8949_v46 = vadd.f32 %v8935_v8, %v8806_v31  ;;  %v8953_v16 = vadd.f32 %v8935_v8, %v8811_v38 }
 0x1e9   : > { %v7524_v14 = vpop.eup %7523  ;;  %7539 = vpow2.f32 %v3110_v40  ;;  %v3106_v1 = vmul.f32 1.442695, %v2949_v57  ;;  %v2826_v53 = vand.u32 2147483647, %v8939_v12  ;;  %v2824_v11 = vand.u32 2147483647, %v8943_v37 }
 0x1ea   : > { %v7526_v27 = vpop.eup %7525  ;;  %v3329_v32 = vadd.f32 1.0, %v7524_v14  ;;  %v8960_v33 = vpop.f32.mrb[48].mxu1  ;;  %v2827_v40 = vand.u32 2147483647, %v8949_v46  ;;  %v2825_v57 = vand.u32 2147483647, %v8953_v16 }
 0x1eb   : > { %v3479_v18 = vmul.f32 0.6931472, %v7526_v27  ;;  %7541 = vpow2.f32 %v3106_v1  ;;  %v2954_v38 = vsub.f32 0.0, %v2826_v53  ;;  %v8963_v13 = vpop.f32.mrb[49].mxu1  ;;  %v2952_v39 = vsub.f32 0.0, %v2824_v11 }
 0x1ec   : > { %v7528_v19 = vpop.eup %7527  ;;  %7543 = vlog2.f32 %v3329_v32  ;;  %v8967_v14 = vpop.f32.mrb[50].mxu1  ;;  %v11446_v31 = vmax.f32 %v8787_v59, 0.0  ;;  %v2955_v53 = vsub.f32 0.0, %v2827_v40  ;;  %v2953_v32 = vsub.f32 0.0, %v2825_v57 }
 0x1ed   : > { %11445 = vst [vmem:[#allocation21_spill] sm:$0xff] %v8967_v14  ;;  %v7530_v60 = vpop.eup %7529  ;;  %v3475_v27 = vmul.f32 0.6931472, %v7528_v19  ;;  %v3116_v1 = vmul.f32 1.442695, %v2954_v38  ;;  %v8971_v10 = vpop.f32.mrb[51].mxu1  ;;  %v3950_v11 = vpack.c.bf16 %v8866_v23, %v8852_v30  ;;  %v3951_v30 = vpack.c.bf16 %v8858_v22, %v8835_v2 }
 0x1ee   : > { %v3711_v6 = vadd.f32 %v3479_v18, %v11446_v31  ;;  %v7532_v55 = vpop.eup %7531  ;;  %v3334_v26 = vadd.f32 1.0, %v7530_v60  ;;  %v3112_v45 = vmul.f32 1.442695, %v2952_v39  ;;  %v11447_v9 = vmax.f32 %v8793_v7, 0.0 }
 0x1ef   : > { %v7534_v58 = vpop.eup %7533  ;;  %v3332_v59 = vadd.f32 1.0, %v7532_v55  ;;  %7545 = vpow2.f32 %v3116_v1  ;;  %v3118_v18 = vmul.f32 1.442695, %v2955_v53  ;;  %v3114_v38 = vmul.f32 1.442695, %v2953_v32  ;;  %6841 = vmatprep.mubr.bf16.mxu0 %v3950_v11 }
 0x1f0   : > { %v8975_v34 = vadd.f32 -0.6931472, %v3711_v6  ;;  %v3709_v14 = vadd.f32 %v3475_v27, %v11447_v9  ;;  %v3485_v31 = vmul.f32 0.6931472, %v7534_v58  ;;  %7547 = vlog2.f32 %v3334_v26  ;;  %6842 = vmatmul.mubr.bf16.gmra.mrb[16].mxu0 %v3951_v30 }
 0x1f1   : > { %v7536_v40 = vpop.eup %7535  ;;  %7549 = vlog2.f32 %v3332_v59  ;;  %v8985_v23 = vadd.f32 %v8935_v8, %v8841_v25  ;;  %v11448_v55 = vmax.f32 %v8815_v21, 0.0  ;;  %v8991_v26 = vadd.f32 %v8935_v8, %v8846_v36 }
 0x1f2   : > { %v8979_v60 = vadd.f32 -0.6931472, %v3709_v14  ;;  %v7538_v7 = vpop.eup %7537  ;;  %v3481_v6 = vmul.f32 0.6931472, %v7536_v40  ;;  %7551 = vpow2.f32 %v3112_v45  ;;  %v8993_v19 = vpop.f32.mrb[52].mxu1  ;;  %v11449_v45 = vmax.f32 %v8819_v35, 0.0 }
 0x1f3   : > { %v3714_v9 = vadd.f32 %v3485_v31, %v11448_v55  ;;  %v7540_v39 = vpop.eup %7539  ;;  %v3487_v58 = vmul.f32 0.6931472, %v7538_v7  ;;  %7553 = vpow2.f32 %v3118_v18  ;;  %v2830_v2 = vand.u32 2147483647, %v8985_v23  ;;  %v8997_v25 = vpop.f32.mrb[53].mxu1 }
 0x1f4   : > { %v3712_v57 = vadd.f32 %v3481_v6, %v11449_v45  ;;  %v3335_v14 = vadd.f32 1.0, %v7540_v39  ;;  %7555 = vpow2.f32 %v3114_v38  ;;  %v9003_v36 = vpop.f32.mrb[54].mxu1  ;;  %v11450_v1 = vmax.f32 %v8825_v24, 0.0 }
 0x1f5   : > { %v8999_v21 = vadd.f32 -0.6931472, %v3714_v9  ;;  %v7542_v27 = vpop.eup %7541  ;;  %v2958_v32 = vsub.f32 0.0, %v2830_v2  ;;  %v2828_v59 = vand.u32 2147483647, %v8991_v26  ;;  %v9009_v31 = vpop.f32.mrb[55].mxu1  ;;  %v9015_v38 = vadd.f32 %v8935_v8, %v8850_v44 }
 0x1f6   : > { %v3715_v53 = vadd.f32 %v3487_v58, %v11450_v1  ;;  %v7544_v18 = vpop.eup %7543  ;;  %v9011_v40 = vadd.f32 -0.6931472, %v3712_v57  ;;  %7557 = vlog2.f32 %v3335_v14  ;;  %v3333_v35 = vadd.f32 1.0, %v7542_v27 }
 0x1f7   : > { %v3483_v24 = vmul.f32 0.6931472, %v7544_v18  ;;  %v3124_v7 = vmul.f32 1.442695, %v2958_v32  ;;  %v9021_v55 = vadd.f32 %v8935_v8, %v8856_v47  ;;  %v2956_v9 = vsub.f32 0.0, %v2828_v59 }
 0x1f8   : > { %v9017_v30 = vadd.f32 -0.6931472, %v3715_v53  ;;  %7559 = vlog2.f32 %v3333_v35  ;;  %v2831_v39 = vand.u32 2147483647, %v9015_v38  ;;  %v11451_v2 = vmax.f32 %v8829_v17, 0.0 }
 0x1f9   : > { %v7546_v58 = vpop.eup %7545  ;;  %7561 = vpow2.f32 %v3124_v7  ;;  %v2829_v57 = vand.u32 2147483647, %v9021_v55  ;;  %v3120_v1 = vmul.f32 1.442695, %v2956_v9  ;;  %v3952_v53 = vpack.c.bf16 %v8916_v51, %v8899_v48 }
 0x1fa   : > { %v3713_v45 = vadd.f32 %v3483_v24, %v11451_v2  ;;  %v7548_v14 = vpop.eup %7547  ;;  %v3338_v27 = vadd.f32 1.0, %v7546_v58  ;;  %v2959_v47 = vsub.f32 0.0, %v2831_v39  ;;  %v9031_v32 = vpop.f32.mrb[56].mxu1  ;;  %v3953_v24 = vpack.c.bf16 %v8903_v43, %v8882_v50 }
 0x1fb   : > { %v7550_v59 = vpop.eup %7549  ;;  %v3493_v35 = vmul.f32 0.6931472, %v7548_v14  ;;  %v2957_v17 = vsub.f32 0.0, %v2829_v57  ;;  %v9037_v7 = vpop.f32.mrb[57].mxu1  ;;  %6845 = vmatprep.mubr.bf16.mxu0 %v3952_v53  ;;  %v9041_v48 = vadd.f32 %v8935_v8, %v8874_v42  ;;  %v11452_v58 = vmax.f32 %v8872_v29, 0.0 }
 0x1fc   : > { %v9033_v18 = vadd.f32 -0.6931472, %v3713_v45  ;;  %v7552_v2 = vpop.eup %7551  ;;  %v3489_v44 = vmul.f32 0.6931472, %v7550_v59  ;;  %7563 = vlog2.f32 %v3338_v27  ;;  %v3126_v9 = vmul.f32 1.442695, %v2959_v47  ;;  %6846 = vmatmul.mubr.bf16.gmra.mrb[20].mxu0 %v3953_v24 }
 0x1fd   : > { %v9043_v51 = vpop.f32.mrb[58].mxu1  ;;  %v7554_v39 = vpop.eup %7553  ;;  %v3718_v45 = vadd.f32 %v3493_v35, %v11452_v58  ;;  %v3336_v57 = vadd.f32 1.0, %v7552_v2  ;;  %7565 = vpow2.f32 %v3120_v1  ;;  %v3122_v43 = vmul.f32 1.442695, %v2957_v17 }
 0x1fe   : > { %v9047_v50 = vpop.f32.mrb[59].mxu1  ;;  %v7556_v14 = vpop.eup %7555  ;;  %v11453_v27 = vmax.f32 %v8878_v41, 0.0  ;;  %v3339_v53 = vadd.f32 1.0, %v7554_v39  ;;  %7567 = vpow2.f32 %v3126_v9  ;;  %v2834_v29 = vand.u32 2147483647, %v9041_v48 }
 0x1ff   : > { %v9052_v59 = vadd.f32 -0.6931472, %v3718_v45  ;;  %7569 = vlog2.f32 %v3336_v57  ;;  %v3337_v6 = vadd.f32 1.0, %v7556_v14  ;;  %v9055_v35 = vpop.permute.xlu1 %4593  ;;  %v9061_v41 = vadd.f32 %v8935_v8, %v8880_v5 }
 0x200   : > { %v3716_v47 = vadd.f32 %v3489_v44, %v11453_v27  ;;  %11454 = vst [vmem:[#allocation22_spill] sm:$0xff] %v9055_v35  ;;  %v7558_v1 = vpop.eup %7557  ;;  %7571 = vlog2.f32 %v3339_v53  ;;  %v9065_v44 = vadd.f32 %v8935_v8, %v8890_v3  ;;  %v2962_v2 = vsub.f32 0.0, %v2834_v29 }
 0x201   : > { %v3495_v24 = vmul.f32 0.6931472, %v7558_v1  ;;  %7573 = vlog2.f32 %v3337_v6  ;;  %v9069_v9 = vadd.f32 %v8935_v8, %v8895_v61  ;;  %v2832_v45 = vand.u32 2147483647, %v9061_v41 }
 0x202   : > { %v9057_v17 = vadd.f32 -0.6931472, %v3716_v47  ;;  %v7560_v39 = vpop.eup %7559  ;;  %7575 = vpow2.f32 %v3122_v43  ;;  %v9074_v57 = vpop.f32.mrb[60].mxu1  ;;  %v11455_v3 = vmax.f32 %v8888_v63, 0.0  ;;  %v3132_v47 = vmul.f32 1.442695, %v2962_v2 }
 0x203   : > { %v7562_v14 = vpop.eup %7561  ;;  %v3491_v6 = vmul.f32 0.6931472, %v7560_v39  ;;  %v2835_v53 = vand.u32 2147483647, %v9065_v44  ;;  %v2960_v29 = vsub.f32 0.0, %v2832_v45  ;;  %v9081_v58 = vpop.f32.mrb[61].mxu1 }
 0x204   : > { %v3719_v27 = vadd.f32 %v3495_v24, %v11455_v3  ;;  %v3342_v61 = vadd.f32 1.0, %v7562_v14  ;;  %v2833_v1 = vand.u32 2147483647, %v9069_v9  ;;  %v11456_v5 = vmax.f32 %v8910_v0, 0.0  ;;  %v9087_v24 = vpop.permute.xlu1 %4612  ;;  %v9089_v2 = vpop.f32.mrb[62].mxu1 }
 0x205   : > { %7577 = vpow2.f32 %v3132_v47  ;;  %v2963_v63 = vsub.f32 0.0, %v2835_v53  ;;  %11457 = vst [vmem:[#allocation23_spill] sm:$0xff] %v9087_v24  ;;  %v3128_v45 = vmul.f32 1.442695, %v2960_v29  ;;  %v3954_v3 = vpack.c.bf16 %v8979_v60, %v8945_v52  ;;  %v9093_v43 = vpop.f32.mrb[63].mxu1 }
 0x206   : > { %v9083_v42 = vadd.f32 -0.6931472, %v3719_v27  ;;  %v3717_v11 = vadd.f32 %v3491_v6, %v11456_v5  ;;  %v7564_v39 = vpop.eup %7563  ;;  %7579 = vlog2.f32 %v3342_v61  ;;  %v2961_v14 = vsub.f32 0.0, %v2833_v1 }
 0x207   : > { %v7566_v27 = vpop.eup %7565  ;;  %v3501_v0 = vmul.f32 0.6931472, %v7564_v39  ;;  %v3134_v5 = vmul.f32 1.442695, %v2963_v63  ;;  %v3955_v6 = vpack.c.bf16 %v8975_v34, %v8928_v49  ;;  %7581 = vpow2.f32 %v3128_v45  ;;  %6849 = vmatprep.mubr.bf16.mxu0 %v3954_v3  ;;  %v9130_v3 = vld [vmem:[%s11338_s2 + $0x10] sm:$0xff] }
 0x208   : > { %v9095_v22 = vadd.f32 -0.6931472, %v3717_v11  ;;  %v7568_v47 = vpop.eup %7567  ;;  %v3340_v53 = vadd.f32 1.0, %v7566_v27  ;;  %v3130_v24 = vmul.f32 1.442695, %v2961_v14  ;;  %v9101_v61 = vadd.f32 %v8935_v8, %v8914_v4  ;;  %v9116_v27 = vpop.permute.xlu1 %4631 }
 0x209   : > { %v7570_v52 = vpop.eup %7569  ;;  %v11458_v60 = vmax.f32 %v8939_v12, 0.0  ;;  %v3343_v11 = vadd.f32 1.0, %v7568_v47  ;;  %7583 = vpow2.f32 %v3134_v5  ;;  %6850 = vmatmul.mubr.bf16.gmra.mrb[24].mxu0 %v3955_v6  ;;  %v9107_v1 = vadd.f32 %v8935_v8, %v8918_v54  ;;  %11459 = vst [vmem:[#allocation24_spill] sm:$0xff] %v9116_v27 }
 0x20a   : > { %v7572_v34 = vpop.eup %7571  ;;  %v3497_v49 = vmul.f32 0.6931472, %v7570_v52  ;;  %7585 = vlog2.f32 %v3340_v53  ;;  %v2838_v39 = vand.u32 2147483647, %v9101_v61  ;;  %v9111_v4 = vpop.f32.mrb[64].mxu1  ;;  %v11460_v5 = vmax.f32 %v8943_v37, 0.0 }
 0x20b   : > { %v3722_v29 = vadd.f32 %v3501_v0, %v11458_v60  ;;  %v7574_v45 = vpop.eup %7573  ;;  %v3503_v12 = vmul.f32 0.6931472, %v7572_v34  ;;  %7587 = vlog2.f32 %v3343_v11  ;;  %v9118_v54 = vpop.f32.mrb[65].mxu1  ;;  %v11461_v60 = vmax.f32 %v8949_v46, 0.0 }
 0x20c   : > { %v7576_v0 = vpop.eup %7575  ;;  %v3720_v6 = vadd.f32 %v3497_v49, %v11460_v5  ;;  %v3499_v47 = vmul.f32 0.6931472, %v7574_v45  ;;  %7589 = vpow2.f32 %v3130_v24  ;;  %v2966_v53 = vsub.f32 0.0, %v2838_v39  ;;  %v9122_v52 = vpop.f32.mrb[66].mxu1 }
 0x20d   : > { %v9113_v14 = vadd.f32 -0.6931472, %v3722_v29  ;;  %v3723_v29 = vadd.f32 %v3503_v12, %v11461_v60  ;;  %v3341_v34 = vadd.f32 1.0, %v7576_v0  ;;  %v2836_v11 = vand.u32 2147483647, %v9107_v1  ;;  %v9136_v49 = vpop.f32.mrb[67].mxu1 }
 0x20e   : > { %v9134_v37 = vrot.slane %v9130_v3, %v8169_v28  ;;  %11463 = vst [vmem:[#allocation26_spill] sm:$0xff] %v9136_v49  ;;  %v9138_v24 = vadd.f32 -0.6931472, %v3720_v6  ;;  %v11464_v39 = vmax.f32 %v8953_v16, 0.0  ;;  %v3140_v45 = vmul.f32 1.442695, %v2966_v53 }
 0x20f   : > { %v9144_v12 = vadd.f32 %v8935_v8, %v8923_v62  ;;  %v7578_v0 = vpop.eup %7577  ;;  %v9146_v5 = vadd.f32 -0.6931472, %v3723_v29  ;;  %7591 = vlog2.f32 %v3341_v34  ;;  %v2964_v60 = vsub.f32 0.0, %v2836_v11  ;;  %v9160_v53 = vld [vmem:[%s11338_s2 + $0x18] sm:$0xff] }
 0x210   : > { %11462 = vst [vmem:[#allocation25_spill] sm:$0xff] %v9134_v37  ;;  %v3721_v46 = vadd.f32 %v3499_v47, %v11464_v39  ;;  %4935 = vbcast.lane.b32.xlu1 %v9134_v37, 264  ;;  %v9151_v63 = vadd.f32 %v8935_v8, %v8926_v56  ;;  %4931 = vbcast.lane.b32.xlu0 %v9134_v37, 256  ;;  %v7580_v16 = vpop.eup %7579  ;;  %v3346_v47 = vadd.f32 1.0, %v7578_v0  ;;  %7593 = vpow2.f32 %v3140_v45  ;;  %v9165_v39 = vpop.permute.xlu1 %4745 }
 0x211   : > { %v3509_v29 = vmul.f32 0.6931472, %v7580_v16  ;;  %v3136_v34 = vmul.f32 1.442695, %v2964_v60  ;;  %v2839_v11 = vand.u32 2147483647, %v9144_v12  ;;  %v3956_v56 = vpack.c.bf16 %v9033_v18, %v9011_v40 }
 0x212   : > { %v9154_v6 = vadd.f32 -0.6931472, %v3721_v46  ;;  %11465 = vst [vmem:[#allocation27_spill] sm:$0xff] %v9165_v39  ;;  %v7582_v46 = vpop.eup %7581  ;;  %7595 = vlog2.f32 %v3346_v47  ;;  %v2837_v0 = vand.u32 2147483647, %v9151_v63  ;;  %v3957_v62 = vpack.c.bf16 %v9017_v30, %v8999_v21  ;;  %v9171_v27 = vpop.f32.mrb[68].mxu1 }
 0x213   : > { %v7584_v16 = vpop.eup %7583  ;;  %v11466_v60 = vmax.f32 %v8985_v23, 0.0  ;;  %v3344_v37 = vadd.f32 1.0, %v7582_v46  ;;  %7597 = vpow2.f32 %v3136_v34  ;;  %v2967_v40 = vsub.f32 0.0, %v2839_v11  ;;  %6853 = vmatprep.mubr.bf16.mxu0 %v3956_v56  ;;  %v9175_v18 = vpop.f32.mrb[69].mxu1 }
 0x214   : > { %v7586_v47 = vpop.eup %7585  ;;  %v3347_v39 = vadd.f32 1.0, %v7584_v16  ;;  %v2965_v45 = vsub.f32 0.0, %v2837_v0  ;;  %6854 = vmatmul.mubr.bf16.gmra.mrb[28].mxu0 %v3957_v62  ;;  %v9179_v49 = vrot.slane %v9160_v53, %v8153_v15  ;;  %v9183_v21 = vadd.f32 %v8935_v8, %v8960_v33  ;;  %v9185_v23 = vpop.f32.mrb[70].mxu1 }
 0x215   : > { %v3726_v35 = vadd.f32 %v3509_v29, %v11466_v60  ;;  %11468 = vst [vmem:[#allocation29_spill] sm:$0xff] %v9185_v23  ;;  %v7588_v30 = vpop.eup %7587  ;;  %v3505_v34 = vmul.f32 0.6931472, %v7586_v47  ;;  %7599 = vlog2.f32 %v3344_v37  ;;  %v3142_v11 = vmul.f32 1.442695, %v2967_v40  ;;  %v9197_v37 = vpop.f32.mrb[71].mxu1 }
 0x216   : > { %11467 = vst [vmem:[#allocation28_spill] sm:$0xff] %v9179_v49  ;;  %v7590_v56 = vpop.eup %7589  ;;  %v3511_v46 = vmul.f32 0.6931472, %v7588_v30  ;;  %7601 = vlog2.f32 %v3347_v39  ;;  %v3138_v62 = vmul.f32 1.442695, %v2965_v45  ;;  %5049 = vbcast.lane.b32.xlu1 %v9179_v49, 264  ;;  %v9203_v40 = vadd.f32 %v8935_v8, %v8963_v13 }
 0x217   : > { %v9187_v29 = vadd.f32 -0.6931472, %v3726_v35  ;;  %v11469_v0 = vmax.f32 %v8991_v26, 0.0  ;;  %v3345_v16 = vadd.f32 1.0, %v7590_v56  ;;  %7603 = vpow2.f32 %v3142_v11  ;;  %v9194_v35 = vpop.permute.xlu1 %4764  ;;  %5045 = vbcast.lane.b32.xlu0 %v9179_v49, 256  ;;  %11471 = vst [vmem:[#allocation31_spill] sm:$0xff] %v9197_v37 }
 0x218   : > { %v2842_v60 = vand.u32 2147483647, %v9183_v21  ;;  %11470 = vst [vmem:[#allocation30_spill] sm:$0xff] %v9194_v35  ;;  %v11472_v39 = vmax.f32 %v9015_v38, 0.0  ;;  %7605 = vpow2.f32 %v3138_v62  ;;  %v9207_v26 = vrot.slane %v9160_v53, %v8160_v20  ;;  %v11474_v11 = vld [vmem:[#allocation21_spill] sm:$0xff]  ;;  %v11477_v13 = vld [vmem:[#allocation15_spill] sm:$0xff] }
 0x219   : > { %v3724_v33 = vadd.f32 %v3505_v34, %v11469_v0  ;;  %v7592_v47 = vpop.eup %7591  ;;  %7607 = vlog2.f32 %v3345_v16  ;;  %v9213_v56 = vadd.f32 %v8935_v8, %v11474_v11  ;;  %v9221_v20 = vadd.f32 %v8935_v8, %v8971_v10 }
 0x21a   : > { %v3727_v45 = vadd.f32 %v3511_v46, %v11472_v39  ;;  %11473 = vst [vmem:[#allocation32_spill] sm:$0xff] %v9207_v26  ;;  %v2970_v34 = vsub.f32 0.0, %v2842_v60  ;;  %v7594_v38 = vpop.eup %7593  ;;  %v3507_v62 = vmul.f32 0.6931472, %v7592_v47  ;;  %5068 = vbcast.lane.b32.xlu1 %v9207_v26, 264  ;;  %v11475_v11 = vmax.f32 %v9021_v55, 0.0 }
 0x21b   : > { %v9209_v30 = vadd.f32 -0.6931472, %v3724_v33  ;;  %v3350_v0 = vadd.f32 1.0, %v7594_v38  ;;  %v2840_v16 = vand.u32 2147483647, %v9203_v40  ;;  %5064 = vbcast.lane.b32.xlu0 %v9207_v26, 256  ;;  %v3958_v38 = vpack.c.bf16 %v9095_v22, %v9057_v17  ;;  %v9233_v60 = vpop.permute.xlu1 %4616 }
 0x21c   : > { %v9215_v46 = vadd.f32 -0.6931472, %v3727_v45  ;;  %v3148_v33 = vmul.f32 1.442695, %v2970_v34  ;;  %v7596_v39 = vpop.eup %7595  ;;  %v3725_v45 = vadd.f32 %v3507_v62, %v11475_v11  ;;  %v2843_v47 = vand.u32 2147483647, %v9213_v56 }
 0x21d   : > { %v2841_v15 = vand.u32 2147483647, %v9221_v20  ;;  %v7598_v10 = vpop.eup %7597  ;;  %v3517_v35 = vmul.f32 0.6931472, %v7596_v39  ;;  %7609 = vlog2.f32 %v3350_v0  ;;  %v2968_v34 = vsub.f32 0.0, %v2840_v16  ;;  %11476 = vst [vmem:[#allocation21_spill] sm:$0xff] %v9233_v60  ;;  %6857 = vmatprep.mubr.bf16.mxu0 %v3958_v38 }
 0x21e   : > { %v9235_v49 = vpop.f32.mrb[72].mxu1  ;;  %v9237_v55 = vadd.f32 -0.6931472, %v3725_v45  ;;  %v3348_v62 = vadd.f32 1.0, %v7598_v10  ;;  %7611 = vpow2.f32 %v3148_v33  ;;  %v2971_v11 = vsub.f32 0.0, %v2843_v47  ;;  %4692 = vbcast.lane.b32.xlu1 %v11477_v13, 272 }
 0x21f   : > { %v9240_v37 = vpop.f32.mrb[73].mxu1  ;;  %v7600_v26 = vpop.eup %7599  ;;  %v11478_v0 = vmax.f32 %v9041_v48, 0.0  ;;  %v3144_v39 = vmul.f32 1.442695, %v2968_v34  ;;  %v2969_v23 = vsub.f32 0.0, %v2841_v15  ;;  %v3959_v22 = vpack.c.bf16 %v9083_v42, %v9052_v59  ;;  %v11479_v60 = vld [vmem:[#allocation11_spill] sm:$0xff] }
 0x220   : > { %v9246_v17 = vpop.f32.mrb[74].mxu1  ;;  %v7602_v45 = vpop.eup %7601  ;;  %v3513_v10 = vmul.f32 0.6931472, %v7600_v26  ;;  %7613 = vlog2.f32 %v3348_v62  ;;  %v3150_v33 = vmul.f32 1.442695, %v2971_v11  ;;  %v9250_v47 = vadd.f32 %v8935_v8, %v8993_v19  ;;  %4658 = vbcast.lane.b32.xlu0 %v11479_v60, 280 }
 0x221   : > { %v3730_v16 = vadd.f32 %v3517_v35, %v11478_v0  ;;  %v9253_v48 = vpop.f32.mrb[75].mxu1  ;;  %v7604_v35 = vpop.eup %7603  ;;  %v3519_v34 = vmul.f32 0.6931472, %v7602_v45  ;;  %7615 = vpow2.f32 %v3144_v39  ;;  %v3146_v42 = vmul.f32 1.442695, %v2969_v23  ;;  %6858 = vmatmul.mubr.bf16.gmra.mrb[32].mxu0 %v3959_v22 }
 0x222   : > { %v7606_v59 = vpop.eup %7605  ;;  %v11480_v26 = vmax.f32 %v9061_v41, 0.0  ;;  %v3351_v62 = vadd.f32 1.0, %v7604_v35  ;;  %7617 = vpow2.f32 %v3150_v33  ;;  %v9260_v11 = vpop.f32.mrb[76].mxu1  ;;  %v2846_v23 = vand.u32 2147483647, %v9250_v47 }
 0x223   : > { %v9255_v15 = vadd.f32 -0.6931472, %v3730_v16  ;;  %v9262_v60 = vpop.permute.xlu0 %4589  ;;  %v7608_v0 = vpop.eup %7607  ;;  %v11482_v16 = vmax.f32 %v9065_v44, 0.0  ;;  %v3349_v45 = vadd.f32 1.0, %v7606_v59  ;;  %7619 = vpow2.f32 %v3146_v42  ;;  %v7957_v42 = vld [vmem:[%s11338_s2] sm:$0xff] }
 0x224   : > { %v3728_v38 = vadd.f32 %v3513_v10, %v11480_v26  ;;  %11481 = vst [vmem:[#allocation11_spill] sm:$0xff] %v9262_v60  ;;  %v9267_v39 = vpop.permute.xlu1 %4650  ;;  %v9269_v41 = vpop.f32.mrb[77].mxu1  ;;  %v3515_v10 = vmul.f32 0.6931472, %v7608_v0  ;;  %7621 = vlog2.f32 %v3351_v62  ;;  %v9275_v33 = vadd.f32 %v8935_v8, %v8997_v25  ;;  %v11485_v59 = vld [vmem:[#allocation10_spill] sm:$0xff] }
 0x225   : > { %v3731_v13 = vadd.f32 %v3519_v34, %v11482_v16  ;;  %11483 = vst [vmem:[#allocation33_spill] sm:$0xff] %v9267_v39  ;;  %v9277_v35 = vpop.f32.mrb[78].mxu1  ;;  %7623 = vlog2.f32 %v3349_v45  ;;  %v2974_v34 = vsub.f32 0.0, %v2846_v23  ;;  %v9285_v26 = vrot.slane %v7957_v42, %v11485_v59 }
 0x226   : > { %v9271_v22 = vadd.f32 -0.6931472, %v3728_v38  ;;  %11484 = vst [vmem:[#allocation34_spill] sm:$0xff] %v9277_v35  ;;  %v9287_v38 = vpop.f32.mrb[79].mxu1  ;;  %v11488_v62 = vmax.f32 %v9069_v9, 0.0  ;;  %v9300_v42 = vadd.f32 %v8935_v8, %v9009_v31  ;;  %v3960_v9 = vpack.c.bf16 %v9154_v6, %v9138_v24  ;;  %v11493_v24 = vld [vmem:[#allocation16_spill] sm:$0xff] }
 0x227   : > { %v9279_v44 = vadd.f32 -0.6931472, %v3731_v13  ;;  %11486 = vst [vmem:[#allocation35_spill] sm:$0xff] %v9285_v26  ;;  %11487 = vst [vmem:[#allocation36_spill] sm:$0xff] %v9287_v38  ;;  %v2844_v16 = vand.u32 2147483647, %v9275_v33  ;;  %v9295_v13 = vadd.f32 %v8935_v8, %v9003_v36  ;;  %v7610_v45 = vpop.eup %7609  ;;  %v9310_v39 = vpop.permute.xlu0 %4608 }
 0x228   : > { %v3729_v0 = vadd.f32 %v3515_v10, %v11488_v62  ;;  %v3156_v23 = vmul.f32 1.442695, %v2974_v34  ;;  %4726 = vbcast.lane.b32.xlu1 %v9285_v26, 264  ;;  %v3961_v10 = vpack.c.bf16 %v9146_v5, %v9113_v14  ;;  %4722 = vbcast.lane.b32.xlu0 %v9285_v26, 256  ;;  %v7612_v62 = vpop.eup %7611  ;;  %v3525_v36 = vmul.f32 0.6931472, %v7610_v45  ;;  %v9314_v6 = vpop.permute.xlu1 %4783 }
 0x229   : > { %v2972_v19 = vsub.f32 0.0, %v2844_v16  ;;  %11489 = vst [vmem:[#allocation37_spill] sm:$0xff] %v9310_v39  ;;  %v3354_v60 = vadd.f32 1.0, %v7612_v62  ;;  %v2847_v31 = vand.u32 2147483647, %v9295_v13  ;;  %6861 = vmatprep.mubr.bf16.mxu0 %v3960_v9  ;;  %11490 = vst [vmem:[#allocation38_spill] sm:$0xff] %v9314_v6  ;;  %v9321_v45 = vadd.f32 %v8935_v8, %v9031_v32 }
 0x22a   : > { %v9307_v25 = vadd.f32 -0.6931472, %v3729_v0  ;;  %7625 = vpow2.f32 %v3156_v23  ;;  %v7614_v14 = vpop.eup %7613  ;;  %v11491_v5 = vmax.f32 %v9101_v61, 0.0  ;;  %v2845_v16 = vand.u32 2147483647, %v9300_v42  ;;  %6862 = vmatmul.mubr.bf16.gmra.mrb[36].mxu0 %v3961_v10  ;;  %v9323_v23 = vpop.f32.mrb[80].mxu1 }
 0x22b   : > { %v3152_v38 = vmul.f32 1.442695, %v2972_v19  ;;  %11492 = vst [vmem:[#allocation39_spill] sm:$0xff] %v9323_v23  ;;  %v7616_v62 = vpop.eup %7615  ;;  %v3521_v34 = vmul.f32 0.6931472, %v7614_v14  ;;  %7627 = vlog2.f32 %v3354_v60  ;;  %v2975_v9 = vsub.f32 0.0, %v2847_v31 }
 0x22c   : > { %v3734_v0 = vadd.f32 %v3525_v36, %v11491_v5  ;;  %4825 = vbcast.lane.b32.xlu1 %v11493_v24, 272  ;;  %v9328_v61 = vadd.f32 %v8935_v8, %v9037_v7  ;;  %v11494_v19 = vld [vmem:[#allocation12_spill] sm:$0xff]  ;;  %v9331_v36 = vpop.f32.mrb[81].mxu1  ;;  %v7618_v10 = vpop.eup %7617  ;;  %v3352_v32 = vadd.f32 1.0, %v7616_v62  ;;  %v2973_v6 = vsub.f32 0.0, %v2845_v16 }
 0x22d   : > { %4791 = vbcast.lane.b32.xlu0 %v11494_v19, 280  ;;  %11495 = vst [vmem:[#allocation12_spill] sm:$0xff] %v9331_v36  ;;  %7629 = vpow2.f32 %v3152_v38  ;;  %v9335_v39 = vpop.f32.mrb[82].mxu1  ;;  %v7620_v60 = vpop.eup %7619  ;;  %v11497_v31 = vmax.f32 %v9107_v1, 0.0  ;;  %v3355_v23 = vadd.f32 1.0, %v7618_v10 }
 0x22e   : > { %v9333_v5 = vadd.f32 -0.6931472, %v3734_v0  ;;  %11496 = vst [vmem:[#allocation40_spill] sm:$0xff] %v9335_v39  ;;  %v3158_v24 = vmul.f32 1.442695, %v2975_v9  ;;  %v9340_v26 = vpop.f32.mrb[83].mxu1  ;;  %v7622_v19 = vpop.eup %7621  ;;  %7631 = vlog2.f32 %v3352_v32 }
 0x22f   : > { %v3732_v14 = vadd.f32 %v3521_v34, %v11497_v31  ;;  %11498 = vst [vmem:[#allocation41_spill] sm:$0xff] %v9340_v26  ;;  %v3353_v36 = vadd.f32 1.0, %v7620_v60  ;;  %v3154_v0 = vmul.f32 1.442695, %v2973_v6  ;;  %v2850_v62 = vand.u32 2147483647, %v9321_v45  ;;  %v9343_v38 = vpop.permute.xlu0 %4627  ;;  %v7624_v16 = vpop.eup %7623 }
 0x230   : > { %11499 = vst [vmem:[#allocation42_spill] sm:$0xff] %v9343_v38  ;;  %v3527_v35 = vmul.f32 0.6931472, %v7622_v19  ;;  %7633 = vlog2.f32 %v3355_v23  ;;  %v9348_v34 = vpop.permute.xlu1 %4665  ;;  %v3523_v9 = vmul.f32 0.6931472, %v7624_v16  ;;  %v11501_v6 = vmax.f32 %v9144_v12, 0.0 }
 0x231   : > { %v9345_v39 = vadd.f32 -0.6931472, %v3732_v14  ;;  %11500 = vst [vmem:[#allocation43_spill] sm:$0xff] %v9348_v34  ;;  %7635 = vlog2.f32 %v3353_v36  ;;  %v2978_v10 = vsub.f32 0.0, %v2850_v62  ;;  %v2848_v32 = vand.u32 2147483647, %v9328_v61 }
 0x232   : > { %v3735_v60 = vadd.f32 %v3527_v35, %v11501_v6  ;;  %7637 = vpow2.f32 %v3158_v24  ;;  %v9356_v31 = vld [vmem:[%s11338_s2 + $0x8] sm:$0xff]  ;;  %v11502_v14 = vld [vmem:[#allocation9_spill] sm:$0xff]  ;;  %v9364_v19 = vadd.f32 %v8935_v8, %v9043_v51  ;;  %v11503_v36 = vmax.f32 %v9151_v63, 0.0  ;;  %v9368_v24 = vpop.f32.mrb[84].mxu1 }
 0x233   : > { %v9360_v23 = vrot.slane %v9356_v31, %v11502_v14  ;;  %7639 = vpow2.f32 %v3154_v0  ;;  %v3164_v12 = vmul.f32 1.442695, %v2978_v10  ;;  %v2976_v35 = vsub.f32 0.0, %v2848_v32  ;;  %11504 = vst [vmem:[#allocation44_spill] sm:$0xff] %v9368_v24  ;;  %v9382_v10 = vpop.permute.xlu0 %4741 }
 0x234   : > { %v3733_v62 = vadd.f32 %v3523_v9, %v11503_v36  ;;  %v7626_v16 = vpop.eup %7625  ;;  %v9370_v6 = vadd.f32 -0.6931472, %v3735_v60  ;;  %v2851_v7 = vand.u32 2147483647, %v9364_v19  ;;  %v9377_v51 = vadd.f32 %v8935_v8, %v9047_v50  ;;  %11505 = vst [vmem:[#allocation45_spill] sm:$0xff] %v9382_v10  ;;  %v9388_v50 = vpop.permute.xlu1 %4749 }
 0x235   : > { %4859 = vbcast.lane.b32.xlu1 %v9360_v23, 264  ;;  %v3358_v0 = vadd.f32 1.0, %v7626_v16  ;;  %7641 = vpow2.f32 %v3164_v12  ;;  %v3160_v9 = vmul.f32 1.442695, %v2976_v35  ;;  %4855 = vbcast.lane.b32.xlu0 %v9360_v23, 256  ;;  %v7628_v32 = vpop.eup %7627  ;;  %v3962_v34 = vpack.c.bf16 %v9237_v55, %v9209_v30  ;;  %11506 = vst [vmem:[#allocation46_spill] sm:$0xff] %v9388_v50 }
 0x236   : > { %v9379_v63 = vadd.f32 -0.6931472, %v3733_v62  ;;  %v2979_v60 = vsub.f32 0.0, %v2851_v7  ;;  %v2849_v1 = vand.u32 2147483647, %v9377_v51  ;;  %v9390_v62 = vpop.f32.mrb[85].mxu1  ;;  %v3963_v35 = vpack.c.bf16 %v9215_v46, %v9187_v29 }
 0x237   : > { %11507 = vst [vmem:[#allocation47_spill] sm:$0xff] %v9390_v62  ;;  %v7630_v16 = vpop.eup %7629  ;;  %v3533_v12 = vmul.f32 0.6931472, %v7628_v32  ;;  %7643 = vlog2.f32 %v3358_v0  ;;  %v9396_v7 = vadd.f32 %v8935_v8, %v9074_v57  ;;  %v9398_v36 = vpop.f32.mrb[86].mxu1  ;;  %6865 = vmatprep.mubr.bf16.mxu0 %v3962_v34  ;;  %v11509_v55 = vld [vmem:[#allocation18_spill] sm:$0xff]  ;;  %v11511_v0 = vmax.f32 %v9183_v21, 0.0 }
 0x238   : > { %11508 = vst [vmem:[#allocation48_spill] sm:$0xff] %v9398_v36  ;;  %v3356_v10 = vadd.f32 1.0, %v7630_v16  ;;  %7645 = vpow2.f32 %v3160_v9  ;;  %v3166_v38 = vmul.f32 1.442695, %v2979_v60  ;;  %v2977_v30 = vsub.f32 0.0, %v2849_v1  ;;  %v9401_v50 = vpop.f32.mrb[87].mxu1  ;;  %v7632_v32 = vpop.eup %7631  ;;  %6866 = vmatmul.mubr.bf16.gmra.mrb[40].mxu0 %v3963_v35 }
 0x239   : > { %4920 = vbcast.lane.b32.xlu1 %v11509_v55, 272  ;;  %11510 = vst [vmem:[#allocation18_spill] sm:$0xff] %v9401_v50  ;;  %v3738_v14 = vadd.f32 %v3533_v12, %v11511_v0  ;;  %v2854_v57 = vand.u32 2147483647, %v9396_v7  ;;  %v9409_v46 = vadd.f32 %v8935_v8, %v9081_v58  ;;  %v11512_v9 = vld [vmem:[#allocation17_spill] sm:$0xff]  ;;  %v11513_v16 = vld [vmem:[#allocation6_spill] sm:$0xff]  ;;  %v9418_v29 = vpop.permute.xlu0 %4760  ;;  %v9426_v24 = vpop.permute.xlu1 %4798 }
 0x23a   : > { %4901 = vbcast.lane.b32.xlu0 %v11512_v9, 272  ;;  %v7634_v1 = vpop.eup %7633  ;;  %v3529_v34 = vmul.f32 0.6931472, %v7632_v32  ;;  %7647 = vlog2.f32 %v3356_v10  ;;  %v3162_v60 = vmul.f32 1.442695, %v2977_v30  ;;  %v9414_v50 = vrot.slane %v9130_v3, %v11513_v16  ;;  %11514 = vst [vmem:[#allocation17_spill] sm:$0xff] %v9418_v29 }
 0x23b   : > { %v7636_v21 = vpop.eup %7635  ;;  %v9416_v12 = vadd.f32 -0.6931472, %v3738_v14  ;;  %v3535_v35 = vmul.f32 0.6931472, %v7634_v1  ;;  %7649 = vpow2.f32 %v3166_v38  ;;  %v2982_v0 = vsub.f32 0.0, %v2854_v57  ;;  %v9420_v58 = vpop.f32.mrb[88].mxu1 }
 0x23c   : > { %11515 = vst [vmem:[#allocation6_spill] sm:$0xff] %v9420_v58  ;;  %v7638_v36 = vpop.eup %7637  ;;  %v11516_v62 = vmax.f32 %v9203_v40, 0.0  ;;  %v3531_v10 = vmul.f32 0.6931472, %v7636_v21  ;;  %7651 = vpow2.f32 %v3162_v60  ;;  %11517 = vst [vmem:[#allocation49_spill] sm:$0xff] %v9426_v24  ;;  %v9428_v14 = vpop.f32.mrb[89].mxu1  ;;  %v9440_v21 = vadd.f32 %v8935_v8, %v9089_v2 }
 0x23d   : > { %4954 = vbcast.lane.b32.xlu1 %v9414_v50, 264  ;;  %11518 = vst [vmem:[#allocation50_spill] sm:$0xff] %v9428_v14  ;;  %v7640_v38 = vpop.eup %7639  ;;  %v11519_v57 = vmax.f32 %v9213_v56, 0.0  ;;  %v3359_v29 = vadd.f32 1.0, %v7638_v36  ;;  %v3172_v58 = vmul.f32 1.442695, %v2982_v0  ;;  %v9448_v0 = vadd.f32 %v8935_v8, %v9093_v43 }
 0x23e   : > { %v3736_v32 = vadd.f32 %v3529_v34, %v11516_v62  ;;  %v2852_v26 = vand.u32 2147483647, %v9409_v46  ;;  %4950 = vbcast.lane.b32.xlu0 %v9414_v50, 256  ;;  %v11520_v62 = vmax.f32 %v9221_v20, 0.0  ;;  %v3357_v60 = vadd.f32 1.0, %v7640_v38  ;;  %v9442_v30 = vpop.f32.mrb[90].mxu1 }
 0x23f   : > { %v3739_v1 = vadd.f32 %v3535_v35, %v11519_v57  ;;  %11521 = vst [vmem:[#allocation51_spill] sm:$0xff] %v9442_v30  ;;  %v7642_v56 = vpop.eup %7641  ;;  %7653 = vlog2.f32 %v3359_v29  ;;  %v2853_v43 = vand.u32 2147483647, %v9448_v0  ;;  %v11526_v24 = vmax.f32 %v9250_v47, 0.0 }
 0x240   : > { %v9434_v40 = vadd.f32 -0.6931472, %v3736_v32  ;;  %v3737_v34 = vadd.f32 %v3531_v10, %v11520_v62  ;;  %v2980_v36 = vsub.f32 0.0, %v2852_v26  ;;  %v9450_v32 = vpop.f32.mrb[91].mxu1  ;;  %7655 = vlog2.f32 %v3357_v60  ;;  %v9457_v26 = vpop.permute.xlu0 %4597 }
 0x241   : > { %v9444_v35 = vadd.f32 -0.6931472, %v3739_v1  ;;  %11522 = vst [vmem:[#allocation52_spill] sm:$0xff] %v9450_v32  ;;  %v3362_v10 = vadd.f32 1.0, %v7642_v56  ;;  %v7644_v38 = vpop.eup %7643  ;;  %7657 = vpow2.f32 %v3172_v58  ;;  %v2855_v1 = vand.u32 2147483647, %v9440_v21  ;;  %v9462_v60 = vpop.permute.xlu1 %4601 }
 0x242   : > { %v9452_v20 = vadd.f32 -0.6931472, %v3737_v34  ;;  %v3168_v57 = vmul.f32 1.442695, %v2980_v36  ;;  %11523 = vst [vmem:[#allocation53_spill] sm:$0xff] %v9457_v26  ;;  %v7646_v62 = vpop.eup %7645  ;;  %v3964_v34 = vpack.c.bf16 %v9307_v25, %v9271_v22  ;;  %11524 = vst [vmem:[#allocation54_spill] sm:$0xff] %v9462_v60  ;;  %v3965_v36 = vpack.c.bf16 %v9279_v44, %v9255_v15 }
 0x243   : > { %v3541_v8 = vmul.f32 0.6931472, %v7644_v38  ;;  %7659 = vlog2.f32 %v3362_v10  ;;  %v3360_v56 = vadd.f32 1.0, %v7646_v62  ;;  %v2983_v58 = vsub.f32 0.0, %v2855_v1  ;;  %v9466_v29 = vpop.f32.mrb[92].mxu1  ;;  %v11534_v60 = vld [vmem:[#allocation19_spill] sm:$0xff] }
 0x244   : > { %7661 = vpow2.f32 %v3168_v57  ;;  %11525 = vst [vmem:[#allocation55_spill] sm:$0xff] %v9466_v29  ;;  %v7648_v2 = vpop.eup %7647  ;;  %v2981_v10 = vsub.f32 0.0, %v2853_v43  ;;  %6869 = vmatprep.mubr.bf16.mxu0 %v3964_v34  ;;  %v9472_v26 = vrot.slane %v9160_v53, %v8169_v28  ;;  %v9475_v22 = vld [vmem:[%s8086_s15] ss:$0 sm:$0xff]  ;;  %v9481_v57 = vpop.f32.mrb[93].mxu1 }
 0x245   : > { %v3742_v38 = vadd.f32 %v3541_v8, %v11526_v24  ;;  %v9479_v25 = vadd.f32 %v9475_v22, %v9111_v4  ;;  %11528 = vst [vmem:[#allocation57_spill] sm:$0xff] %v9481_v57  ;;  %v7650_v15 = vpop.eup %7649  ;;  %v3537_v44 = vmul.f32 0.6931472, %v7648_v2  ;;  %7663 = vlog2.f32 %v3360_v56  ;;  %6870 = vmatmul.mubr.bf16.gmra.mrb[44].mxu0 %v3965_v36  ;;  %v9487_v24 = vpop.f32.mrb[94].mxu1  ;;  %v11535_v57 = vld [vmem:[#allocation26_spill] sm:$0xff] }
 0x246   : > { %11527 = vst [vmem:[#allocation56_spill] sm:$0xff] %v9472_v26  ;;  %v3174_v1 = vmul.f32 1.442695, %v2983_v58  ;;  %v9485_v47 = vadd.f32 %v9475_v22, %v9118_v54  ;;  %11529 = vst [vmem:[#allocation58_spill] sm:$0xff] %v9487_v24  ;;  %v7652_v28 = vpop.eup %7651  ;;  %v3363_v8 = vadd.f32 1.0, %v7650_v15  ;;  %5087 = vbcast.lane.b32.xlu1 %v9472_v26, 264  ;;  %v9494_v4 = vadd.f32 %v9475_v22, %v9122_v52  ;;  %v9500_v58 = vpop.permute.xlu0 %4646 }
 0x247   : > { %v9489_v62 = vadd.f32 -0.6931472, %v3742_v38  ;;  %v3170_v43 = vmul.f32 1.442695, %v2981_v10  ;;  %v11530_v2 = vmax.f32 %v9275_v33, 0.0  ;;  %v3361_v56 = vadd.f32 1.0, %v7652_v28  ;;  %v9507_v15 = vpop.permute.xlu1 %4654 }
 0x248   : > { %7665 = vpow2.f32 %v3174_v1  ;;  %5083 = vbcast.lane.b32.xlu0 %v9472_v26, 256  ;;  %11531 = vst [vmem:[#allocation59_spill] sm:$0xff] %v9500_v58  ;;  %v9502_v36 = vpop.f32.mrb[95].mxu1  ;;  %v2858_v38 = vand.u32 2147483647, %v9479_v25  ;;  %11533 = vst [vmem:[#allocation61_spill] sm:$0xff] %v9507_v15  ;;  %v9516_v15 = vadd.f32 %v9475_v22, %v11535_v57 }
 0x249   : > { %v3740_v34 = vadd.f32 %v3537_v44, %v11530_v2  ;;  %11532 = vst [vmem:[#allocation60_spill] sm:$0xff] %v9502_v36  ;;  %7667 = vlog2.f32 %v3363_v8  ;;  %v2856_v52 = vand.u32 2147483647, %v9485_v47  ;;  %v7654_v33 = vpop.eup %7653  ;;  %v2859_v28 = vand.u32 2147483647, %v9494_v4 }
 0x24a   : > { %7669 = vlog2.f32 %v3361_v56  ;;  %v7656_v2 = vpop.eup %7655  ;;  %v3543_v54 = vmul.f32 0.6931472, %v7654_v33  ;;  %v2986_v8 = vsub.f32 0.0, %v2858_v38  ;;  %4711 = vbcast.lane.b32.xlu1 %v11534_v60, 272  ;;  %v11536_v56 = vld [vmem:[#allocation13_spill] sm:$0xff]  ;;  %v9521_v1 = vpop.f32.mrb[96].mxu1 }
 0x24b   : > { %v9509_v44 = vadd.f32 -0.6931472, %v3740_v34  ;;  %7671 = vpow2.f32 %v3170_v43  ;;  %v2984_v58 = vsub.f32 0.0, %v2856_v52  ;;  %v7658_v10 = vpop.eup %7657  ;;  %v3539_v36 = vmul.f32 0.6931472, %v7656_v2  ;;  %v9525_v2 = vpop.f32.mrb[97].mxu1 }
 0x24c   : > { %v2987_v24 = vsub.f32 0.0, %v2859_v28  ;;  %v3966_v34 = vpack.c.bf16 %v9379_v63, %v9345_v39  ;;  %4677 = vbcast.lane.b32.xlu0 %v11536_v56, 280  ;;  %v11537_v43 = vmax.f32 %v9295_v13, 0.0  ;;  %v3366_v52 = vadd.f32 1.0, %v7658_v10  ;;  %v9530_v63 = vpop.permute.xlu0 %4779  ;;  %v9532_v56 = vpop.f32.mrb[98].mxu1  ;;  %v11540_v10 = vld [vmem:[#allocation20_spill] sm:$0xff] }
 0x24d   : > { %v7660_v33 = vpop.eup %7659  ;;  %v3180_v29 = vmul.f32 1.442695, %v2986_v8  ;;  %v3176_v32 = vmul.f32 1.442695, %v2984_v58  ;;  %v11538_v57 = vmax.f32 %v9300_v42, 0.0  ;;  %11539 = vst [vmem:[#allocation26_spill] sm:$0xff] %v9530_v63  ;;  %v9538_v8 = vpop.permute.xlu1 %4688 }
 0x24e   : > { %v3743_v38 = vadd.f32 %v3543_v54, %v11537_v43  ;;  %v7662_v28 = vpop.eup %7661  ;;  %v3549_v30 = vmul.f32 0.6931472, %v7660_v33  ;;  %v3182_v14 = vmul.f32 1.442695, %v2987_v24  ;;  %6873 = vmatprep.mubr.bf16.mxu0 %v3966_v34  ;;  %7673 = vlog2.f32 %v3366_v52  ;;  %4844 = vbcast.lane.b32.xlu1 %v11540_v10, 272  ;;  %11541 = vst [vmem:[#allocation13_spill] sm:$0xff] %v9538_v8 }
 0x24f   : > { %v3741_v60 = vadd.f32 %v3539_v36, %v11538_v57  ;;  %v3364_v54 = vadd.f32 1.0, %v7662_v28  ;;  %v2857_v58 = vand.u32 2147483647, %v9516_v15  ;;  %v7664_v42 = vpop.eup %7663  ;;  %v11542_v24 = vmax.f32 %v9321_v45, 0.0  ;;  %v11543_v43 = vld [vmem:[#allocation14_spill] sm:$0xff]  ;;  %v11559_v63 = vld [vmem:[#allocation25_spill] sm:$0xff] }
 0x250   : > { %v9534_v13 = vadd.f32 -0.6931472, %v3743_v38  ;;  %7675 = vpow2.f32 %v3180_v29  ;;  %v3967_v33 = vpack.c.bf16 %v9370_v6, %v9333_v5  ;;  %4810 = vbcast.lane.b32.xlu0 %v11543_v43, 280  ;;  %v9547_v38 = vpop.f32.mrb[99].mxu1  ;;  %v3545_v52 = vmul.f32 0.6931472, %v7664_v42 }
 0x251   : > { %v9540_v36 = vadd.f32 -0.6931472, %v3741_v60  ;;  %v3746_v34 = vadd.f32 %v3549_v30, %v11542_v24  ;;  %7677 = vlog2.f32 %v3364_v54  ;;  %v2985_v28 = vsub.f32 0.0, %v2857_v58 }
 0x252   : > { %v9551_v57 = vadd.f32 %v9475_v22, %v9171_v27  ;;  %v7666_v60 = vpop.eup %7665  ;;  %7679 = vpow2.f32 %v3176_v32  ;;  %6874 = vmatmul.mubr.bf16.gmra.mrb[48].mxu0 %v3967_v33  ;;  %v9557_v45 = vadd.f32 %v9475_v22, %v9175_v18  ;;  %v9561_v5 = vrot.slane %v9356_v31, %v11485_v59  ;;  %v11551_v32 = vld [vmem:[#allocation29_spill] sm:$0xff] }
 0x253   : > { %v9553_v39 = vadd.f32 -0.6931472, %v3746_v34  ;;  %v7668_v6 = vpop.eup %7667  ;;  %v11545_v30 = vmax.f32 %v9328_v61, 0.0  ;;  %v3367_v54 = vadd.f32 1.0, %v7666_v60  ;;  %7681 = vpow2.f32 %v3182_v14  ;;  %v9568_v34 = vpop.permute.xlu0 %4635 }
 0x254   : > { %11544 = vst [vmem:[#allocation20_spill] sm:$0xff] %v9561_v5  ;;  %v3178_v27 = vmul.f32 1.442695, %v2985_v28  ;;  %v7670_v58 = vpop.eup %7669  ;;  %v3551_v42 = vmul.f32 0.6931472, %v7668_v6  ;;  %11546 = vst [vmem:[#allocation14_spill] sm:$0xff] %v9568_v34 }
 0x255   : > { %v3744_v29 = vadd.f32 %v3545_v52, %v11545_v30  ;;  %v2862_v24 = vand.u32 2147483647, %v9551_v57  ;;  %v7672_v33 = vpop.eup %7671  ;;  %v3547_v43 = vmul.f32 0.6931472, %v7670_v58  ;;  %7683 = vlog2.f32 %v3367_v54  ;;  %v9573_v52 = vpop.permute.xlu1 %4817  ;;  %4878 = vbcast.lane.b32.xlu1 %v9561_v5, 264  ;;  %4874 = vbcast.lane.b32.xlu0 %v9561_v5, 256 }
 0x256   : > { %v2860_v61 = vand.u32 2147483647, %v9557_v45  ;;  %11547 = vst [vmem:[#allocation62_spill] sm:$0xff] %v9573_v52  ;;  %v11548_v14 = vmax.f32 %v9364_v19, 0.0  ;;  %v3365_v60 = vadd.f32 1.0, %v7672_v33  ;;  %7685 = vpow2.f32 %v3178_v27  ;;  %v9579_v30 = vpop.f32.mrb[100].mxu1 }
 0x257   : > { %v9570_v31 = vadd.f32 -0.6931472, %v3744_v29  ;;  %v2990_v6 = vsub.f32 0.0, %v2862_v24  ;;  %v9581_v29 = vpop.f32.mrb[0].mxu0  ;;  %v11550_v54 = vmax.f32 %v9377_v51, 0.0  ;;  %v9587_v52 = vadd.f32 %v9475_v22, %v11551_v32  ;;  %v11552_v19 = vld [vmem:[#allocation31_spill] sm:$0xff] }
 0x258   : > { %v3747_v28 = vadd.f32 %v3551_v42, %v11548_v14  ;;  %11549 = vst [vmem:[#allocation63_spill] sm:$0xff] %v9581_v29  ;;  %v2988_v18 = vsub.f32 0.0, %v2860_v61  ;;  %v9591_v27 = vadd.f32 %v9475_v22, %v11552_v19  ;;  %v9593_v42 = vpop.f32.mrb[101].mxu1  ;;  %v9595_v24 = vpop.f32.mrb[1].mxu0  ;;  %7687 = vlog2.f32 %v3365_v60 }
 0x259   : > { %v3745_v58 = vadd.f32 %v3547_v43, %v11550_v54  ;;  %11553 = vst [vmem:[#allocation29_spill] sm:$0xff] %v9593_v42  ;;  %11554 = vst [vmem:[#allocation31_spill] sm:$0xff] %v9595_v24  ;;  %v3188_v14 = vmul.f32 1.442695, %v2990_v6  ;;  %v3968_v51 = vpack.c.bf16 %v9452_v20, %v9434_v40  ;;  %v9601_v43 = vpop.f32.mrb[102].mxu1  ;;  %v7674_v61 = vpop.eup %7673  ;;  %4939 = vbcast.lane.b32.xlu0 %v11559_v63, 272 }
 0x25a   : > { %v9597_v33 = vadd.f32 -0.6931472, %v3747_v28  ;;  %11555 = vst [vmem:[#allocation64_spill] sm:$0xff] %v9601_v43  ;;  %v3184_v54 = vmul.f32 1.442695, %v2988_v18  ;;  %v7676_v8 = vpop.eup %7675  ;;  %v9609_v6 = vpop.permute.xlu0 %4669  ;;  %v3969_v18 = vpack.c.bf16 %v9444_v35, %v9416_v12  ;;  %v11561_v29 = vmax.f32 %v9396_v7, 0.0 }
 0x25b   : > { %v9603_v32 = vadd.f32 -0.6931472, %v3745_v58  ;;  %v3557_v34 = vmul.f32 0.6931472, %v7674_v61  ;;  %7689 = vpow2.f32 %v3188_v14  ;;  %v2863_v28 = vand.u32 2147483647, %v9587_v52  ;;  %6877 = vmatprep.mubr.bf16.mxu0 %v3968_v51  ;;  %v7678_v40 = vpop.eup %7677  ;;  %v9633_v7 = vpop.permute.xlu1 %4893 }
 0x25c   : > { %v2861_v60 = vand.u32 2147483647, %v9591_v27  ;;  %11556 = vst [vmem:[#allocation65_spill] sm:$0xff] %v9609_v6  ;;  %v3370_v20 = vadd.f32 1.0, %v7676_v8  ;;  %7691 = vpow2.f32 %v3184_v54  ;;  %v11557_v58 = vld [vmem:[#allocation7_spill] sm:$0xff]  ;;  %v9618_v14 = vpop.f32.mrb[103].mxu1  ;;  %v7680_v61 = vpop.eup %7679  ;;  %6878 = vmatmul.mubr.bf16.gmra.mrb[52].mxu0 %v3969_v18  ;;  %v9631_v35 = vadd.f32 %v9475_v22, %v9240_v37 }
 0x25d   : > { %v9615_v19 = vrot.slane %v9130_v3, %v11557_v58  ;;  %11560 = vst [vmem:[#allocation25_spill] sm:$0xff] %v9618_v14  ;;  %v3750_v51 = vadd.f32 %v3557_v34, %v11561_v29  ;;  %v3553_v24 = vmul.f32 0.6931472, %v7678_v40  ;;  %v2991_v6 = vsub.f32 0.0, %v2863_v28  ;;  %v9622_v8 = vpop.f32.mrb[104].mxu1  ;;  %v7682_v54 = vpop.eup %7681  ;;  %11563 = vst [vmem:[#allocation67_spill] sm:$0xff] %v9633_v7 }
 0x25e   : > { %v2989_v59 = vsub.f32 0.0, %v2861_v60  ;;  %11562 = vst [vmem:[#allocation66_spill] sm:$0xff] %v9622_v8  ;;  %7693 = vlog2.f32 %v3370_v20  ;;  %v3368_v12 = vadd.f32 1.0, %v7680_v61  ;;  %v9627_v3 = vadd.f32 %v9475_v22, %v9235_v49  ;;  %v9635_v34 = vpop.f32.mrb[105].mxu1 }
 0x25f   : > { %11558 = vst [vmem:[#allocation7_spill] sm:$0xff] %v9615_v19  ;;  %4969 = vbcast.lane.b32.xlu1 %v9615_v19, 256  ;;  %11564 = vst [vmem:[#allocation68_spill] sm:$0xff] %v9635_v34  ;;  %v9637_v29 = vadd.f32 -0.6931472, %v3750_v51  ;;  %v11565_v28 = vmax.f32 %v9409_v46, 0.0  ;;  %v7684_v61 = vpop.eup %7683  ;;  %v9665_v46 = vpop.permute.xlu1 %4912 }
 0x260   : > { %v3371_v40 = vadd.f32 1.0, %v7682_v54  ;;  %v3190_v20 = vmul.f32 1.442695, %v2991_v6  ;;  %v9641_v18 = vpop.f32.mrb[106].mxu1  ;;  %7695 = vlog2.f32 %v3368_v12  ;;  %v3186_v49 = vmul.f32 1.442695, %v2989_v59  ;;  %v7686_v7 = vpop.eup %7685 }
 0x261   : > { %v3748_v60 = vadd.f32 %v3553_v24, %v11565_v28  ;;  %11566 = vst [vmem:[#allocation69_spill] sm:$0xff] %v9641_v18  ;;  %v2866_v37 = vand.u32 2147483647, %v9627_v3  ;;  %4973 = vbcast.lane.b32.xlu0 %v9615_v19, 264  ;;  %v3559_v51 = vmul.f32 0.6931472, %v7684_v61  ;;  %v9649_v24 = vpop.permute.xlu0 %4768  ;;  %v9663_v61 = vadd.f32 %v9475_v22, %v9253_v48 }
 0x262   : > { %7697 = vlog2.f32 %v3371_v40  ;;  %11567 = vst [vmem:[#allocation70_spill] sm:$0xff] %v9649_v24  ;;  %v9651_v6 = vpop.f32.mrb[107].mxu1  ;;  %v3369_v54 = vadd.f32 1.0, %v7686_v7  ;;  %v2864_v12 = vand.u32 2147483647, %v9631_v35  ;;  %v11569_v28 = vld [vmem:[#allocation28_spill] sm:$0xff]  ;;  %v7688_v8 = vpop.eup %7687  ;;  %v9659_v40 = vadd.f32 %v9475_v22, %v9246_v17 }
 0x263   : > { %v9646_v34 = vadd.f32 -0.6931472, %v3748_v60  ;;  %11568 = vst [vmem:[#allocation71_spill] sm:$0xff] %v9651_v6  ;;  %7699 = vpow2.f32 %v3190_v20  ;;  %v2994_v59 = vsub.f32 0.0, %v2866_v37  ;;  %5053 = vbcast.lane.b32.xlu1 %v11569_v28, 272  ;;  %v11570_v18 = vmax.f32 %v9440_v21, 0.0 }
 0x264   : > { %7701 = vpow2.f32 %v3186_v49  ;;  %v3555_v7 = vmul.f32 0.6931472, %v7688_v8  ;;  %v2992_v37 = vsub.f32 0.0, %v2864_v12  ;;  %11571 = vst [vmem:[#allocation28_spill] sm:$0xff] %v9665_v46  ;;  %v11572_v24 = vld [vmem:[#allocation32_spill] sm:$0xff]  ;;  %v11573_v48 = vmax.f32 %v9448_v0, 0.0 }
 0x265   : > { %v3751_v60 = vadd.f32 %v3559_v51, %v11570_v18  ;;  %7703 = vlog2.f32 %v3369_v54  ;;  %v3196_v20 = vmul.f32 1.442695, %v2994_v59  ;;  %5072 = vbcast.lane.b32.xlu0 %v11572_v24, 272  ;;  %v7690_v6 = vpop.eup %7689  ;;  %v2867_v17 = vand.u32 2147483647, %v9659_v40  ;;  %v9678_v43 = vpop.permute.xlu0 %4802 }
 0x266   : > { %v7692_v51 = vpop.eup %7691  ;;  %v3749_v8 = vadd.f32 %v3555_v7, %v11573_v48  ;;  %v3374_v54 = vadd.f32 1.0, %v7690_v6  ;;  %v3192_v59 = vmul.f32 1.442695, %v2992_v37  ;;  %v2865_v14 = vand.u32 2147483647, %v9663_v61  ;;  %11574 = vst [vmem:[#allocation32_spill] sm:$0xff] %v9678_v43 }
 0x267   : > { %v9668_v21 = vadd.f32 -0.6931472, %v3751_v60  ;;  %7705 = vpow2.f32 %v3196_v20  ;;  %v3372_v12 = vadd.f32 1.0, %v7692_v51  ;;  %v2995_v46 = vsub.f32 0.0, %v2867_v17  ;;  %v11582_v43 = vld [vmem:[#allocation15_spill] sm:$0xff] }
 0x268   : > { %v3970_v60 = vpack.c.bf16 %v9540_v36, %v9509_v44  ;;  %v7694_v18 = vpop.eup %7693  ;;  %v9680_v42 = vadd.f32 -0.6931472, %v3749_v8  ;;  %7707 = vlog2.f32 %v3374_v54  ;;  %v3971_v0 = vpack.c.bf16 %v9534_v13, %v9489_v62  ;;  %v9701_v13 = vpop.permute.xlu1 %4639 }
 0x269   : > { %v9686_v6 = vrot.slane %v9160_v53, %v11513_v16  ;;  %v3565_v7 = vmul.f32 0.6931472, %v7694_v18  ;;  %7709 = vlog2.f32 %v3372_v12  ;;  %v3198_v20 = vmul.f32 1.442695, %v2995_v46  ;;  %v11575_v53 = vld [vmem:[#allocation34_spill] sm:$0xff]  ;;  %v9703_v36 = vpop.f32.mrb[108].mxu1 }
 0x26a   : > { %v2993_v37 = vsub.f32 0.0, %v2865_v14  ;;  %6881 = vmatprep.mubr.bf16.mxu0 %v3970_v60  ;;  %v7696_v17 = vpop.eup %7695  ;;  %7711 = vpow2.f32 %v3192_v59  ;;  %v9691_v44 = vadd.f32 %v9475_v22, %v9260_v11  ;;  %v9695_v62 = vadd.f32 %v9475_v22, %v9269_v41  ;;  %11576 = vst [vmem:[#allocation34_spill] sm:$0xff] %v9701_v13  ;;  %v9708_v48 = vpop.f32.mrb[109].mxu1 }
 0x26b   : > { %6882 = vmatmul.mubr.bf16.gmra.mrb[56].mxu0 %v3971_v0  ;;  %5102 = vbcast.lane.b32.xlu1 %v9686_v6, 256  ;;  %v9699_v16 = vadd.f32 %v9475_v22, %v11575_v53  ;;  %v11577_v46 = vmax.f32 %v9479_v25, 0.0  ;;  %v3561_v51 = vmul.f32 0.6931472, %v7696_v17  ;;  %7713 = vpow2.f32 %v3198_v20  ;;  %v9719_v17 = vpop.f32.mrb[110].mxu1 }
 0x26c   : > { %v7698_v14 = vpop.eup %7697  ;;  %v3194_v11 = vmul.f32 1.442695, %v2993_v37  ;;  %5106 = vbcast.lane.b32.xlu0 %v9686_v6, 264  ;;  %v2870_v59 = vand.u32 2147483647, %v9691_v44  ;;  %v11578_v25 = vmax.f32 %v9485_v47, 0.0  ;;  %v9717_v37 = vpop.permute.xlu0 %4620 }
 0x26d   : > { %v3754_v18 = vadd.f32 %v3565_v7, %v11577_v46  ;;  %v7700_v41 = vpop.eup %7699  ;;  %v3567_v8 = vmul.f32 0.6931472, %v7698_v14  ;;  %11579 = vst [vmem:[#allocation72_spill] sm:$0xff] %v9717_v37  ;;  %11580 = vst [vmem:[#allocation73_spill] sm:$0xff] %v9719_v17  ;;  %v11581_v14 = vmax.f32 %v9494_v4, 0.0 }
 0x26e   : > { %v7702_v60 = vpop.eup %7701  ;;  %v3752_v7 = vadd.f32 %v3561_v51, %v11578_v25  ;;  %v3375_v20 = vadd.f32 1.0, %v7700_v41  ;;  %7715 = vpow2.f32 %v3194_v11  ;;  %v2998_v49 = vsub.f32 0.0, %v2870_v59  ;;  %v11584_v41 = vld [vmem:[#allocation35_spill] sm:$0xff]  ;;  %v9733_v59 = vpop.permute.xlu1 %4703 }
 0x26f   : > { %v9713_v0 = vadd.f32 -0.6931472, %v3754_v18  ;;  %v7704_v53 = vpop.eup %7703  ;;  %v3755_v46 = vadd.f32 %v3567_v8, %v11581_v14  ;;  %v3373_v54 = vadd.f32 1.0, %v7702_v60  ;;  %v2868_v12 = vand.u32 2147483647, %v9695_v62  ;;  %4696 = vbcast.lane.b32.xlu1 %v11582_v43, 280 }
 0x270   : > { %v9725_v18 = vpop.f32.mrb[111].mxu1  ;;  %v9727_v47 = vadd.f32 -0.6931472, %v3752_v7  ;;  %v3563_v51 = vmul.f32 0.6931472, %v7704_v53  ;;  %7717 = vlog2.f32 %v3375_v20  ;;  %4730 = vbcast.lane.b32.xlu0 %v11584_v41, 272 }
 0x271   : > { %11583 = vst [vmem:[#allocation15_spill] sm:$0xff] %v9725_v18  ;;  %v7706_v25 = vpop.eup %7705  ;;  %v9731_v13 = vadd.f32 -0.6931472, %v3755_v46  ;;  %7719 = vlog2.f32 %v3373_v54  ;;  %v3204_v4 = vmul.f32 1.442695, %v2998_v49  ;;  %v2996_v8 = vsub.f32 0.0, %v2868_v12 }
 0x272   : > { %11585 = vst [vmem:[#allocation35_spill] sm:$0xff] %v9733_v59  ;;  %v11586_v43 = vmax.f32 %v9516_v15, 0.0  ;;  %v3378_v14 = vadd.f32 1.0, %v7706_v25  ;;  %v2871_v7 = vand.u32 2147483647, %v9699_v16  ;;  %v11587_v53 = vld [vmem:[#allocation36_spill] sm:$0xff]  ;;  %v7708_v11 = vpop.eup %7707  ;;  %v3972_v54 = vpack.c.bf16 %v9603_v32, %v9570_v31 }
 0x273   : > { %v9740_v20 = vadd.f32 %v9475_v22, %v11587_v53  ;;  %7721 = vpow2.f32 %v3204_v4  ;;  %v3200_v37 = vmul.f32 1.442695, %v2996_v8  ;;  %v3973_v49 = vpack.c.bf16 %v9597_v33, %v9553_v39  ;;  %v11588_v12 = vld [vmem:[#allocation16_spill] sm:$0xff]  ;;  %v7710_v15 = vpop.eup %7709  ;;  %v9754_v39 = vpop.f32.mrb[112].mxu1  ;;  %v11592_v53 = vld [vmem:[#allocation39_spill] sm:$0xff] }
 0x274   : > { %v3753_v60 = vadd.f32 %v3563_v51, %v11586_v43  ;;  %4829 = vbcast.lane.b32.xlu1 %v11588_v12, 280  ;;  %v3573_v51 = vmul.f32 0.6931472, %v7708_v11  ;;  %7723 = vlog2.f32 %v3378_v14  ;;  %v2999_v25 = vsub.f32 0.0, %v2871_v7  ;;  %v9749_v43 = vpop.permute.xlu0 %4684  ;;  %4863 = vbcast.lane.b32.xlu0 %v9360_v23, 272  ;;  %v7712_v4 = vpop.eup %7711  ;;  %11590 = vst [vmem:[#allocation16_spill] sm:$0xff] %v9754_v39 }
 0x275   : > { %11589 = vst [vmem:[#allocation36_spill] sm:$0xff] %v9749_v43  ;;  %v3569_v8 = vmul.f32 0.6931472, %v7710_v15  ;;  %7725 = vpow2.f32 %v3200_v37  ;;  %v2869_v32 = vand.u32 2147483647, %v9740_v20  ;;  %6885 = vmatprep.mubr.bf16.mxu0 %v3972_v54  ;;  %v7714_v33 = vpop.eup %7713  ;;  %v3376_v14 = vadd.f32 1.0, %v7712_v4 }
 0x276   : > { %v9747_v46 = vadd.f32 -0.6931472, %v3753_v60  ;;  %v11591_v60 = vmax.f32 %v9551_v57, 0.0  ;;  %v3206_v7 = vmul.f32 1.442695, %v2999_v25  ;;  %6886 = vmatmul.mubr.bf16.gmra.mrb[60].mxu0 %v3973_v49  ;;  %v9760_v12 = vadd.f32 %v9475_v22, %v11592_v53  ;;  %v9762_v15 = vpop.f32.mrb[113].mxu1  ;;  %v9771_v57 = vpop.permute.xlu1 %4753 }
 0x277   : > { %11593 = vst [vmem:[#allocation39_spill] sm:$0xff] %v9762_v15  ;;  %v11594_v37 = vmax.f32 %v9557_v45, 0.0  ;;  %v3379_v59 = vadd.f32 1.0, %v7714_v33  ;;  %v2997_v54 = vsub.f32 0.0, %v2869_v32  ;;  %v11595_v43 = vld [vmem:[#allocation12_spill] sm:$0xff]  ;;  %v9773_v49 = vpop.f32.mrb[114].mxu1  ;;  %7727 = vlog2.f32 %v3376_v14 }
 0x278   : > { %v3758_v11 = vadd.f32 %v3573_v51, %v11591_v60  ;;  %v9768_v39 = vadd.f32 %v9475_v22, %v11595_v43  ;;  %4905 = vbcast.lane.b32.xlu1 %v11512_v9, 280  ;;  %11596 = vst [vmem:[#allocation12_spill] sm:$0xff] %v9771_v57  ;;  %11597 = vst [vmem:[#allocation74_spill] sm:$0xff] %v9773_v49  ;;  %v7716_v51 = vpop.eup %7715  ;;  %v2874_v45 = vand.u32 2147483647, %v9760_v12  ;;  %4924 = vbcast.lane.b32.xlu0 %v11509_v55, 280  ;;  %v9786_v53 = vpop.permute.xlu0 %4787 }
 0x279   : > { %v3756_v31 = vadd.f32 %v3569_v8, %v11594_v37  ;;  %7729 = vlog2.f32 %v3379_v59  ;;  %v3377_v43 = vadd.f32 1.0, %v7716_v51  ;;  %v3202_v32 = vmul.f32 1.442695, %v2997_v54  ;;  %v9782_v9 = vpop.f32.mrb[115].mxu1  ;;  %11599 = vst [vmem:[#allocation76_spill] sm:$0xff] %v9786_v53  ;;  %v11600_v55 = vld [vmem:[#allocation40_spill] sm:$0xff] }
 0x27a   : > { %v9775_v25 = vadd.f32 -0.6931472, %v3758_v11  ;;  %11598 = vst [vmem:[#allocation75_spill] sm:$0xff] %v9782_v9  ;;  %v7718_v33 = vpop.eup %7717  ;;  %7731 = vpow2.f32 %v3206_v7  ;;  %v3002_v60 = vsub.f32 0.0, %v2874_v45  ;;  %v2872_v14 = vand.u32 2147483647, %v9768_v39  ;;  %v9802_v9 = vpop.permute.xlu1 %4806 }
 0x27b   : > { %v9780_v8 = vadd.f32 -0.6931472, %v3756_v31  ;;  %v7720_v37 = vpop.eup %7719  ;;  %v3575_v4 = vmul.f32 0.6931472, %v7718_v33  ;;  %7733 = vlog2.f32 %v3377_v43  ;;  %v9790_v31 = vadd.f32 %v9475_v22, %v11600_v55  ;;  %v11601_v59 = vld [vmem:[#allocation41_spill] sm:$0xff]  ;;  %11603 = vst [vmem:[#allocation40_spill] sm:$0xff] %v9802_v9 }
 0x27c   : > { %v9794_v54 = vadd.f32 %v9475_v22, %v11601_v59  ;;  %4958 = vbcast.lane.b32.xlu1 %v9414_v50, 272  ;;  %v3571_v7 = vmul.f32 0.6931472, %v7720_v37  ;;  %7735 = vpow2.f32 %v3202_v32  ;;  %v3212_v51 = vmul.f32 1.442695, %v3002_v60  ;;  %v9813_v18 = vpop.permute.xlu0 %4821 }
 0x27d   : > { %v3000_v45 = vsub.f32 0.0, %v2872_v14  ;;  %v7722_v11 = vpop.eup %7721  ;;  %v11602_v53 = vmax.f32 %v9587_v52, 0.0  ;;  %v2875_v33 = vand.u32 2147483647, %v9790_v31  ;;  %v11604_v49 = vmax.f32 %v9591_v27, 0.0  ;;  %11605 = vst [vmem:[#allocation41_spill] sm:$0xff] %v9813_v18 }
 0x27e   : > { %v7724_v59 = vpop.eup %7723  ;;  %v3382_v37 = vadd.f32 1.0, %v7722_v11  ;;  %7737 = vpow2.f32 %v3212_v51  ;;  %v2873_v9 = vand.u32 2147483647, %v9794_v54  ;;  %v9815_v27 = vpop.f32.mrb[116].mxu1 }
 0x27f   : > { %v3759_v57 = vadd.f32 %v3575_v4, %v11602_v53  ;;  %v3757_v15 = vadd.f32 %v3571_v7, %v11604_v49  ;;  %v3208_v32 = vmul.f32 1.442695, %v3000_v45  ;;  %v7726_v60 = vpop.eup %7725  ;;  %v3581_v52 = vmul.f32 0.6931472, %v7724_v59  ;;  %11606 = vst [vmem:[#allocation77_spill] sm:$0xff] %v9815_v27  ;;  %v11610_v45 = vld [vmem:[#allocation44_spill] sm:$0xff] }
 0x280   : > { %v3003_v4 = vsub.f32 0.0, %v2875_v33  ;;  %v3974_v53 = vpack.c.bf16 %v9680_v42, %v9646_v34  ;;  %7739 = vlog2.f32 %v3382_v37  ;;  %v3380_v55 = vadd.f32 1.0, %v7726_v60  ;;  %v9821_v42 = vpop.f32.mrb[117].mxu1  ;;  %v9823_v34 = vpop.f32.mrb[2].mxu0  ;;  %v11611_v59 = vld [vmem:[#allocation47_spill] sm:$0xff] }
 0x281   : > { %v9806_v14 = vadd.f32 -0.6931472, %v3759_v57  ;;  %v9810_v43 = vadd.f32 -0.6931472, %v3757_v15  ;;  %v11607_v49 = vmax.f32 %v9627_v3, 0.0  ;;  %7741 = vpow2.f32 %v3208_v32  ;;  %11608 = vst [vmem:[#allocation78_spill] sm:$0xff] %v9821_v42  ;;  %v7728_v15 = vpop.eup %7727 }
 0x282   : > { %v3214_v57 = vmul.f32 1.442695, %v3003_v4  ;;  %6889 = vmatprep.mubr.bf16.mxu0 %v3974_v53  ;;  %v3975_v7 = vpack.c.bf16 %v9668_v21, %v9637_v29  ;;  %11609 = vst [vmem:[#allocation79_spill] sm:$0xff] %v9823_v34  ;;  %7743 = vlog2.f32 %v3380_v55  ;;  %v3001_v51 = vsub.f32 0.0, %v2873_v9  ;;  %v9833_v37 = vpop.f32.mrb[118].mxu1  ;;  %v9835_v32 = vpop.f32.mrb[3].mxu0 }
 0x283   : > { %v3762_v11 = vadd.f32 %v3581_v52, %v11607_v49  ;;  %v9827_v33 = vadd.f32 %v9475_v22, %v11610_v45  ;;  %v9831_v3 = vadd.f32 %v9475_v22, %v11611_v59  ;;  %11612 = vst [vmem:[#allocation44_spill] sm:$0xff] %v9833_v37  ;;  %11613 = vst [vmem:[#allocation47_spill] sm:$0xff] %v9835_v32  ;;  %v7730_v29 = vpop.eup %7729  ;;  %v3577_v60 = vmul.f32 0.6931472, %v7728_v15  ;;  %v9842_v9 = vld [vmem:[%s11338_s2 + $0x10] sm:$0xff]  ;;  %v9848_v4 = vpop.permute.xlu1 %4840 }
 0x284   : > { %7745 = vpow2.f32 %v3214_v57  ;;  %6890 = vmatmul.mubr.bf16.gmra.mrb[64].mxu0 %v3975_v7  ;;  %v11614_v55 = vld [vmem:[#allocation8_spill] sm:$0xff]  ;;  %11616 = vst [vmem:[#allocation80_spill] sm:$0xff] %v9848_v4  ;;  %v9850_v53 = vpop.f32.mrb[119].mxu1  ;;  %v7732_v49 = vpop.eup %7731  ;;  %v3583_v45 = vmul.f32 0.6931472, %v7730_v29  ;;  %v11618_v59 = vmax.f32 %v9631_v35, 0.0 }
 0x285   : > { %v9837_v21 = vadd.f32 -0.6931472, %v3762_v11  ;;  %v9846_v52 = vrot.slane %v9842_v9, %v11614_v55  ;;  %11617 = vst [vmem:[#allocation81_spill] sm:$0xff] %v9850_v53  ;;  %v3210_v11 = vmul.f32 1.442695, %v3001_v51  ;;  %v7734_v7 = vpop.eup %7733  ;;  %v3383_v34 = vadd.f32 1.0, %v7732_v49 }
 0x286   : > { %v3760_v18 = vadd.f32 %v3577_v60, %v11618_v59  ;;  %v2878_v32 = vand.u32 2147483647, %v9827_v33  ;;  %v2876_v37 = vand.u32 2147483647, %v9831_v3  ;;  %v7736_v4 = vpop.eup %7735  ;;  %v11619_v53 = vmax.f32 %v9659_v40, 0.0  ;;  %v11620_v15 = vld [vmem:[#allocation48_spill] sm:$0xff] }
 0x287   : > { %11615 = vst [vmem:[#allocation8_spill] sm:$0xff] %v9846_v52  ;;  %4992 = vbcast.lane.b32.xlu1 %v9846_v52, 264  ;;  %v3579_v51 = vmul.f32 0.6931472, %v7734_v7  ;;  %7747 = vpow2.f32 %v3210_v11  ;;  %v9863_v57 = vadd.f32 %v9475_v22, %v11620_v15  ;;  %4988 = vbcast.lane.b32.xlu0 %v9846_v52, 256  ;;  %v3381_v60 = vadd.f32 1.0, %v7736_v4  ;;  %v9873_v11 = vpop.permute.xlu0 %4897  ;;  %v9876_v17 = vpop.permute.xlu1 %4935 }
 0x288   : > { %v3763_v29 = vadd.f32 %v3583_v45, %v11619_v53  ;;  %v9866_v35 = vadd.f32 -0.6931472, %v3760_v18  ;;  %7749 = vlog2.f32 %v3383_v34  ;;  %v3006_v49 = vsub.f32 0.0, %v2878_v32  ;;  %v7738_v59 = vpop.eup %7737  ;;  %11622 = vst [vmem:[#allocation48_spill] sm:$0xff] %v9873_v11  ;;  %11623 = vst [vmem:[#allocation82_spill] sm:$0xff] %v9876_v17  ;;  %v9891_v45 = vpop.f32.mrb[120].mxu1 }
 0x289   : > { %v11621_v27 = vmax.f32 %v9663_v61, 0.0  ;;  %v3004_v53 = vsub.f32 0.0, %v2876_v37  ;;  %7751 = vlog2.f32 %v3381_v60  ;;  %v3386_v15 = vadd.f32 1.0, %v7738_v59 }
 0x28a   : > { %v9868_v42 = vadd.f32 -0.6931472, %v3763_v29  ;;  %v3220_v7 = vmul.f32 1.442695, %v3006_v49  ;;  %v2879_v18 = vand.u32 2147483647, %v9863_v57  ;;  %v7740_v34 = vpop.eup %7739  ;;  %v3977_v49 = vpack.c.bf16 %v9731_v13, %v9713_v0 }
 0x28b   : > { %v3761_v40 = vadd.f32 %v3579_v51, %v11621_v27  ;;  %v3216_v4 = vmul.f32 1.442695, %v3004_v53  ;;  %v11624_v29 = vld [vmem:[#allocation18_spill] sm:$0xff]  ;;  %v3976_v27 = vpack.c.bf16 %v9747_v46, %v9727_v47  ;;  %5091 = vbcast.lane.b32.xlu0 %v9472_v26, 272  ;;  %v7742_v37 = vpop.eup %7741  ;;  %v3589_v51 = vmul.f32 0.6931472, %v7740_v34 }
 0x28c   : > { %v9882_v61 = vadd.f32 %v9475_v22, %v11624_v29  ;;  %7753 = vlog2.f32 %v3386_v15  ;;  %v3007_v60 = vsub.f32 0.0, %v2879_v18  ;;  %v7744_v59 = vpop.eup %7743  ;;  %v11625_v46 = vmax.f32 %v9691_v44, 0.0  ;;  %v9895_v18 = vpop.f32.mrb[121].mxu1 }
 0x28d   : > { %v9878_v32 = vadd.f32 -0.6931472, %v3761_v40  ;;  %v3384_v40 = vadd.f32 1.0, %v7742_v37  ;;  %7755 = vpow2.f32 %v3220_v7  ;;  %6893 = vmatprep.mubr.bf16.mxu0 %v3976_v27  ;;  %v3585_v34 = vmul.f32 0.6931472, %v7744_v59  ;;  %11626 = vst [vmem:[#allocation18_spill] sm:$0xff] %v9895_v18  ;;  %v9906_v44 = vpop.permute.xlu0 %4916 }
 0x28e   : > { %v2877_v29 = vand.u32 2147483647, %v9882_v61  ;;  %v7746_v47 = vpop.eup %7745  ;;  %v3766_v17 = vadd.f32 %v3589_v51, %v11625_v46  ;;  %7757 = vpow2.f32 %v3216_v4  ;;  %v3222_v15 = vmul.f32 1.442695, %v3007_v60  ;;  %6894 = vmatmul.mubr.bf16.gmra.mrb[68].mxu0 %v3977_v49  ;;  %v9900_v7 = vld [vmem:[%s11338_s2 + $0x18] sm:$0xff]  ;;  %11628 = vst [vmem:[#allocation84_spill] sm:$0xff] %v9906_v44 }
 0x28f   : > { %7759 = vlog2.f32 %v3384_v40  ;;  %v3387_v13 = vadd.f32 1.0, %v7746_v47  ;;  %v9904_v27 = vrot.slane %v9900_v7, %v11557_v58  ;;  %v9908_v37 = vpop.f32.mrb[122].mxu1  ;;  %v11630_v51 = vmax.f32 %v9695_v62, 0.0  ;;  %v11631_v49 = vld [vmem:[#allocation6_spill] sm:$0xff]  ;;  %v9918_v40 = vpop.permute.xlu1 %5049  ;;  %v11635_v62 = vld [vmem:[#allocation51_spill] sm:$0xff] }
 0x290   : > { %v3005_v0 = vsub.f32 0.0, %v2877_v29  ;;  %11629 = vst [vmem:[#allocation85_spill] sm:$0xff] %v9908_v37  ;;  %v9910_v4 = vadd.f32 -0.6931472, %v3766_v17  ;;  %7761 = vpow2.f32 %v3222_v15  ;;  %v9916_v59 = vadd.f32 %v9475_v22, %v11631_v49  ;;  %11632 = vst [vmem:[#allocation6_spill] sm:$0xff] %v9918_v40  ;;  %v9920_v29 = vpop.f32.mrb[123].mxu1 }
 0x291   : > { %11627 = vst [vmem:[#allocation83_spill] sm:$0xff] %v9904_v27  ;;  %v3764_v60 = vadd.f32 %v3585_v34, %v11630_v51  ;;  %11633 = vst [vmem:[#allocation86_spill] sm:$0xff] %v9920_v29  ;;  %v7748_v58 = vpop.eup %7747  ;;  %7763 = vlog2.f32 %v3387_v13  ;;  %5121 = vbcast.lane.b32.xlu1 %v9904_v27, 256  ;;  %v11634_v46 = vld [vmem:[#allocation50_spill] sm:$0xff]  ;;  %v9929_v34 = vadd.f32 %v9475_v22, %v11635_v62  ;;  %5125 = vbcast.lane.b32.xlu0 %v9904_v27, 264  ;;  %v11637_v29 = vld [vmem:[#allocation19_spill] sm:$0xff]  ;;  %v9947_v40 = vpop.permute.xlu0 %4673 }
 0x292   : > { %v3218_v47 = vmul.f32 1.442695, %v3005_v0  ;;  %v9925_v17 = vadd.f32 %v9475_v22, %v11634_v46  ;;  %v7750_v15 = vpop.eup %7749  ;;  %v3385_v49 = vadd.f32 1.0, %v7748_v58  ;;  %v2882_v13 = vand.u32 2147483647, %v9916_v59  ;;  %11639 = vst [vmem:[#allocation50_spill] sm:$0xff] %v9947_v40 }
 0x293   : > { %v9932_v51 = vadd.f32 -0.6931472, %v3764_v60  ;;  %v3591_v0 = vmul.f32 0.6931472, %v7750_v15  ;;  %v7752_v44 = vpop.eup %7751  ;;  %v2883_v27 = vand.u32 2147483647, %v9929_v34  ;;  %v3978_v37 = vpack.c.bf16 %v9810_v43, %v9780_v8 }
 0x294   : > { %7765 = vpow2.f32 %v3218_v47  ;;  %v2880_v46 = vand.u32 2147483647, %v9925_v17  ;;  %v3010_v62 = vsub.f32 0.0, %v2882_v13  ;;  %v11636_v60 = vmax.f32 %v9699_v16, 0.0  ;;  %v11638_v15 = vld [vmem:[#allocation52_spill] sm:$0xff] }
 0x295   : > { %7767 = vlog2.f32 %v3385_v49  ;;  %v3587_v26 = vmul.f32 0.6931472, %v7752_v44  ;;  %4715 = vbcast.lane.b32.xlu1 %v11637_v29, 280  ;;  %v9945_v47 = vadd.f32 %v9475_v22, %v11638_v15  ;;  %4848 = vbcast.lane.b32.xlu0 %v11540_v10, 280  ;;  %v3011_v11 = vsub.f32 0.0, %v2883_v27  ;;  %v9954_v44 = vpop.permute.xlu1 %5068 }
 0x296   : > { %v3767_v58 = vadd.f32 %v3591_v0, %v11636_v60  ;;  %v3008_v53 = vsub.f32 0.0, %v2880_v46  ;;  %v7754_v49 = vpop.eup %7753  ;;  %v3228_v13 = vmul.f32 1.442695, %v3010_v62  ;;  %v3979_v16 = vpack.c.bf16 %v9806_v14, %v9775_v25  ;;  %11640 = vst [vmem:[#allocation51_spill] sm:$0xff] %v9954_v44  ;;  %6897 = vmatprep.mubr.bf16.mxu0 %v3978_v37  ;;  %v10002_v62 = vld [vmem:[%s8086_s15] ss:$0 sm:$0xff] }
 0x297   : > { %v7756_v29 = vpop.eup %7755  ;;  %v11641_v46 = vmax.f32 %v9740_v20, 0.0  ;;  %v3597_v15 = vmul.f32 0.6931472, %v7754_v49  ;;  %v3230_v27 = vmul.f32 1.442695, %v3011_v11  ;;  %v11642_v25 = vmax.f32 %v9760_v12, 0.0 }
 0x298   : > { %v9956_v0 = vadd.f32 -0.6931472, %v3767_v58  ;;  %v3224_v40 = vmul.f32 1.442695, %v3008_v53  ;;  %v7758_v10 = vpop.eup %7757  ;;  %v3390_v18 = vadd.f32 1.0, %v7756_v29  ;;  %7769 = vpow2.f32 %v3228_v13  ;;  %6898 = vmatmul.mubr.bf16.gmra.mrb[72].mxu0 %v3979_v16  ;;  %v11643_v11 = vld [vmem:[#allocation55_spill] sm:$0xff]  ;;  %v9978_v29 = vpop.permute.xlu0 %4707 }
 0x299   : > { %v3765_v60 = vadd.f32 %v3587_v26, %v11641_v46  ;;  %v7760_v8 = vpop.eup %7759  ;;  %v3770_v14 = vadd.f32 %v3597_v15, %v11642_v25  ;;  %v3388_v58 = vadd.f32 1.0, %v7758_v10  ;;  %4882 = vbcast.lane.b32.xlu1 %v9561_v5, 272  ;;  %v2881_v53 = vand.u32 2147483647, %v9945_v47  ;;  %4943 = vbcast.lane.b32.xlu0 %v11559_v63, 280  ;;  %11645 = vst [vmem:[#allocation19_spill] sm:$0xff] %v9978_v29  ;;  %v9984_v63 = vpop.permute.xlu1 %4692 }
 0x29a   : > { %7771 = vpow2.f32 %v3224_v40  ;;  %v7762_v26 = vpop.eup %7761  ;;  %v3593_v20 = vmul.f32 0.6931472, %v7760_v8  ;;  %v9969_v49 = vadd.f32 %v9475_v22, %v11643_v11  ;;  %v11644_v40 = vld [vmem:[#allocation57_spill] sm:$0xff]  ;;  %v11646_v46 = vmax.f32 %v9768_v39, 0.0  ;;  %11647 = vst [vmem:[#allocation52_spill] sm:$0xff] %v9984_v63 }
 0x29b   : > { %v9961_v43 = vadd.f32 -0.6931472, %v3765_v60  ;;  %7773 = vlog2.f32 %v3390_v18  ;;  %v7764_v37 = vpop.eup %7763  ;;  %v9972_v13 = vadd.f32 -0.6931472, %v3770_v14  ;;  %v3391_v12 = vadd.f32 1.0, %v7762_v26  ;;  %v9980_v18 = vpop.f32.mrb[124].mxu1 }
 0x29c   : > { %7775 = vlog2.f32 %v3388_v58  ;;  %v9976_v16 = vadd.f32 %v9475_v22, %v11644_v40  ;;  %v3768_v60 = vadd.f32 %v3593_v20, %v11646_v46  ;;  %v3599_v15 = vmul.f32 0.6931472, %v7764_v37  ;;  %v9986_v8 = vpop.f32.mrb[125].mxu1  ;;  %v11649_v58 = vld [vmem:[#allocation58_spill] sm:$0xff]  ;;  %v11654_v5 = vld [vmem:[#allocation9_spill] sm:$0xff] }
 0x29d   : > { %7777 = vpow2.f32 %v3230_v27  ;;  %v3009_v10 = vsub.f32 0.0, %v2881_v53  ;;  %v2886_v14 = vand.u32 2147483647, %v9969_v49  ;;  %4977 = vbcast.lane.b32.xlu1 %v9615_v19, 272  ;;  %v9992_v39 = vpop.f32.mrb[126].mxu1  ;;  %v11648_v20 = vmax.f32 %v9790_v31, 0.0  ;;  %v10024_v19 = vpop.permute.xlu1 %4726 }
 0x29e   : > { %v7766_v25 = vpop.eup %7765  ;;  %7779 = vlog2.f32 %v3391_v12  ;;  %v9994_v27 = vadd.f32 -0.6931472, %v3768_v60  ;;  %v9998_v40 = vpop.f32.mrb[127].mxu1  ;;  %v2884_v22 = vand.u32 2147483647, %v9976_v16  ;;  %v10006_v44 = vadd.f32 %v10002_v62, %v11649_v58  ;;  %v11650_v60 = vld [vmem:[#allocation60_spill] sm:$0xff] }
 0x29f   : > { %v7768_v26 = vpop.eup %7767  ;;  %v3771_v53 = vadd.f32 %v3599_v15, %v11648_v20  ;;  %v3389_v11 = vadd.f32 1.0, %v7766_v25  ;;  %v3226_v37 = vmul.f32 1.442695, %v3009_v10  ;;  %v3014_v46 = vsub.f32 0.0, %v2886_v14  ;;  %v10018_v20 = vpop.permute.xlu0 %4772  ;;  %11653 = vst [vmem:[#allocation57_spill] sm:$0xff] %v10024_v19 }
 0x2a0   : > { %v3595_v12 = vmul.f32 0.6931472, %v7768_v26  ;;  %v10012_v31 = vadd.f32 %v10002_v62, %v11650_v60  ;;  %v3980_v15 = vpack.c.bf16 %v9878_v32, %v9866_v35  ;;  %v11651_v10 = vmax.f32 %v9794_v54, 0.0  ;;  %11652 = vst [vmem:[#allocation55_spill] sm:$0xff] %v10018_v20 }
 0x2a1   : > { %v10008_v29 = vadd.f32 -0.6931472, %v3771_v53  ;;  %7781 = vlog2.f32 %v3389_v11  ;;  %v3236_v14 = vmul.f32 1.442695, %v3014_v46  ;;  %v3012_v26 = vsub.f32 0.0, %v2884_v22 }
 0x2a2   : > { %v3769_v25 = vadd.f32 %v3595_v12, %v11651_v10  ;;  %7783 = vpow2.f32 %v3226_v37  ;;  %v7770_v58 = vpop.eup %7769  ;;  %v2887_v11 = vand.u32 2147483647, %v10006_v44  ;;  %v2885_v60 = vand.u32 2147483647, %v10012_v31  ;;  %6901 = vmatprep.mubr.bf16.mxu0 %v3980_v15 }
 0x2a3   : > { %v3394_v32 = vadd.f32 1.0, %v7770_v58  ;;  %7785 = vpow2.f32 %v3236_v14  ;;  %v3232_v22 = vmul.f32 1.442695, %v3012_v26  ;;  %v3981_v53 = vpack.c.bf16 %v9868_v42, %v9837_v21 }
 0x2a4   : > { %v7772_v35 = vpop.eup %7771  ;;  %v10026_v54 = vadd.f32 -0.6931472, %v3769_v25  ;;  %v3015_v46 = vsub.f32 0.0, %v2887_v11  ;;  %v3013_v10 = vsub.f32 0.0, %v2885_v60  ;;  %v10032_v15 = vrot.slane %v9842_v9, %v11654_v5 }
 0x2a5   : > { %v7774_v37 = vpop.eup %7773  ;;  %v3392_v12 = vadd.f32 1.0, %v7772_v35  ;;  %7787 = vlog2.f32 %v3394_v32  ;;  %v10036_v25 = vadd.f32 %v10002_v62, %v9521_v1  ;;  %6902 = vmatmul.mubr.bf16.gmra.mrb[76].mxu0 %v3981_v53  ;;  %v11655_v42 = vmax.f32 %v9827_v33, 0.0  ;;  %v10043_v1 = vpop.permute.xlu0 %4836 }
 0x2a6   : > { %v7776_v20 = vpop.eup %7775  ;;  %v3605_v63 = vmul.f32 0.6931472, %v7774_v37  ;;  %v3238_v58 = vmul.f32 1.442695, %v3015_v46  ;;  %v3234_v11 = vmul.f32 1.442695, %v3013_v10  ;;  %v10060_v46 = vadd.f32 %v10002_v62, %v9532_v56 }
 0x2a7   : > { %v7778_v14 = vpop.eup %7777  ;;  %v3601_v26 = vmul.f32 0.6931472, %v7776_v20  ;;  %7789 = vlog2.f32 %v3392_v12  ;;  %5011 = vbcast.lane.b32.xlu1 %v10032_v15, 264  ;;  %5007 = vbcast.lane.b32.xlu0 %v10032_v15, 256  ;;  %11656 = vst [vmem:[#allocation58_spill] sm:$0xff] %v10043_v1  ;;  %v11657_v20 = vmax.f32 %v9831_v3, 0.0  ;;  %v10048_v12 = vpop.permute.xlu1 %4825  ;;  %v10075_v56 = vadd.f32 %v10002_v62, %v9547_v38 }
 0x2a8   : > { %v7780_v60 = vpop.eup %7779  ;;  %v3774_v21 = vadd.f32 %v3605_v63, %v11655_v42  ;;  %v3395_v35 = vadd.f32 1.0, %v7778_v14  ;;  %7791 = vpow2.f32 %v3232_v22  ;;  %v2890_v53 = vand.u32 2147483647, %v10036_v25  ;;  %11658 = vst [vmem:[#allocation60_spill] sm:$0xff] %v10048_v12  ;;  %v10050_v33 = vpop.f32.mrb[4].mxu0 }
 0x2a9   : > { %v3772_v32 = vadd.f32 %v3601_v26, %v11657_v20  ;;  %v3607_v37 = vmul.f32 0.6931472, %v7780_v60  ;;  %7793 = vpow2.f32 %v3238_v58  ;;  %v10056_v22 = vadd.f32 %v10002_v62, %v9525_v2  ;;  %v10062_v3 = vpop.f32.mrb[5].mxu0 }
 0x2aa   : > { %v10052_v63 = vadd.f32 -0.6931472, %v3774_v21  ;;  %7795 = vlog2.f32 %v3395_v35  ;;  %v11659_v26 = vmax.f32 %v9863_v57, 0.0  ;;  %v3018_v60 = vsub.f32 0.0, %v2890_v53  ;;  %v10068_v42 = vpop.f32.mrb[6].mxu0 }
 0x2ab   : > { %v7782_v10 = vpop.eup %7781  ;;  %v10064_v14 = vadd.f32 -0.6931472, %v3772_v32  ;;  %7797 = vpow2.f32 %v3234_v11  ;;  %v2888_v20 = vand.u32 2147483647, %v10056_v22  ;;  %5076 = vbcast.lane.b32.xlu1 %v11572_v24, 280  ;;  %5057 = vbcast.lane.b32.xlu0 %v11569_v28, 280  ;;  %v10085_v24 = vpop.permute.xlu0 %4931 }
 0x2ac   : > { %v3775_v58 = vadd.f32 %v3607_v37, %v11659_v26  ;;  %v7784_v21 = vpop.eup %7783  ;;  %v3603_v35 = vmul.f32 0.6931472, %v7782_v10  ;;  %v3244_v37 = vmul.f32 1.442695, %v3018_v60  ;;  %v11660_v26 = vmax.f32 %v9882_v61, 0.0  ;;  %11661 = vst [vmem:[#allocation9_spill] sm:$0xff] %v10085_v24  ;;  %v10092_v61 = vpop.permute.xlu1 %4859 }
 0x2ad   : > { %v3393_v57 = vadd.f32 1.0, %v7784_v21  ;;  %v7786_v53 = vpop.eup %7785  ;;  %v3016_v9 = vsub.f32 0.0, %v2888_v20  ;;  %v2891_v2 = vand.u32 2147483647, %v10060_v46  ;;  %v10087_v38 = vpop.f32.mrb[7].mxu0  ;;  %v3982_v21 = vpack.c.bf16 %v9961_v43, %v9932_v51  ;;  %11662 = vst [vmem:[#allocation87_spill] sm:$0xff] %v10092_v61 }
 0x2ae   : > { %v10077_v32 = vadd.f32 -0.6931472, %v3775_v58  ;;  %v3773_v10 = vadd.f32 %v3603_v35, %v11660_v26  ;;  %v3398_v58 = vadd.f32 1.0, %v7786_v53  ;;  %v2889_v60 = vand.u32 2147483647, %v10075_v56  ;;  %v11673_v61 = vld [vmem:[#allocation66_spill] sm:$0xff] }
 0x2af   : > { %7799 = vlog2.f32 %v3393_v57  ;;  %v7788_v35 = vpop.eup %7787  ;;  %v3240_v26 = vmul.f32 1.442695, %v3016_v9  ;;  %v3019_v1 = vsub.f32 0.0, %v2891_v2  ;;  %6905 = vmatprep.mubr.bf16.mxu0 %v3982_v21  ;;  %v3983_v57 = vpack.c.bf16 %v9956_v0, %v9910_v4  ;;  %5110 = vbcast.lane.b32.xlu0 %v9686_v6, 272 }
 0x2b0   : > { %v10094_v20 = vadd.f32 -0.6931472, %v3773_v10  ;;  %7801 = vpow2.f32 %v3244_v37  ;;  %v3613_v11 = vmul.f32 0.6931472, %v7788_v35  ;;  %v3017_v24 = vsub.f32 0.0, %v2889_v60 }
 0x2b1   : > { %v7790_v28 = vpop.eup %7789  ;;  %7803 = vlog2.f32 %v3398_v58  ;;  %v3246_v51 = vmul.f32 1.442695, %v3019_v1  ;;  %v10100_v43 = vrot.slane %v9900_v7, %v11614_v55  ;;  %v11664_v2 = vmax.f32 %v9916_v59, 0.0  ;;  %6906 = vmatmul.mubr.bf16.gmra.mrb[80].mxu0 %v3983_v57  ;;  %v11666_v55 = vld [vmem:[#allocation29_spill] sm:$0xff]  ;;  %v10116_v59 = vpop.permute.xlu0 %5045 }
 0x2b2   : > { %v7792_v53 = vpop.eup %7791  ;;  %v3609_v12 = vmul.f32 0.6931472, %v7790_v28  ;;  %7805 = vpow2.f32 %v3240_v26  ;;  %v3242_v58 = vmul.f32 1.442695, %v3017_v24  ;;  %v10107_v4 = vadd.f32 %v10002_v62, %v9579_v30  ;;  %11667 = vst [vmem:[#allocation29_spill] sm:$0xff] %v10116_v59 }
 0x2b3   : > { %11663 = vst [vmem:[#allocation88_spill] sm:$0xff] %v10100_v43  ;;  %v7794_v9 = vpop.eup %7793  ;;  %v3778_v37 = vadd.f32 %v3613_v11, %v11664_v2  ;;  %v3396_v10 = vadd.f32 1.0, %v7792_v53  ;;  %v11665_v1 = vmax.f32 %v9925_v17, 0.0  ;;  %7807 = vpow2.f32 %v3246_v51  ;;  %5140 = vbcast.lane.b32.xlu1 %v10100_v43, 256  ;;  %v10118_v11 = vpop.f32.mrb[8].mxu0  ;;  %5144 = vbcast.lane.b32.xlu0 %v10100_v43, 264 }
 0x2b4   : > { %v7796_v0 = vpop.eup %7795  ;;  %v3399_v21 = vadd.f32 1.0, %v7794_v9  ;;  %v10114_v7 = vadd.f32 %v10002_v62, %v11666_v55  ;;  %v10125_v26 = vpop.f32.mrb[9].mxu0  ;;  %v2894_v53 = vand.u32 2147483647, %v10107_v4  ;;  %v11669_v51 = vmax.f32 %v9929_v34, 0.0 }
 0x2b5   : > { %v3776_v60 = vadd.f32 %v3609_v12, %v11665_v1  ;;  %v7798_v24 = vpop.eup %7797  ;;  %v10120_v35 = vadd.f32 -0.6931472, %v3778_v37  ;;  %v3615_v30 = vmul.f32 0.6931472, %v7796_v0  ;;  %7809 = vlog2.f32 %v3396_v10  ;;  %v10123_v12 = vpop.permute.xlu1 %4920  ;;  %v11670_v1 = vld [vmem:[#allocation64_spill] sm:$0xff] }
 0x2b6   : > { %11668 = vst [vmem:[#allocation89_spill] sm:$0xff] %v10123_v12  ;;  %7811 = vlog2.f32 %v3399_v21  ;;  %v3397_v57 = vadd.f32 1.0, %v7798_v24  ;;  %v2892_v37 = vand.u32 2147483647, %v10114_v7  ;;  %v10135_v10 = vpop.f32.mrb[10].mxu0  ;;  %v3022_v0 = vsub.f32 0.0, %v2894_v53  ;;  %v10156_v17 = vpop.permute.xlu0 %5064 }
 0x2b7   : > { %v10127_v28 = vadd.f32 -0.6931472, %v3776_v60  ;;  %v3779_v9 = vadd.f32 %v3615_v30, %v11669_v51  ;;  %7813 = vpow2.f32 %v3242_v58  ;;  %4734 = vbcast.lane.b32.xlu1 %v11584_v41, 280  ;;  %v10140_v60 = vadd.f32 %v10002_v62, %v11670_v1  ;;  %v11671_v21 = vld [vmem:[#allocation25_spill] sm:$0xff]  ;;  %v10146_v34 = vpop.f32.mrb[11].mxu0  ;;  %11672 = vst [vmem:[#allocation64_spill] sm:$0xff] %v10156_v17 }
 0x2b8   : > { %7815 = vlog2.f32 %v3397_v57  ;;  %v10144_v55 = vadd.f32 %v10002_v62, %v11671_v21  ;;  %v3020_v30 = vsub.f32 0.0, %v2892_v37  ;;  %v3984_v57 = vpack.c.bf16 %v10026_v54, %v9994_v27  ;;  %4867 = vbcast.lane.b32.xlu0 %v9360_v23, 280 }
 0x2b9   : > { %v7800_v58 = vpop.eup %7799  ;;  %v10148_v24 = vadd.f32 -0.6931472, %v3779_v9  ;;  %v3985_v41 = vpack.c.bf16 %v10008_v29, %v9972_v13  ;;  %v3252_v1 = vmul.f32 1.442695, %v3022_v0  ;;  %v2895_v37 = vand.u32 2147483647, %v10140_v60  ;;  %v10163_v13 = vpop.permute.xlu1 %4954 }
 0x2ba   : > { %v7802_v53 = vpop.eup %7801  ;;  %v3611_v51 = vmul.f32 0.6931472, %v7800_v58  ;;  %v3248_v9 = vmul.f32 1.442695, %v3020_v30  ;;  %6909 = vmatprep.mubr.bf16.mxu0 %v3984_v57  ;;  %v10161_v27 = vadd.f32 %v10002_v62, %v11673_v61  ;;  %11674 = vst [vmem:[#allocation25_spill] sm:$0xff] %v10163_v13  ;;  %v11675_v54 = vmax.f32 %v9945_v47, 0.0 }
 0x2bb   : > { %v7804_v59 = vpop.eup %7803  ;;  %v3402_v12 = vadd.f32 1.0, %v7802_v53  ;;  %7817 = vpow2.f32 %v3252_v1  ;;  %v2893_v53 = vand.u32 2147483647, %v10144_v55  ;;  %6910 = vmatmul.mubr.bf16.gmra.mrb[84].mxu0 %v3985_v41  ;;  %4962 = vbcast.lane.b32.xlu1 %v9414_v50, 280  ;;  %v3023_v57 = vsub.f32 0.0, %v2895_v37 }
 0x2bc   : > { %v7806_v29 = vpop.eup %7805  ;;  %v3777_v0 = vadd.f32 %v3611_v51, %v11675_v54  ;;  %v3621_v58 = vmul.f32 0.6931472, %v7804_v59  ;;  %v11676_v23 = vmax.f32 %v9969_v49, 0.0  ;;  %v2898_v41 = vand.u32 2147483647, %v10161_v27  ;;  %4996 = vbcast.lane.b32.xlu0 %v9846_v52, 272  ;;  %v10183_v49 = vpop.permute.xlu0 %4658 }
 0x2bd   : > { %7819 = vlog2.f32 %v3402_v12  ;;  %v3400_v30 = vadd.f32 1.0, %v7806_v29  ;;  %v7808_v21 = vpop.eup %7807  ;;  %v3021_v47 = vsub.f32 0.0, %v2893_v53  ;;  %v3254_v1 = vmul.f32 1.442695, %v3023_v57  ;;  %v11677_v54 = vld [vmem:[#allocation68_spill] sm:$0xff]  ;;  %11678 = vst [vmem:[#allocation66_spill] sm:$0xff] %v10183_v49  ;;  %v10189_v57 = vpop.permute.xlu1 %5087 }
 0x2be   : > { %v10171_v2 = vadd.f32 -0.6931472, %v3777_v0  ;;  %v3782_v17 = vadd.f32 %v3621_v58, %v11676_v23  ;;  %7821 = vpow2.f32 %v3248_v9  ;;  %v3403_v51 = vadd.f32 1.0, %v7808_v21  ;;  %v11679_v53 = vld [vmem:[#allocation69_spill] sm:$0xff]  ;;  %11680 = vst [vmem:[#allocation68_spill] sm:$0xff] %v10189_v57 }
 0x2bf   : > { %v7810_v59 = vpop.eup %7809  ;;  %7823 = vlog2.f32 %v3400_v30  ;;  %v3250_v29 = vmul.f32 1.442695, %v3021_v47  ;;  %v10181_v0 = vadd.f32 %v10002_v62, %v11677_v54  ;;  %v3026_v21 = vsub.f32 0.0, %v2898_v41 }
 0x2c0   : > { %v7812_v50 = vpop.eup %7811  ;;  %v10177_v12 = vadd.f32 -0.6931472, %v3782_v17  ;;  %v3617_v37 = vmul.f32 0.6931472, %v7810_v59  ;;  %7825 = vlog2.f32 %v3403_v51  ;;  %v10187_v30 = vadd.f32 %v10002_v62, %v11679_v53  ;;  %v10191_v17 = vpop.f32.mrb[12].mxu0 }
 0x2c1   : > { %v7814_v9 = vpop.eup %7813  ;;  %v3623_v58 = vmul.f32 0.6931472, %v7812_v50  ;;  %v11681_v47 = vmax.f32 %v9976_v16, 0.0  ;;  %7827 = vpow2.f32 %v3254_v1  ;;  %v10196_v13 = vpop.f32.mrb[13].mxu0  ;;  %v11682_v51 = vmax.f32 %v10006_v44, 0.0 }
 0x2c2   : > { %v7816_v23 = vpop.eup %7815  ;;  %v3401_v54 = vadd.f32 1.0, %v7814_v9  ;;  %7829 = vpow2.f32 %v3250_v29  ;;  %v3260_v53 = vmul.f32 1.442695, %v3026_v21  ;;  %v10200_v19 = vpop.f32.mrb[14].mxu0  ;;  %v2896_v16 = vand.u32 2147483647, %v10181_v0 }
 0x2c3   : > { %v3780_v59 = vadd.f32 %v3617_v37, %v11681_v47  ;;  %v3783_v41 = vadd.f32 %v3623_v58, %v11682_v51  ;;  %v3619_v50 = vmul.f32 0.6931472, %v7816_v23  ;;  %v10206_v1 = vpop.f32.mrb[15].mxu0  ;;  %v11683_v47 = vmax.f32 %v10012_v31, 0.0  ;;  %v11684_v23 = vld [vmem:[#allocation71_spill] sm:$0xff] }
 0x2c4   : > { %7831 = vlog2.f32 %v3401_v54  ;;  %v2899_v29 = vand.u32 2147483647, %v10187_v30  ;;  %v3024_v21 = vsub.f32 0.0, %v2896_v16  ;;  %v3986_v54 = vpack.c.bf16 %v10094_v20, %v10064_v14 }
 0x2c5   : > { %v10202_v57 = vadd.f32 -0.6931472, %v3780_v59  ;;  %v10208_v9 = vadd.f32 -0.6931472, %v3783_v41  ;;  %v3781_v44 = vadd.f32 %v3619_v50, %v11683_v47  ;;  %7833 = vpow2.f32 %v3260_v53  ;;  %v7818_v58 = vpop.eup %7817  ;;  %v10221_v41 = vpop.permute.xlu0 %4722 }
 0x2c6   : > { %v10215_v59 = vadd.f32 %v10002_v62, %v11684_v23  ;;  %v3987_v51 = vpack.c.bf16 %v10077_v32, %v10052_v63  ;;  %11685 = vst [vmem:[#allocation69_spill] sm:$0xff] %v10221_v41  ;;  %v3406_v50 = vadd.f32 1.0, %v7818_v58  ;;  %v3027_v53 = vsub.f32 0.0, %v2899_v29  ;;  %v10229_v47 = vpop.permute.xlu1 %4711  ;;  %6913 = vmatprep.mubr.bf16.mxu0 %v3986_v54 }
 0x2c7   : > { %v7820_v37 = vpop.eup %7819  ;;  %v10223_v31 = vadd.f32 -0.6931472, %v3781_v44  ;;  %v10227_v16 = vadd.f32 %v10002_v62, %v9703_v36  ;;  %11686 = vst [vmem:[#allocation71_spill] sm:$0xff] %v10229_v47  ;;  %v3256_v52 = vmul.f32 1.442695, %v3024_v21  ;;  %v10234_v63 = vadd.f32 %v10002_v62, %v9708_v48 }
 0x2c8   : > { %v7822_v23 = vpop.eup %7821  ;;  %v3629_v61 = vmul.f32 0.6931472, %v7820_v37  ;;  %7835 = vlog2.f32 %v3406_v50  ;;  %v3262_v44 = vmul.f32 1.442695, %v3027_v53  ;;  %v2897_v29 = vand.u32 2147483647, %v10215_v59  ;;  %6914 = vmatmul.mubr.bf16.gmra.mrb[88].mxu0 %v3987_v51 }
 0x2c9   : > { %v7824_v32 = vpop.eup %7823  ;;  %v3404_v20 = vadd.f32 1.0, %v7822_v23  ;;  %v11687_v36 = vmax.f32 %v10036_v25, 0.0  ;;  %7837 = vpow2.f32 %v3256_v52  ;;  %v2902_v48 = vand.u32 2147483647, %v10227_v16  ;;  %v10246_v25 = vpop.permute.xlu0 %4791 }
 0x2ca   : > { %v3625_v41 = vmul.f32 0.6931472, %v7824_v32  ;;  %v7826_v21 = vpop.eup %7825  ;;  %v3025_v54 = vsub.f32 0.0, %v2897_v29  ;;  %v11688_v53 = vmax.f32 %v10056_v22, 0.0  ;;  %11689 = vst [vmem:[#allocation90_spill] sm:$0xff] %v10246_v25  ;;  %v10248_v52 = vpop.f32.mrb[16].mxu0 }
 0x2cb   : > { %v3786_v58 = vadd.f32 %v3629_v61, %v11687_v36  ;;  %7839 = vlog2.f32 %v3404_v20  ;;  %v7828_v50 = vpop.eup %7827  ;;  %v3631_v47 = vmul.f32 0.6931472, %v7826_v21  ;;  %11690 = vst [vmem:[#allocation91_spill] sm:$0xff] %v10248_v52  ;;  %v3030_v29 = vsub.f32 0.0, %v2902_v48  ;;  %v10251_v37 = vpop.permute.xlu1 %4844 }
 0x2cc   : > { %v3784_v51 = vadd.f32 %v3625_v41, %v11688_v53  ;;  %7841 = vpow2.f32 %v3262_v44  ;;  %v7830_v61 = vpop.eup %7829  ;;  %v3407_v32 = vadd.f32 1.0, %v7828_v50  ;;  %v3258_v20 = vmul.f32 1.442695, %v3025_v54  ;;  %11691 = vst [vmem:[#allocation92_spill] sm:$0xff] %v10251_v37  ;;  %v11693_v44 = vld [vmem:[#allocation73_spill] sm:$0xff]  ;;  %v10261_v25 = vpop.f32.mrb[17].mxu0 }
 0x2cd   : > { %v10242_v23 = vadd.f32 -0.6931472, %v3786_v58  ;;  %v2900_v36 = vand.u32 2147483647, %v10234_v63  ;;  %v11692_v22 = vmax.f32 %v10060_v46, 0.0  ;;  %v3405_v21 = vadd.f32 1.0, %v7830_v61 }
 0x2ce   : > { %v7832_v14 = vpop.eup %7831  ;;  %v10253_v58 = vadd.f32 -0.6931472, %v3784_v51  ;;  %v10259_v53 = vadd.f32 %v10002_v62, %v11693_v44  ;;  %11694 = vst [vmem:[#allocation73_spill] sm:$0xff] %v10261_v25  ;;  %7843 = vlog2.f32 %v3407_v32  ;;  %v3268_v48 = vmul.f32 1.442695, %v3030_v29  ;;  %v10263_v43 = vpop.f32.mrb[18].mxu0 }
 0x2cf   : > { %v3787_v41 = vadd.f32 %v3631_v47, %v11692_v22  ;;  %v7834_v50 = vpop.eup %7833  ;;  %v3627_v54 = vmul.f32 0.6931472, %v7832_v14  ;;  %v3028_v49 = vsub.f32 0.0, %v2900_v36  ;;  %11695 = vst [vmem:[#allocation93_spill] sm:$0xff] %v10263_v43  ;;  %7845 = vlog2.f32 %v3405_v21  ;;  %v10268_v47 = vpop.f32.mrb[19].mxu0  ;;  %v11698_v32 = vld [vmem:[#allocation15_spill] sm:$0xff] }
 0x2d0   : > { %v3410_v51 = vadd.f32 1.0, %v7834_v50  ;;  %11696 = vst [vmem:[#allocation94_spill] sm:$0xff] %v10268_v47  ;;  %v11697_v61 = vmax.f32 %v10075_v56, 0.0  ;;  %7847 = vpow2.f32 %v3258_v20  ;;  %v2903_v14 = vand.u32 2147483647, %v10259_v53  ;;  %v10281_v21 = vpop.permute.xlu0 %4855  ;;  %v11700_v20 = vld [vmem:[#allocation16_spill] sm:$0xff] }
 0x2d1   : > { %v10265_v37 = vadd.f32 -0.6931472, %v3787_v41  ;;  %v3264_v44 = vmul.f32 1.442695, %v3028_v49  ;;  %v10275_v29 = vadd.f32 %v10002_v62, %v11698_v32  ;;  %v3988_v36 = vpack.c.bf16 %v10171_v2, %v10127_v28  ;;  %11699 = vst [vmem:[#allocation15_spill] sm:$0xff] %v10281_v21  ;;  %v10301_v47 = vpop.f32.mrb[20].mxu0 }
 0x2d2   : > { %v3785_v22 = vadd.f32 %v3627_v54, %v11697_v61  ;;  %7849 = vlog2.f32 %v3410_v51  ;;  %v3989_v41 = vpack.c.bf16 %v10148_v24, %v10120_v35  ;;  %v7836_v50 = vpop.eup %7835  ;;  %v3031_v49 = vsub.f32 0.0, %v2903_v14  ;;  %v10289_v51 = vpop.permute.xlu1 %4878 }
 0x2d3   : > { %7851 = vpow2.f32 %v3268_v48  ;;  %v10287_v54 = vadd.f32 %v10002_v62, %v11700_v20  ;;  %11701 = vst [vmem:[#allocation16_spill] sm:$0xff] %v10289_v51  ;;  %v7838_v61 = vpop.eup %7837  ;;  %v3637_v32 = vmul.f32 0.6931472, %v7836_v50  ;;  %v2901_v35 = vand.u32 2147483647, %v10275_v29  ;;  %6917 = vmatprep.mubr.bf16.mxu0 %v3988_v36  ;;  %v10307_v48 = vpop.f32.mrb[21].mxu0 }
 0x2d4   : > { %v10283_v56 = vadd.f32 -0.6931472, %v3785_v22  ;;  %7853 = vpow2.f32 %v3264_v44  ;;  %v3408_v24 = vadd.f32 1.0, %v7838_v61  ;;  %v3270_v22 = vmul.f32 1.442695, %v3031_v49  ;;  %6918 = vmatmul.mubr.bf16.gmra.mrb[92].mxu0 %v3989_v41  ;;  %v11703_v44 = vld [vmem:[#allocation39_spill] sm:$0xff] }
 0x2d5   : > { %v7840_v2 = vpop.eup %7839  ;;  %v2906_v14 = vand.u32 2147483647, %v10287_v54  ;;  %v11702_v46 = vmax.f32 %v10107_v4, 0.0  ;;  %v3029_v50 = vsub.f32 0.0, %v2901_v35  ;;  %v10299_v28 = vadd.f32 %v10002_v62, %v11703_v44  ;;  %11704 = vst [vmem:[#allocation39_spill] sm:$0xff] %v10301_v47  ;;  %v11705_v41 = vld [vmem:[#allocation74_spill] sm:$0xff]  ;;  %v10313_v35 = vpop.permute.xlu0 %4901 }
 0x2d6   : > { %v7842_v20 = vpop.eup %7841  ;;  %v3633_v21 = vmul.f32 0.6931472, %v7840_v2  ;;  %7855 = vlog2.f32 %v3408_v24  ;;  %v10305_v61 = vadd.f32 %v10002_v62, %v11705_v41  ;;  %11706 = vst [vmem:[#allocation74_spill] sm:$0xff] %v10307_v48  ;;  %v11707_v4 = vmax.f32 %v10114_v7, 0.0  ;;  %11708 = vst [vmem:[#allocation95_spill] sm:$0xff] %v10313_v35  ;;  %v10315_v2 = vpop.f32.mrb[22].mxu0 }
 0x2d7   : > { %v3790_v51 = vadd.f32 %v3637_v32, %v11702_v46  ;;  %v3411_v36 = vadd.f32 1.0, %v7842_v20  ;;  %v3034_v49 = vsub.f32 0.0, %v2906_v14  ;;  %7857 = vpow2.f32 %v3270_v22  ;;  %11709 = vst [vmem:[#allocation96_spill] sm:$0xff] %v10315_v2  ;;  %v10319_v41 = vpop.permute.xlu1 %4969  ;;  %v11713_v47 = vld [vmem:[#allocation75_spill] sm:$0xff] }
 0x2d8   : > { %v3788_v46 = vadd.f32 %v3633_v21, %v11707_v4  ;;  %v3266_v32 = vmul.f32 1.442695, %v3029_v50  ;;  %v7844_v24 = vpop.eup %7843  ;;  %v2904_v44 = vand.u32 2147483647, %v10299_v28  ;;  %11710 = vst [vmem:[#allocation97_spill] sm:$0xff] %v10319_v41  ;;  %v11712_v35 = vmax.f32 %v10140_v60, 0.0 }
 0x2d9   : > { %v10309_v43 = vadd.f32 -0.6931472, %v3790_v51  ;;  %7859 = vlog2.f32 %v3411_v36  ;;  %v3276_v14 = vmul.f32 1.442695, %v3034_v49  ;;  %v10321_v51 = vpop.f32.mrb[23].mxu0  ;;  %v7846_v48 = vpop.eup %7845 }
 0x2da   : > { %11711 = vst [vmem:[#allocation98_spill] sm:$0xff] %v10321_v51  ;;  %v10323_v7 = vadd.f32 -0.6931472, %v3788_v46  ;;  %v3639_v21 = vmul.f32 0.6931472, %v7844_v24  ;;  %7861 = vpow2.f32 %v3266_v32  ;;  %v7848_v50 = vpop.eup %7847  ;;  %v3032_v36 = vsub.f32 0.0, %v2904_v44 }
 0x2db   : > { %v3635_v4 = vmul.f32 0.6931472, %v7846_v48  ;;  %7863 = vpow2.f32 %v3276_v14  ;;  %v2907_v49 = vand.u32 2147483647, %v10305_v61  ;;  %v3409_v41 = vadd.f32 1.0, %v7848_v50 }
 0x2dc   : > { %v7850_v20 = vpop.eup %7849  ;;  %v3791_v2 = vadd.f32 %v3639_v21, %v11712_v35  ;;  %v10331_v51 = vadd.f32 %v10002_v62, %v11713_v47  ;;  %v3990_v46 = vpack.c.bf16 %v10223_v31, %v10202_v57  ;;  %v11714_v24 = vmax.f32 %v10144_v55, 0.0  ;;  %v10340_v47 = vpop.permute.xlu0 %4950 }
 0x2dd   : > { %v7852_v32 = vpop.eup %7851  ;;  %v3645_v14 = vmul.f32 0.6931472, %v7850_v20  ;;  %v3272_v44 = vmul.f32 1.442695, %v3032_v36  ;;  %v3035_v22 = vsub.f32 0.0, %v2907_v49  ;;  %7865 = vlog2.f32 %v3409_v41  ;;  %11715 = vst [vmem:[#allocation75_spill] sm:$0xff] %v10340_v47  ;;  %v10346_v20 = vpop.permute.xlu1 %5053 }
 0x2de   : > { %v3789_v48 = vadd.f32 %v3635_v4, %v11714_v24  ;;  %v7854_v25 = vpop.eup %7853  ;;  %v10337_v52 = vadd.f32 -0.6931472, %v3791_v2  ;;  %v3414_v60 = vadd.f32 1.0, %v7852_v32  ;;  %6921 = vmatprep.mubr.bf16.mxu0 %v3990_v46  ;;  %v11716_v57 = vmax.f32 %v10161_v27, 0.0  ;;  %11717 = vst [vmem:[#allocation99_spill] sm:$0xff] %v10346_v20  ;;  %v11718_v49 = vld [vmem:[#allocation77_spill] sm:$0xff] }
 0x2df   : > { %v3412_v55 = vadd.f32 1.0, %v7854_v25  ;;  %7867 = vpow2.f32 %v3272_v44  ;;  %v3278_v50 = vmul.f32 1.442695, %v3035_v22  ;;  %v2905_v2 = vand.u32 2147483647, %v10331_v51  ;;  %v11719_v27 = vld [vmem:[#allocation78_spill] sm:$0xff] }
 0x2e0   : > { %v10342_v21 = vadd.f32 -0.6931472, %v3789_v48  ;;  %v3794_v31 = vadd.f32 %v3645_v14, %v11716_v57  ;;  %7869 = vlog2.f32 %v3414_v60  ;;  %v3991_v41 = vpack.c.bf16 %v10208_v9, %v10177_v12  ;;  %v7856_v4 = vpop.eup %7855  ;;  %v11720_v48 = vld [vmem:[#allocation44_spill] sm:$0xff]  ;;  %v10365_v9 = vpop.f32.mrb[24].mxu0 }
 0x2e1   : > { %7871 = vlog2.f32 %v3412_v55  ;;  %v10355_v46 = vadd.f32 %v10002_v62, %v11718_v49  ;;  %v10359_v25 = vadd.f32 %v10002_v62, %v11719_v27  ;;  %v7858_v32 = vpop.eup %7857  ;;  %v3641_v24 = vmul.f32 0.6931472, %v7856_v4  ;;  %11721 = vst [vmem:[#allocation77_spill] sm:$0xff] %v10365_v9  ;;  %v10370_v55 = vpop.f32.mrb[25].mxu0 }
 0x2e2   : > { %v10351_v36 = vadd.f32 -0.6931472, %v3794_v31  ;;  %7873 = vpow2.f32 %v3278_v50  ;;  %v3033_v22 = vsub.f32 0.0, %v2905_v2  ;;  %6922 = vmatmul.mubr.bf16.gmra.mrb[96].mxu0 %v3991_v41  ;;  %v10363_v12 = vadd.f32 %v10002_v62, %v11720_v48  ;;  %11722 = vst [vmem:[#allocation78_spill] sm:$0xff] %v10370_v55  ;;  %v10375_v48 = vpop.permute.xlu0 %5083  ;;  %v10378_v47 = vpop.permute.xlu1 %5102 }
 0x2e3   : > { %v7860_v14 = vpop.eup %7859  ;;  %v3415_v44 = vadd.f32 1.0, %v7858_v32  ;;  %v2910_v57 = vand.u32 2147483647, %v10355_v46  ;;  %v11723_v50 = vmax.f32 %v10181_v0, 0.0  ;;  %v2908_v27 = vand.u32 2147483647, %v10359_v25 }
 0x2e4   : > { %v7862_v4 = vpop.eup %7861  ;;  %v3647_v41 = vmul.f32 0.6931472, %v7860_v14  ;;  %v3274_v49 = vmul.f32 1.442695, %v3033_v22  ;;  %11724 = vst [vmem:[#allocation44_spill] sm:$0xff] %v10375_v48  ;;  %11725 = vst [vmem:[#allocation100_spill] sm:$0xff] %v10378_v47 }
 0x2e5   : > { %v3792_v2 = vadd.f32 %v3641_v24, %v11723_v50  ;;  %v7864_v35 = vpop.eup %7863  ;;  %7875 = vlog2.f32 %v3415_v44  ;;  %v3413_v32 = vadd.f32 1.0, %v7862_v4  ;;  %v3038_v60 = vsub.f32 0.0, %v2910_v57  ;;  %v10380_v31 = vpop.f32.mrb[26].mxu0  ;;  %v11729_v47 = vld [vmem:[#allocation81_spill] sm:$0xff] }
 0x2e6   : > { %11726 = vst [vmem:[#allocation101_spill] sm:$0xff] %v10380_v31  ;;  %v11727_v0 = vmax.f32 %v10187_v30, 0.0  ;;  %v3418_v22 = vadd.f32 1.0, %v7864_v35  ;;  %7877 = vpow2.f32 %v3274_v49  ;;  %v10386_v14 = vpop.f32.mrb[27].mxu0  ;;  %v3036_v44 = vsub.f32 0.0, %v2908_v27 }
 0x2e7   : > { %v10382_v55 = vadd.f32 -0.6931472, %v3792_v2  ;;  %11728 = vst [vmem:[#allocation102_spill] sm:$0xff] %v10386_v14  ;;  %7879 = vlog2.f32 %v3413_v32  ;;  %v3284_v50 = vmul.f32 1.442695, %v3038_v60  ;;  %v7866_v4 = vpop.eup %7865  ;;  %v10393_v2 = vadd.f32 %v10002_v62, %v11729_v47  ;;  %v10401_v47 = vpop.permute.xlu0 %4677  ;;  %v11744_v14 = vld [vmem:[#allocation86_spill] sm:$0xff] }
 0x2e8   : > { %v3795_v24 = vadd.f32 %v3647_v41, %v11727_v0  ;;  %v2911_v57 = vand.u32 2147483647, %v10363_v12  ;;  %7881 = vlog2.f32 %v3418_v22  ;;  %v3992_v30 = vpack.c.bf16 %v10283_v56, %v10253_v58  ;;  %11730 = vst [vmem:[#allocation81_spill] sm:$0xff] %v10401_v47 }
 0x2e9   : > { %v7868_v35 = vpop.eup %7867  ;;  %v3643_v41 = vmul.f32 0.6931472, %v7866_v4  ;;  %7883 = vpow2.f32 %v3284_v50  ;;  %v3280_v49 = vmul.f32 1.442695, %v3036_v44  ;;  %v3993_v22 = vpack.c.bf16 %v10265_v37, %v10242_v23  ;;  %v10405_v44 = vpop.permute.xlu1 %4696 }
 0x2ea   : > { %v10389_v20 = vadd.f32 -0.6931472, %v3795_v24  ;;  %v3039_v32 = vsub.f32 0.0, %v2911_v57  ;;  %v7870_v60 = vpop.eup %7869  ;;  %v3416_v27 = vadd.f32 1.0, %v7868_v35  ;;  %v2909_v24 = vand.u32 2147483647, %v10393_v2  ;;  %6925 = vmatprep.mubr.bf16.mxu0 %v3992_v30 }
 0x2eb   : > { %v7872_v48 = vpop.eup %7871  ;;  %v11731_v58 = vmax.f32 %v10215_v59, 0.0  ;;  %v3653_v4 = vmul.f32 0.6931472, %v7870_v60  ;;  %7885 = vpow2.f32 %v3280_v49  ;;  %11732 = vst [vmem:[#allocation103_spill] sm:$0xff] %v10405_v44  ;;  %6926 = vmatmul.mubr.bf16.gmra.mrb[100].mxu0 %v3993_v22  ;;  %v10409_v30 = vadd.f32 %v10002_v62, %v9891_v45  ;;  %v10415_v49 = vpop.f32.mrb[28].mxu0 }
 0x2ec   : > { %v3286_v50 = vmul.f32 1.442695, %v3039_v32  ;;  %v7874_v57 = vpop.eup %7873  ;;  %v3649_v35 = vmul.f32 0.6931472, %v7872_v48  ;;  %7887 = vlog2.f32 %v3416_v27  ;;  %v3037_v0 = vsub.f32 0.0, %v2909_v24  ;;  %11734 = vst [vmem:[#allocation104_spill] sm:$0xff] %v10415_v49 }
 0x2ed   : > { %v3793_v56 = vadd.f32 %v3643_v41, %v11731_v58  ;;  %v11733_v23 = vmax.f32 %v10227_v16, 0.0  ;;  %v3419_v41 = vadd.f32 1.0, %v7874_v57  ;;  %v11735_v32 = vmax.f32 %v10234_v63, 0.0  ;;  %v10421_v22 = vpop.f32.mrb[29].mxu0  ;;  %v11737_v16 = vld [vmem:[#allocation18_spill] sm:$0xff]  ;;  %v10444_v44 = vpop.permute.xlu1 %4829 }
 0x2ee   : > { %7889 = vpow2.f32 %v3286_v50  ;;  %v3282_v48 = vmul.f32 1.442695, %v3037_v0  ;;  %v2914_v24 = vand.u32 2147483647, %v10409_v30  ;;  %11736 = vst [vmem:[#allocation105_spill] sm:$0xff] %v10421_v22  ;;  %v10433_v63 = vpop.f32.mrb[30].mxu0 }
 0x2ef   : > { %v10411_v37 = vadd.f32 -0.6931472, %v3793_v56  ;;  %v3798_v59 = vadd.f32 %v3653_v4, %v11733_v23  ;;  %v3796_v60 = vadd.f32 %v3649_v35, %v11735_v32  ;;  %v7876_v45 = vpop.eup %7875  ;;  %7891 = vlog2.f32 %v3419_v41  ;;  %v11738_v4 = vld [vmem:[#allocation85_spill] sm:$0xff]  ;;  %11739 = vst [vmem:[#allocation18_spill] sm:$0xff] %v10433_v63  ;;  %v10437_v32 = vpop.permute.xlu0 %4810  ;;  %11742 = vst [vmem:[#allocation107_spill] sm:$0xff] %v10444_v44 }
 0x2f0   : > { %v10427_v56 = vadd.f32 %v10002_v62, %v11737_v16  ;;  %v10431_v50 = vadd.f32 %v10002_v62, %v11738_v4  ;;  %v7878_v0 = vpop.eup %7877  ;;  %v3655_v35 = vmul.f32 0.6931472, %v7876_v45  ;;  %7893 = vpow2.f32 %v3282_v48  ;;  %11740 = vst [vmem:[#allocation85_spill] sm:$0xff] %v10437_v32 }
 0x2f1   : > { %v10423_v58 = vadd.f32 -0.6931472, %v3798_v59  ;;  %v10435_v57 = vadd.f32 -0.6931472, %v3796_v60  ;;  %v3042_v23 = vsub.f32 0.0, %v2914_v24  ;;  %v10439_v59 = vpop.f32.mrb[31].mxu0  ;;  %v7880_v41 = vpop.eup %7879  ;;  %v10451_v16 = vadd.f32 %v10002_v62, %v11744_v14 }
 0x2f2   : > { %11741 = vst [vmem:[#allocation106_spill] sm:$0xff] %v10439_v59  ;;  %v3417_v27 = vadd.f32 1.0, %v7878_v0  ;;  %v2912_v22 = vand.u32 2147483647, %v10427_v56  ;;  %v7882_v63 = vpop.eup %7881  ;;  %v11743_v60 = vmax.f32 %v10259_v53, 0.0  ;;  %v11745_v4 = vmax.f32 %v10275_v29, 0.0 }
 0x2f3   : > { %v3651_v48 = vmul.f32 0.6931472, %v7880_v41  ;;  %v3292_v24 = vmul.f32 1.442695, %v3042_v23  ;;  %v2915_v32 = vand.u32 2147483647, %v10431_v50  ;;  %v7884_v49 = vpop.eup %7883  ;;  %v10463_v47 = vpop.permute.xlu0 %4874 }
 0x2f4   : > { %v3799_v45 = vadd.f32 %v3655_v35, %v11743_v60  ;;  %v3661_v59 = vmul.f32 0.6931472, %v7882_v63  ;;  %7895 = vlog2.f32 %v3417_v27  ;;  %v3040_v0 = vsub.f32 0.0, %v2912_v22  ;;  %11747 = vst [vmem:[#allocation86_spill] sm:$0xff] %v10463_v47  ;;  %v11777_v47 = vld [vmem:[#allocation72_spill] sm:$0xff] }
 0x2f5   : > { %v3797_v44 = vadd.f32 %v3651_v48, %v11745_v4  ;;  %v3422_v9 = vadd.f32 1.0, %v7884_v49  ;;  %7897 = vpow2.f32 %v3292_v24  ;;  %v7886_v53 = vpop.eup %7885  ;;  %v11746_v35 = vmax.f32 %v10287_v54, 0.0 }
 0x2f6   : > { %v10453_v31 = vadd.f32 -0.6931472, %v3799_v45  ;;  %v3288_v41 = vmul.f32 1.442695, %v3040_v0  ;;  %v3043_v60 = vsub.f32 0.0, %v2915_v32  ;;  %v7888_v22 = vpop.eup %7887  ;;  %v3420_v14 = vadd.f32 1.0, %v7886_v53 }
 0x2f7   : > { %v3802_v23 = vadd.f32 %v3661_v59, %v11746_v35  ;;  %v10460_v63 = vadd.f32 -0.6931472, %v3797_v44  ;;  %7899 = vlog2.f32 %v3422_v9  ;;  %v2913_v45 = vand.u32 2147483647, %v10451_v16  ;;  %v10467_v59 = vpop.permute.xlu1 %4905 }
 0x2f8   : > { %v7890_v29 = vpop.eup %7889  ;;  %v3657_v4 = vmul.f32 0.6931472, %v7888_v22  ;;  %7901 = vpow2.f32 %v3288_v41  ;;  %v3294_v54 = vmul.f32 1.442695, %v3043_v60  ;;  %11748 = vst [vmem:[#allocation108_spill] sm:$0xff] %v10467_v59  ;;  %v3994_v44 = vpack.c.bf16 %v10342_v21, %v10323_v7 }
 0x2f9   : > { %v10465_v49 = vadd.f32 -0.6931472, %v3802_v23  ;;  %7903 = vlog2.f32 %v3420_v14  ;;  %v3423_v32 = vadd.f32 1.0, %v7890_v29  ;;  %v3041_v48 = vsub.f32 0.0, %v2913_v45  ;;  %v7892_v9 = vpop.eup %7891 }
 0x2fa   : > { %v11749_v24 = vmax.f32 %v10299_v28, 0.0  ;;  %7905 = vpow2.f32 %v3294_v54  ;;  %v3995_v53 = vpack.c.bf16 %v10337_v52, %v10309_v43  ;;  %v10477_v35 = vadd.f32 %v10002_v62, %v9980_v18  ;;  %v7894_v23 = vpop.eup %7893  ;;  %6929 = vmatprep.mubr.bf16.mxu0 %v3994_v44  ;;  %v10483_v28 = vpop.f32.mrb[32].mxu0 }
 0x2fb   : > { %v3663_v41 = vmul.f32 0.6931472, %v7892_v9  ;;  %7907 = vlog2.f32 %v3423_v32  ;;  %v3290_v60 = vmul.f32 1.442695, %v3041_v48  ;;  %v10481_v7 = vadd.f32 %v10002_v62, %v9986_v8  ;;  %v10493_v8 = vpop.permute.xlu0 %4939  ;;  %v10495_v29 = vpop.f32.mrb[33].mxu0 }
 0x2fc   : > { %v3800_v0 = vadd.f32 %v3657_v4, %v11749_v24  ;;  %v3421_v22 = vadd.f32 1.0, %v7894_v23  ;;  %6930 = vmatmul.mubr.bf16.gmra.mrb[104].mxu0 %v3995_v53  ;;  %v2918_v18 = vand.u32 2147483647, %v10477_v35  ;;  %v11750_v52 = vmax.f32 %v10305_v61, 0.0  ;;  %11751 = vst [vmem:[#allocation109_spill] sm:$0xff] %v10493_v8  ;;  %v10504_v61 = vpop.permute.xlu1 %4958  ;;  %v10506_v9 = vpop.f32.mrb[34].mxu0 }
 0x2fd   : > { %7909 = vpow2.f32 %v3290_v60  ;;  %v2916_v62 = vand.u32 2147483647, %v10481_v7  ;;  %v7963_v32 = vld [vmem:[%s8086_s15] ss:$0 sm:$0xff]  ;;  %11752 = vst [vmem:[#allocation110_spill] sm:$0xff] %v10504_v61  ;;  %v10512_v60 = vpop.f32.mrb[35].mxu0 }
 0x2fe   : > { %v10485_v21 = vadd.f32 -0.6931472, %v3800_v0  ;;  %v3803_v14 = vadd.f32 %v3663_v41, %v11750_v52  ;;  %v7896_v4 = vpop.eup %7895  ;;  %7911 = vlog2.f32 %v3421_v22  ;;  %v3046_v54 = vsub.f32 0.0, %v2918_v18  ;;  %v11762_v61 = vld [vmem:[#allocation54_spill] sm:$0xff] }
 0x2ff   : > { %v10499_v48 = vadd.f32 %v7963_v32, %v9992_v39  ;;  %v10502_v44 = vadd.f32 %v7963_v32, %v9998_v40  ;;  %v7898_v24 = vpop.eup %7897  ;;  %v3659_v53 = vmul.f32 0.6931472, %v7896_v4  ;;  %v3044_v23 = vsub.f32 0.0, %v2916_v62 }
 0x300   : > { %v10508_v0 = vadd.f32 -0.6931472, %v3803_v14  ;;  %v3996_v41 = vpack.c.bf16 %v10411_v37, %v10382_v55  ;;  %v3426_v22 = vadd.f32 1.0, %v7898_v24  ;;  %v3300_v39 = vmul.f32 1.442695, %v3046_v54 }
 0x301   : > { %v2919_v40 = vand.u32 2147483647, %v10499_v48  ;;  %v7900_v52 = vpop.eup %7899  ;;  %v11753_v32 = vmax.f32 %v10331_v51, 0.0  ;;  %v3296_v14 = vmul.f32 1.442695, %v3044_v23  ;;  %v3997_v54 = vpack.c.bf16 %v10389_v20, %v10351_v36  ;;  %v10527_v23 = vpop.permute.xlu0 %4973 }
 0x302   : > { %v2917_v62 = vand.u32 2147483647, %v10502_v44  ;;  %6933 = vmatprep.mubr.bf16.mxu0 %v3996_v41  ;;  %v7902_v55 = vpop.eup %7901  ;;  %v3669_v37 = vmul.f32 0.6931472, %v7900_v52  ;;  %7913 = vlog2.f32 %v3426_v22  ;;  %11754 = vst [vmem:[#allocation111_spill] sm:$0xff] %v10527_v23  ;;  %v11755_v41 = vmax.f32 %v10355_v46, 0.0 }
 0x303   : > { %v3801_v45 = vadd.f32 %v3659_v53, %v11753_v32  ;;  %v3047_v24 = vsub.f32 0.0, %v2919_v40  ;;  %v7904_v18 = vpop.eup %7903  ;;  %v3424_v27 = vadd.f32 1.0, %v7902_v55  ;;  %7915 = vpow2.f32 %v3300_v39  ;;  %v10525_v53 = vld [vmem:[%s8102_s24] ss:$0 sm:$0xff]  ;;  %v10531_v40 = vpop.permute.xlu1 %4992 }
 0x304   : > { %v3045_v51 = vsub.f32 0.0, %v2917_v62  ;;  %v7906_v32 = vpop.eup %7905  ;;  %v3806_v4 = vadd.f32 %v3669_v37, %v11755_v41  ;;  %v3665_v52 = vmul.f32 0.6931472, %v7904_v18  ;;  %7917 = vpow2.f32 %v3296_v14  ;;  %6934 = vmatmul.mubr.bf16.gmra.mrb[108].mxu0 %v3997_v54  ;;  %11756 = vst [vmem:[#allocation112_spill] sm:$0xff] %v10531_v40  ;;  %v10533_v20 = vpop.f32.mrb[36].mxu0  ;;  %v7964_v62 = vld [vmem:[%s11338_s2 + $0x10] sm:$0xff] }
 0x305   : > { %v10522_v43 = vadd.f32 -0.6931472, %v3801_v45  ;;  %v3302_v22 = vmul.f32 1.442695, %v3047_v24  ;;  %v7908_v36 = vpop.eup %7907  ;;  %7919 = vlog2.f32 %v3424_v27  ;;  %v3427_v45 = vadd.f32 1.0, %v7906_v32  ;;  %v11757_v55 = vld [vmem:[#allocation10_spill] sm:$0xff] }
 0x306   : > { %v3298_v39 = vmul.f32 1.442695, %v3045_v51  ;;  %v10539_v23 = vrot.slane %v7964_v62, %v11757_v55  ;;  %v10541_v46 = vpop.f32.mrb[37].mxu0  ;;  %v10543_v18 = vadd.f32 -0.6931472, %v3806_v4  ;;  %v11758_v14 = vmax.f32 %v10359_v25, 0.0 }
 0x307   : > { %v3671_v24 = vmul.f32 0.6931472, %v7908_v36  ;;  %7921 = vpow2.f32 %v3302_v22  ;;  %v10547_v54 = vpop.f32.mrb[38].mxu0  ;;  %v7910_v27 = vpop.eup %7909  ;;  %v4082_v51 = vadd.f32 %v10050_v33, %v10525_v53  ;;  %v4074_v32 = vadd.f32 %v10525_v53, %v10062_v3  ;;  %v11760_v33 = vld [vmem:[#allocation53_spill] sm:$0xff]  ;;  %v11761_v40 = vld [vmem:[#allocation11_spill] sm:$0xff] }
 0x308   : > { %v3804_v37 = vadd.f32 %v3665_v52, %v11758_v14  ;;  %7923 = vlog2.f32 %v3427_v45  ;;  %5026 = vbcast.lane.b32.xlu1 %v10539_v23, 256  ;;  %v4085_v4 = vadd.f32 %v10068_v42, %v10525_v53  ;;  %5030 = vbcast.lane.b32.xlu0 %v10539_v23, 264  ;;  %v10557_v25 = vpop.f32.mrb[39].mxu0  ;;  %v7912_v41 = vpop.eup %7911  ;;  %v11759_v22 = vmax.f32 %v10363_v12, 0.0 }
 0x309   : > { %v3425_v45 = vadd.f32 1.0, %v7910_v27  ;;  %7925 = vpow2.f32 %v3298_v39  ;;  %v3667_v62 = vmul.f32 0.6931472, %v7912_v41  ;;  %v5194_v14 = vmul.f32 %v11760_v33, %v4082_v51  ;;  %v10566_v42 = vpop.permute.xlu0 %5072  ;;  %v11766_v51 = vld [vmem:[#allocation47_spill] sm:$0xff] }
 0x30a   : > { %v10559_v52 = vadd.f32 -0.6931472, %v3804_v37  ;;  %v3807_v36 = vadd.f32 %v3671_v24, %v11759_v22  ;;  %v5192_v3 = vmul.f32 %v11761_v40, %v4074_v32  ;;  %v5195_v8 = vmul.f32 %v11762_v61, %v4085_v4  ;;  %11763 = vst [vmem:[#allocation10_spill] sm:$0xff] %v10566_v42  ;;  %v10574_v24 = vpop.permute.xlu1 %5121  ;;  %v11767_v32 = vld [vmem:[#allocation31_spill] sm:$0xff]  ;;  %v11768_v4 = vld [vmem:[#allocation56_spill] sm:$0xff] }
 0x30b   : > { %7927 = vlog2.f32 %v3425_v45  ;;  %v4077_v37 = vadd.f32 %v10525_v53, %v10087_v38  ;;  %v3998_v12 = vpack.c.bf16 %v10460_v63, %v10435_v57  ;;  %11764 = vst [vmem:[#allocation53_spill] sm:$0xff] %v10574_v24  ;;  %v11765_v39 = vmax.f32 %v10393_v2, 0.0  ;;  %v11769_v41 = vld [vmem:[#allocation79_spill] sm:$0xff]  ;;  %v11770_v45 = vld [vmem:[#allocation22_spill] sm:$0xff]  ;;  %v10588_v2 = vld [vmem:[%s11338_s2 + $0x18] sm:$0xff] }
 0x30c   : > { %v10568_v59 = vadd.f32 -0.6931472, %v3807_v36  ;;  %v5326_v40 = vmul.f32 %v5194_v14, %v11766_v51  ;;  %v5324_v61 = vmul.f32 %v5192_v3, %v11767_v32  ;;  %5095 = vbcast.lane.b32.xlu1 %v11768_v4, 280  ;;  %v5327_v22 = vmul.f32 %v11769_v41, %v5195_v8  ;;  %v7914_v36 = vpop.eup %7913  ;;  %v11774_v4 = vld [vmem:[#allocation21_spill] sm:$0xff] }
 0x30d   : > { %v3805_v27 = vadd.f32 %v3667_v62, %v11765_v39  ;;  %v5193_v33 = vmul.f32 %v11770_v45, %v4077_v37  ;;  %6937 = vmatprep.mubr.bf16.mxu0 %v3998_v12  ;;  %v3999_v38 = vpack.c.bf16 %v10453_v31, %v10423_v58  ;;  %v10592_v57 = vrot.slane %v10588_v2, %v11654_v5  ;;  %v7916_v8 = vpop.eup %7915  ;;  %v11772_v58 = vld [vmem:[#allocation83_spill] sm:$0xff] }
 0x30e   : > { %v4098_v63 = vadd.f32 %v10118_v11, %v10525_v53  ;;  %v3677_v14 = vmul.f32 0.6931472, %v7914_v36  ;;  %v4090_v3 = vadd.f32 %v10525_v53, %v10125_v26  ;;  %v4101_v31 = vadd.f32 %v10135_v10, %v10525_v53  ;;  %5129 = vbcast.lane.b32.xlu0 %v11772_v58, 272  ;;  %v7918_v37 = vpop.eup %7917  ;;  %v11773_v39 = vld [vmem:[#allocation63_spill] sm:$0xff]  ;;  %v11776_v10 = vld [vmem:[#allocation37_spill] sm:$0xff] }
 0x30f   : > { %11771 = vst [vmem:[#allocation11_spill] sm:$0xff] %v10592_v57  ;;  %v10596_v62 = vadd.f32 -0.6931472, %v3805_v27  ;;  %v3430_v12 = vadd.f32 1.0, %v7916_v8  ;;  %v5325_v5 = vmul.f32 %v11773_v39, %v5193_v33  ;;  %6938 = vmatmul.mubr.bf16.gmra.mrb[112].mxu0 %v3999_v38  ;;  %v4093_v11 = vadd.f32 %v10525_v53, %v10146_v34  ;;  %v7920_v27 = vpop.eup %7919  ;;  %v10612_v8 = vpop.permute.xlu0 %5106 }
 0x310   : > { %v5198_v45 = vmul.f32 %v11774_v4, %v4098_v63  ;;  %v11775_v36 = vmax.f32 %v10409_v30, 0.0  ;;  %v3428_v26 = vadd.f32 1.0, %v7918_v37  ;;  %5159 = vbcast.lane.b32.xlu1 %v10592_v57, 256  ;;  %v5196_v42 = vmul.f32 %v11776_v10, %v4090_v3  ;;  %11778 = vst [vmem:[#allocation54_spill] sm:$0xff] %v10612_v8  ;;  %v10615_v4 = vpop.permute.xlu1 %4715  ;;  %v10626_v10 = vpop.f32.mrb[40].mxu0 }
 0x311   : > { %v5199_v58 = vmul.f32 %v11777_v47, %v4101_v31  ;;  %v7922_v33 = vpop.eup %7921  ;;  %v3673_v38 = vmul.f32 0.6931472, %v7920_v27  ;;  %7929 = vlog2.f32 %v3430_v12  ;;  %v5452_v63 = vadd.f32 %v5325_v5, %v5324_v61  ;;  %v5740_v5 = vld [vmem:[%s8112_s16] sm:$0xff] }
 0x312   : > { %v3810_v24 = vadd.f32 %v3677_v14, %v11775_v36  ;;  %v5330_v34 = vmul.f32 %v5198_v45, %v11766_v51  ;;  %v7924_v30 = vpop.eup %7923  ;;  %7931 = vlog2.f32 %v3428_v26  ;;  %v3431_v37 = vadd.f32 1.0, %v7922_v33  ;;  %5163 = vbcast.lane.b32.xlu0 %v10592_v57, 264  ;;  %v5741_v45 = vld [vmem:[%s8112_s16 + $0x8] sm:$0xff]  ;;  %v11780_v26 = vld [vmem:[#allocation20_spill] sm:$0xff]  ;;  %v10632_v57 = vpop.f32.mrb[41].mxu0 }
 0x313   : > { %v5328_v3 = vmul.f32 %v5196_v42, %v11767_v32  ;;  %v7926_v47 = vpop.eup %7925  ;;  %v11779_v31 = vmax.f32 %v10427_v56, 0.0  ;;  %v3679_v12 = vmul.f32 0.6931472, %v7924_v30  ;;  %v5453_v36 = vadd.f32 %v5452_v63, %v5326_v40  ;;  %v11781_v33 = vld [vmem:[#allocation23_spill] sm:$0xff] }
 0x314   : > { %v10617_v14 = vadd.f32 -0.6931472, %v3810_v24  ;;  %v5331_v61 = vmul.f32 %v11769_v41, %v5199_v58  ;;  %7933 = vlog2.f32 %v3431_v37  ;;  %v3429_v24 = vadd.f32 1.0, %v7926_v47  ;;  %4886 = vbcast.lane.b32.xlu1 %v11780_v26, 280  ;;  %v10640_v37 = vpop.f32.mrb[42].mxu0 }
 0x315   : > { %v3808_v27 = vadd.f32 %v3673_v38, %v11779_v31  ;;  %v5197_v42 = vmul.f32 %v11781_v33, %v4093_v11  ;;  %v4000_v8 = vpack.c.bf16 %v10522_v43, %v10485_v21  ;;  %v7928_v56 = vpop.eup %7927  ;;  %v11782_v40 = vmax.f32 %v10431_v50, 0.0  ;;  %v11783_v43 = vld [vmem:[#allocation7_spill] sm:$0xff]  ;;  %v10644_v31 = vpop.permute.xlu0 %4730  ;;  %v11785_v33 = vld [vmem:[#allocation14_spill] sm:$0xff] }
 0x316   : > { %v5454_v63 = vadd.f32 %v5453_v36, %v5327_v22  ;;  %v4001_v30 = vpack.c.bf16 %v10508_v0, %v10465_v49  ;;  %v3675_v47 = vmul.f32 0.6931472, %v7928_v56  ;;  %7935 = vlog2.f32 %v3429_v24  ;;  %4981 = vbcast.lane.b32.xlu0 %v11783_v43, 280 }
 0x317   : > { %v10634_v38 = vadd.f32 -0.6931472, %v3808_v27  ;;  %v3811_v58 = vadd.f32 %v3679_v12, %v11782_v40  ;;  %v5329_v11 = vmul.f32 %v11773_v39, %v5197_v42  ;;  %6941 = vmatprep.mubr.bf16.mxu0 %v4000_v8  ;;  %v7065_v21 = vpack.c.bf16 %v5741_v45, %v5740_v5  ;;  %v10646_v27 = vpop.f32.mrb[43].mxu0  ;;  %v10654_v12 = vpop.permute.xlu1 %4882 }
 0x318   : > { %v5455_v22 = vrot.slane %v5454_v63, 4  ;;  %6942 = vmatmul.mubr.bf16.gmra.mrb[116].mxu0 %v4001_v30  ;;  %v4114_v49 = vadd.f32 %v10191_v17, %v10525_v53  ;;  %v4106_v0 = vadd.f32 %v10525_v53, %v10196_v13  ;;  %v11784_v8 = vmax.f32 %v10451_v16, 0.0  ;;  %v11786_v17 = vld [vmem:[#allocation42_spill] sm:$0xff]  ;;  %v11788_v30 = vld [vmem:[#allocation24_spill] sm:$0xff]  ;;  %5015 = vbcast.lane.b32.xlu1 %v10032_v15, 272 }
 0x319   : > { %v10648_v50 = vadd.f32 -0.6931472, %v3811_v58  ;;  %v5461_v5 = vadd.f32 %v5329_v11, %v5328_v3  ;;  %7066 = vmatprep.subr.bf16.mxu1 %v7065_v21  ;;  %v4117_v45 = vadd.f32 %v10200_v19, %v10525_v53  ;;  %v4109_v24 = vadd.f32 %v10525_v53, %v10206_v1  ;;  %v11787_v3 = vld [vmem:[#allocation34_spill] sm:$0xff]  ;;  %v10672_v19 = vpop.permute.xlu0 %4863 }
 0x31a   : > { %v3809_v36 = vadd.f32 %v3675_v47, %v11784_v8  ;;  %v5456_v26 = vadd.f32 %v5455_v22, %v5454_v63  ;;  %v5202_v42 = vmul.f32 %v11785_v33, %v4114_v49  ;;  %v5200_v56 = vmul.f32 %v11786_v17, %v4106_v0  ;;  %7068 = vmatpush3.bf16.msra.mxu1 %v7065_v21  ;;  %v11789_v8 = vld [vmem:[#allocation91_spill] sm:$0xff]  ;;  %v11793_v17 = vld [vmem:[#allocation93_spill] sm:$0xff] }
 0x31b   : > { %v4002_v13 = vpack.c.bf16 %v10596_v62, %v10559_v52  ;;  %v5462_v16 = vadd.f32 %v5461_v5, %v5330_v34  ;;  %v5203_v58 = vmul.f32 %v11787_v3, %v4117_v45  ;;  %v5201_v47 = vmul.f32 %v11788_v30, %v4109_v24  ;;  %5114 = vbcast.lane.b32.xlu0 %v9686_v6, 280  ;;  %v7930_v1 = vpop.eup %7929  ;;  %v11790_v5 = vld [vmem:[#allocation73_spill] sm:$0xff]  ;;  %v10684_v24 = vpop.permute.xlu1 %4977 }
 0x31c   : > { %v10666_v40 = vadd.f32 -0.6931472, %v3809_v36  ;;  %v5457_v63 = vrot.slane %v5456_v26, 2  ;;  %v5334_v11 = vmul.f32 %v5202_v42, %v11766_v51  ;;  %v5332_v21 = vmul.f32 %v5200_v56, %v11767_v32  ;;  %v7932_v62 = vpop.eup %7931  ;;  %11791 = vst [vmem:[#allocation47_spill] sm:$0xff] %v10684_v24  ;;  %v11796_v30 = vld [vmem:[#allocation61_spill] sm:$0xff]  ;;  %v11825_v24 = vld [vmem:[#allocation71_spill] sm:$0xff] }
 0x31d   : > { %6945 = vmatprep.mubr.bf16.mxu0 %v4002_v13  ;;  %v4003_v52 = vpack.c.bf16 %v10568_v59, %v10543_v18  ;;  %v3685_v34 = vmul.f32 0.6931472, %v7930_v1  ;;  %v5463_v43 = vadd.f32 %v5462_v16, %v5331_v61  ;;  %v5335_v22 = vmul.f32 %v11769_v41, %v5203_v58  ;;  %v11794_v13 = vld [vmem:[#allocation88_spill] sm:$0xff]  ;;  %v10694_v1 = vpop.f32.mrb[44].mxu0 }
 0x31e   : > { %v5333_v49 = vmul.f32 %v11773_v39, %v5201_v47  ;;  %v3681_v6 = vmul.f32 0.6931472, %v7932_v62  ;;  %v5458_v0 = vadd.f32 %v5457_v63, %v5456_v26  ;;  %v4130_v36 = vadd.f32 %v11789_v8, %v10525_v53  ;;  %v7934_v33 = vpop.eup %7933  ;;  %5148 = vbcast.lane.b32.xlu1 %v11794_v13, 272  ;;  %v10699_v8 = vpop.permute.xlu0 %4924 }
 0x31f   : > { %v4122_v45 = vadd.f32 %v10525_v53, %v11790_v5  ;;  %v11792_v59 = vmax.f32 %v10477_v35, 0.0  ;;  %v5464_v42 = vrot.slane %v5463_v43, 4  ;;  %v4133_v56 = vadd.f32 %v11793_v17, %v10525_v53  ;;  %11798 = vst [vmem:[#allocation31_spill] sm:$0xff] %v10699_v8  ;;  %v10701_v5 = vpop.f32.mrb[45].mxu0 }
 0x320   : > { %v5470_v61 = vadd.f32 %v5333_v49, %v5332_v21  ;;  %v11795_v26 = vmax.f32 %v10481_v7, 0.0  ;;  %v3687_v3 = vmul.f32 0.6931472, %v7934_v33  ;;  %v5459_v58 = vrot.slane %v5458_v0, 1  ;;  %6946 = vmatmul.mubr.bf16.gmra.mrb[120].mxu0 %v4003_v52  ;;  %v7936_v63 = vpop.eup %7935 }
 0x321   : > { %v3814_v18 = vadd.f32 %v3685_v34, %v11792_v59  ;;  %v5206_v47 = vmul.f32 %v11796_v30, %v4130_v36  ;;  %v5465_v62 = vadd.f32 %v5464_v42, %v5463_v43  ;;  %v11797_v34 = vld [vmem:[#allocation59_spill] sm:$0xff]  ;;  %v3683_v52 = vmul.f32 0.6931472, %v7936_v63  ;;  %v10707_v36 = vpop.f32.mrb[46].mxu0 }
 0x322   : > { %v3812_v16 = vadd.f32 %v3681_v6, %v11795_v26  ;;  %v5471_v21 = vadd.f32 %v5470_v61, %v5334_v11  ;;  %v5204_v49 = vmul.f32 %v11797_v34, %v4122_v45  ;;  %v11799_v6 = vmax.f32 %v10499_v48, 0.0  ;;  %v10711_v45 = vpop.f32.mrb[47].mxu0  ;;  %v11801_v48 = vld [vmem:[#allocation66_spill] sm:$0xff] }
 0x323   : > { %v10696_v35 = vadd.f32 -0.6931472, %v3814_v18  ;;  %v10705_v59 = vadd.f32 %v5459_v58, %v5458_v0  ;;  %v5466_v17 = vrot.slane %v5465_v62, 2  ;;  %v5338_v43 = vmul.f32 %v5206_v47, %v11766_v51  ;;  %v10720_v58 = vpop.permute.xlu1 %5011 }
 0x324   : > { %v6406_v7 = vadd.f32 -0.6931472, %v3812_v16  ;;  %v3815_v33 = vadd.f32 %v3687_v3, %v11799_v6  ;;  %v5472_v18 = vadd.f32 %v5471_v21, %v5335_v22  ;;  %v5336_v11 = vmul.f32 %v5204_v49, %v11767_v32  ;;  %v11802_v3 = vld [vmem:[#allocation94_spill] sm:$0xff]  ;;  %11803 = vst [vmem:[#allocation56_spill] sm:$0xff] %v10720_v58  ;;  %v11813_v58 = vld [vmem:[#allocation65_spill] sm:$0xff] }
 0x325   : > { %v11800_v61 = vmax.f32 %v10502_v44, 0.0  ;;  %v5207_v16 = vmul.f32 %v11801_v48, %v4133_v56  ;;  %v4125_v0 = vadd.f32 %v10525_v53, %v11802_v3  ;;  %v5467_v30 = vadd.f32 %v5466_v17, %v5465_v62  ;;  %v11804_v44 = vld [vmem:[#allocation33_spill] sm:$0xff]  ;;  %v11805_v56 = vld [vmem:[#allocation39_spill] sm:$0xff]  ;;  %v11807_v17 = vld [vmem:[#allocation96_spill] sm:$0xff] }
 0x326   : > { %v10713_v42 = vadd.f32 -0.6931472, %v3815_v33  ;;  %v5473_v22 = vrot.slane %v5472_v18, 4  ;;  %v4004_v47 = vpack.c.bf16 %v10666_v40, %v10634_v38  ;;  %v4005_v63 = vpack.c.bf16 %v10648_v50, %v10617_v14  ;;  %v10734_v40 = vpop.permute.xlu0 %4988  ;;  %v11809_v50 = vld [vmem:[#allocation50_spill] sm:$0xff] }
 0x327   : > { %v3813_v26 = vadd.f32 %v3683_v52, %v11800_v61  ;;  %v5339_v34 = vmul.f32 %v11769_v41, %v5207_v16  ;;  %v5205_v49 = vmul.f32 %v11804_v44, %v4125_v0  ;;  %v4146_v6 = vadd.f32 %v11805_v56, %v10525_v53  ;;  %v11806_v61 = vld [vmem:[#allocation74_spill] sm:$0xff]  ;;  %11808 = vst [vmem:[#allocation79_spill] sm:$0xff] %v10734_v40  ;;  %v11812_v44 = vld [vmem:[#allocation81_spill] sm:$0xff] }
 0x328   : > { %v5468_v33 = vrot.slane %v5467_v30, 1  ;;  %v5474_v52 = vadd.f32 %v5473_v22, %v5472_v18  ;;  %6949 = vmatprep.mubr.bf16.mxu0 %v4004_v47  ;;  %v4138_v62 = vadd.f32 %v10525_v53, %v11806_v61  ;;  %v4149_v38 = vadd.f32 %v11807_v17, %v10525_v53  ;;  %v11810_v48 = vld [vmem:[#allocation98_spill] sm:$0xff]  ;;  %v11811_v22 = vld [vmem:[#allocation43_spill] sm:$0xff] }
 0x329   : > { %v6407_v21 = vadd.f32 -0.6931472, %v3813_v26  ;;  %v5337_v14 = vmul.f32 %v11773_v39, %v5205_v49  ;;  %6950 = vmatmul.mubr.bf16.gmra.mrb[124].mxu0 %v4005_v63  ;;  %v5210_v26 = vmul.f32 %v11809_v50, %v4146_v6  ;;  %v4141_v16 = vadd.f32 %v10525_v53, %v11810_v48  ;;  %v10748_v49 = vpop.permute.xlu1 %5076  ;;  %v11818_v50 = vld [vmem:[#allocation52_spill] sm:$0xff]  ;;  %v11819_v48 = vld [vmem:[#allocation102_spill] sm:$0xff] }
 0x32a   : > { %v10740_v0 = vadd.f32 %v5468_v33, %v5467_v30  ;;  %v5475_v18 = vrot.slane %v5474_v52, 2  ;;  %v5208_v47 = vmul.f32 %v11811_v22, %v4138_v62  ;;  %v5211_v56 = vmul.f32 %v11812_v44, %v4149_v38  ;;  %11814 = vst [vmem:[#allocation22_spill] sm:$0xff] %v10748_v49  ;;  %v11822_v44 = vld [vmem:[#allocation36_spill] sm:$0xff] }
 0x32b   : > { %v4006_v3 = vpack.c.bf16 %v6407_v21, %v6406_v7  ;;  %v5479_v61 = vadd.f32 %v5337_v14, %v5336_v11  ;;  %v5342_v17 = vmul.f32 %v5210_v26, %v11766_v51  ;;  %v5209_v40 = vmul.f32 %v11813_v58, %v4141_v16  ;;  %v11815_v21 = vld [vmem:[#allocation77_spill] sm:$0xff]  ;;  %v11816_v58 = vld [vmem:[#allocation78_spill] sm:$0xff]  ;;  %v10759_v14 = vpop.f32.mrb[48].mxu0 }
 0x32c   : > { %v4007_v63 = vpack.c.bf16 %v10713_v42, %v10696_v35  ;;  %v5476_v6 = vadd.f32 %v5475_v18, %v5474_v52  ;;  %v5340_v7 = vmul.f32 %v5208_v47, %v11767_v32  ;;  %v5343_v30 = vmul.f32 %v11769_v41, %v5211_v56  ;;  %v11817_v35 = vld [vmem:[#allocation101_spill] sm:$0xff]  ;;  %v10766_v18 = vpop.permute.xlu0 %5091 }
 0x32d   : > { %6953 = vmatprep.mubr.bf16.mxu0 %v4006_v3  ;;  %v4162_v33 = vadd.f32 %v11815_v21, %v10525_v53  ;;  %v5480_v11 = vadd.f32 %v5479_v61, %v5338_v43  ;;  %v5341_v62 = vmul.f32 %v11773_v39, %v5209_v40  ;;  %v4154_v38 = vadd.f32 %v10525_v53, %v11816_v58  ;;  %v11820_v3 = vld [vmem:[#allocation104_spill] sm:$0xff]  ;;  %v10768_v40 = vpop.f32.mrb[49].mxu0  ;;  %v11823_v61 = vld [vmem:[#allocation103_spill] sm:$0xff] }
 0x32e   : > { %v4165_v42 = vadd.f32 %v11817_v35, %v10525_v53  ;;  %v5477_v52 = vrot.slane %v5476_v6, 1  ;;  %v4157_v16 = vadd.f32 %v10525_v53, %v11819_v48  ;;  %v4178_v43 = vadd.f32 %v11820_v3, %v10525_v53  ;;  %11821 = vst [vmem:[#allocation63_spill] sm:$0xff] %v10766_v18  ;;  %v5742_v58 = vld [vmem:[%s8112_s16 + $0x10] sm:$0xff]  ;;  %v5743_v35 = vld [vmem:[%s8112_s16 + $0x18] sm:$0xff]  ;;  %v10774_v49 = vpop.f32.mrb[50].mxu0 }
 0x32f   : > { %v5214_v26 = vmul.f32 %v11818_v50, %v4162_v33  ;;  %v5481_v22 = vadd.f32 %v5480_v11, %v5339_v34  ;;  %v5488_v47 = vadd.f32 %v5341_v62, %v5340_v7  ;;  %v5212_v56 = vmul.f32 %v11822_v44, %v4154_v38  ;;  %v11824_v48 = vld [vmem:[#allocation13_spill] sm:$0xff]  ;;  %v10781_v8 = vpop.f32.mrb[51].mxu0  ;;  %v10785_v38 = vpop.permute.xlu1 %5140  ;;  %v11827_v44 = vld [vmem:[#allocation18_spill] sm:$0xff] }
 0x330   : > { %v5215_v21 = vmul.f32 %v11823_v61, %v4165_v42  ;;  %v10776_v33 = vadd.f32 %v5477_v52, %v5476_v6  ;;  %v5213_v3 = vmul.f32 %v11824_v48, %v4157_v16  ;;  %v5218_v18 = vmul.f32 %v11825_v24, %v4178_v43  ;;  %v11829_v61 = vld [vmem:[#allocation35_spill] sm:$0xff] }
 0x331   : > { %v5346_v50 = vmul.f32 %v5214_v26, %v11766_v51  ;;  %v5482_v34 = vrot.slane %v5481_v22, 4  ;;  %v5489_v7 = vadd.f32 %v5488_v47, %v5342_v17  ;;  %6954 = vmatmul.mubr.bf16.gmra.mrb[128].mxu0 %v4007_v63  ;;  %v5344_v11 = vmul.f32 %v5212_v56, %v11767_v32  ;;  %v11826_v26 = vld [vmem:[#allocation105_spill] sm:$0xff]  ;;  %v11828_v63 = vld [vmem:[#allocation106_spill] sm:$0xff] }
 0x332   : > { %v5347_v62 = vmul.f32 %v11769_v41, %v5215_v21  ;;  %v5345_v6 = vmul.f32 %v11773_v39, %v5213_v3  ;;  %v5350_v42 = vmul.f32 %v5218_v18, %v11766_v51  ;;  %v7069_v52 = vpack.c.bf16 %v5743_v35, %v5742_v58  ;;  %v10802_v58 = vpop.permute.xlu0 %5125  ;;  %v11830_v3 = vld [vmem:[#allocation19_spill] sm:$0xff] }
 0x333   : > { %v4170_v16 = vadd.f32 %v10525_v53, %v11826_v26  ;;  %v5483_v24 = vadd.f32 %v5482_v34, %v5481_v22  ;;  %v5490_v43 = vadd.f32 %v5489_v7, %v5343_v30  ;;  %v4181_v17 = vadd.f32 %v11827_v44, %v10525_v53 }
 0x334   : > { %v4173_v47 = vadd.f32 %v10525_v53, %v11828_v63  ;;  %v5497_v56 = vadd.f32 %v5345_v6, %v5344_v11  ;;  %7070 = vmatprep.subr.bf16.mxu1 %v7069_v52  ;;  %v10798_v48 = vrot.slane %v10588_v2, %v11757_v55  ;;  %v4194_v18 = vadd.f32 %v10483_v28, %v10525_v53  ;;  %v10819_v63 = vpop.f32.mrb[52].mxu0 }
 0x335   : > { %v5216_v21 = vmul.f32 %v11829_v61, %v4170_v16  ;;  %v5484_v30 = vrot.slane %v5483_v24, 2  ;;  %v5491_v22 = vrot.slane %v5490_v43, 4  ;;  %7072 = vmatpush3.bf16.msra.mxu1 %v7069_v52  ;;  %v5219_v35 = vmul.f32 %v10615_v4, %v4181_v17  ;;  %v4735_v4 = vpop.permute.xlu1 %4734  ;;  %v11831_v16 = vld [vmem:[#allocation69_spill] sm:$0xff] }
 0x336   : > { %v5217_v34 = vmul.f32 %v11830_v3, %v4173_v47  ;;  %v5498_v7 = vadd.f32 %v5497_v56, %v5346_v50  ;;  %5178 = vbcast.lane.b32.xlu0 %v10798_v48, 256  ;;  %v4186_v55 = vadd.f32 %v10525_v53, %v10495_v29  ;;  %5182 = vbcast.lane.b32.xlu1 %v10798_v48, 264  ;;  %v10824_v56 = vpop.f32.mrb[53].mxu0 }
 0x337   : > { %v5348_v11 = vmul.f32 %v5216_v21, %v11767_v32  ;;  %v10811_v28 = vadd.f32 %v5484_v30, %v5483_v24  ;;  %v5492_v2 = vadd.f32 %v5491_v22, %v5490_v43  ;;  %v5351_v6 = vmul.f32 %v11769_v41, %v5219_v35  ;;  %v11832_v21 = vld [vmem:[#allocation8_spill] sm:$0xff]  ;;  %v10832_v30 = vpop.f32.mrb[54].mxu0 }
 0x338   : > { %v5349_v52 = vmul.f32 %v11773_v39, %v5217_v34  ;;  %v5499_v26 = vadd.f32 %v5498_v7, %v5347_v62  ;;  %v5220_v50 = vmul.f32 %v11831_v16, %v4186_v55  ;;  %v5222_v44 = vmul.f32 %v10644_v31, %v4194_v18  ;;  %v10839_v7 = vpop.f32.mrb[55].mxu0  ;;  %v11834_v16 = vld [vmem:[#allocation46_spill] sm:$0xff] }
 0x339   : > { %v4197_v17 = vadd.f32 %v10506_v9, %v10525_v53  ;;  %v5486_v29 = vrot.slane %v10811_v28, 1  ;;  %v5493_v24 = vrot.slane %v5492_v2, 2  ;;  %v4189_v43 = vadd.f32 %v10525_v53, %v10512_v60  ;;  %v10830_v9 = vpop.permute.xlu0 %4848  ;;  %v11833_v60 = vld [vmem:[#allocation57_spill] sm:$0xff] }
 0x33a   : > { %v5506_v47 = vadd.f32 %v5349_v52, %v5348_v11  ;;  %v5500_v61 = vrot.slane %v5499_v26, 4  ;;  %v5352_v62 = vmul.f32 %v5220_v50, %v11767_v32  ;;  %5000 = vbcast.lane.b32.xlu0 %v11832_v21, 280  ;;  %v5354_v31 = vmul.f32 %v5222_v44, %v11766_v51  ;;  %5034 = vbcast.lane.b32.xlu1 %v10539_v23, 272  ;;  %v11835_v44 = vld [vmem:[#allocation83_spill] sm:$0xff] }
 0x33b   : > { %v5223_v18 = vmul.f32 %v4735_v4, %v4197_v17  ;;  %v10834_v22 = vadd.f32 %v5493_v24, %v5492_v2  ;;  %v5221_v3 = vmul.f32 %v11833_v60, %v4189_v43  ;;  %v4210_v34 = vadd.f32 %v10533_v20, %v10525_v53  ;;  %v11836_v17 = vld [vmem:[#allocation45_spill] sm:$0xff]  ;;  %v11837_v24 = vld [vmem:[#allocation11_spill] sm:$0xff] }
 0x33c   : > { %v5507_v35 = vadd.f32 %v5506_v47, %v5350_v42  ;;  %v10841_v11 = vadd.f32 %v5500_v61, %v5499_v26  ;;  %v4202_v52 = vadd.f32 %v10525_v53, %v10541_v46  ;;  %v4213_v2 = vadd.f32 %v10547_v54, %v10525_v53  ;;  %v11838_v47 = vld [vmem:[#allocation12_spill] sm:$0xff]  ;;  %v5745_v60 = vld [vmem:[%s8112_s16 + $0x28] sm:$0xff] }
 0x33d   : > { %v5355_v55 = vmul.f32 %v11769_v41, %v5223_v18  ;;  %v5353_v4 = vmul.f32 %v11773_v39, %v5221_v3  ;;  %v5226_v20 = vmul.f32 %v11834_v16, %v4210_v34  ;;  %v4205_v26 = vadd.f32 %v10525_v53, %v10557_v25  ;;  %v11839_v18 = vld [vmem:[#allocation27_spill] sm:$0xff] }
 0x33e   : > { %v10848_v42 = vadd.f32 %v5507_v35, %v5351_v6  ;;  %v5502_v50 = vrot.slane %v10841_v11, 2  ;;  %5133 = vbcast.lane.b32.xlu0 %v11835_v44, 280  ;;  %v5224_v46 = vmul.f32 %v11836_v17, %v4202_v52  ;;  %5167 = vbcast.lane.b32.xlu1 %v11837_v24, 272  ;;  %v5227_v54 = vmul.f32 %v11838_v47, %v4213_v2  ;;  %v5744_v35 = vld [vmem:[%s8112_s16 + $0x20] sm:$0xff]  ;;  %v11841_v17 = vld [vmem:[#allocation17_spill] sm:$0xff] }
 0x33f   : > { %v4226_v6 = vadd.f32 %v10626_v10, %v10525_v53  ;;  %v5515_v61 = vadd.f32 %v5353_v4, %v5352_v62  ;;  %v5358_v21 = vmul.f32 %v5226_v20, %v11766_v51  ;;  %v5225_v25 = vmul.f32 %v11839_v18, %v4205_v26  ;;  %v11840_v52 = vld [vmem:[#allocation70_spill] sm:$0xff]  ;;  %v10871_v10 = vpop.permute.xlu0 %4943 }
 0x340   : > { %v5509_v43 = vrot.slane %v10848_v42, 4  ;;  %v5356_v3 = vmul.f32 %v5224_v46, %v11767_v32  ;;  %v5359_v34 = vmul.f32 %v11769_v41, %v5227_v54  ;;  %v4218_v2 = vadd.f32 %v10525_v53, %v10632_v57  ;;  %v11843_v18 = vld [vmem:[#allocation30_spill] sm:$0xff] }
 0x341   : > { %v5230_v16 = vmul.f32 %v11840_v52, %v4226_v6  ;;  %v5516_v44 = vadd.f32 %v5515_v61, %v5354_v31  ;;  %v5357_v62 = vmul.f32 %v11773_v39, %v5225_v25  ;;  %v4229_v4 = vadd.f32 %v10640_v37, %v10525_v53  ;;  %v11842_v6 = vld [vmem:[#allocation55_spill] sm:$0xff] }
 0x342   : > { %v4221_v20 = vadd.f32 %v10525_v53, %v10646_v27  ;;  %5019 = vbcast.lane.b32.xlu0 %v10032_v15, 280  ;;  %5152 = vbcast.lane.b32.xlu1 %v11794_v13, 280  ;;  %v5228_v46 = vmul.f32 %v11841_v17, %v4218_v2  ;;  %v7073_v57 = vpack.c.bf16 %v5745_v60, %v5744_v35  ;;  %v5495_v47 = vrot.slane %v10834_v22, 1  ;;  %v10892_v35 = vpop.f32.mrb[56].mxu0 }
 0x343   : > { %v5362_v26 = vmul.f32 %v5230_v16, %v11766_v51  ;;  %v5517_v31 = vadd.f32 %v5516_v44, %v5355_v55  ;;  %v5524_v54 = vadd.f32 %v5357_v62, %v5356_v3  ;;  %v5231_v61 = vmul.f32 %v11842_v6, %v4229_v4  ;;  %v10896_v16 = vpop.f32.mrb[57].mxu0  ;;  %v11845_v44 = vld [vmem:[#allocation26_spill] sm:$0xff] }
 0x344   : > { %v5229_v37 = vmul.f32 %v11843_v18, %v4221_v20  ;;  %v5360_v25 = vmul.f32 %v5228_v46, %v11767_v32  ;;  %7074 = vmatprep.subr.bf16.mxu1 %v7073_v57  ;;  %v4242_v15 = vadd.f32 %v10694_v1, %v10525_v53  ;;  %v4234_v27 = vadd.f32 %v10525_v53, %v10701_v5  ;;  %v11844_v1 = vld [vmem:[#allocation76_spill] sm:$0xff]  ;;  %v11846_v62 = vld [vmem:[#allocation90_spill] sm:$0xff]  ;;  %v10904_v20 = vpop.permute.xlu0 %5007 }
 0x345   : > { %v4245_v13 = vadd.f32 %v10707_v36, %v10525_v53  ;;  %v5518_v55 = vrot.slane %v5517_v31, 4  ;;  %v5525_v60 = vadd.f32 %v5524_v54, %v5358_v21  ;;  %v5363_v3 = vmul.f32 %v11769_v41, %v5231_v61  ;;  %7076 = vmatpush3.bf16.msra.mxu1 %v7073_v57  ;;  %v10906_v21 = vpop.f32.mrb[58].mxu0  ;;  %v11847_v18 = vld [vmem:[#allocation38_spill] sm:$0xff] }
 0x346   : > { %v5361_v52 = vmul.f32 %v11773_v39, %v5229_v37  ;;  %5038 = vbcast.lane.b32.xlu1 %v10539_v23, 280  ;;  %v5234_v2 = vmul.f32 %v11844_v1, %v4242_v15  ;;  %v5232_v5 = vmul.f32 %v11845_v44, %v4234_v27  ;;  %v4237_v36 = vadd.f32 %v10525_v53, %v10711_v45  ;;  %v10911_v54 = vpop.f32.mrb[59].mxu0 }
 0x347   : > { %v5235_v4 = vmul.f32 %v11846_v62, %v4245_v13  ;;  %v5519_v17 = vadd.f32 %v5518_v55, %v5517_v31  ;;  %v5526_v46 = vadd.f32 %v5525_v60, %v5359_v34  ;;  %v5487_v23 = vadd.f32 %v5486_v29, %v10811_v28  ;;  %5186 = vbcast.lane.b32.xlu0 %v10798_v48, 272 }
 0x348   : > { %v5533_v57 = vadd.f32 %v5361_v52, %v5360_v25  ;;  %v5366_v6 = vmul.f32 %v5234_v2, %v11766_v51  ;;  %v5364_v61 = vmul.f32 %v5232_v5, %v11767_v32  ;;  %v5233_v37 = vmul.f32 %v11847_v18, %v4237_v36 }
 0x349   : > { %v5367_v45 = vmul.f32 %v11769_v41, %v5235_v4  ;;  %v5520_v15 = vrot.slane %v5519_v17, 2  ;;  %v5527_v31 = vrot.slane %v5526_v46, 4  ;;  %v5496_v25 = vadd.f32 %v5495_v47, %v10834_v22 }
 0x34a   : > { %v5534_v34 = vadd.f32 %v5533_v57, %v5362_v26  ;;  %v5365_v27 = vmul.f32 %v11773_v39, %v5233_v37  ;;  %v5503_v28 = vadd.f32 %v5502_v50, %v10841_v11  ;;  %v5510_v29 = vadd.f32 %v5509_v43, %v10848_v42  ;;  %5190 = vbcast.lane.b32.xlu1 %v10798_v48, 280  ;;  %v10931_v50 = vpop.permute.xlu0 %5057 }
 0x34b   : > { %v5796_v13 = vsel %vm5795_vm0, %v10740_v0, %v10705_v59  ;;  %v5528_v55 = vadd.f32 %v5527_v31, %v5526_v46  ;;  %v5521_v52 = vadd.f32 %v5520_v15, %v5519_v17  ;;  %5171 = vbcast.lane.b32.xlu0 %v11837_v24, 280  ;;  %v10934_v24 = vpop.f32.mrb[60].mxu0  ;;  %v4250_v31 = vadd.f32 %v10525_v53, %v10768_v40 }
 0x34c   : > { %v5535_v60 = vadd.f32 %v5534_v34, %v5363_v3  ;;  %v5542_v22 = vadd.f32 %v5365_v27, %v5364_v61  ;;  %v5504_v26 = vrot.slane %v5503_v28, 1  ;;  %v5511_v47 = vrot.slane %v5510_v29, 2  ;;  %v10937_v4 = vpop.f32.mrb[61].mxu0 }
 0x34d   : > { %v5798_v11 = vsel %vm5797_vm1, %v10776_v33, %v5796_v13  ;;  %v5529_v42 = vrot.slane %v5528_v55, 2  ;;  %v5522_v1 = vrot.slane %v5521_v52, 1  ;;  %v10940_v57 = vpop.f32.mrb[62].mxu0  ;;  %v4258_v61 = vadd.f32 %v10759_v14, %v10525_v53 }
 0x34e   : > { %v5536_v43 = vrot.slane %v5535_v60, 4  ;;  %v5543_v59 = vadd.f32 %v5542_v22, %v5366_v6  ;;  %v5505_v0 = vadd.f32 %v5504_v26, %v5503_v28  ;;  %v5512_v48 = vadd.f32 %v5511_v47, %v5510_v29  ;;  %v10946_v18 = vpop.f32.mrb[63].mxu0  ;;  %v11848_v28 = vld [vmem:[#allocation40_spill] sm:$0xff]  ;;  %v11850_v22 = vld [vmem:[#allocation85_spill] sm:$0xff] }
 0x34f   : > { %v5800_v3 = vsel %vm5799_vm2, %v5487_v23, %v5798_v11  ;;  %v5530_v2 = vadd.f32 %v5529_v42, %v5528_v55  ;;  %v5523_v17 = vadd.f32 %v5522_v1, %v5521_v52  ;;  %v4261_v34 = vadd.f32 %v10774_v49, %v10525_v53  ;;  %v11851_v49 = vld [vmem:[#allocation32_spill] sm:$0xff] }
 0x350   : > { %v5537_v44 = vadd.f32 %v5536_v43, %v5535_v60  ;;  %v5544_v5 = vadd.f32 %v5543_v59, %v5367_v45  ;;  %v5513_v62 = vrot.slane %v5512_v48, 1  ;;  %v5802_v33 = vsel %vm5801_vm3, %v5496_v25, %v5800_v3  ;;  %v10944_v45 = vpop.permute.xlu0 %5110  ;;  %v11849_v60 = vld [vmem:[#allocation49_spill] sm:$0xff]  ;;  %v11852_v3 = vld [vmem:[#allocation60_spill] sm:$0xff] }
 0x351   : > { %v5804_v46 = vsel %vm5803_vm4, %v5505_v0, %v5802_v33  ;;  %v5531_v37 = vrot.slane %v5530_v2, 1  ;;  %v5238_v29 = vmul.f32 %v11848_v28, %v4258_v61  ;;  %v4253_v14 = vadd.f32 %v10525_v53, %v10781_v8  ;;  %v5746_v28 = vld [vmem:[%s8112_s16 + $0x30] sm:$0xff] }
 0x352   : > { %v5538_v36 = vrot.slane %v5537_v44, 2  ;;  %v5545_v23 = vrot.slane %v5544_v5, 4  ;;  %v5514_v6 = vadd.f32 %v5513_v62, %v5512_v48  ;;  %v5236_v52 = vmul.f32 %v11849_v60, %v4250_v31 }
 0x353   : > { %v5239_v26 = vmul.f32 %v11850_v22, %v4261_v34  ;;  %v5370_v40 = vmul.f32 %v5238_v29, %v11766_v51  ;;  %v5237_v11 = vmul.f32 %v11851_v49, %v4253_v14  ;;  %v4274_v42 = vadd.f32 %v10819_v63, %v10525_v53  ;;  %v11856_v34 = vld [vmem:[#allocation92_spill] sm:$0xff] }
 0x354   : > { %v5539_v15 = vadd.f32 %v5538_v36, %v5537_v44  ;;  %v5546_v25 = vadd.f32 %v5545_v23, %v5544_v5  ;;  %v5806_v27 = vsel %vm5805_vm5, %v5514_v6, %v5804_v46  ;;  %v10963_v43 = vadd.f32 %v5531_v37, %v5530_v2  ;;  %v10973_v63 = vpop.permute.xlu0 %5144  ;;  %v11853_v2 = vld [vmem:[#allocation62_spill] sm:$0xff]  ;;  %v11854_v6 = vld [vmem:[#allocation107_spill] sm:$0xff]  ;;  %v11855_v37 = vld [vmem:[#allocation41_spill] sm:$0xff] }
 0x355   : > { %v5808_v55 = vsel %vm5807_vm6, %v5523_v17, %v5806_v27  ;;  %v5368_v8 = vmul.f32 %v5236_v52, %v11767_v32  ;;  %v5371_v1 = vmul.f32 %v11769_v41, %v5239_v26  ;;  %v4266_v59 = vadd.f32 %v10525_v53, %v10824_v56 }
 0x356   : > { %v5540_v13 = vrot.slane %v5539_v15, 1  ;;  %v5547_v47 = vrot.slane %v5546_v25, 2  ;;  %6989 = vmatprep.mubr.f32.mxu1 %v5808_v55  ;;  %v5369_v48 = vmul.f32 %v11773_v39, %v5237_v11  ;;  %v5242_v44 = vmul.f32 %v11852_v3, %v4274_v42 }
 0x357   : > { %v4277_v5 = vadd.f32 %v10832_v30, %v10525_v53  ;;  %v5240_v62 = vmul.f32 %v11853_v2, %v4266_v59  ;;  %v4269_v33 = vadd.f32 %v10525_v53, %v10839_v7  ;;  %v4290_v56 = vadd.f32 %v10892_v35, %v10525_v53  ;;  %v11857_v7 = vld [vmem:[#allocation58_spill] sm:$0xff]  ;;  %v5747_v35 = vld [vmem:[%s8112_s16 + $0x38] sm:$0xff]  ;;  %v11858_v59 = vld [vmem:[#allocation80_spill] sm:$0xff] }
 0x358   : > { %v5548_v0 = vadd.f32 %v5547_v47, %v5546_v25  ;;  %v4282_v36 = vadd.f32 %v10525_v53, %v10896_v16  ;;  %v10982_v17 = vadd.f32 %v5540_v13, %v5539_v15  ;;  %v5551_v46 = vadd.f32 %v5369_v48, %v5368_v8  ;;  %v6891_v13 = vpop.f32.mrb[64].mxu0  ;;  %v4868_v42 = vpop.permute.xlu0 %4867 }
 0x359   : > { %v5374_v23 = vmul.f32 %v5242_v44, %v11766_v51  ;;  %v5243_v30 = vmul.f32 %v11854_v6, %v4277_v5  ;;  %v5372_v61 = vmul.f32 %v5240_v62, %v11767_v32  ;;  %v5241_v31 = vmul.f32 %v11855_v37, %v4269_v33  ;;  %v4313_v26 = vpop.f32.mrb[65].mxu0  ;;  %v11859_v33 = vld [vmem:[#allocation15_spill] sm:$0xff] }
 0x35a   : > { %v5246_v25 = vmul.f32 %v11856_v34, %v4290_v56  ;;  %v5244_v27 = vmul.f32 %v11857_v7, %v4282_v36  ;;  %v5549_v29 = vrot.slane %v5548_v0, 1  ;;  %v5552_v14 = vadd.f32 %v5551_v46, %v5370_v40  ;;  %v11860_v46 = vld [vmem:[#allocation87_spill] sm:$0xff] }
 0x35b   : > { %v5375_v16 = vmul.f32 %v11769_v41, %v5243_v30  ;;  %v4293_v15 = vadd.f32 %v10906_v21, %v10525_v53  ;;  %v5373_v55 = vmul.f32 %v11773_v39, %v5241_v31  ;;  %v4285_v22 = vadd.f32 %v10525_v53, %v10911_v54  ;;  %v11003_v21 = vpop.f32.mrb[66].mxu0 }
 0x35c   : > { %v5378_v60 = vmul.f32 %v5246_v25, %v11766_v51  ;;  %v5376_v52 = vmul.f32 %v5244_v27, %v11767_v32  ;;  %v5553_v47 = vadd.f32 %v5552_v14, %v5371_v1  ;;  %v7077_v40 = vpack.c.bf16 %v5747_v35, %v5746_v28  ;;  %v4316_v44 = vpop.f32.mrb[67].mxu0 }
 0x35d   : > { %v5247_v49 = vmul.f32 %v10830_v9, %v4293_v15  ;;  %v4306_v11 = vadd.f32 %v10934_v24, %v10525_v53  ;;  %v5560_v8 = vadd.f32 %v5373_v55, %v5372_v61  ;;  %v5245_v48 = vmul.f32 %v11858_v59, %v4285_v22 }
 0x35e   : > { %v4298_v3 = vadd.f32 %v10525_v53, %v10937_v4  ;;  %v4309_v54 = vadd.f32 %v10940_v57, %v10525_v53  ;;  %v5554_v1 = vrot.slane %v5553_v47, 4  ;;  %7078 = vmatprep.subr.bf16.mxu1 %v7077_v40  ;;  %v4301_v24 = vadd.f32 %v10525_v53, %v10946_v18 }
 0x35f   : > { %v5379_v9 = vmul.f32 %v11769_v41, %v5247_v49  ;;  %v5250_v5 = vmul.f32 %v10672_v19, %v4306_v11  ;;  %v5561_v2 = vadd.f32 %v5560_v8, %v5374_v23  ;;  %v5377_v62 = vmul.f32 %v11773_v39, %v5245_v48  ;;  %7080 = vmatpush3.bf16.msra.mxu1 %v7077_v40  ;;  %v11862_v49 = vld [vmem:[#allocation16_spill] sm:$0xff] }
 0x360   : > { %v5248_v56 = vmul.f32 %v11859_v33, %v4298_v3  ;;  %v5251_v4 = vmul.f32 %v4868_v42, %v4309_v54  ;;  %v5555_v36 = vadd.f32 %v5554_v1, %v5553_v47  ;;  %v5249_v6 = vmul.f32 %v11860_v46, %v4301_v24  ;;  %v11863_v3 = vld [vmem:[#allocation95_spill] sm:$0xff]  ;;  %v5750_v46 = vld [vmem:[%s8112_s16 + $0x50] sm:$0xff] }
 0x361   : > { %v5382_v57 = vmul.f32 %v5250_v5, %v11766_v51  ;;  %v4322_v30 = vadd.f32 %v6891_v13, %v10525_v53  ;;  %v5562_v61 = vadd.f32 %v5561_v2, %v5375_v16  ;;  %v5569_v37 = vadd.f32 %v5377_v62, %v5376_v52  ;;  %v11861_v13 = vld [vmem:[#allocation86_spill] sm:$0xff]  ;;  %v6895_v52 = vpop.f32.mrb[68].mxu0  ;;  %v11864_v5 = vld [vmem:[#allocation67_spill] sm:$0xff] }
 0x362   : > { %v5380_v19 = vmul.f32 %v5248_v56, %v11767_v32  ;;  %v5383_v18 = vmul.f32 %v11769_v41, %v5251_v4  ;;  %v5556_v23 = vrot.slane %v5555_v36, 2  ;;  %v5381_v31 = vmul.f32 %v11773_v39, %v5249_v6  ;;  %v5748_v62 = vld [vmem:[%s8112_s16 + $0x40] sm:$0xff]  ;;  %v5749_v33 = vld [vmem:[%s8112_s16 + $0x48] sm:$0xff]  ;;  %v5751_v6 = vld [vmem:[%s8112_s16 + $0x58] sm:$0xff] }
 0x363   : > { %v5254_v34 = vmul.f32 %v10654_v12, %v4322_v30  ;;  %v4314_v25 = vadd.f32 %v10525_v53, %v4313_v26  ;;  %v11024_v7 = vadd.f32 %v5549_v29, %v5548_v0  ;;  %v5563_v27 = vrot.slane %v5562_v61, 4  ;;  %v11031_v12 = vld [vmem:[%s8102_s24] ss:$0 sm:$0xff]  ;;  %v4329_v29 = vpop.f32.mrb[69].mxu0 }
 0x364   : > { %v5570_v28 = vadd.f32 %v5569_v37, %v5378_v60  ;;  %v4317_v35 = vadd.f32 %v10525_v53, %v4316_v44  ;;  %v5557_v14 = vadd.f32 %v5556_v23, %v5555_v36  ;;  %v5578_v16 = vadd.f32 %v5381_v31, %v5380_v19  ;;  %v6896_v42 = vpop.f32.mrb[70].mxu0  ;;  %v11865_v37 = vld [vmem:[#allocation108_spill] sm:$0xff] }
 0x365   : > { %v5386_v15 = vmul.f32 %v5254_v34, %v11766_v51  ;;  %v5252_v55 = vmul.f32 %v11861_v13, %v4314_v25  ;;  %v5564_v22 = vadd.f32 %v5563_v27, %v5562_v61  ;;  %v4338_v0 = vadd.f32 %v11031_v12, %v6895_v52  ;;  %v4332_v44 = vpop.f32.mrb[71].mxu0  ;;  %v5752_v13 = vld [vmem:[%s8112_s16 + $0x60] sm:$0xff] }
 0x366   : > { %v5571_v47 = vadd.f32 %v5570_v28, %v5379_v9  ;;  %v5253_v40 = vmul.f32 %v11862_v49, %v4317_v35  ;;  %v5558_v60 = vrot.slane %v5557_v14, 1  ;;  %v5579_v53 = vadd.f32 %v5578_v16, %v5382_v57  ;;  %v11866_v35 = vld [vmem:[#allocation48_spill] sm:$0xff] }
 0x367   : > { %v5384_v26 = vmul.f32 %v5252_v55, %v11767_v32  ;;  %v4330_v11 = vadd.f32 %v11031_v12, %v4329_v29  ;;  %v5565_v8 = vrot.slane %v5564_v22, 2  ;;  %v5258_v54 = vmul.f32 %v11863_v3, %v4338_v0  ;;  %v5753_v55 = vld [vmem:[%s8112_s16 + $0x68] sm:$0xff] }
 0x368   : > { %v5572_v59 = vrot.slane %v5571_v47, 4  ;;  %v5385_v48 = vmul.f32 %v11773_v39, %v5253_v40  ;;  %v5559_v1 = vadd.f32 %v5558_v60, %v5557_v14  ;;  %v5580_v9 = vadd.f32 %v5579_v53, %v5383_v18 }
 0x369   : > { %v5256_v24 = vmul.f32 %v11864_v5, %v4330_v11  ;;  %v4341_v2 = vadd.f32 %v11031_v12, %v6896_v42  ;;  %v5566_v56 = vadd.f32 %v5565_v8, %v5564_v22  ;;  %v5390_v57 = vmul.f32 %v5258_v54, %v11766_v51  ;;  %v5754_v8 = vld [vmem:[%s8112_s16 + $0x70] sm:$0xff]  ;;  %v11867_v5 = vld [vmem:[#allocation89_spill] sm:$0xff] }
 0x36a   : > { %v5573_v4 = vadd.f32 %v5572_v59, %v5571_v47  ;;  %v5587_v36 = vadd.f32 %v5385_v48, %v5384_v26  ;;  %v5581_v30 = vrot.slane %v5580_v9, 4  ;;  %v4333_v18 = vadd.f32 %v11031_v12, %v4332_v44  ;;  %v5755_v59 = vld [vmem:[%s8112_s16 + $0x78] sm:$0xff] }
 0x36b   : > { %v5388_v61 = vmul.f32 %v5256_v24, %v11767_v32  ;;  %v5259_v19 = vmul.f32 %v11865_v37, %v4341_v2  ;;  %v5567_v23 = vrot.slane %v5566_v56, 1  ;;  %v7081_v25 = vpack.c.bf16 %v5749_v33, %v5748_v62  ;;  %v6899_v0 = vpop.f32.mrb[72].mxu0  ;;  %v11868_v62 = vld [vmem:[#allocation28_spill] sm:$0xff] }
 0x36c   : > { %v5574_v31 = vrot.slane %v5573_v4, 2  ;;  %v11048_v34 = vadd.f32 %v5587_v36, %v5386_v15  ;;  %v5582_v27 = vadd.f32 %v5581_v30, %v5580_v9  ;;  %v5257_v14 = vmul.f32 %v11866_v35, %v4333_v18  ;;  %v4345_v42 = vpop.f32.mrb[73].mxu0  ;;  %v11071_v36 = vpop.permute.xlu1 %4962  ;;  %v11869_v30 = vld [vmem:[#allocation31_spill] sm:$0xff] }
 0x36d   : > { %v5391_v28 = vmul.f32 %v11769_v41, %v5259_v19  ;;  %v7085_v16 = vpack.c.bf16 %v5751_v6, %v5750_v46  ;;  %v5568_v52 = vadd.f32 %v5567_v23, %v5566_v56  ;;  %7082 = vmatprep.subr.bf16.mxu1 %v7081_v25  ;;  %v5809_v15 = vsel %vm5795_vm0, %v10982_v17, %v10963_v43  ;;  %v6900_v54 = vpop.f32.mrb[74].mxu0  ;;  %v11870_v19 = vld [vmem:[#allocation84_spill] sm:$0xff] }
 0x36e   : > { %v5575_v22 = vadd.f32 %v5574_v31, %v5573_v4  ;;  %v5583_v47 = vrot.slane %v5582_v27, 2  ;;  %v5389_v49 = vmul.f32 %v11773_v39, %v5257_v14  ;;  %7084 = vmatpush3.bf16.msra.mxu1 %v7081_v25  ;;  %v7089_v29 = vpack.c.bf16 %v5753_v55, %v5752_v13  ;;  %v4348_v2 = vpop.f32.mrb[75].mxu0 }
 0x36f   : > { %7086 = vmatprep.subr.bf16.mxu1 %v7085_v16  ;;  %v5810_v60 = vsel %vm5797_vm1, %v11024_v7, %v5809_v15  ;;  %v4354_v11 = vadd.f32 %v11031_v12, %v6899_v0  ;;  %v4346_v3 = vadd.f32 %v11031_v12, %v4345_v42  ;;  %v4357_v7 = vadd.f32 %v11031_v12, %v6900_v54  ;;  %v11872_v42 = vld [vmem:[#allocation9_spill] sm:$0xff] }
 0x370   : > { %v5576_v40 = vrot.slane %v5575_v22, 1  ;;  %v5584_v53 = vadd.f32 %v5583_v47, %v5582_v27  ;;  %v5596_v26 = vadd.f32 %v5389_v49, %v5388_v61  ;;  %v5811_v48 = vsel %vm5799_vm2, %v5559_v1, %v5810_v60  ;;  %v11871_v60 = vld [vmem:[#allocation109_spill] sm:$0xff] }
 0x371   : > { %v5812_v17 = vsel %vm5801_vm3, %v5568_v52, %v5811_v48  ;;  %v5262_v24 = vmul.f32 %v11867_v5, %v4354_v11  ;;  %v5260_v33 = vmul.f32 %v11868_v62, %v4346_v3  ;;  %v4349_v56 = vadd.f32 %v11031_v12, %v4348_v2 }
 0x372   : > { %v5577_v43 = vadd.f32 %v5576_v40, %v5575_v22  ;;  %v5585_v44 = vrot.slane %v5584_v53, 1  ;;  %v5597_v9 = vadd.f32 %v5596_v26, %v5390_v57  ;;  %7088 = vmatpush3.bf16.msra.mxu1 %v7085_v16  ;;  %v7093_v1 = vpack.c.bf16 %v5755_v59, %v5754_v8  ;;  %v11084_v22 = vpop.permute.xlu0 %4996 }
 0x373   : > { %7090 = vmatprep.subr.bf16.mxu1 %v7089_v29  ;;  %v5394_v57 = vmul.f32 %v5262_v24, %v11766_v51  ;;  %v5263_v61 = vmul.f32 %v11869_v30, %v4357_v7  ;;  %v5392_v37 = vmul.f32 %v5260_v33, %v11767_v32  ;;  %v5261_v18 = vmul.f32 %v11870_v19, %v4349_v56 }
 0x374   : > { %v5813_v4 = vsel %vm5803_vm4, %v5577_v43, %v5812_v17  ;;  %v5586_v46 = vadd.f32 %v5585_v44, %v5584_v53  ;;  %v5598_v6 = vadd.f32 %v5597_v9, %v5391_v28  ;;  %v11873_v9 = vld [vmem:[#allocation82_spill] sm:$0xff]  ;;  %v4325_v24 = vadd.f32 %v11031_v12, %v11003_v21 }
 0x375   : > { %v5395_v31 = vmul.f32 %v11769_v41, %v5263_v61  ;;  %v5393_v27 = vmul.f32 %v11773_v39, %v5261_v18 }
 0x376   : > { %v5599_v23 = vrot.slane %v5598_v6, 4  ;;  %7092 = vmatpush3.bf16.msra.mxu1 %v7089_v29  ;;  %v11079_v25 = vsel %vm5805_vm5, %v5586_v46, %v5813_v4 }
 0x377   : > { %7094 = vmatprep.subr.bf16.mxu1 %v7093_v1  ;;  %v5605_v28 = vadd.f32 %v5393_v27, %v5392_v37 }
 0x378   : > { %v5600_v35 = vadd.f32 %v5599_v23, %v5598_v6  ;;  %v6903_v13 = vpop.f32.mrb[76].mxu0 }
 0x379   : > { %v5606_v16 = vadd.f32 %v5605_v28, %v5394_v57  ;;  %v4370_v47 = vadd.f32 %v11031_v12, %v6903_v13  ;;  %v4361_v49 = vpop.f32.mrb[77].mxu0 }
 0x37a   : > { %v11082_v14 = vpop.permute.xlu1 %5026  ;;  %7096 = vmatpush3.bf16.msra.mxu1 %v7093_v1  ;;  %v5601_v55 = vrot.slane %v5600_v35, 2  ;;  %v4362_v40 = vadd.f32 %v11031_v12, %v4361_v49  ;;  %v6904_v0 = vpop.f32.mrb[78].mxu0 }
 0x37b   : > { %v5607_v52 = vadd.f32 %v5606_v16, %v5395_v31  ;;  %v5266_v53 = vmul.f32 %v11871_v60, %v4370_v47  ;;  %v4373_v26 = vadd.f32 %v11031_v12, %v6904_v0  ;;  %v4364_v11 = vpop.f32.mrb[79].mxu0  ;;  %v11103_v62 = vpop.permute.xlu0 %5030  ;;  %v11874_v16 = vld [vmem:[#allocation110_spill] sm:$0xff] }
 0x37c   : > { %v5264_v8 = vmul.f32 %v11872_v42, %v4362_v40  ;;  %v4365_v59 = vadd.f32 %v11031_v12, %v4364_v11  ;;  %v5602_v48 = vadd.f32 %v5601_v55, %v5600_v35  ;;  %v11875_v40 = vld [vmem:[#allocation75_spill] sm:$0xff]  ;;  %v11876_v42 = vld [vmem:[#allocation25_spill] sm:$0xff] }
 0x37d   : > { %v5608_v29 = vrot.slane %v5607_v52, 4  ;;  %v5398_v54 = vmul.f32 %v5266_v53, %v11766_v51  ;;  %v5267_v43 = vmul.f32 %v10871_v10, %v4373_v26 }
 0x37e   : > { %v11087_v15 = vpop.permute.xlu1 %5095  ;;  %v5396_v44 = vmul.f32 %v5264_v8, %v11767_v32  ;;  %v5265_v5 = vmul.f32 %v11873_v9, %v4365_v59  ;;  %v5603_v56 = vrot.slane %v5602_v48, 1 }
 0x37f   : > { %v5609_v3 = vadd.f32 %v5608_v29, %v5607_v52  ;;  %v5399_v2 = vmul.f32 %v11769_v41, %v5267_v43 }
 0x380   : > { %v5397_v33 = vmul.f32 %v11773_v39, %v5265_v5  ;;  %v5604_v37 = vadd.f32 %v5603_v56, %v5602_v48  ;;  %v11107_v21 = vpop.permute.xlu0 %5129 }
 0x381   : > { %v5610_v7 = vrot.slane %v5609_v3, 2 }
 0x382   : > { %v11096_v17 = vpop.permute.xlu1 %5159  ;;  %v5614_v10 = vadd.f32 %v5397_v33, %v5396_v44 }
 0x383   : > { %v5611_v1 = vadd.f32 %v5610_v7, %v5609_v3 }
 0x384   : > { %v5615_v57 = vadd.f32 %v5614_v10, %v5398_v54  ;;  %v6907_v30 = vpop.f32.mrb[80].mxu0  ;;  %v11122_v3 = vpop.permute.xlu0 %5163  ;;  %v11877_v10 = vld [vmem:[#allocation47_spill] sm:$0xff] }
 0x385   : > { %v5612_v6 = vrot.slane %v5611_v1, 1  ;;  %v4386_v18 = vadd.f32 %v11031_v12, %v6907_v30  ;;  %v4377_v23 = vpop.f32.mrb[81].mxu0 }
 0x386   : > { %v4887_v4 = vpop.permute.xlu1 %4886  ;;  %v5616_v31 = vadd.f32 %v5615_v57, %v5399_v2  ;;  %v4378_v27 = vadd.f32 %v11031_v12, %v4377_v23  ;;  %v6908_v35 = vpop.f32.mrb[82].mxu0 }
 0x387   : > { %v5255_v46 = vmul.f32 %v4887_v4, %v4325_v24  ;;  %v5613_v19 = vadd.f32 %v5612_v6, %v5611_v1  ;;  %v5270_v13 = vmul.f32 %v11874_v16, %v4386_v18  ;;  %v4389_v55 = vadd.f32 %v11031_v12, %v6908_v35  ;;  %v4380_v52 = vpop.f32.mrb[83].mxu0  ;;  %v5960_v16 = vld [vmem:[%s8121_s22 + $0x8] sm:$0xff] }
 0x388   : > { %v5617_v49 = vrot.slane %v5616_v31, 4  ;;  %v5268_v0 = vmul.f32 %v11875_v40, %v4378_v27  ;;  %v4381_v29 = vadd.f32 %v11031_v12, %v4380_v52  ;;  %v11879_v52 = vld [vmem:[#allocation111_spill] sm:$0xff] }
 0x389   : > { %v5387_v61 = vmul.f32 %v11769_v41, %v5255_v46  ;;  %v5816_v47 = vsel %vm5795_vm0, %v5613_v19, %v5604_v37  ;;  %v5402_v53 = vmul.f32 %v5270_v13, %v11766_v51  ;;  %v5271_v26 = vmul.f32 %v11071_v36, %v4389_v55  ;;  %v11878_v37 = vld [vmem:[#allocation97_spill] sm:$0xff] }
 0x38a   : > { %v5618_v11 = vadd.f32 %v5617_v49, %v5616_v31  ;;  %v5269_v8 = vmul.f32 %v11876_v42, %v4381_v29 }
 0x38b   : > { %v5589_v28 = vadd.f32 %v11048_v34, %v5387_v61  ;;  %v5400_v34 = vmul.f32 %v5268_v0, %v11767_v32  ;;  %v5403_v48 = vmul.f32 %v11769_v41, %v5271_v26  ;;  %v4982_v61 = vpop.permute.xlu0 %4981 }
 0x38c   : > { %v5619_v54 = vrot.slane %v5618_v11, 2  ;;  %v5401_v43 = vmul.f32 %v11773_v39, %v5269_v8 }
 0x38d   : > { %v5590_v60 = vrot.slane %v5589_v28, 4 }
 0x38e   : > { %v6911_v9 = vpop.f32.mrb[84].mxu0  ;;  %v5620_v5 = vadd.f32 %v5619_v54, %v5618_v11  ;;  %v5623_v24 = vadd.f32 %v5401_v43, %v5400_v34  ;;  %v5016_v34 = vpop.permute.xlu1 %5015 }
 0x38f   : > { %v5591_v59 = vadd.f32 %v5590_v60, %v5589_v28  ;;  %v4402_v7 = vadd.f32 %v11031_v12, %v6911_v9  ;;  %v4393_v36 = vpop.f32.mrb[85].mxu0  ;;  %v5959_v28 = vld [vmem:[%s8121_s22] sm:$0xff]  ;;  %v5961_v9 = vld [vmem:[%s8121_s22 + $0x10] sm:$0xff] }
 0x390   : > { %v4394_v33 = vadd.f32 %v11031_v12, %v4393_v36  ;;  %v6912_v56 = vpop.f32.mrb[86].mxu0  ;;  %v5621_v1 = vrot.slane %v5620_v5, 1  ;;  %v5624_v4 = vadd.f32 %v5623_v24, %v5402_v53  ;;  %v7097_v40 = vpack.c.bf16 %v5960_v16, %v5959_v28  ;;  %v5963_v24 = vld [vmem:[%s8121_s22 + $0x20] sm:$0xff] }
 0x391   : > { %v5592_v44 = vrot.slane %v5591_v59, 2  ;;  %v5274_v46 = vmul.f32 %v11877_v10, %v4402_v7  ;;  %v4405_v6 = vadd.f32 %v11031_v12, %v6912_v56  ;;  %v4396_v57 = vpop.f32.mrb[87].mxu0 }
 0x392   : > { %v5272_v19 = vmul.f32 %v11878_v37, %v4394_v33  ;;  %v4397_v18 = vadd.f32 %v11031_v12, %v4396_v57  ;;  %v5622_v23 = vadd.f32 %v5621_v1, %v5620_v5  ;;  %v5625_v31 = vadd.f32 %v5624_v4, %v5403_v48  ;;  %7098 = vmatprep.subr.bf16.mxu0 %v7097_v40  ;;  %v5962_v5 = vld [vmem:[%s8121_s22 + $0x18] sm:$0xff]  ;;  %v11147_v36 = vpop.permute.xlu1 %5148  ;;  %v5964_v1 = vld [vmem:[%s8121_s22 + $0x28] sm:$0xff] }
 0x393   : > { %v5593_v2 = vadd.f32 %v5592_v44, %v5591_v59  ;;  %v5406_v27 = vmul.f32 %v5274_v46, %v11766_v51  ;;  %v5275_v35 = vmul.f32 %v4982_v61, %v4405_v6  ;;  %7129 = vmatprep.subr.bf16.mxu1 %v7097_v40  ;;  %7100 = vmatpush3.bf16.msra.mxu0 %v7097_v40  ;;  %v11880_v57 = vld [vmem:[#allocation79_spill] sm:$0xff] }
 0x394   : > { %v5404_v55 = vmul.f32 %v5272_v19, %v11767_v32  ;;  %v5273_v49 = vmul.f32 %v11879_v52, %v4397_v18  ;;  %v5626_v0 = vrot.slane %v5625_v31, 4  ;;  %v5817_v60 = vsel %vm5797_vm1, %v5622_v23, %v5816_v47 }
 0x395   : > { %v5594_v30 = vrot.slane %v5593_v2, 1  ;;  %v5407_v29 = vmul.f32 %v11769_v41, %v5275_v35  ;;  %v7101_v56 = vpack.c.bf16 %v5962_v5, %v5961_v9  ;;  %v7105_v6 = vpack.c.bf16 %v5964_v1, %v5963_v24 }
 0x396   : > { %v5405_v26 = vmul.f32 %v11773_v39, %v5273_v49  ;;  %v5627_v11 = vadd.f32 %v5626_v0, %v5625_v31  ;;  %v11881_v31 = vld [vmem:[#allocation112_spill] sm:$0xff] }
 0x397   : > { %v5595_v13 = vadd.f32 %v5594_v30, %v5593_v2  ;;  %7102 = vmatprep.subr.bf16.mxu0 %v7101_v56 }
 0x398   : > { %v5632_v42 = vadd.f32 %v5405_v26, %v5404_v55  ;;  %v5628_v8 = vrot.slane %v5627_v11, 2  ;;  %7104 = vmatpush3.bf16.msra.mxu0 %v7101_v56 }
 0x399   : > { %v5815_v53 = vsel %vm5807_vm6, %v5595_v13, %v11079_v25  ;;  %v11141_v25 = vpop.permute.xlu0 %5114  ;;  %7106 = vmatprep.subr.bf16.mxu0 %v7105_v6 }
 0x39a   : > { %6990 = vmatmul.mubr.f32.vlgmr.msra.gmra.mrb[128].mxu1 %v5815_v53  ;;  %v5633_v59 = vadd.f32 %v5632_v42, %v5406_v27  ;;  %v5629_v47 = vadd.f32 %v5628_v8, %v5627_v11 }
 0x39b   : > { %7137 = vmatpush3.bf16.msra.mxu1 %v7097_v40  ;;  %v6915_v48 = vpop.f32.mrb[88].mxu0 }
 0x39c   : > { %v5634_v54 = vadd.f32 %v5633_v59, %v5407_v29  ;;  %v4418_v43 = vadd.f32 %v11031_v12, %v6915_v48  ;;  %v4409_v44 = vpop.f32.mrb[89].mxu0  ;;  %v5630_v7 = vrot.slane %v5629_v47, 1  ;;  %7130 = vmatprep.subr.bf16.mxu1 %v7101_v56  ;;  %7108 = vmatpush3.bf16.msra.mxu0 %v7105_v6 }
 0x39d   : > { %v4410_v2 = vadd.f32 %v11031_v12, %v4409_v44  ;;  %v6916_v33 = vpop.f32.mrb[90].mxu0 }
 0x39e   : > { %v5635_v4 = vrot.slane %v5634_v54, 4  ;;  %v5278_v10 = vmul.f32 %v11084_v22, %v4418_v43  ;;  %v4412_v46 = vpop.f32.mrb[91].mxu0  ;;  %v5631_v37 = vadd.f32 %v5630_v7, %v5629_v47  ;;  %v4421_v52 = vadd.f32 %v11031_v12, %v6916_v33 }
 0x39f   : > { %v5276_v30 = vmul.f32 %v11880_v57, %v4410_v2  ;;  %v4413_v61 = vadd.f32 %v11031_v12, %v4412_v46  ;;  %7138 = vmatpush3.bf16.msra.mxu1 %v7101_v56 }
 0x3a0   : > { %v5636_v19 = vadd.f32 %v5635_v4, %v5634_v54  ;;  %v5410_v18 = vmul.f32 %v5278_v10, %v11766_v51  ;;  %v5818_v22 = vsel %vm5799_vm2, %v5631_v37, %v5817_v60  ;;  %7131 = vmatprep.subr.bf16.mxu1 %v7105_v6  ;;  %v11882_v10 = vld [vmem:[#allocation56_spill] sm:$0xff] }
 0x3a1   : > { %v5408_v23 = vmul.f32 %v5276_v30, %v11767_v32  ;;  %v5277_v27 = vmul.f32 %v11881_v31, %v4413_v61 }
 0x3a2   : > { %v5637_v35 = vrot.slane %v5636_v19, 2 }
 0x3a3   : > { %v5409_v16 = vmul.f32 %v11773_v39, %v5277_v27  ;;  %7139 = vmatpush3.bf16.msra.mxu1 %v7105_v6 }
 0x3a4   : > { %v5638_v55 = vadd.f32 %v5637_v35, %v5636_v19 }
 0x3a5   : > { %v5641_v49 = vadd.f32 %v5409_v16, %v5408_v23 }
 0x3a6   : > { %v5639_v40 = vrot.slane %v5638_v55, 1 }
 0x3a7   : > { %v5642_v29 = vadd.f32 %v5641_v49, %v5410_v18  ;;  %v6919_v26 = vpop.f32.mrb[92].mxu0 }
 0x3a8   : > { %v11158_v28 = vpop.permute.xlu0 %5178  ;;  %v11161_v13 = vpop.permute.xlu1 %5182  ;;  %v5640_v11 = vadd.f32 %v5639_v40, %v5638_v55  ;;  %v4434_v42 = vadd.f32 %v11031_v12, %v6919_v26 }
 0x3a9   : > { %v4425_v8 = vpop.f32.mrb[93].mxu0 }
 0x3aa   : > { %v4426_v47 = vadd.f32 %v11031_v12, %v4425_v8  ;;  %v6920_v48 = vpop.f32.mrb[94].mxu0  ;;  %v5819_v54 = vsel %vm5801_vm3, %v5640_v11, %v5818_v22  ;;  %v5282_v44 = vmul.f32 %v5016_v34, %v4434_v42 }
 0x3ab   : > { %v4428_v9 = vpop.f32.mrb[95].mxu0  ;;  %v4437_v7 = vadd.f32 %v11031_v12, %v6920_v48 }
 0x3ac   : > { %v5001_v0 = vpop.permute.xlu0 %5000  ;;  %v5035_v53 = vpop.permute.xlu1 %5034  ;;  %v5280_v24 = vmul.f32 %v10904_v20, %v4426_v47  ;;  %v4429_v2 = vadd.f32 %v11031_v12, %v4428_v9  ;;  %v5414_v56 = vmul.f32 %v5282_v44, %v11766_v51 }
 0x3ad   : > { %v5279_v60 = vmul.f32 %v5001_v0, %v4421_v52 }
 0x3ae   : > { %v5412_v4 = vmul.f32 %v5280_v24, %v11767_v32  ;;  %v5281_v46 = vmul.f32 %v11882_v10, %v4429_v2 }
 0x3af   : > { %v5411_v59 = vmul.f32 %v11769_v41, %v5279_v60 }
 0x3b0   : > { %v11168_v43 = vpop.permute.xlu0 %5133  ;;  %v11173_v33 = vpop.permute.xlu1 %5167  ;;  %v5413_v34 = vmul.f32 %v11773_v39, %v5281_v46 }
 0x3b1   : > { %v5643_v5 = vadd.f32 %v5642_v29, %v5411_v59 }
 0x3b2   : > { %v5650_v37 = vadd.f32 %v5413_v34, %v5412_v4 }
 0x3b3   : > { %v5644_v1 = vrot.slane %v5643_v5, 4 }
 0x3b4   : > { %v5020_v6 = vpop.permute.xlu0 %5019  ;;  %v11179_v61 = vpop.permute.xlu1 %5152  ;;  %v5651_v23 = vadd.f32 %v5650_v37, %v5414_v56 }
 0x3b5   : > { %v5645_v57 = vadd.f32 %v5644_v1, %v5643_v5  ;;  %v5283_v30 = vmul.f32 %v5020_v6, %v4437_v7  ;;  %v6923_v31 = vpop.f32.mrb[96].mxu0 }
 0x3b6   : > { %v4450_v27 = vadd.f32 %v11031_v12, %v6923_v31  ;;  %v4441_v22 = vpop.f32.mrb[97].mxu0 }
 0x3b7   : > { %v5646_v20 = vrot.slane %v5645_v57, 2  ;;  %v5415_v19 = vmul.f32 %v11769_v41, %v5283_v30  ;;  %v4442_v55 = vadd.f32 %v11031_v12, %v4441_v22  ;;  %v6924_v52 = vpop.f32.mrb[98].mxu0 }
 0x3b8   : > { %v5039_v49 = vpop.permute.xlu1 %5038  ;;  %v5286_v40 = vmul.f32 %v5035_v53, %v4450_v27  ;;  %v4453_v0 = vadd.f32 %v11031_v12, %v6924_v52  ;;  %v4444_v29 = vpop.f32.mrb[99].mxu0 }
 0x3b9   : > { %v5647_v18 = vadd.f32 %v5646_v20, %v5645_v57  ;;  %v5652_v16 = vadd.f32 %v5651_v23, %v5415_v19  ;;  %v5284_v11 = vmul.f32 %v11082_v14, %v4442_v55  ;;  %v4445_v42 = vadd.f32 %v11031_v12, %v4444_v29  ;;  %v11883_v57 = vld [vmem:[#allocation99_spill] sm:$0xff]  ;;  %v11884_v20 = vld [vmem:[#allocation29_spill] sm:$0xff] }
 0x3ba   : > { %v5418_v8 = vmul.f32 %v5286_v40, %v11766_v51  ;;  %v5287_v59 = vmul.f32 %v5039_v49, %v4453_v0 }
 0x3bb   : > { %v5648_v35 = vrot.slane %v5647_v18, 1  ;;  %v5653_v26 = vrot.slane %v5652_v16, 4  ;;  %v5416_v48 = vmul.f32 %v5284_v11, %v11767_v32  ;;  %v5285_v44 = vmul.f32 %v11103_v62, %v4445_v42 }
 0x3bc   : > { %v5419_v53 = vmul.f32 %v11769_v41, %v5287_v59 }
 0x3bd   : > { %v5649_v60 = vadd.f32 %v5648_v35, %v5647_v18  ;;  %v5654_v47 = vadd.f32 %v5653_v26, %v5652_v16  ;;  %v5417_v24 = vmul.f32 %v11773_v39, %v5285_v44  ;;  %v11885_v35 = vld [vmem:[#allocation6_spill] sm:$0xff] }
 0x3be   : > { %v6927_v14 = vpop.f32.mrb[100].mxu0 }
 0x3bf   : > { %v5820_v9 = vsel %vm5803_vm4, %v5649_v60, %v5819_v54  ;;  %v5655_v5 = vrot.slane %v5654_v47, 2  ;;  %v5659_v2 = vadd.f32 %v5417_v24, %v5416_v48  ;;  %v4466_v56 = vadd.f32 %v11031_v12, %v6927_v14  ;;  %v4457_v1 = vpop.f32.mrb[101].mxu0 }
 0x3c0   : > { %v4458_v10 = vadd.f32 %v11031_v12, %v4457_v1  ;;  %v6928_v46 = vpop.f32.mrb[102].mxu0 }
 0x3c1   : > { %v5656_v7 = vadd.f32 %v5655_v5, %v5654_v47  ;;  %v5660_v4 = vadd.f32 %v5659_v2, %v5418_v8  ;;  %v5290_v62 = vmul.f32 %v11883_v57, %v4466_v56  ;;  %v4469_v54 = vadd.f32 %v11031_v12, %v6928_v46  ;;  %v4460_v34 = vpop.f32.mrb[103].mxu0  ;;  %v11887_v2 = vld [vmem:[#allocation64_spill] sm:$0xff]  ;;  %v11889_v57 = vld [vmem:[#allocation51_spill] sm:$0xff] }
 0x3c2   : > { %v5288_v37 = vmul.f32 %v11884_v20, %v4458_v10  ;;  %v4461_v19 = vadd.f32 %v11031_v12, %v4460_v34  ;;  %v11888_v10 = vld [vmem:[#allocation22_spill] sm:$0xff] }
 0x3c3   : > { %v5657_v6 = vrot.slane %v5656_v7, 1  ;;  %v5661_v30 = vadd.f32 %v5660_v4, %v5419_v53  ;;  %v5422_v23 = vmul.f32 %v5290_v62, %v11766_v51  ;;  %v5291_v31 = vmul.f32 %v10931_v50, %v4469_v54 }
 0x3c4   : > { %v5420_v22 = vmul.f32 %v5288_v37, %v11767_v32  ;;  %v5289_v16 = vmul.f32 %v11885_v35, %v4461_v19 }
 0x3c5   : > { %v5658_v18 = vadd.f32 %v5657_v6, %v5656_v7  ;;  %v5662_v27 = vrot.slane %v5661_v30, 4  ;;  %v5423_v52 = vmul.f32 %v11769_v41, %v5291_v31 }
 0x3c6   : > { %v5421_v40 = vmul.f32 %v11773_v39, %v5289_v16 }
 0x3c7   : > { %v5821_v55 = vsel %vm5805_vm5, %v5658_v18, %v5820_v9  ;;  %v5663_v49 = vadd.f32 %v5662_v27, %v5661_v30  ;;  %v11886_v9 = vld [vmem:[#allocation10_spill] sm:$0xff]  ;;  %v11890_v27 = vld [vmem:[#allocation63_spill] sm:$0xff] }
 0x3c8   : > { %v5668_v29 = vadd.f32 %v5421_v40, %v5420_v22 }
 0x3c9   : > { %v5664_v0 = vrot.slane %v5663_v49, 2 }
 0x3ca   : > { %v5669_v60 = vadd.f32 %v5668_v29, %v5422_v23 }
 0x3cb   : > { %v5665_v26 = vadd.f32 %v5664_v0, %v5663_v49 }
 0x3cc   : > { %v5670_v11 = vadd.f32 %v5669_v60, %v5423_v52  ;;  %v11891_v52 = vld [vmem:[#allocation44_spill] sm:$0xff] }
 0x3cd   : > { %v5666_v42 = vrot.slane %v5665_v26, 1 }
 0x3ce   : > { %v5671_v1 = vrot.slane %v5670_v11, 4 }
 0x3cf   : > { %v6931_v8 = vpop.f32.mrb[104].mxu0  ;;  %v5667_v47 = vadd.f32 %v5666_v42, %v5665_v26  ;;  %v11892_v42 = vld [vmem:[#allocation68_spill] sm:$0xff] }
 0x3d0   : > { %v4482_v50 = vadd.f32 %v11031_v12, %v6931_v8  ;;  %v4473_v59 = vpop.f32.mrb[105].mxu0  ;;  %v5672_v20 = vadd.f32 %v5671_v1, %v5670_v11 }
 0x3d1   : > { %v4474_v48 = vadd.f32 %v11031_v12, %v4473_v59  ;;  %v6932_v44 = vpop.f32.mrb[106].mxu0  ;;  %v5822_v7 = vsel %vm5807_vm6, %v5667_v47, %v5821_v55 }
 0x3d2   : > { %v5294_v53 = vmul.f32 %v11886_v9, %v4482_v50  ;;  %v4485_v5 = vadd.f32 %v11031_v12, %v6932_v44  ;;  %v4476_v24 = vpop.f32.mrb[107].mxu0  ;;  %6992 = vmatprep.mubr.f32.mxu1 %v5822_v7  ;;  %v5673_v0 = vrot.slane %v5672_v20, 2 }
 0x3d3   : > { %v5292_v14 = vmul.f32 %v11887_v2, %v4474_v48  ;;  %v4477_v56 = vadd.f32 %v11031_v12, %v4476_v24 }
 0x3d4   : > { %v5426_v4 = vmul.f32 %v5294_v53, %v11766_v51  ;;  %v5295_v46 = vmul.f32 %v11888_v10, %v4485_v5  ;;  %v5674_v48 = vadd.f32 %v5673_v0, %v5672_v20 }
 0x3d5   : > { %v5424_v6 = vmul.f32 %v5292_v14, %v11767_v32  ;;  %v5293_v62 = vmul.f32 %v11889_v57, %v4477_v56  ;;  %v11893_v57 = vld [vmem:[#allocation100_spill] sm:$0xff] }
 0x3d6   : > { %v5427_v54 = vmul.f32 %v11769_v41, %v5295_v46  ;;  %v5675_v56 = vrot.slane %v5674_v48, 1 }
 0x3d7   : > { %v5425_v34 = vmul.f32 %v11773_v39, %v5293_v62  ;;  %v6935_v30 = vpop.f32.mrb[108].mxu0 }
 0x3d8   : > { %v4498_v37 = vadd.f32 %v11031_v12, %v6935_v30  ;;  %v4489_v19 = vpop.f32.mrb[109].mxu0 }
 0x3d9   : > { %v5677_v18 = vadd.f32 %v5425_v34, %v5424_v6  ;;  %v4490_v23 = vadd.f32 %v11031_v12, %v4489_v19  ;;  %v6936_v31 = vpop.f32.mrb[110].mxu0 }
 0x3da   : > { %v5298_v22 = vmul.f32 %v11890_v27, %v4498_v37  ;;  %v4501_v35 = vadd.f32 %v11031_v12, %v6936_v31  ;;  %v4492_v16 = vpop.f32.mrb[111].mxu0  ;;  %v5676_v31 = vadd.f32 %v5675_v56, %v5674_v48 }
 0x3db   : > { %v5678_v55 = vadd.f32 %v5677_v18, %v5426_v4  ;;  %v5296_v49 = vmul.f32 %v11891_v52, %v4490_v23  ;;  %v4493_v40 = vadd.f32 %v11031_v12, %v4492_v16  ;;  %v11894_v18 = vld [vmem:[#allocation54_spill] sm:$0xff] }
 0x3dc   : > { %v5430_v29 = vmul.f32 %v5298_v22, %v11766_v51  ;;  %v5299_v60 = vmul.f32 %v11087_v15, %v4501_v35 }
 0x3dd   : > { %v5679_v26 = vadd.f32 %v5678_v55, %v5427_v54  ;;  %v5428_v11 = vmul.f32 %v5296_v49, %v11767_v32  ;;  %v5297_v8 = vmul.f32 %v11892_v42, %v4493_v40 }
 0x3de   : > { %v5431_v50 = vmul.f32 %v11769_v41, %v5299_v60 }
 0x3df   : > { %v5680_v59 = vrot.slane %v5679_v26, 4  ;;  %v5429_v47 = vmul.f32 %v11773_v39, %v5297_v8 }
 0x3e1   : > { %v5681_v44 = vadd.f32 %v5680_v59, %v5679_v26  ;;  %v5686_v9 = vadd.f32 %v5429_v47, %v5428_v11 }
 0x3e2   : > { %v6939_v53 = vpop.f32.mrb[112].mxu0 }
 0x3e3   : > { %v4514_v5 = vadd.f32 %v11031_v12, %v6939_v53  ;;  %v4505_v24 = vpop.f32.mrb[113].mxu0  ;;  %v5682_v7 = vrot.slane %v5681_v44, 2  ;;  %v5687_v2 = vadd.f32 %v5686_v9, %v5430_v29 }
 0x3e4   : > { %v4506_v15 = vadd.f32 %v11031_v12, %v4505_v24  ;;  %v6940_v14 = vpop.f32.mrb[114].mxu0 }
 0x3e5   : > { %v5302_v1 = vmul.f32 %v10944_v45, %v4514_v5  ;;  %v4517_v4 = vadd.f32 %v11031_v12, %v6940_v14  ;;  %v4508_v10 = vpop.f32.mrb[115].mxu0  ;;  %v5683_v46 = vadd.f32 %v5682_v7, %v5681_v44  ;;  %v5688_v6 = vadd.f32 %v5687_v2, %v5431_v50  ;;  %v11895_v50 = vld [vmem:[#allocation53_spill] sm:$0xff] }
 0x3e6   : > { %v5300_v62 = vmul.f32 %v11893_v57, %v4506_v15  ;;  %v4509_v54 = vadd.f32 %v11031_v12, %v4508_v10 }
 0x3e7   : > { %v5434_v34 = vmul.f32 %v5302_v1, %v11766_v51  ;;  %v5303_v30 = vmul.f32 %v11141_v25, %v4517_v4  ;;  %v5684_v20 = vrot.slane %v5683_v46, 1  ;;  %v5689_v37 = vrot.slane %v5688_v6, 4 }
 0x3e8   : > { %v5432_v19 = vmul.f32 %v5300_v62, %v11767_v32  ;;  %v5301_v23 = vmul.f32 %v11894_v18, %v4509_v54 }
 0x3e9   : > { %v5435_v45 = vmul.f32 %v11769_v41, %v5303_v30  ;;  %v5685_v27 = vadd.f32 %v5684_v20, %v5683_v46  ;;  %v5690_v22 = vadd.f32 %v5689_v37, %v5688_v6  ;;  %v5187_v37 = vpop.permute.xlu0 %5186 }
 0x3ea   : > { %v5433_v35 = vmul.f32 %v11773_v39, %v5301_v23 }
 0x3eb   : > { %v6943_v16 = vpop.f32.mrb[116].mxu0  ;;  %v5691_v49 = vrot.slane %v5690_v22, 2  ;;  %v5823_v29 = vsel %vm5795_vm0, %v5685_v27, %v5676_v31 }
 0x3ec   : > { %v4530_v55 = vadd.f32 %v11031_v12, %v6943_v16  ;;  %v4521_v52 = vpop.f32.mrb[117].mxu0  ;;  %v5695_v40 = vadd.f32 %v5433_v35, %v5432_v19 }
 0x3ed   : > { %v4522_v25 = vadd.f32 %v11031_v12, %v4521_v52  ;;  %v6944_v0 = vpop.f32.mrb[118].mxu0  ;;  %v5692_v42 = vadd.f32 %v5691_v49, %v5690_v22 }
 0x3ee   : > { %v5306_v60 = vmul.f32 %v11107_v21, %v4530_v55  ;;  %v4533_v26 = vadd.f32 %v11031_v12, %v6944_v0  ;;  %v4524_v11 = vpop.f32.mrb[119].mxu0  ;;  %v5696_v8 = vadd.f32 %v5695_v40, %v5434_v34  ;;  %v5172_v0 = vpop.permute.xlu0 %5171 }
 0x3ef   : > { %v5304_v59 = vmul.f32 %v11895_v50, %v4522_v25  ;;  %v4525_v47 = vadd.f32 %v11031_v12, %v4524_v11  ;;  %v5693_v9 = vrot.slane %v5692_v42, 1 }
 0x3f0   : > { %v5438_v48 = vmul.f32 %v5306_v60, %v11766_v51  ;;  %v5307_v44 = vmul.f32 %v11168_v43, %v4533_v26  ;;  %v5697_v53 = vadd.f32 %v5696_v8, %v5435_v45 }
 0x3f1   : > { %v5436_v5 = vmul.f32 %v5304_v59, %v11767_v32  ;;  %v5305_v24 = vmul.f32 %v10802_v58, %v4525_v47  ;;  %v5694_v7 = vadd.f32 %v5693_v9, %v5692_v42 }
 0x3f2   : > { %v5439_v21 = vmul.f32 %v11769_v41, %v5307_v44  ;;  %v5698_v2 = vrot.slane %v5697_v53, 4 }
 0x3f3   : > { %v5437_v15 = vmul.f32 %v11773_v39, %v5305_v24  ;;  %v6947_v14 = vpop.f32.mrb[120].mxu0  ;;  %v5824_v6 = vsel %vm5797_vm1, %v5694_v7, %v5823_v29 }
 0x3f4   : > { %v4546_v56 = vadd.f32 %v11031_v12, %v6947_v14  ;;  %v4537_v1 = vpop.f32.mrb[121].mxu0  ;;  %v5699_v4 = vadd.f32 %v5698_v2, %v5697_v53 }
 0x3f5   : > { %v5704_v10 = vadd.f32 %v5437_v15, %v5436_v5  ;;  %v4538_v43 = vadd.f32 %v11031_v12, %v4537_v1  ;;  %v6948_v46 = vpop.f32.mrb[122].mxu0 }
 0x3f6   : > { %v5310_v57 = vmul.f32 %v11147_v36, %v4546_v56  ;;  %v4549_v58 = vadd.f32 %v11031_v12, %v6948_v46  ;;  %v4540_v62 = vpop.f32.mrb[123].mxu0  ;;  %v5700_v54 = vrot.slane %v5699_v4, 2 }
 0x3f7   : > { %v5705_v34 = vadd.f32 %v5704_v10, %v5438_v48  ;;  %v5308_v30 = vmul.f32 %v10785_v38, %v4538_v43  ;;  %v4541_v20 = vadd.f32 %v11031_v12, %v4540_v62  ;;  %v5191_v10 = vpop.permute.xlu1 %5190 }
 0x3f8   : > { %v5442_v19 = vmul.f32 %v5310_v57, %v11766_v51  ;;  %v5311_v18 = vmul.f32 %v11179_v61, %v4549_v58  ;;  %v5701_v23 = vadd.f32 %v5700_v54, %v5699_v4 }
 0x3f9   : > { %v5706_v45 = vadd.f32 %v5705_v34, %v5439_v21  ;;  %v5440_v31 = vmul.f32 %v5308_v30, %v11767_v32  ;;  %v5309_v36 = vmul.f32 %v10973_v63, %v4541_v20 }
 0x3fa   : > { %v5443_v27 = vmul.f32 %v11769_v41, %v5311_v18  ;;  %v5702_v22 = vrot.slane %v5701_v23, 1 }
 0x3fb   : > { %v5707_v35 = vrot.slane %v5706_v45, 4  ;;  %v5441_v16 = vmul.f32 %v11773_v39, %v5309_v36 }
 0x3fc   : > { %v6951_v38 = vpop.f32.mrb[124].mxu0  ;;  %v5703_v29 = vadd.f32 %v5702_v22, %v5701_v23 }
 0x3fd   : > { %v4562_v55 = vadd.f32 %v11031_v12, %v6951_v38  ;;  %v4553_v52 = vpop.f32.mrb[125].mxu0  ;;  %v5708_v49 = vadd.f32 %v5707_v35, %v5706_v45  ;;  %v5713_v40 = vadd.f32 %v5441_v16, %v5440_v31 }
 0x3fe   : > { %v4554_v61 = vadd.f32 %v11031_v12, %v4553_v52  ;;  %v6952_v25 = vpop.f32.mrb[126].mxu0  ;;  %v5825_v48 = vsel %vm5799_vm2, %v5703_v29, %v5824_v6  ;;  %v5966_v52 = vld [vmem:[%s8121_s22 + $0x38] sm:$0xff]  ;;  %v5969_v29 = vld [vmem:[%s8121_s22 + $0x50] sm:$0xff] }
 0x3ff   : > { %v5314_v60 = vmul.f32 %v11173_v33, %v4562_v55  ;;  %v4565_v63 = vadd.f32 %v11031_v12, %v6952_v25  ;;  %v4556_v26 = vpop.f32.mrb[127].mxu0  ;;  %v5709_v11 = vrot.slane %v5708_v49, 2  ;;  %v5714_v42 = vadd.f32 %v5713_v40, %v5442_v19 }
 0x400   : > { %v5312_v8 = vmul.f32 %v11096_v17, %v4554_v61  ;;  %v4557_v50 = vadd.f32 %v11031_v12, %v4556_v26 }
 0x401   : > { %v5446_v59 = vmul.f32 %v5314_v60, %v11766_v51  ;;  %v5315_v47 = vmul.f32 %v5172_v0, %v4565_v63  ;;  %v5710_v44 = vadd.f32 %v5709_v11, %v5708_v49  ;;  %v5715_v9 = vadd.f32 %v5714_v42, %v5443_v27  ;;  %v5967_v49 = vld [vmem:[%s8121_s22 + $0x40] sm:$0xff]  ;;  %v5970_v60 = vld [vmem:[%s8121_s22 + $0x58] sm:$0xff] }
 0x402   : > { %v5444_v53 = vmul.f32 %v5312_v8, %v11767_v32  ;;  %v5313_v33 = vmul.f32 %v11122_v3, %v4557_v50  ;;  %v7117_v11 = vpack.c.bf16 %v5970_v60, %v5969_v29  ;;  %v5971_v8 = vld [vmem:[%s8121_s22 + $0x60] sm:$0xff]  ;;  %v5972_v50 = vld [vmem:[%s8121_s22 + $0x68] sm:$0xff] }
 0x403   : > { %v5447_v5 = vmul.f32 %v11769_v41, %v5315_v47  ;;  %v5716_v24 = vrot.slane %v5715_v9, 4  ;;  %v5711_v17 = vrot.slane %v5710_v44, 1  ;;  %v7121_v47 = vpack.c.bf16 %v5972_v50, %v5971_v8  ;;  %v6416_v29 = vld [vmem:[%s627_s26] ss:$0 sm:$0xff] }
 0x404   : > { %v5445_v21 = vmul.f32 %v11773_v39, %v5313_v33  ;;  %v6955_v7 = vpop.f32.mrb[128].mxu0 }
 0x405   : > { %v4578_v2 = vadd.f32 %v11031_v12, %v6955_v7  ;;  %v4569_v15 = vpop.f32.mrb[129].mxu0  ;;  %v5717_v14 = vadd.f32 %v5716_v24, %v5715_v9  ;;  %v5712_v43 = vadd.f32 %v5711_v17, %v5710_v44  ;;  %v5973_v44 = vld [vmem:[%s8121_s22 + $0x70] sm:$0xff]  ;;  %v5974_v9 = vld [vmem:[%s8121_s22 + $0x78] sm:$0xff] }
 0x406   : > { %v5722_v56 = vadd.f32 %v5445_v21, %v5444_v53  ;;  %v4570_v1 = vadd.f32 %v11031_v12, %v4569_v15  ;;  %v6956_v4 = vpop.f32.mrb[130].mxu0  ;;  %v7125_v33 = vpack.c.bf16 %v5974_v9, %v5973_v44 }
 0x407   : > { %v5318_v46 = vmul.f32 %v5187_v37, %v4578_v2  ;;  %v4581_v3 = vadd.f32 %v11031_v12, %v6956_v4  ;;  %v4572_v6 = vpop.f32.mrb[131].mxu0  ;;  %v5718_v57 = vrot.slane %v5717_v14, 2  ;;  %v5826_v20 = vsel %vm5801_vm3, %v5712_v43, %v5825_v48 }
 0x408   : > { %v5723_v58 = vadd.f32 %v5722_v56, %v5446_v59  ;;  %v5316_v62 = vmul.f32 %v11158_v28, %v4570_v1  ;;  %v4573_v54 = vadd.f32 %v11031_v12, %v4572_v6 }
 0x409   : > { %v5450_v34 = vmul.f32 %v5318_v46, %v11766_v51  ;;  %v5319_v30 = vmul.f32 %v5191_v10, %v4581_v3  ;;  %v5719_v37 = vadd.f32 %v5718_v57, %v5717_v14 }
 0x40a   : > { %v5724_v19 = vadd.f32 %v5723_v58, %v5447_v5  ;;  %v5448_v18 = vmul.f32 %v5316_v62, %v11767_v32  ;;  %v5317_v23 = vmul.f32 %v11161_v13, %v4573_v54  ;;  %v6411_v5 = vld [vmem:[%s619_s19] ss:$0 sm:$0xff] }
 0x40b   : > { %v5451_v45 = vmul.f32 %v11769_v41, %v5319_v30  ;;  %v5720_v12 = vrot.slane %v5719_v37, 1  ;;  %v5965_v41 = vld [vmem:[%s8121_s22 + $0x30] sm:$0xff] }
 0x40c   : > { %v5725_v31 = vrot.slane %v5724_v19, 4  ;;  %v5449_v28 = vmul.f32 %v11773_v39, %v5317_v23  ;;  %v7109_v40 = vpack.c.bf16 %v5966_v52, %v5965_v41  ;;  %v5968_v39 = vld [vmem:[%s8121_s22 + $0x48] sm:$0xff] }
 0x40d   : > { %v5721_v27 = vadd.f32 %v5720_v12, %v5719_v37  ;;  %v7113_v0 = vpack.c.bf16 %v5968_v39, %v5967_v49 }
 0x40e   : > { %v5726_v51 = vadd.f32 %v5725_v31, %v5724_v19  ;;  %v5731_v36 = vadd.f32 %v5449_v28, %v5448_v18  ;;  %7110 = vmatprep.subr.bf16.mxu0 %v7109_v40  ;;  %7132 = vmatprep.subr.bf16.mxu1 %v7109_v40 }
 0x40f   : > { %v5827_v13 = vsel %vm5803_vm4, %v5721_v27, %v5826_v20  ;;  %7112 = vmatpush3.bf16.msra.mxu0 %v7109_v40  ;;  %7140 = vmatpush3.bf16.msra.mxu1 %v7109_v40 }
 0x410   : > { %v5727_v22 = vrot.slane %v5726_v51, 2  ;;  %v5732_v32 = vadd.f32 %v5731_v36, %v5450_v34  ;;  %7114 = vmatprep.subr.bf16.mxu0 %v7113_v0  ;;  %7133 = vmatprep.subr.bf16.mxu1 %v7113_v0 }
 0x412   : > { %v5728_v35 = vadd.f32 %v5727_v22, %v5726_v51  ;;  %v5733_v16 = vadd.f32 %v5732_v32, %v5451_v45 }
 0x413   : > { %7116 = vmatpush3.bf16.msra.mxu0 %v7113_v0  ;;  %7141 = vmatpush3.bf16.msra.mxu1 %v7113_v0 }
 0x414   : > { %v5734_v38 = vrot.slane %v5733_v16, 4  ;;  %v5729_v55 = vrot.slane %v5728_v35, 1  ;;  %7118 = vmatprep.subr.bf16.mxu0 %v7117_v11  ;;  %7134 = vmatprep.subr.bf16.mxu1 %v7117_v11 }
 0x416   : > { %v5735_v61 = vadd.f32 %v5734_v38, %v5733_v16  ;;  %v5730_v25 = vadd.f32 %v5729_v55, %v5728_v35 }
 0x417   : > { %7120 = vmatpush3.bf16.msra.mxu0 %v7117_v11  ;;  %7142 = vmatpush3.bf16.msra.mxu1 %v7117_v11 }
 0x418   : > { %v5736_v63 = vrot.slane %v5735_v61, 2  ;;  %v5828_v26 = vsel %vm5805_vm5, %v5730_v25, %v5827_v13  ;;  %7122 = vmatprep.subr.bf16.mxu0 %v7121_v47  ;;  %7135 = vmatprep.subr.bf16.mxu1 %v7121_v47 }
 0x41a   : > { %v5737_v42 = vadd.f32 %v5736_v63, %v5735_v61  ;;  %v6070_v63 = vld [vmem:[#allocation2 + $0x8] sm:$0xff] }
 0x41b   : > { %7124 = vmatpush3.bf16.msra.mxu0 %v7121_v47  ;;  %7143 = vmatpush3.bf16.msra.mxu1 %v7121_v47 }
 0x41c   : > { %v5738_v59 = vrot.slane %v5737_v42, 1  ;;  %7126 = vmatprep.subr.bf16.mxu0 %v7125_v33  ;;  %7136 = vmatprep.subr.bf16.mxu1 %v7125_v33 }
 0x41e   : > { %v5739_v48 = vadd.f32 %v5738_v59, %v5737_v42  ;;  %v6069_v42 = vld [vmem:[#allocation2] sm:$0xff] }
 0x41f   : > { %7128 = vmatpush3.bf16.msra.mxu0 %v7125_v33  ;;  %7144 = vmatpush3.bf16.msra.mxu1 %v7125_v33 }
 0x420   : > { %v5829_v53 = vsel %vm5807_vm6, %v5739_v48, %v5828_v26  ;;  %v6072_v48 = vld [vmem:[#allocation2 + $0x18] sm:$0xff] }
 0x421   : > { %6993 = vmatmul.mubr.f32.gmra.mrb[130].mxu1 %v5829_v53  ;;  %v6071_v53 = vld [vmem:[#allocation2 + $0x10] sm:$0xff] }
 0x46d   : > { %v6991_v24 = vpop.f32.mrb[128].mxu1 }
 0x46e   : > { %v5906_v21 = vadd.f32 %v6991_v24, %v6411_v5  ;;  %v5900_v7 = vpop.f32.mrb[129].mxu1 }
 0x46f   : > { %v5901_v17 = vadd.f32 %v6411_v5, %v5900_v7 }
 0x470   : > { %v5924_v2 = vand.u32 2147483647, %v5906_v21  ;;  %v5920_v58 = vmax.f32 %v5906_v21, 0.0 }
 0x471   : > { %v5923_v15 = vand.u32 2147483647, %v5901_v17  ;;  %v5919_v54 = vmax.f32 %v5901_v17, 0.0 }
 0x472   : > { %v5928_v14 = vsub.f32 0.0, %v5924_v2 }
 0x473   : > { %v5927_v56 = vsub.f32 0.0, %v5923_v15 }
 0x474   : > { %v5933_v1 = vmul.f32 1.442695, %v5928_v14 }
 0x475   : > { %v5931_v4 = vmul.f32 1.442695, %v5927_v56 }
 0x476   : > { %7937 = vpow2.f32 %v5933_v1 }
 0x477   : > { %7939 = vpow2.f32 %v5931_v4 }
 0x480   : > { %v7938_v10 = vpop.eup %7937 }
 0x481   : > { %v7940_v43 = vpop.eup %7939  ;;  %v5940_v46 = vadd.f32 1.0, %v7938_v10 }
 0x482   : > { %v5939_v3 = vadd.f32 1.0, %v7940_v43 }
 0x483   : > { %7941 = vlog2.f32 %v5940_v46 }
 0x484   : > { %7943 = vlog2.f32 %v5939_v3 }
 0x48d   : > { %v7942_v6 = vpop.eup %7941 }
 0x48e   : > { %v7944_v57 = vpop.eup %7943  ;;  %v5946_v62 = vmul.f32 0.6931472, %v7942_v6 }
 0x48f   : > { %v5944_v34 = vmul.f32 0.6931472, %v7944_v57 }
 0x490   : > { %v5952_v30 = vadd.f32 %v5946_v62, %v5920_v58 }
 0x491   : > { %v5951_v20 = vadd.f32 %v5944_v34, %v5919_v54 }
 0x492   : > { %v6413_v18 = vadd.f32 -0.6931472, %v5952_v30 }
 0x493   : > { %v6412_v19 = vadd.f32 -0.6931472, %v5951_v20 }
 0x495   : > { %7027 = vmatprep.mubr.f32.mxu0 %v6412_v19 }
 0x496   : > { %7028 = vmatmul.mubr.f32.vlgmr.msra.gmra.mrb[132].mxu0 %v6413_v18 }
 0x4f4   : > { %v6994_v23 = vpop.f32.mrb[130].mxu1 }
 0x4f5   : > { %v5916_v37 = vadd.f32 %v6994_v23, %v6411_v5  ;;  %v5910_v45 = vpop.f32.mrb[131].mxu1 }
 0x4f6   : > { %v5911_v31 = vadd.f32 %v6411_v5, %v5910_v45 }
 0x4f7   : > { %v5926_v28 = vand.u32 2147483647, %v5916_v37  ;;  %v5922_v41 = vmax.f32 %v5916_v37, 0.0 }
 0x4f8   : > { %v5925_v12 = vand.u32 2147483647, %v5911_v31  ;;  %v5921_v49 = vmax.f32 %v5911_v31, 0.0 }
 0x4f9   : > { %v5930_v51 = vsub.f32 0.0, %v5926_v28 }
 0x4fa   : > { %v5929_v36 = vsub.f32 0.0, %v5925_v12 }
 0x4fb   : > { %v5937_v27 = vmul.f32 1.442695, %v5930_v51 }
 0x4fc   : > { %v5935_v22 = vmul.f32 1.442695, %v5929_v36 }
 0x4fd   : > { %7945 = vpow2.f32 %v5937_v27 }
 0x4fe   : > { %7947 = vpow2.f32 %v5935_v22 }
 0x507   : > { %v7946_v32 = vpop.eup %7945 }
 0x508   : > { %v7948_v13 = vpop.eup %7947  ;;  %v5942_v35 = vadd.f32 1.0, %v7946_v32 }
 0x509   : > { %v5941_v16 = vadd.f32 1.0, %v7948_v13 }
 0x50a   : > { %7949 = vlog2.f32 %v5942_v35 }
 0x50b   : > { %7951 = vlog2.f32 %v5941_v16 }
 0x514   : > { %v7950_v38 = vpop.eup %7949 }
 0x515   : > { %v7952_v55 = vpop.eup %7951  ;;  %v5950_v52 = vmul.f32 0.6931472, %v7950_v38 }
 0x516   : > { %v5948_v40 = vmul.f32 0.6931472, %v7952_v55 }
 0x517   : > { %v5954_v39 = vadd.f32 %v5950_v52, %v5922_v41 }
 0x518   : > { %v5953_v61 = vadd.f32 %v5948_v40, %v5921_v49 }
 0x519   : > { %v6415_v0 = vadd.f32 -0.6931472, %v5954_v39 }
 0x51a   : > { %v6414_v25 = vadd.f32 -0.6931472, %v5953_v61 }
 0x51c   : > { %7030 = vmatprep.mubr.f32.mxu1 %v6414_v25 }
 0x51d   : > { %7031 = vmatmul.mubr.f32.vlgmr.msra.gmra.mrb[132].mxu1 %v6415_v0 }
 0x569   : > { %v7029_v60 = vpop.f32.mrb[132].mxu0 }
 0x56a   : > { %v6054_v26 = vadd.f32 %v7029_v60, %v6416_v29  ;;  %v6048_v11 = vpop.f32.mrb[133].mxu0 }
 0x56b   : > { %v6049_v8 = vadd.f32 %v6416_v29, %v6048_v11 }
 0x56c   : > { %v6074_v50 = vadd.f32 %v6070_v63, %v6054_v26 }
 0x56d   : > { %v6073_v59 = vadd.f32 %v6069_v42, %v6049_v8 }
 0x56e   : > { %6078 = vst [vmem:[#allocation2 + $0x8] sm:$0xff] %v6074_v50  ;;  %6082 = vst [vmem:[%s11349_s13 + $0x8] sm:$0xff] %v6074_v50 }
 0x56f   : > { %6077 = vst [vmem:[#allocation2] sm:$0xff] %v6073_v59  ;;  %6081 = vst [vmem:[%s11349_s13] sm:$0xff] %v6073_v59 }
 0x5f0   : > { %v7032_v47 = vpop.f32.mrb[132].mxu1 }
 0x5f1   : > { %v6064_v44 = vadd.f32 %v7032_v47, %v6416_v29  ;;  %v6058_v9 = vpop.f32.mrb[133].mxu1 }
 0x5f2   : > { %v6059_v33 = vadd.f32 %v6416_v29, %v6058_v9 }
 0x5f3   : > { %v6076_v5 = vadd.f32 %v6072_v48, %v6064_v44 }
 0x5f4   : > { %v6075_v24 = vadd.f32 %v6071_v53, %v6059_v33 }
 0x5f5   : > { %6080 = vst [vmem:[#allocation2 + $0x18] sm:$0xff] %v6076_v5  ;;  %6084 = vst [vmem:[%s11349_s13 + $0x18] sm:$0xff] %v6076_v5 }
 0x5f6   : > { %6079 = vst [vmem:[#allocation2 + $0x10] sm:$0xff] %v6075_v24  ;;  %6083 = vst [vmem:[%s11349_s13 + $0x10] sm:$0xff] %v6075_v24 }
 0x5f7 PF: > { %s23_s27 = sadd.s32 1, %s7989_s27   ;;  %s11896_s25 = sld [smem:[#allocation4_spill]] }
 0x5f8   : > { %p20_p6 = scmp.ge.s32.totalorder %s23_s27, 4   ;;  %s11897_s26 = sld [smem:[#allocation5_spill]] }
 0x5fa   :  { %22 = sbr.rel (!%p20_p6) target bundleno = 6 (0x6), region = 141 }

</bundles_post_ra>
